<compile_context>
chip_gen: v7x
topology: tpu7x:2x2x1
jax: 0.10.0
libtpu: 0.0.40
codegen_flags: <defaults>
</compile_context>

<pallas_src>
import functools

import jax
import jax.numpy as jnp
from jax.experimental import pallas as pl
from jax.experimental.pallas import tpu as pltpu


def _shift_h(a, dy):
    """out[..., y, x] = a[..., y+dy, x] with zero fill; a: (TT, C, H, W)."""
    if dy == 1:
        return jnp.concatenate(
            [a[:, :, 1:, :], jnp.zeros_like(a[:, :, :1, :])], axis=2)
    if dy == -1:
        return jnp.concatenate(
            [jnp.zeros_like(a[:, :, :1, :]), a[:, :, :-1, :]], axis=2)
    return a


def _shift_w(a, dx):
    """out[..., y, x] = a[..., y, x+dx] with zero fill; a: (TT, C, H, W)."""
    if dx == 1:
        return jnp.concatenate(
            [a[:, :, :, 1:], jnp.zeros_like(a[:, :, :, :1])], axis=3)
    if dx == -1:
        return jnp.concatenate(
            [jnp.zeros_like(a[:, :, :, :1]), a[:, :, :, :-1]], axis=3)
    return a


def tsa_kernel(x_ref, prev_ref, w_ref, b_ref, out_ref, *, TT, C, H, W):
    """One (batch, T-block) grid step.

    x_ref   : (TT, C, H, W)  VMEM  frames [tb*TT, tb*TT + TT)
    prev_ref: (C, H, W)      VMEM  frame tb*TT - 1 (clamped to 0 -> zero diff at t=0)
    w_ref   : (C*C*9,)       SMEM  Conv2d weight flattened from (Cout, Cin, 3, 3)
    b_ref   : (C,)           SMEM  Conv2d bias
    out_ref : (TT, C, H, W)  VMEM
    """
    x = x_ref[...].astype(jnp.float32)                     # (TT, C, H, W)
    prev0 = prev_ref[...].astype(jnp.float32)[None]        # (1, C, H, W)
    if TT > 1:
        prev = jnp.concatenate([prev0, x[:TT - 1]], axis=0)
    else:
        prev = prev0
    # Temporal difference.  For the global first frame the halo is the frame
    # itself, so the diff is exactly zero — no masking needed.
    diff = x - prev                                        # (TT, C, H, W)

    # 3x3 conv (padding=1) on the VPU: 9 zero-filled spatial shifts, then a
    # scalar-broadcast multiply-add per (ci, co) weight read from SMEM.
    # TODO(synk): for large C (>= ~64) switch to an im2col (H*W, 9C) @ (9C, C)
    # MXU matmul instead of this O(9*C^2) VPU unroll.
    acc = [jnp.full((TT, H, W), b_ref[co], dtype=jnp.float32) for co in range(C)]
    for ky in range(3):
        row = _shift_h(diff, ky - 1)
        for kx in range(3):
            sh = _shift_w(row, kx - 1)       # diff[t, c, y+ky-1, x+kx-1], zero outside
            for ci in range(C):
                s_ci = sh[:, ci, :, :]       # (TT, H, W)
                for co in range(C):
                    w = w_ref[((co * C + ci) * 3 + ky) * 3 + kx]
                    acc[co] = acc[co] + w * s_ci

    conv = jnp.stack(acc, axis=1)                          # (TT, C, H, W)
    out_ref[...] = (conv * x + x).astype(out_ref.dtype)


def temporal_attention(x, weight, bias, *, t_block=None):
    """x: (B, T, C, H, W); weight: (C, C, 3, 3); bias: (C,). Returns (B, T, C, H, W)."""
    B, T, C, H, W = x.shape
    assert weight.shape == (C, C, 3, 3) and bias.shape == (C,)

    # T-block size: largest divisor of T whose block stays under ~1 MiB, so
    # double-buffered in/out blocks + in-kernel temporaries fit every generation
    # (including v7x's 64 MiB physical VMEM).
    frame_bytes = C * H * W * x.dtype.itemsize
    if t_block is None:
        budget = 1 << 20
        t_block = 1
        for cand in range(T, 0, -1):
            if T % cand == 0 and cand * frame_bytes <= max(budget, frame_bytes):
                t_block = cand
                break
    assert T % t_block == 0
    ntb = T // t_block

    w_flat = weight.astype(jnp.float32).reshape(-1)        # (C*C*9,) -> SMEM
    b_flat = bias.astype(jnp.float32).reshape(-1)          # (C,)     -> SMEM

    def halo_index_map(b, t):                              # frame just before the block
        return (b, jnp.maximum(t * t_block - 1, 0), 0, 0, 0)

    kern = functools.partial(tsa_kernel, TT=t_block, C=C, H=H, W=W)

    out = pl.pallas_call(
        kern,
        out_shape=jax.ShapeDtypeStruct((B, T, C, H, W), x.dtype),
        grid_spec=pltpu.PrefetchScalarGridSpec(
            num_scalar_prefetch=0,
            grid=(B, ntb),
            in_specs=[
                # TT frames of this batch (each frame fetched from HBM exactly once).
                pl.BlockSpec((None, t_block, C, H, W),
                             lambda b, t: (b, t, 0, 0, 0)),
                # 1-frame halo (previous frame of the block), clamped at t = 0.
                pl.BlockSpec((None, None, C, H, W), halo_index_map),
                # Conv weight / bias as SMEM scalars (tiny, resident).
                pl.BlockSpec(memory_space=pltpu.MemorySpace.SMEM),
                pl.BlockSpec(memory_space=pltpu.MemorySpace.SMEM),
            ],
            out_specs=pl.BlockSpec((None, t_block, C, H, W),
                                   lambda b, t: (b, t, 0, 0, 0)),
        ),
        compiler_params=pltpu.CompilerParams(
            dimension_semantics=("parallel", "parallel"),
            vmem_limit_bytes=32 * 1024 * 1024,
        ),
    )(x, x, w_flat, b_flat)
    return out


def ref_forward(x, weight, bias):
    """Pure-JAX reference mirroring the PyTorch forward."""
    B, T, C, H, W = x.shape
    o = jnp.concatenate(
        [jnp.zeros((B, 1, C, H, W), x.dtype), x[:, 1:] - x[:, :-1]], axis=1)
    op = jnp.pad(o, ((0, 0), (0, 0), (0, 0), (1, 1), (1, 1)))
    acc = jnp.zeros((B, T, C, H, W), jnp.float32)
    for ky in range(3):
        for kx in range(3):
            patch = op[:, :, :, ky:ky + H, kx:kx + W]
            acc = acc + jnp.einsum('btihw,oi->btohw', patch, weight[:, :, ky, kx])
    conv = acc + bias[None, None, :, None, None]
    return conv * x + x


if __name__ == "__main__":
    key = jax.random.PRNGKey(0)
    kx, kw, kb = jax.random.split(key, 3)
    B, T, C, H, W = 2, 4, 4, 16, 16
    x = jax.random.normal(kx, (B, T, C, H, W), dtype=jnp.float32)

    # Deterministic parameters exactly as in __init__: weight.data.copy_(init)
    # broadcasts the (3,3) center-delta to every (co, ci); bias is zero.
    init = jnp.zeros((3, 3), jnp.float32).at[1, 1].set(1.0)
    weight0 = jnp.broadcast_to(init, (C, C, 3, 3)).astype(jnp.float32)
    bias0 = jnp.zeros((C,), jnp.float32)

    y = jax.block_until_ready(temporal_attention(x, weight0, bias0))
    y_ref = ref_forward(x, weight0, bias0)
    assert y.shape == x.shape
    assert jnp.allclose(y, y_ref, atol=1e-4, rtol=1e-4), \
        float(jnp.max(jnp.abs(y - y_ref)))

    # Extra check with random weights/bias to exercise every conv tap & channel mix.
    weight1 = 0.1 * jax.random.normal(kw, (C, C, 3, 3), dtype=jnp.float32)
    bias1 = 0.1 * jax.random.normal(kb, (C,), dtype=jnp.float32)
    y1 = jax.block_until_ready(temporal_attention(x, weight1, bias1))
    y1_ref = ref_forward(x, weight1, bias1)
    assert jnp.allclose(y1, y1_ref, atol=1e-3, rtol=1e-3), \
        float(jnp.max(jnp.abs(y1 - y1_ref)))

    print("KERNEL_OK")
</pallas_src>

<mosaic_0001>
module attributes {stable_mosaic.version = 11 : i64} {
  func.func @tsa_kernel(%arg0: i32, %arg1: i32, %arg2: memref<1x4x4x16x16xf32, #tpu.memory_space<vmem>>, %arg3: memref<1x1x4x16x16xf32, #tpu.memory_space<vmem>>, %arg4: memref<144xf32, #tpu.memory_space<smem>>, %arg5: memref<4xf32, #tpu.memory_space<smem>>, %arg6: memref<1x4x4x16x16xf32, #tpu.memory_space<vmem>>) attributes {dimension_semantics = [#tpu.dimension_semantics<parallel>, #tpu.dimension_semantics<parallel>], iteration_bounds = array<i64: 2, 1>, scalar_prefetch = 0 : i64, scratch_operands = 0 : i64, tpu.core_type = #tpu.core_type<tc>, window_params = [{transform_indices = @transform_0, window_bounds = array<i64: 1, 4, 4, 16, 16>}, {transform_indices = @transform_1, window_bounds = array<i64: 1, 1, 4, 16, 16>}, {transform_indices = @transform_2, window_bounds = array<i64: 144>}, {transform_indices = @transform_3, window_bounds = array<i64: 4>}, {transform_indices = @transform_4, window_bounds = array<i64: 1, 4, 4, 16, 16>}]} {
    %c0 = arith.constant 0 : index
    %c0_0 = arith.constant 0 : index
    %c0_1 = arith.constant 0 : index
    %c0_2 = arith.constant 0 : index
    %c0_3 = arith.constant 0 : index
    %0 = vector.load %arg2[%c0, %c0_0, %c0_1, %c0_2, %c0_3] : memref<1x4x4x16x16xf32, #tpu.memory_space<vmem>>, vector<1x4x4x16x16xf32>
    %1 = vector.shape_cast %0 : vector<1x4x4x16x16xf32> to vector<4x4x16x16xf32>
    %c0_4 = arith.constant 0 : index
    %c0_5 = arith.constant 0 : index
    %c0_6 = arith.constant 0 : index
    %c0_7 = arith.constant 0 : index
    %c0_8 = arith.constant 0 : index
    %2 = vector.load %arg3[%c0_4, %c0_5, %c0_6, %c0_7, %c0_8] : memref<1x1x4x16x16xf32, #tpu.memory_space<vmem>>, vector<1x1x4x16x16xf32>
    %3 = vector.shape_cast %2 : vector<1x1x4x16x16xf32> to vector<4x16x16xf32>
    %4 = vector.shape_cast %3 : vector<4x16x16xf32> to vector<1x4x16x16xf32>
    %5 = vector.extract_strided_slice %1 {offsets = [0, 0, 0, 0], sizes = [3, 4, 16, 16], strides = [1, 1, 1, 1]} : vector<4x4x16x16xf32> to vector<3x4x16x16xf32>
    %6 = tpu.concatenate %4, %5 in 0 : vector<1x4x16x16xf32>, vector<3x4x16x16xf32> -> vector<4x4x16x16xf32>
    %7 = arith.subf %1, %6 : vector<4x4x16x16xf32>
    %c0_9 = arith.constant 0 : index
    %8 = memref.load %arg5[%c0_9] : memref<4xf32, #tpu.memory_space<smem>>
    %9 = vector.broadcast %8 : f32 to vector<4x16x16xf32>
    %c1 = arith.constant 1 : index
    %10 = memref.load %arg5[%c1] : memref<4xf32, #tpu.memory_space<smem>>
    %11 = vector.broadcast %10 : f32 to vector<4x16x16xf32>
    %c2 = arith.constant 2 : index
    %12 = memref.load %arg5[%c2] : memref<4xf32, #tpu.memory_space<smem>>
    %13 = vector.broadcast %12 : f32 to vector<4x16x16xf32>
    %c3 = arith.constant 3 : index
    %14 = memref.load %arg5[%c3] : memref<4xf32, #tpu.memory_space<smem>>
    %15 = vector.broadcast %14 : f32 to vector<4x16x16xf32>
    %cst = arith.constant 0.000000e+00 : f32
    %16 = vector.broadcast %cst : f32 to vector<4x4x1x16xf32>
    %17 = vector.extract_strided_slice %7 {offsets = [0, 0, 0, 0], sizes = [4, 4, 15, 16], strides = [1, 1, 1, 1]} : vector<4x4x16x16xf32> to vector<4x4x15x16xf32>
    %18 = tpu.concatenate %16, %17 in 2 : vector<4x4x1x16xf32>, vector<4x4x15x16xf32> -> vector<4x4x16x16xf32>
    %cst_10 = arith.constant 0.000000e+00 : f32
    %19 = vector.broadcast %cst_10 : f32 to vector<4x4x16x1xf32>
    %20 = vector.extract_strided_slice %18 {offsets = [0, 0, 0, 0], sizes = [4, 4, 16, 15], strides = [1, 1, 1, 1]} : vector<4x4x16x16xf32> to vector<4x4x16x15xf32>
    %21 = tpu.concatenate %19, %20 in 3 : vector<4x4x16x1xf32>, vector<4x4x16x15xf32> -> vector<4x4x16x16xf32>
    %22 = vector.extract_strided_slice %21 {offsets = [0, 0, 0, 0], sizes = [4, 1, 16, 16], strides = [1, 1, 1, 1]} : vector<4x4x16x16xf32> to vector<4x1x16x16xf32>
    %23 = vector.shape_cast %22 : vector<4x1x16x16xf32> to vector<4x16x16xf32>
    %c0_11 = arith.constant 0 : index
    %24 = memref.load %arg4[%c0_11] : memref<144xf32, #tpu.memory_space<smem>>
    %25 = vector.broadcast %24 : f32 to vector<4x16x16xf32>
    %26 = arith.mulf %25, %23 : vector<4x16x16xf32>
    %27 = arith.addf %9, %26 : vector<4x16x16xf32>
    %c36 = arith.constant 36 : index
    %28 = memref.load %arg4[%c36] : memref<144xf32, #tpu.memory_space<smem>>
    %29 = vector.broadcast %28 : f32 to vector<4x16x16xf32>
    %30 = arith.mulf %29, %23 : vector<4x16x16xf32>
    %31 = arith.addf %11, %30 : vector<4x16x16xf32>
    %c72 = arith.constant 72 : index
    %32 = memref.load %arg4[%c72] : memref<144xf32, #tpu.memory_space<smem>>
    %33 = vector.broadcast %32 : f32 to vector<4x16x16xf32>
    %34 = arith.mulf %33, %23 : vector<4x16x16xf32>
    %35 = arith.addf %13, %34 : vector<4x16x16xf32>
    %c108 = arith.constant 108 : index
    %36 = memref.load %arg4[%c108] : memref<144xf32, #tpu.memory_space<smem>>
    %37 = vector.broadcast %36 : f32 to vector<4x16x16xf32>
    %38 = arith.mulf %37, %23 : vector<4x16x16xf32>
    %39 = arith.addf %15, %38 : vector<4x16x16xf32>
    %40 = vector.extract_strided_slice %21 {offsets = [0, 1, 0, 0], sizes = [4, 1, 16, 16], strides = [1, 1, 1, 1]} : vector<4x4x16x16xf32> to vector<4x1x16x16xf32>
    %41 = vector.shape_cast %40 : vector<4x1x16x16xf32> to vector<4x16x16xf32>
    %c9 = arith.constant 9 : index
    %42 = memref.load %arg4[%c9] : memref<144xf32, #tpu.memory_space<smem>>
    %43 = vector.broadcast %42 : f32 to vector<4x16x16xf32>
    %44 = arith.mulf %43, %41 : vector<4x16x16xf32>
    %45 = arith.addf %27, %44 : vector<4x16x16xf32>
    %c45 = arith.constant 45 : index
    %46 = memref.load %arg4[%c45] : memref<144xf32, #tpu.memory_space<smem>>
    %47 = vector.broadcast %46 : f32 to vector<4x16x16xf32>
    %48 = arith.mulf %47, %41 : vector<4x16x16xf32>
    %49 = arith.addf %31, %48 : vector<4x16x16xf32>
    %c81 = arith.constant 81 : index
    %50 = memref.load %arg4[%c81] : memref<144xf32, #tpu.memory_space<smem>>
    %51 = vector.broadcast %50 : f32 to vector<4x16x16xf32>
    %52 = arith.mulf %51, %41 : vector<4x16x16xf32>
    %53 = arith.addf %35, %52 : vector<4x16x16xf32>
    %c117 = arith.constant 117 : index
    %54 = memref.load %arg4[%c117] : memref<144xf32, #tpu.memory_space<smem>>
    %55 = vector.broadcast %54 : f32 to vector<4x16x16xf32>
    %56 = arith.mulf %55, %41 : vector<4x16x16xf32>
    %57 = arith.addf %39, %56 : vector<4x16x16xf32>
    %58 = vector.extract_strided_slice %21 {offsets = [0, 2, 0, 0], sizes = [4, 1, 16, 16], strides = [1, 1, 1, 1]} : vector<4x4x16x16xf32> to vector<4x1x16x16xf32>
    %59 = vector.shape_cast %58 : vector<4x1x16x16xf32> to vector<4x16x16xf32>
    %c18 = arith.constant 18 : index
    %60 = memref.load %arg4[%c18] : memref<144xf32, #tpu.memory_space<smem>>
    %61 = vector.broadcast %60 : f32 to vector<4x16x16xf32>
    %62 = arith.mulf %61, %59 : vector<4x16x16xf32>
    %63 = arith.addf %45, %62 : vector<4x16x16xf32>
    %c54 = arith.constant 54 : index
    %64 = memref.load %arg4[%c54] : memref<144xf32, #tpu.memory_space<smem>>
    %65 = vector.broadcast %64 : f32 to vector<4x16x16xf32>
    %66 = arith.mulf %65, %59 : vector<4x16x16xf32>
    %67 = arith.addf %49, %66 : vector<4x16x16xf32>
    %c90 = arith.constant 90 : index
    %68 = memref.load %arg4[%c90] : memref<144xf32, #tpu.memory_space<smem>>
    %69 = vector.broadcast %68 : f32 to vector<4x16x16xf32>
    %70 = arith.mulf %69, %59 : vector<4x16x16xf32>
    %71 = arith.addf %53, %70 : vector<4x16x16xf32>
    %c126 = arith.constant 126 : index
    %72 = memref.load %arg4[%c126] : memref<144xf32, #tpu.memory_space<smem>>
    %73 = vector.broadcast %72 : f32 to vector<4x16x16xf32>
    %74 = arith.mulf %73, %59 : vector<4x16x16xf32>
    %75 = arith.addf %57, %74 : vector<4x16x16xf32>
    %76 = vector.extract_strided_slice %21 {offsets = [0, 3, 0, 0], sizes = [4, 1, 16, 16], strides = [1, 1, 1, 1]} : vector<4x4x16x16xf32> to vector<4x1x16x16xf32>
    %77 = vector.shape_cast %76 : vector<4x1x16x16xf32> to vector<4x16x16xf32>
    %c27 = arith.constant 27 : index
    %78 = memref.load %arg4[%c27] : memref<144xf32, #tpu.memory_space<smem>>
    %79 = vector.broadcast %78 : f32 to vector<4x16x16xf32>
    %80 = arith.mulf %79, %77 : vector<4x16x16xf32>
    %81 = arith.addf %63, %80 : vector<4x16x16xf32>
    %c63 = arith.constant 63 : index
    %82 = memref.load %arg4[%c63] : memref<144xf32, #tpu.memory_space<smem>>
    %83 = vector.broadcast %82 : f32 to vector<4x16x16xf32>
    %84 = arith.mulf %83, %77 : vector<4x16x16xf32>
    %85 = arith.addf %67, %84 : vector<4x16x16xf32>
    %c99 = arith.constant 99 : index
    %86 = memref.load %arg4[%c99] : memref<144xf32, #tpu.memory_space<smem>>
    %87 = vector.broadcast %86 : f32 to vector<4x16x16xf32>
    %88 = arith.mulf %87, %77 : vector<4x16x16xf32>
    %89 = arith.addf %71, %88 : vector<4x16x16xf32>
    %c135 = arith.constant 135 : index
    %90 = memref.load %arg4[%c135] : memref<144xf32, #tpu.memory_space<smem>>
    %91 = vector.broadcast %90 : f32 to vector<4x16x16xf32>
    %92 = arith.mulf %91, %77 : vector<4x16x16xf32>
    %93 = arith.addf %75, %92 : vector<4x16x16xf32>
    %94 = vector.extract_strided_slice %18 {offsets = [0, 0, 0, 0], sizes = [4, 1, 16, 16], strides = [1, 1, 1, 1]} : vector<4x4x16x16xf32> to vector<4x1x16x16xf32>
    %95 = vector.shape_cast %94 : vector<4x1x16x16xf32> to vector<4x16x16xf32>
    %c1_12 = arith.constant 1 : index
    %96 = memref.load %arg4[%c1_12] : memref<144xf32, #tpu.memory_space<smem>>
    %97 = vector.broadcast %96 : f32 to vector<4x16x16xf32>
    %98 = arith.mulf %97, %95 : vector<4x16x16xf32>
    %99 = arith.addf %81, %98 : vector<4x16x16xf32>
    %c37 = arith.constant 37 : index
    %100 = memref.load %arg4[%c37] : memref<144xf32, #tpu.memory_space<smem>>
    %101 = vector.broadcast %100 : f32 to vector<4x16x16xf32>
    %102 = arith.mulf %101, %95 : vector<4x16x16xf32>
    %103 = arith.addf %85, %102 : vector<4x16x16xf32>
    %c73 = arith.constant 73 : index
    %104 = memref.load %arg4[%c73] : memref<144xf32, #tpu.memory_space<smem>>
    %105 = vector.broadcast %104 : f32 to vector<4x16x16xf32>
    %106 = arith.mulf %105, %95 : vector<4x16x16xf32>
    %107 = arith.addf %89, %106 : vector<4x16x16xf32>
    %c109 = arith.constant 109 : index
    %108 = memref.load %arg4[%c109] : memref<144xf32, #tpu.memory_space<smem>>
    %109 = vector.broadcast %108 : f32 to vector<4x16x16xf32>
    %110 = arith.mulf %109, %95 : vector<4x16x16xf32>
    %111 = arith.addf %93, %110 : vector<4x16x16xf32>
    %112 = vector.extract_strided_slice %18 {offsets = [0, 1, 0, 0], sizes = [4, 1, 16, 16], strides = [1, 1, 1, 1]} : vector<4x4x16x16xf32> to vector<4x1x16x16xf32>
    %113 = vector.shape_cast %112 : vector<4x1x16x16xf32> to vector<4x16x16xf32>
    %c10 = arith.constant 10 : index
    %114 = memref.load %arg4[%c10] : memref<144xf32, #tpu.memory_space<smem>>
    %115 = vector.broadcast %114 : f32 to vector<4x16x16xf32>
    %116 = arith.mulf %115, %113 : vector<4x16x16xf32>
    %117 = arith.addf %99, %116 : vector<4x16x16xf32>
    %c46 = arith.constant 46 : index
    %118 = memref.load %arg4[%c46] : memref<144xf32, #tpu.memory_space<smem>>
    %119 = vector.broadcast %118 : f32 to vector<4x16x16xf32>
    %120 = arith.mulf %119, %113 : vector<4x16x16xf32>
    %121 = arith.addf %103, %120 : vector<4x16x16xf32>
    %c82 = arith.constant 82 : index
    %122 = memref.load %arg4[%c82] : memref<144xf32, #tpu.memory_space<smem>>
    %123 = vector.broadcast %122 : f32 to vector<4x16x16xf32>
    %124 = arith.mulf %123, %113 : vector<4x16x16xf32>
    %125 = arith.addf %107, %124 : vector<4x16x16xf32>
    %c118 = arith.constant 118 : index
    %126 = memref.load %arg4[%c118] : memref<144xf32, #tpu.memory_space<smem>>
    %127 = vector.broadcast %126 : f32 to vector<4x16x16xf32>
    %128 = arith.mulf %127, %113 : vector<4x16x16xf32>
    %129 = arith.addf %111, %128 : vector<4x16x16xf32>
    %130 = vector.extract_strided_slice %18 {offsets = [0, 2, 0, 0], sizes = [4, 1, 16, 16], strides = [1, 1, 1, 1]} : vector<4x4x16x16xf32> to vector<4x1x16x16xf32>
    %131 = vector.shape_cast %130 : vector<4x1x16x16xf32> to vector<4x16x16xf32>
    %c19 = arith.constant 19 : index
    %132 = memref.load %arg4[%c19] : memref<144xf32, #tpu.memory_space<smem>>
    %133 = vector.broadcast %132 : f32 to vector<4x16x16xf32>
    %134 = arith.mulf %133, %131 : vector<4x16x16xf32>
    %135 = arith.addf %117, %134 : vector<4x16x16xf32>
    %c55 = arith.constant 55 : index
    %136 = memref.load %arg4[%c55] : memref<144xf32, #tpu.memory_space<smem>>
    %137 = vector.broadcast %136 : f32 to vector<4x16x16xf32>
    %138 = arith.mulf %137, %131 : vector<4x16x16xf32>
    %139 = arith.addf %121, %138 : vector<4x16x16xf32>
    %c91 = arith.constant 91 : index
    %140 = memref.load %arg4[%c91] : memref<144xf32, #tpu.memory_space<smem>>
    %141 = vector.broadcast %140 : f32 to vector<4x16x16xf32>
    %142 = arith.mulf %141, %131 : vector<4x16x16xf32>
    %143 = arith.addf %125, %142 : vector<4x16x16xf32>
    %c127 = arith.constant 127 : index
    %144 = memref.load %arg4[%c127] : memref<144xf32, #tpu.memory_space<smem>>
    %145 = vector.broadcast %144 : f32 to vector<4x16x16xf32>
    %146 = arith.mulf %145, %131 : vector<4x16x16xf32>
    %147 = arith.addf %129, %146 : vector<4x16x16xf32>
    %148 = vector.extract_strided_slice %18 {offsets = [0, 3, 0, 0], sizes = [4, 1, 16, 16], strides = [1, 1, 1, 1]} : vector<4x4x16x16xf32> to vector<4x1x16x16xf32>
    %149 = vector.shape_cast %148 : vector<4x1x16x16xf32> to vector<4x16x16xf32>
    %c28 = arith.constant 28 : index
    %150 = memref.load %arg4[%c28] : memref<144xf32, #tpu.memory_space<smem>>
    %151 = vector.broadcast %150 : f32 to vector<4x16x16xf32>
    %152 = arith.mulf %151, %149 : vector<4x16x16xf32>
    %153 = arith.addf %135, %152 : vector<4x16x16xf32>
    %c64 = arith.constant 64 : index
    %154 = memref.load %arg4[%c64] : memref<144xf32, #tpu.memory_space<smem>>
    %155 = vector.broadcast %154 : f32 to vector<4x16x16xf32>
    %156 = arith.mulf %155, %149 : vector<4x16x16xf32>
    %157 = arith.addf %139, %156 : vector<4x16x16xf32>
    %c100 = arith.constant 100 : index
    %158 = memref.load %arg4[%c100] : memref<144xf32, #tpu.memory_space<smem>>
    %159 = vector.broadcast %158 : f32 to vector<4x16x16xf32>
    %160 = arith.mulf %159, %149 : vector<4x16x16xf32>
    %161 = arith.addf %143, %160 : vector<4x16x16xf32>
    %c136 = arith.constant 136 : index
    %162 = memref.load %arg4[%c136] : memref<144xf32, #tpu.memory_space<smem>>
    %163 = vector.broadcast %162 : f32 to vector<4x16x16xf32>
    %164 = arith.mulf %163, %149 : vector<4x16x16xf32>
    %165 = arith.addf %147, %164 : vector<4x16x16xf32>
    %166 = vector.extract_strided_slice %18 {offsets = [0, 0, 0, 1], sizes = [4, 4, 16, 15], strides = [1, 1, 1, 1]} : vector<4x4x16x16xf32> to vector<4x4x16x15xf32>
    %cst_13 = arith.constant 0.000000e+00 : f32
    %167 = vector.broadcast %cst_13 : f32 to vector<4x4x16x1xf32>
    %168 = tpu.concatenate %166, %167 in 3 : vector<4x4x16x15xf32>, vector<4x4x16x1xf32> -> vector<4x4x16x16xf32>
    %169 = vector.extract_strided_slice %168 {offsets = [0, 0, 0, 0], sizes = [4, 1, 16, 16], strides = [1, 1, 1, 1]} : vector<4x4x16x16xf32> to vector<4x1x16x16xf32>
    %170 = vector.shape_cast %169 : vector<4x1x16x16xf32> to vector<4x16x16xf32>
    %c2_14 = arith.constant 2 : index
    %171 = memref.load %arg4[%c2_14] : memref<144xf32, #tpu.memory_space<smem>>
    %172 = vector.broadcast %171 : f32 to vector<4x16x16xf32>
    %173 = arith.mulf %172, %170 : vector<4x16x16xf32>
    %174 = arith.addf %153, %173 : vector<4x16x16xf32>
    %c38 = arith.constant 38 : index
    %175 = memref.load %arg4[%c38] : memref<144xf32, #tpu.memory_space<smem>>
    %176 = vector.broadcast %175 : f32 to vector<4x16x16xf32>
    %177 = arith.mulf %176, %170 : vector<4x16x16xf32>
    %178 = arith.addf %157, %177 : vector<4x16x16xf32>
    %c74 = arith.constant 74 : index
    %179 = memref.load %arg4[%c74] : memref<144xf32, #tpu.memory_space<smem>>
    %180 = vector.broadcast %179 : f32 to vector<4x16x16xf32>
    %181 = arith.mulf %180, %170 : vector<4x16x16xf32>
    %182 = arith.addf %161, %181 : vector<4x16x16xf32>
    %c110 = arith.constant 110 : index
    %183 = memref.load %arg4[%c110] : memref<144xf32, #tpu.memory_space<smem>>
    %184 = vector.broadcast %183 : f32 to vector<4x16x16xf32>
    %185 = arith.mulf %184, %170 : vector<4x16x16xf32>
    %186 = arith.addf %165, %185 : vector<4x16x16xf32>
    %187 = vector.extract_strided_slice %168 {offsets = [0, 1, 0, 0], sizes = [4, 1, 16, 16], strides = [1, 1, 1, 1]} : vector<4x4x16x16xf32> to vector<4x1x16x16xf32>
    %188 = vector.shape_cast %187 : vector<4x1x16x16xf32> to vector<4x16x16xf32>
    %c11 = arith.constant 11 : index
    %189 = memref.load %arg4[%c11] : memref<144xf32, #tpu.memory_space<smem>>
    %190 = vector.broadcast %189 : f32 to vector<4x16x16xf32>
    %191 = arith.mulf %190, %188 : vector<4x16x16xf32>
    %192 = arith.addf %174, %191 : vector<4x16x16xf32>
    %c47 = arith.constant 47 : index
    %193 = memref.load %arg4[%c47] : memref<144xf32, #tpu.memory_space<smem>>
    %194 = vector.broadcast %193 : f32 to vector<4x16x16xf32>
    %195 = arith.mulf %194, %188 : vector<4x16x16xf32>
    %196 = arith.addf %178, %195 : vector<4x16x16xf32>
    %c83 = arith.constant 83 : index
    %197 = memref.load %arg4[%c83] : memref<144xf32, #tpu.memory_space<smem>>
    %198 = vector.broadcast %197 : f32 to vector<4x16x16xf32>
    %199 = arith.mulf %198, %188 : vector<4x16x16xf32>
    %200 = arith.addf %182, %199 : vector<4x16x16xf32>
    %c119 = arith.constant 119 : index
    %201 = memref.load %arg4[%c119] : memref<144xf32, #tpu.memory_space<smem>>
    %202 = vector.broadcast %201 : f32 to vector<4x16x16xf32>
    %203 = arith.mulf %202, %188 : vector<4x16x16xf32>
    %204 = arith.addf %186, %203 : vector<4x16x16xf32>
    %205 = vector.extract_strided_slice %168 {offsets = [0, 2, 0, 0], sizes = [4, 1, 16, 16], strides = [1, 1, 1, 1]} : vector<4x4x16x16xf32> to vector<4x1x16x16xf32>
    %206 = vector.shape_cast %205 : vector<4x1x16x16xf32> to vector<4x16x16xf32>
    %c20 = arith.constant 20 : index
    %207 = memref.load %arg4[%c20] : memref<144xf32, #tpu.memory_space<smem>>
    %208 = vector.broadcast %207 : f32 to vector<4x16x16xf32>
    %209 = arith.mulf %208, %206 : vector<4x16x16xf32>
    %210 = arith.addf %192, %209 : vector<4x16x16xf32>
    %c56 = arith.constant 56 : index
    %211 = memref.load %arg4[%c56] : memref<144xf32, #tpu.memory_space<smem>>
    %212 = vector.broadcast %211 : f32 to vector<4x16x16xf32>
    %213 = arith.mulf %212, %206 : vector<4x16x16xf32>
    %214 = arith.addf %196, %213 : vector<4x16x16xf32>
    %c92 = arith.constant 92 : index
    %215 = memref.load %arg4[%c92] : memref<144xf32, #tpu.memory_space<smem>>
    %216 = vector.broadcast %215 : f32 to vector<4x16x16xf32>
    %217 = arith.mulf %216, %206 : vector<4x16x16xf32>
    %218 = arith.addf %200, %217 : vector<4x16x16xf32>
    %c128 = arith.constant 128 : index
    %219 = memref.load %arg4[%c128] : memref<144xf32, #tpu.memory_space<smem>>
    %220 = vector.broadcast %219 : f32 to vector<4x16x16xf32>
    %221 = arith.mulf %220, %206 : vector<4x16x16xf32>
    %222 = arith.addf %204, %221 : vector<4x16x16xf32>
    %223 = vector.extract_strided_slice %168 {offsets = [0, 3, 0, 0], sizes = [4, 1, 16, 16], strides = [1, 1, 1, 1]} : vector<4x4x16x16xf32> to vector<4x1x16x16xf32>
    %224 = vector.shape_cast %223 : vector<4x1x16x16xf32> to vector<4x16x16xf32>
    %c29 = arith.constant 29 : index
    %225 = memref.load %arg4[%c29] : memref<144xf32, #tpu.memory_space<smem>>
    %226 = vector.broadcast %225 : f32 to vector<4x16x16xf32>
    %227 = arith.mulf %226, %224 : vector<4x16x16xf32>
    %228 = arith.addf %210, %227 : vector<4x16x16xf32>
    %c65 = arith.constant 65 : index
    %229 = memref.load %arg4[%c65] : memref<144xf32, #tpu.memory_space<smem>>
    %230 = vector.broadcast %229 : f32 to vector<4x16x16xf32>
    %231 = arith.mulf %230, %224 : vector<4x16x16xf32>
    %232 = arith.addf %214, %231 : vector<4x16x16xf32>
    %c101 = arith.constant 101 : index
    %233 = memref.load %arg4[%c101] : memref<144xf32, #tpu.memory_space<smem>>
    %234 = vector.broadcast %233 : f32 to vector<4x16x16xf32>
    %235 = arith.mulf %234, %224 : vector<4x16x16xf32>
    %236 = arith.addf %218, %235 : vector<4x16x16xf32>
    %c137 = arith.constant 137 : index
    %237 = memref.load %arg4[%c137] : memref<144xf32, #tpu.memory_space<smem>>
    %238 = vector.broadcast %237 : f32 to vector<4x16x16xf32>
    %239 = arith.mulf %238, %224 : vector<4x16x16xf32>
    %240 = arith.addf %222, %239 : vector<4x16x16xf32>
    %cst_15 = arith.constant 0.000000e+00 : f32
    %241 = vector.broadcast %cst_15 : f32 to vector<4x4x16x1xf32>
    %242 = vector.extract_strided_slice %7 {offsets = [0, 0, 0, 0], sizes = [4, 4, 16, 15], strides = [1, 1, 1, 1]} : vector<4x4x16x16xf32> to vector<4x4x16x15xf32>
    %243 = tpu.concatenate %241, %242 in 3 : vector<4x4x16x1xf32>, vector<4x4x16x15xf32> -> vector<4x4x16x16xf32>
    %244 = vector.extract_strided_slice %243 {offsets = [0, 0, 0, 0], sizes = [4, 1, 16, 16], strides = [1, 1, 1, 1]} : vector<4x4x16x16xf32> to vector<4x1x16x16xf32>
    %245 = vector.shape_cast %244 : vector<4x1x16x16xf32> to vector<4x16x16xf32>
    %c3_16 = arith.constant 3 : index
    %246 = memref.load %arg4[%c3_16] : memref<144xf32, #tpu.memory_space<smem>>
    %247 = vector.broadcast %246 : f32 to vector<4x16x16xf32>
    %248 = arith.mulf %247, %245 : vector<4x16x16xf32>
    %249 = arith.addf %228, %248 : vector<4x16x16xf32>
    %c39 = arith.constant 39 : index
    %250 = memref.load %arg4[%c39] : memref<144xf32, #tpu.memory_space<smem>>
    %251 = vector.broadcast %250 : f32 to vector<4x16x16xf32>
    %252 = arith.mulf %251, %245 : vector<4x16x16xf32>
    %253 = arith.addf %232, %252 : vector<4x16x16xf32>
    %c75 = arith.constant 75 : index
    %254 = memref.load %arg4[%c75] : memref<144xf32, #tpu.memory_space<smem>>
    %255 = vector.broadcast %254 : f32 to vector<4x16x16xf32>
    %256 = arith.mulf %255, %245 : vector<4x16x16xf32>
    %257 = arith.addf %236, %256 : vector<4x16x16xf32>
    %c111 = arith.constant 111 : index
    %258 = memref.load %arg4[%c111] : memref<144xf32, #tpu.memory_space<smem>>
    %259 = vector.broadcast %258 : f32 to vector<4x16x16xf32>
    %260 = arith.mulf %259, %245 : vector<4x16x16xf32>
    %261 = arith.addf %240, %260 : vector<4x16x16xf32>
    %262 = vector.extract_strided_slice %243 {offsets = [0, 1, 0, 0], sizes = [4, 1, 16, 16], strides = [1, 1, 1, 1]} : vector<4x4x16x16xf32> to vector<4x1x16x16xf32>
    %263 = vector.shape_cast %262 : vector<4x1x16x16xf32> to vector<4x16x16xf32>
    %c12 = arith.constant 12 : index
    %264 = memref.load %arg4[%c12] : memref<144xf32, #tpu.memory_space<smem>>
    %265 = vector.broadcast %264 : f32 to vector<4x16x16xf32>
    %266 = arith.mulf %265, %263 : vector<4x16x16xf32>
    %267 = arith.addf %249, %266 : vector<4x16x16xf32>
    %c48 = arith.constant 48 : index
    %268 = memref.load %arg4[%c48] : memref<144xf32, #tpu.memory_space<smem>>
    %269 = vector.broadcast %268 : f32 to vector<4x16x16xf32>
    %270 = arith.mulf %269, %263 : vector<4x16x16xf32>
    %271 = arith.addf %253, %270 : vector<4x16x16xf32>
    %c84 = arith.constant 84 : index
    %272 = memref.load %arg4[%c84] : memref<144xf32, #tpu.memory_space<smem>>
    %273 = vector.broadcast %272 : f32 to vector<4x16x16xf32>
    %274 = arith.mulf %273, %263 : vector<4x16x16xf32>
    %275 = arith.addf %257, %274 : vector<4x16x16xf32>
    %c120 = arith.constant 120 : index
    %276 = memref.load %arg4[%c120] : memref<144xf32, #tpu.memory_space<smem>>
    %277 = vector.broadcast %276 : f32 to vector<4x16x16xf32>
    %278 = arith.mulf %277, %263 : vector<4x16x16xf32>
    %279 = arith.addf %261, %278 : vector<4x16x16xf32>
    %280 = vector.extract_strided_slice %243 {offsets = [0, 2, 0, 0], sizes = [4, 1, 16, 16], strides = [1, 1, 1, 1]} : vector<4x4x16x16xf32> to vector<4x1x16x16xf32>
    %281 = vector.shape_cast %280 : vector<4x1x16x16xf32> to vector<4x16x16xf32>
    %c21 = arith.constant 21 : index
    %282 = memref.load %arg4[%c21] : memref<144xf32, #tpu.memory_space<smem>>
    %283 = vector.broadcast %282 : f32 to vector<4x16x16xf32>
    %284 = arith.mulf %283, %281 : vector<4x16x16xf32>
    %285 = arith.addf %267, %284 : vector<4x16x16xf32>
    %c57 = arith.constant 57 : index
    %286 = memref.load %arg4[%c57] : memref<144xf32, #tpu.memory_space<smem>>
    %287 = vector.broadcast %286 : f32 to vector<4x16x16xf32>
    %288 = arith.mulf %287, %281 : vector<4x16x16xf32>
    %289 = arith.addf %271, %288 : vector<4x16x16xf32>
    %c93 = arith.constant 93 : index
    %290 = memref.load %arg4[%c93] : memref<144xf32, #tpu.memory_space<smem>>
    %291 = vector.broadcast %290 : f32 to vector<4x16x16xf32>
    %292 = arith.mulf %291, %281 : vector<4x16x16xf32>
    %293 = arith.addf %275, %292 : vector<4x16x16xf32>
    %c129 = arith.constant 129 : index
    %294 = memref.load %arg4[%c129] : memref<144xf32, #tpu.memory_space<smem>>
    %295 = vector.broadcast %294 : f32 to vector<4x16x16xf32>
    %296 = arith.mulf %295, %281 : vector<4x16x16xf32>
    %297 = arith.addf %279, %296 : vector<4x16x16xf32>
    %298 = vector.extract_strided_slice %243 {offsets = [0, 3, 0, 0], sizes = [4, 1, 16, 16], strides = [1, 1, 1, 1]} : vector<4x4x16x16xf32> to vector<4x1x16x16xf32>
    %299 = vector.shape_cast %298 : vector<4x1x16x16xf32> to vector<4x16x16xf32>
    %c30 = arith.constant 30 : index
    %300 = memref.load %arg4[%c30] : memref<144xf32, #tpu.memory_space<smem>>
    %301 = vector.broadcast %300 : f32 to vector<4x16x16xf32>
    %302 = arith.mulf %301, %299 : vector<4x16x16xf32>
    %303 = arith.addf %285, %302 : vector<4x16x16xf32>
    %c66 = arith.constant 66 : index
    %304 = memref.load %arg4[%c66] : memref<144xf32, #tpu.memory_space<smem>>
    %305 = vector.broadcast %304 : f32 to vector<4x16x16xf32>
    %306 = arith.mulf %305, %299 : vector<4x16x16xf32>
    %307 = arith.addf %289, %306 : vector<4x16x16xf32>
    %c102 = arith.constant 102 : index
    %308 = memref.load %arg4[%c102] : memref<144xf32, #tpu.memory_space<smem>>
    %309 = vector.broadcast %308 : f32 to vector<4x16x16xf32>
    %310 = arith.mulf %309, %299 : vector<4x16x16xf32>
    %311 = arith.addf %293, %310 : vector<4x16x16xf32>
    %c138 = arith.constant 138 : index
    %312 = memref.load %arg4[%c138] : memref<144xf32, #tpu.memory_space<smem>>
    %313 = vector.broadcast %312 : f32 to vector<4x16x16xf32>
    %314 = arith.mulf %313, %299 : vector<4x16x16xf32>
    %315 = arith.addf %297, %314 : vector<4x16x16xf32>
    %316 = vector.extract_strided_slice %7 {offsets = [0, 0, 0, 0], sizes = [4, 1, 16, 16], strides = [1, 1, 1, 1]} : vector<4x4x16x16xf32> to vector<4x1x16x16xf32>
    %317 = vector.shape_cast %316 : vector<4x1x16x16xf32> to vector<4x16x16xf32>
    %c4 = arith.constant 4 : index
    %318 = memref.load %arg4[%c4] : memref<144xf32, #tpu.memory_space<smem>>
    %319 = vector.broadcast %318 : f32 to vector<4x16x16xf32>
    %320 = arith.mulf %319, %317 : vector<4x16x16xf32>
    %321 = arith.addf %303, %320 : vector<4x16x16xf32>
    %c40 = arith.constant 40 : index
    %322 = memref.load %arg4[%c40] : memref<144xf32, #tpu.memory_space<smem>>
    %323 = vector.broadcast %322 : f32 to vector<4x16x16xf32>
    %324 = arith.mulf %323, %317 : vector<4x16x16xf32>
    %325 = arith.addf %307, %324 : vector<4x16x16xf32>
    %c76 = arith.constant 76 : index
    %326 = memref.load %arg4[%c76] : memref<144xf32, #tpu.memory_space<smem>>
    %327 = vector.broadcast %326 : f32 to vector<4x16x16xf32>
    %328 = arith.mulf %327, %317 : vector<4x16x16xf32>
    %329 = arith.addf %311, %328 : vector<4x16x16xf32>
    %c112 = arith.constant 112 : index
    %330 = memref.load %arg4[%c112] : memref<144xf32, #tpu.memory_space<smem>>
    %331 = vector.broadcast %330 : f32 to vector<4x16x16xf32>
    %332 = arith.mulf %331, %317 : vector<4x16x16xf32>
    %333 = arith.addf %315, %332 : vector<4x16x16xf32>
    %334 = vector.extract_strided_slice %7 {offsets = [0, 1, 0, 0], sizes = [4, 1, 16, 16], strides = [1, 1, 1, 1]} : vector<4x4x16x16xf32> to vector<4x1x16x16xf32>
    %335 = vector.shape_cast %334 : vector<4x1x16x16xf32> to vector<4x16x16xf32>
    %c13 = arith.constant 13 : index
    %336 = memref.load %arg4[%c13] : memref<144xf32, #tpu.memory_space<smem>>
    %337 = vector.broadcast %336 : f32 to vector<4x16x16xf32>
    %338 = arith.mulf %337, %335 : vector<4x16x16xf32>
    %339 = arith.addf %321, %338 : vector<4x16x16xf32>
    %c49 = arith.constant 49 : index
    %340 = memref.load %arg4[%c49] : memref<144xf32, #tpu.memory_space<smem>>
    %341 = vector.broadcast %340 : f32 to vector<4x16x16xf32>
    %342 = arith.mulf %341, %335 : vector<4x16x16xf32>
    %343 = arith.addf %325, %342 : vector<4x16x16xf32>
    %c85 = arith.constant 85 : index
    %344 = memref.load %arg4[%c85] : memref<144xf32, #tpu.memory_space<smem>>
    %345 = vector.broadcast %344 : f32 to vector<4x16x16xf32>
    %346 = arith.mulf %345, %335 : vector<4x16x16xf32>
    %347 = arith.addf %329, %346 : vector<4x16x16xf32>
    %c121 = arith.constant 121 : index
    %348 = memref.load %arg4[%c121] : memref<144xf32, #tpu.memory_space<smem>>
    %349 = vector.broadcast %348 : f32 to vector<4x16x16xf32>
    %350 = arith.mulf %349, %335 : vector<4x16x16xf32>
    %351 = arith.addf %333, %350 : vector<4x16x16xf32>
    %352 = vector.extract_strided_slice %7 {offsets = [0, 2, 0, 0], sizes = [4, 1, 16, 16], strides = [1, 1, 1, 1]} : vector<4x4x16x16xf32> to vector<4x1x16x16xf32>
    %353 = vector.shape_cast %352 : vector<4x1x16x16xf32> to vector<4x16x16xf32>
    %c22 = arith.constant 22 : index
    %354 = memref.load %arg4[%c22] : memref<144xf32, #tpu.memory_space<smem>>
    %355 = vector.broadcast %354 : f32 to vector<4x16x16xf32>
    %356 = arith.mulf %355, %353 : vector<4x16x16xf32>
    %357 = arith.addf %339, %356 : vector<4x16x16xf32>
    %c58 = arith.constant 58 : index
    %358 = memref.load %arg4[%c58] : memref<144xf32, #tpu.memory_space<smem>>
    %359 = vector.broadcast %358 : f32 to vector<4x16x16xf32>
    %360 = arith.mulf %359, %353 : vector<4x16x16xf32>
    %361 = arith.addf %343, %360 : vector<4x16x16xf32>
    %c94 = arith.constant 94 : index
    %362 = memref.load %arg4[%c94] : memref<144xf32, #tpu.memory_space<smem>>
    %363 = vector.broadcast %362 : f32 to vector<4x16x16xf32>
    %364 = arith.mulf %363, %353 : vector<4x16x16xf32>
    %365 = arith.addf %347, %364 : vector<4x16x16xf32>
    %c130 = arith.constant 130 : index
    %366 = memref.load %arg4[%c130] : memref<144xf32, #tpu.memory_space<smem>>
    %367 = vector.broadcast %366 : f32 to vector<4x16x16xf32>
    %368 = arith.mulf %367, %353 : vector<4x16x16xf32>
    %369 = arith.addf %351, %368 : vector<4x16x16xf32>
    %370 = vector.extract_strided_slice %7 {offsets = [0, 3, 0, 0], sizes = [4, 1, 16, 16], strides = [1, 1, 1, 1]} : vector<4x4x16x16xf32> to vector<4x1x16x16xf32>
    %371 = vector.shape_cast %370 : vector<4x1x16x16xf32> to vector<4x16x16xf32>
    %c31 = arith.constant 31 : index
    %372 = memref.load %arg4[%c31] : memref<144xf32, #tpu.memory_space<smem>>
    %373 = vector.broadcast %372 : f32 to vector<4x16x16xf32>
    %374 = arith.mulf %373, %371 : vector<4x16x16xf32>
    %375 = arith.addf %357, %374 : vector<4x16x16xf32>
    %c67 = arith.constant 67 : index
    %376 = memref.load %arg4[%c67] : memref<144xf32, #tpu.memory_space<smem>>
    %377 = vector.broadcast %376 : f32 to vector<4x16x16xf32>
    %378 = arith.mulf %377, %371 : vector<4x16x16xf32>
    %379 = arith.addf %361, %378 : vector<4x16x16xf32>
    %c103 = arith.constant 103 : index
    %380 = memref.load %arg4[%c103] : memref<144xf32, #tpu.memory_space<smem>>
    %381 = vector.broadcast %380 : f32 to vector<4x16x16xf32>
    %382 = arith.mulf %381, %371 : vector<4x16x16xf32>
    %383 = arith.addf %365, %382 : vector<4x16x16xf32>
    %c139 = arith.constant 139 : index
    %384 = memref.load %arg4[%c139] : memref<144xf32, #tpu.memory_space<smem>>
    %385 = vector.broadcast %384 : f32 to vector<4x16x16xf32>
    %386 = arith.mulf %385, %371 : vector<4x16x16xf32>
    %387 = arith.addf %369, %386 : vector<4x16x16xf32>
    %388 = vector.extract_strided_slice %7 {offsets = [0, 0, 0, 1], sizes = [4, 4, 16, 15], strides = [1, 1, 1, 1]} : vector<4x4x16x16xf32> to vector<4x4x16x15xf32>
    %cst_17 = arith.constant 0.000000e+00 : f32
    %389 = vector.broadcast %cst_17 : f32 to vector<4x4x16x1xf32>
    %390 = tpu.concatenate %388, %389 in 3 : vector<4x4x16x15xf32>, vector<4x4x16x1xf32> -> vector<4x4x16x16xf32>
    %391 = vector.extract_strided_slice %390 {offsets = [0, 0, 0, 0], sizes = [4, 1, 16, 16], strides = [1, 1, 1, 1]} : vector<4x4x16x16xf32> to vector<4x1x16x16xf32>
    %392 = vector.shape_cast %391 : vector<4x1x16x16xf32> to vector<4x16x16xf32>
    %c5 = arith.constant 5 : index
    %393 = memref.load %arg4[%c5] : memref<144xf32, #tpu.memory_space<smem>>
    %394 = vector.broadcast %393 : f32 to vector<4x16x16xf32>
    %395 = arith.mulf %394, %392 : vector<4x16x16xf32>
    %396 = arith.addf %375, %395 : vector<4x16x16xf32>
    %c41 = arith.constant 41 : index
    %397 = memref.load %arg4[%c41] : memref<144xf32, #tpu.memory_space<smem>>
    %398 = vector.broadcast %397 : f32 to vector<4x16x16xf32>
    %399 = arith.mulf %398, %392 : vector<4x16x16xf32>
    %400 = arith.addf %379, %399 : vector<4x16x16xf32>
    %c77 = arith.constant 77 : index
    %401 = memref.load %arg4[%c77] : memref<144xf32, #tpu.memory_space<smem>>
    %402 = vector.broadcast %401 : f32 to vector<4x16x16xf32>
    %403 = arith.mulf %402, %392 : vector<4x16x16xf32>
    %404 = arith.addf %383, %403 : vector<4x16x16xf32>
    %c113 = arith.constant 113 : index
    %405 = memref.load %arg4[%c113] : memref<144xf32, #tpu.memory_space<smem>>
    %406 = vector.broadcast %405 : f32 to vector<4x16x16xf32>
    %407 = arith.mulf %406, %392 : vector<4x16x16xf32>
    %408 = arith.addf %387, %407 : vector<4x16x16xf32>
    %409 = vector.extract_strided_slice %390 {offsets = [0, 1, 0, 0], sizes = [4, 1, 16, 16], strides = [1, 1, 1, 1]} : vector<4x4x16x16xf32> to vector<4x1x16x16xf32>
    %410 = vector.shape_cast %409 : vector<4x1x16x16xf32> to vector<4x16x16xf32>
    %c14 = arith.constant 14 : index
    %411 = memref.load %arg4[%c14] : memref<144xf32, #tpu.memory_space<smem>>
    %412 = vector.broadcast %411 : f32 to vector<4x16x16xf32>
    %413 = arith.mulf %412, %410 : vector<4x16x16xf32>
    %414 = arith.addf %396, %413 : vector<4x16x16xf32>
    %c50 = arith.constant 50 : index
    %415 = memref.load %arg4[%c50] : memref<144xf32, #tpu.memory_space<smem>>
    %416 = vector.broadcast %415 : f32 to vector<4x16x16xf32>
    %417 = arith.mulf %416, %410 : vector<4x16x16xf32>
    %418 = arith.addf %400, %417 : vector<4x16x16xf32>
    %c86 = arith.constant 86 : index
    %419 = memref.load %arg4[%c86] : memref<144xf32, #tpu.memory_space<smem>>
    %420 = vector.broadcast %419 : f32 to vector<4x16x16xf32>
    %421 = arith.mulf %420, %410 : vector<4x16x16xf32>
    %422 = arith.addf %404, %421 : vector<4x16x16xf32>
    %c122 = arith.constant 122 : index
    %423 = memref.load %arg4[%c122] : memref<144xf32, #tpu.memory_space<smem>>
    %424 = vector.broadcast %423 : f32 to vector<4x16x16xf32>
    %425 = arith.mulf %424, %410 : vector<4x16x16xf32>
    %426 = arith.addf %408, %425 : vector<4x16x16xf32>
    %427 = vector.extract_strided_slice %390 {offsets = [0, 2, 0, 0], sizes = [4, 1, 16, 16], strides = [1, 1, 1, 1]} : vector<4x4x16x16xf32> to vector<4x1x16x16xf32>
    %428 = vector.shape_cast %427 : vector<4x1x16x16xf32> to vector<4x16x16xf32>
    %c23 = arith.constant 23 : index
    %429 = memref.load %arg4[%c23] : memref<144xf32, #tpu.memory_space<smem>>
    %430 = vector.broadcast %429 : f32 to vector<4x16x16xf32>
    %431 = arith.mulf %430, %428 : vector<4x16x16xf32>
    %432 = arith.addf %414, %431 : vector<4x16x16xf32>
    %c59 = arith.constant 59 : index
    %433 = memref.load %arg4[%c59] : memref<144xf32, #tpu.memory_space<smem>>
    %434 = vector.broadcast %433 : f32 to vector<4x16x16xf32>
    %435 = arith.mulf %434, %428 : vector<4x16x16xf32>
    %436 = arith.addf %418, %435 : vector<4x16x16xf32>
    %c95 = arith.constant 95 : index
    %437 = memref.load %arg4[%c95] : memref<144xf32, #tpu.memory_space<smem>>
    %438 = vector.broadcast %437 : f32 to vector<4x16x16xf32>
    %439 = arith.mulf %438, %428 : vector<4x16x16xf32>
    %440 = arith.addf %422, %439 : vector<4x16x16xf32>
    %c131 = arith.constant 131 : index
    %441 = memref.load %arg4[%c131] : memref<144xf32, #tpu.memory_space<smem>>
    %442 = vector.broadcast %441 : f32 to vector<4x16x16xf32>
    %443 = arith.mulf %442, %428 : vector<4x16x16xf32>
    %444 = arith.addf %426, %443 : vector<4x16x16xf32>
    %445 = vector.extract_strided_slice %390 {offsets = [0, 3, 0, 0], sizes = [4, 1, 16, 16], strides = [1, 1, 1, 1]} : vector<4x4x16x16xf32> to vector<4x1x16x16xf32>
    %446 = vector.shape_cast %445 : vector<4x1x16x16xf32> to vector<4x16x16xf32>
    %c32 = arith.constant 32 : index
    %447 = memref.load %arg4[%c32] : memref<144xf32, #tpu.memory_space<smem>>
    %448 = vector.broadcast %447 : f32 to vector<4x16x16xf32>
    %449 = arith.mulf %448, %446 : vector<4x16x16xf32>
    %450 = arith.addf %432, %449 : vector<4x16x16xf32>
    %c68 = arith.constant 68 : index
    %451 = memref.load %arg4[%c68] : memref<144xf32, #tpu.memory_space<smem>>
    %452 = vector.broadcast %451 : f32 to vector<4x16x16xf32>
    %453 = arith.mulf %452, %446 : vector<4x16x16xf32>
    %454 = arith.addf %436, %453 : vector<4x16x16xf32>
    %c104 = arith.constant 104 : index
    %455 = memref.load %arg4[%c104] : memref<144xf32, #tpu.memory_space<smem>>
    %456 = vector.broadcast %455 : f32 to vector<4x16x16xf32>
    %457 = arith.mulf %456, %446 : vector<4x16x16xf32>
    %458 = arith.addf %440, %457 : vector<4x16x16xf32>
    %c140 = arith.constant 140 : index
    %459 = memref.load %arg4[%c140] : memref<144xf32, #tpu.memory_space<smem>>
    %460 = vector.broadcast %459 : f32 to vector<4x16x16xf32>
    %461 = arith.mulf %460, %446 : vector<4x16x16xf32>
    %462 = arith.addf %444, %461 : vector<4x16x16xf32>
    %463 = vector.extract_strided_slice %7 {offsets = [0, 0, 1, 0], sizes = [4, 4, 15, 16], strides = [1, 1, 1, 1]} : vector<4x4x16x16xf32> to vector<4x4x15x16xf32>
    %cst_18 = arith.constant 0.000000e+00 : f32
    %464 = vector.broadcast %cst_18 : f32 to vector<4x4x1x16xf32>
    %465 = tpu.concatenate %463, %464 in 2 : vector<4x4x15x16xf32>, vector<4x4x1x16xf32> -> vector<4x4x16x16xf32>
    %cst_19 = arith.constant 0.000000e+00 : f32
    %466 = vector.broadcast %cst_19 : f32 to vector<4x4x16x1xf32>
    %467 = vector.extract_strided_slice %465 {offsets = [0, 0, 0, 0], sizes = [4, 4, 16, 15], strides = [1, 1, 1, 1]} : vector<4x4x16x16xf32> to vector<4x4x16x15xf32>
    %468 = tpu.concatenate %466, %467 in 3 : vector<4x4x16x1xf32>, vector<4x4x16x15xf32> -> vector<4x4x16x16xf32>
    %469 = vector.extract_strided_slice %468 {offsets = [0, 0, 0, 0], sizes = [4, 1, 16, 16], strides = [1, 1, 1, 1]} : vector<4x4x16x16xf32> to vector<4x1x16x16xf32>
    %470 = vector.shape_cast %469 : vector<4x1x16x16xf32> to vector<4x16x16xf32>
    %c6 = arith.constant 6 : index
    %471 = memref.load %arg4[%c6] : memref<144xf32, #tpu.memory_space<smem>>
    %472 = vector.broadcast %471 : f32 to vector<4x16x16xf32>
    %473 = arith.mulf %472, %470 : vector<4x16x16xf32>
    %474 = arith.addf %450, %473 : vector<4x16x16xf32>
    %c42 = arith.constant 42 : index
    %475 = memref.load %arg4[%c42] : memref<144xf32, #tpu.memory_space<smem>>
    %476 = vector.broadcast %475 : f32 to vector<4x16x16xf32>
    %477 = arith.mulf %476, %470 : vector<4x16x16xf32>
    %478 = arith.addf %454, %477 : vector<4x16x16xf32>
    %c78 = arith.constant 78 : index
    %479 = memref.load %arg4[%c78] : memref<144xf32, #tpu.memory_space<smem>>
    %480 = vector.broadcast %479 : f32 to vector<4x16x16xf32>
    %481 = arith.mulf %480, %470 : vector<4x16x16xf32>
    %482 = arith.addf %458, %481 : vector<4x16x16xf32>
    %c114 = arith.constant 114 : index
    %483 = memref.load %arg4[%c114] : memref<144xf32, #tpu.memory_space<smem>>
    %484 = vector.broadcast %483 : f32 to vector<4x16x16xf32>
    %485 = arith.mulf %484, %470 : vector<4x16x16xf32>
    %486 = arith.addf %462, %485 : vector<4x16x16xf32>
    %487 = vector.extract_strided_slice %468 {offsets = [0, 1, 0, 0], sizes = [4, 1, 16, 16], strides = [1, 1, 1, 1]} : vector<4x4x16x16xf32> to vector<4x1x16x16xf32>
    %488 = vector.shape_cast %487 : vector<4x1x16x16xf32> to vector<4x16x16xf32>
    %c15 = arith.constant 15 : index
    %489 = memref.load %arg4[%c15] : memref<144xf32, #tpu.memory_space<smem>>
    %490 = vector.broadcast %489 : f32 to vector<4x16x16xf32>
    %491 = arith.mulf %490, %488 : vector<4x16x16xf32>
    %492 = arith.addf %474, %491 : vector<4x16x16xf32>
    %c51 = arith.constant 51 : index
    %493 = memref.load %arg4[%c51] : memref<144xf32, #tpu.memory_space<smem>>
    %494 = vector.broadcast %493 : f32 to vector<4x16x16xf32>
    %495 = arith.mulf %494, %488 : vector<4x16x16xf32>
    %496 = arith.addf %478, %495 : vector<4x16x16xf32>
    %c87 = arith.constant 87 : index
    %497 = memref.load %arg4[%c87] : memref<144xf32, #tpu.memory_space<smem>>
    %498 = vector.broadcast %497 : f32 to vector<4x16x16xf32>
    %499 = arith.mulf %498, %488 : vector<4x16x16xf32>
    %500 = arith.addf %482, %499 : vector<4x16x16xf32>
    %c123 = arith.constant 123 : index
    %501 = memref.load %arg4[%c123] : memref<144xf32, #tpu.memory_space<smem>>
    %502 = vector.broadcast %501 : f32 to vector<4x16x16xf32>
    %503 = arith.mulf %502, %488 : vector<4x16x16xf32>
    %504 = arith.addf %486, %503 : vector<4x16x16xf32>
    %505 = vector.extract_strided_slice %468 {offsets = [0, 2, 0, 0], sizes = [4, 1, 16, 16], strides = [1, 1, 1, 1]} : vector<4x4x16x16xf32> to vector<4x1x16x16xf32>
    %506 = vector.shape_cast %505 : vector<4x1x16x16xf32> to vector<4x16x16xf32>
    %c24 = arith.constant 24 : index
    %507 = memref.load %arg4[%c24] : memref<144xf32, #tpu.memory_space<smem>>
    %508 = vector.broadcast %507 : f32 to vector<4x16x16xf32>
    %509 = arith.mulf %508, %506 : vector<4x16x16xf32>
    %510 = arith.addf %492, %509 : vector<4x16x16xf32>
    %c60 = arith.constant 60 : index
    %511 = memref.load %arg4[%c60] : memref<144xf32, #tpu.memory_space<smem>>
    %512 = vector.broadcast %511 : f32 to vector<4x16x16xf32>
    %513 = arith.mulf %512, %506 : vector<4x16x16xf32>
    %514 = arith.addf %496, %513 : vector<4x16x16xf32>
    %c96 = arith.constant 96 : index
    %515 = memref.load %arg4[%c96] : memref<144xf32, #tpu.memory_space<smem>>
    %516 = vector.broadcast %515 : f32 to vector<4x16x16xf32>
    %517 = arith.mulf %516, %506 : vector<4x16x16xf32>
    %518 = arith.addf %500, %517 : vector<4x16x16xf32>
    %c132 = arith.constant 132 : index
    %519 = memref.load %arg4[%c132] : memref<144xf32, #tpu.memory_space<smem>>
    %520 = vector.broadcast %519 : f32 to vector<4x16x16xf32>
    %521 = arith.mulf %520, %506 : vector<4x16x16xf32>
    %522 = arith.addf %504, %521 : vector<4x16x16xf32>
    %523 = vector.extract_strided_slice %468 {offsets = [0, 3, 0, 0], sizes = [4, 1, 16, 16], strides = [1, 1, 1, 1]} : vector<4x4x16x16xf32> to vector<4x1x16x16xf32>
    %524 = vector.shape_cast %523 : vector<4x1x16x16xf32> to vector<4x16x16xf32>
    %c33 = arith.constant 33 : index
    %525 = memref.load %arg4[%c33] : memref<144xf32, #tpu.memory_space<smem>>
    %526 = vector.broadcast %525 : f32 to vector<4x16x16xf32>
    %527 = arith.mulf %526, %524 : vector<4x16x16xf32>
    %528 = arith.addf %510, %527 : vector<4x16x16xf32>
    %c69 = arith.constant 69 : index
    %529 = memref.load %arg4[%c69] : memref<144xf32, #tpu.memory_space<smem>>
    %530 = vector.broadcast %529 : f32 to vector<4x16x16xf32>
    %531 = arith.mulf %530, %524 : vector<4x16x16xf32>
    %532 = arith.addf %514, %531 : vector<4x16x16xf32>
    %c105 = arith.constant 105 : index
    %533 = memref.load %arg4[%c105] : memref<144xf32, #tpu.memory_space<smem>>
    %534 = vector.broadcast %533 : f32 to vector<4x16x16xf32>
    %535 = arith.mulf %534, %524 : vector<4x16x16xf32>
    %536 = arith.addf %518, %535 : vector<4x16x16xf32>
    %c141 = arith.constant 141 : index
    %537 = memref.load %arg4[%c141] : memref<144xf32, #tpu.memory_space<smem>>
    %538 = vector.broadcast %537 : f32 to vector<4x16x16xf32>
    %539 = arith.mulf %538, %524 : vector<4x16x16xf32>
    %540 = arith.addf %522, %539 : vector<4x16x16xf32>
    %541 = vector.extract_strided_slice %465 {offsets = [0, 0, 0, 0], sizes = [4, 1, 16, 16], strides = [1, 1, 1, 1]} : vector<4x4x16x16xf32> to vector<4x1x16x16xf32>
    %542 = vector.shape_cast %541 : vector<4x1x16x16xf32> to vector<4x16x16xf32>
    %c7 = arith.constant 7 : index
    %543 = memref.load %arg4[%c7] : memref<144xf32, #tpu.memory_space<smem>>
    %544 = vector.broadcast %543 : f32 to vector<4x16x16xf32>
    %545 = arith.mulf %544, %542 : vector<4x16x16xf32>
    %546 = arith.addf %528, %545 : vector<4x16x16xf32>
    %c43 = arith.constant 43 : index
    %547 = memref.load %arg4[%c43] : memref<144xf32, #tpu.memory_space<smem>>
    %548 = vector.broadcast %547 : f32 to vector<4x16x16xf32>
    %549 = arith.mulf %548, %542 : vector<4x16x16xf32>
    %550 = arith.addf %532, %549 : vector<4x16x16xf32>
    %c79 = arith.constant 79 : index
    %551 = memref.load %arg4[%c79] : memref<144xf32, #tpu.memory_space<smem>>
    %552 = vector.broadcast %551 : f32 to vector<4x16x16xf32>
    %553 = arith.mulf %552, %542 : vector<4x16x16xf32>
    %554 = arith.addf %536, %553 : vector<4x16x16xf32>
    %c115 = arith.constant 115 : index
    %555 = memref.load %arg4[%c115] : memref<144xf32, #tpu.memory_space<smem>>
    %556 = vector.broadcast %555 : f32 to vector<4x16x16xf32>
    %557 = arith.mulf %556, %542 : vector<4x16x16xf32>
    %558 = arith.addf %540, %557 : vector<4x16x16xf32>
    %559 = vector.extract_strided_slice %465 {offsets = [0, 1, 0, 0], sizes = [4, 1, 16, 16], strides = [1, 1, 1, 1]} : vector<4x4x16x16xf32> to vector<4x1x16x16xf32>
    %560 = vector.shape_cast %559 : vector<4x1x16x16xf32> to vector<4x16x16xf32>
    %c16 = arith.constant 16 : index
    %561 = memref.load %arg4[%c16] : memref<144xf32, #tpu.memory_space<smem>>
    %562 = vector.broadcast %561 : f32 to vector<4x16x16xf32>
    %563 = arith.mulf %562, %560 : vector<4x16x16xf32>
    %564 = arith.addf %546, %563 : vector<4x16x16xf32>
    %c52 = arith.constant 52 : index
    %565 = memref.load %arg4[%c52] : memref<144xf32, #tpu.memory_space<smem>>
    %566 = vector.broadcast %565 : f32 to vector<4x16x16xf32>
    %567 = arith.mulf %566, %560 : vector<4x16x16xf32>
    %568 = arith.addf %550, %567 : vector<4x16x16xf32>
    %c88 = arith.constant 88 : index
    %569 = memref.load %arg4[%c88] : memref<144xf32, #tpu.memory_space<smem>>
    %570 = vector.broadcast %569 : f32 to vector<4x16x16xf32>
    %571 = arith.mulf %570, %560 : vector<4x16x16xf32>
    %572 = arith.addf %554, %571 : vector<4x16x16xf32>
    %c124 = arith.constant 124 : index
    %573 = memref.load %arg4[%c124] : memref<144xf32, #tpu.memory_space<smem>>
    %574 = vector.broadcast %573 : f32 to vector<4x16x16xf32>
    %575 = arith.mulf %574, %560 : vector<4x16x16xf32>
    %576 = arith.addf %558, %575 : vector<4x16x16xf32>
    %577 = vector.extract_strided_slice %465 {offsets = [0, 2, 0, 0], sizes = [4, 1, 16, 16], strides = [1, 1, 1, 1]} : vector<4x4x16x16xf32> to vector<4x1x16x16xf32>
    %578 = vector.shape_cast %577 : vector<4x1x16x16xf32> to vector<4x16x16xf32>
    %c25 = arith.constant 25 : index
    %579 = memref.load %arg4[%c25] : memref<144xf32, #tpu.memory_space<smem>>
    %580 = vector.broadcast %579 : f32 to vector<4x16x16xf32>
    %581 = arith.mulf %580, %578 : vector<4x16x16xf32>
    %582 = arith.addf %564, %581 : vector<4x16x16xf32>
    %c61 = arith.constant 61 : index
    %583 = memref.load %arg4[%c61] : memref<144xf32, #tpu.memory_space<smem>>
    %584 = vector.broadcast %583 : f32 to vector<4x16x16xf32>
    %585 = arith.mulf %584, %578 : vector<4x16x16xf32>
    %586 = arith.addf %568, %585 : vector<4x16x16xf32>
    %c97 = arith.constant 97 : index
    %587 = memref.load %arg4[%c97] : memref<144xf32, #tpu.memory_space<smem>>
    %588 = vector.broadcast %587 : f32 to vector<4x16x16xf32>
    %589 = arith.mulf %588, %578 : vector<4x16x16xf32>
    %590 = arith.addf %572, %589 : vector<4x16x16xf32>
    %c133 = arith.constant 133 : index
    %591 = memref.load %arg4[%c133] : memref<144xf32, #tpu.memory_space<smem>>
    %592 = vector.broadcast %591 : f32 to vector<4x16x16xf32>
    %593 = arith.mulf %592, %578 : vector<4x16x16xf32>
    %594 = arith.addf %576, %593 : vector<4x16x16xf32>
    %595 = vector.extract_strided_slice %465 {offsets = [0, 3, 0, 0], sizes = [4, 1, 16, 16], strides = [1, 1, 1, 1]} : vector<4x4x16x16xf32> to vector<4x1x16x16xf32>
    %596 = vector.shape_cast %595 : vector<4x1x16x16xf32> to vector<4x16x16xf32>
    %c34 = arith.constant 34 : index
    %597 = memref.load %arg4[%c34] : memref<144xf32, #tpu.memory_space<smem>>
    %598 = vector.broadcast %597 : f32 to vector<4x16x16xf32>
    %599 = arith.mulf %598, %596 : vector<4x16x16xf32>
    %600 = arith.addf %582, %599 : vector<4x16x16xf32>
    %c70 = arith.constant 70 : index
    %601 = memref.load %arg4[%c70] : memref<144xf32, #tpu.memory_space<smem>>
    %602 = vector.broadcast %601 : f32 to vector<4x16x16xf32>
    %603 = arith.mulf %602, %596 : vector<4x16x16xf32>
    %604 = arith.addf %586, %603 : vector<4x16x16xf32>
    %c106 = arith.constant 106 : index
    %605 = memref.load %arg4[%c106] : memref<144xf32, #tpu.memory_space<smem>>
    %606 = vector.broadcast %605 : f32 to vector<4x16x16xf32>
    %607 = arith.mulf %606, %596 : vector<4x16x16xf32>
    %608 = arith.addf %590, %607 : vector<4x16x16xf32>
    %c142 = arith.constant 142 : index
    %609 = memref.load %arg4[%c142] : memref<144xf32, #tpu.memory_space<smem>>
    %610 = vector.broadcast %609 : f32 to vector<4x16x16xf32>
    %611 = arith.mulf %610, %596 : vector<4x16x16xf32>
    %612 = arith.addf %594, %611 : vector<4x16x16xf32>
    %613 = vector.extract_strided_slice %465 {offsets = [0, 0, 0, 1], sizes = [4, 4, 16, 15], strides = [1, 1, 1, 1]} : vector<4x4x16x16xf32> to vector<4x4x16x15xf32>
    %cst_20 = arith.constant 0.000000e+00 : f32
    %614 = vector.broadcast %cst_20 : f32 to vector<4x4x16x1xf32>
    %615 = tpu.concatenate %613, %614 in 3 : vector<4x4x16x15xf32>, vector<4x4x16x1xf32> -> vector<4x4x16x16xf32>
    %616 = vector.extract_strided_slice %615 {offsets = [0, 0, 0, 0], sizes = [4, 1, 16, 16], strides = [1, 1, 1, 1]} : vector<4x4x16x16xf32> to vector<4x1x16x16xf32>
    %617 = vector.shape_cast %616 : vector<4x1x16x16xf32> to vector<4x16x16xf32>
    %c8 = arith.constant 8 : index
    %618 = memref.load %arg4[%c8] : memref<144xf32, #tpu.memory_space<smem>>
    %619 = vector.broadcast %618 : f32 to vector<4x16x16xf32>
    %620 = arith.mulf %619, %617 : vector<4x16x16xf32>
    %621 = arith.addf %600, %620 : vector<4x16x16xf32>
    %c44 = arith.constant 44 : index
    %622 = memref.load %arg4[%c44] : memref<144xf32, #tpu.memory_space<smem>>
    %623 = vector.broadcast %622 : f32 to vector<4x16x16xf32>
    %624 = arith.mulf %623, %617 : vector<4x16x16xf32>
    %625 = arith.addf %604, %624 : vector<4x16x16xf32>
    %c80 = arith.constant 80 : index
    %626 = memref.load %arg4[%c80] : memref<144xf32, #tpu.memory_space<smem>>
    %627 = vector.broadcast %626 : f32 to vector<4x16x16xf32>
    %628 = arith.mulf %627, %617 : vector<4x16x16xf32>
    %629 = arith.addf %608, %628 : vector<4x16x16xf32>
    %c116 = arith.constant 116 : index
    %630 = memref.load %arg4[%c116] : memref<144xf32, #tpu.memory_space<smem>>
    %631 = vector.broadcast %630 : f32 to vector<4x16x16xf32>
    %632 = arith.mulf %631, %617 : vector<4x16x16xf32>
    %633 = arith.addf %612, %632 : vector<4x16x16xf32>
    %634 = vector.extract_strided_slice %615 {offsets = [0, 1, 0, 0], sizes = [4, 1, 16, 16], strides = [1, 1, 1, 1]} : vector<4x4x16x16xf32> to vector<4x1x16x16xf32>
    %635 = vector.shape_cast %634 : vector<4x1x16x16xf32> to vector<4x16x16xf32>
    %c17 = arith.constant 17 : index
    %636 = memref.load %arg4[%c17] : memref<144xf32, #tpu.memory_space<smem>>
    %637 = vector.broadcast %636 : f32 to vector<4x16x16xf32>
    %638 = arith.mulf %637, %635 : vector<4x16x16xf32>
    %639 = arith.addf %621, %638 : vector<4x16x16xf32>
    %c53 = arith.constant 53 : index
    %640 = memref.load %arg4[%c53] : memref<144xf32, #tpu.memory_space<smem>>
    %641 = vector.broadcast %640 : f32 to vector<4x16x16xf32>
    %642 = arith.mulf %641, %635 : vector<4x16x16xf32>
    %643 = arith.addf %625, %642 : vector<4x16x16xf32>
    %c89 = arith.constant 89 : index
    %644 = memref.load %arg4[%c89] : memref<144xf32, #tpu.memory_space<smem>>
    %645 = vector.broadcast %644 : f32 to vector<4x16x16xf32>
    %646 = arith.mulf %645, %635 : vector<4x16x16xf32>
    %647 = arith.addf %629, %646 : vector<4x16x16xf32>
    %c125 = arith.constant 125 : index
    %648 = memref.load %arg4[%c125] : memref<144xf32, #tpu.memory_space<smem>>
    %649 = vector.broadcast %648 : f32 to vector<4x16x16xf32>
    %650 = arith.mulf %649, %635 : vector<4x16x16xf32>
    %651 = arith.addf %633, %650 : vector<4x16x16xf32>
    %652 = vector.extract_strided_slice %615 {offsets = [0, 2, 0, 0], sizes = [4, 1, 16, 16], strides = [1, 1, 1, 1]} : vector<4x4x16x16xf32> to vector<4x1x16x16xf32>
    %653 = vector.shape_cast %652 : vector<4x1x16x16xf32> to vector<4x16x16xf32>
    %c26 = arith.constant 26 : index
    %654 = memref.load %arg4[%c26] : memref<144xf32, #tpu.memory_space<smem>>
    %655 = vector.broadcast %654 : f32 to vector<4x16x16xf32>
    %656 = arith.mulf %655, %653 : vector<4x16x16xf32>
    %657 = arith.addf %639, %656 : vector<4x16x16xf32>
    %c62 = arith.constant 62 : index
    %658 = memref.load %arg4[%c62] : memref<144xf32, #tpu.memory_space<smem>>
    %659 = vector.broadcast %658 : f32 to vector<4x16x16xf32>
    %660 = arith.mulf %659, %653 : vector<4x16x16xf32>
    %661 = arith.addf %643, %660 : vector<4x16x16xf32>
    %c98 = arith.constant 98 : index
    %662 = memref.load %arg4[%c98] : memref<144xf32, #tpu.memory_space<smem>>
    %663 = vector.broadcast %662 : f32 to vector<4x16x16xf32>
    %664 = arith.mulf %663, %653 : vector<4x16x16xf32>
    %665 = arith.addf %647, %664 : vector<4x16x16xf32>
    %c134 = arith.constant 134 : index
    %666 = memref.load %arg4[%c134] : memref<144xf32, #tpu.memory_space<smem>>
    %667 = vector.broadcast %666 : f32 to vector<4x16x16xf32>
    %668 = arith.mulf %667, %653 : vector<4x16x16xf32>
    %669 = arith.addf %651, %668 : vector<4x16x16xf32>
    %670 = vector.extract_strided_slice %615 {offsets = [0, 3, 0, 0], sizes = [4, 1, 16, 16], strides = [1, 1, 1, 1]} : vector<4x4x16x16xf32> to vector<4x1x16x16xf32>
    %671 = vector.shape_cast %670 : vector<4x1x16x16xf32> to vector<4x16x16xf32>
    %c35 = arith.constant 35 : index
    %672 = memref.load %arg4[%c35] : memref<144xf32, #tpu.memory_space<smem>>
    %673 = vector.broadcast %672 : f32 to vector<4x16x16xf32>
    %674 = arith.mulf %673, %671 : vector<4x16x16xf32>
    %675 = arith.addf %657, %674 : vector<4x16x16xf32>
    %c71 = arith.constant 71 : index
    %676 = memref.load %arg4[%c71] : memref<144xf32, #tpu.memory_space<smem>>
    %677 = vector.broadcast %676 : f32 to vector<4x16x16xf32>
    %678 = arith.mulf %677, %671 : vector<4x16x16xf32>
    %679 = arith.addf %661, %678 : vector<4x16x16xf32>
    %c107 = arith.constant 107 : index
    %680 = memref.load %arg4[%c107] : memref<144xf32, #tpu.memory_space<smem>>
    %681 = vector.broadcast %680 : f32 to vector<4x16x16xf32>
    %682 = arith.mulf %681, %671 : vector<4x16x16xf32>
    %683 = arith.addf %665, %682 : vector<4x16x16xf32>
    %c143 = arith.constant 143 : index
    %684 = memref.load %arg4[%c143] : memref<144xf32, #tpu.memory_space<smem>>
    %685 = vector.broadcast %684 : f32 to vector<4x16x16xf32>
    %686 = arith.mulf %685, %671 : vector<4x16x16xf32>
    %687 = arith.addf %669, %686 : vector<4x16x16xf32>
    %688 = vector.shape_cast %675 : vector<4x16x16xf32> to vector<4x1x16x16xf32>
    %689 = vector.shape_cast %679 : vector<4x16x16xf32> to vector<4x1x16x16xf32>
    %690 = vector.shape_cast %683 : vector<4x16x16xf32> to vector<4x1x16x16xf32>
    %691 = vector.shape_cast %687 : vector<4x16x16xf32> to vector<4x1x16x16xf32>
    %692 = tpu.concatenate %688, %689, %690, %691 in 1 : vector<4x1x16x16xf32>, vector<4x1x16x16xf32>, vector<4x1x16x16xf32>, vector<4x1x16x16xf32> -> vector<4x4x16x16xf32>
    %693 = arith.mulf %692, %1 : vector<4x4x16x16xf32>
    %694 = arith.addf %693, %1 : vector<4x4x16x16xf32>
    %c0_21 = arith.constant 0 : index
    %c0_22 = arith.constant 0 : index
    %c0_23 = arith.constant 0 : index
    %c0_24 = arith.constant 0 : index
    %c0_25 = arith.constant 0 : index
    %695 = vector.load %arg6[%c0_21, %c0_22, %c0_23, %c0_24, %c0_25] : memref<1x4x4x16x16xf32, #tpu.memory_space<vmem>>, vector<1x4x4x16x16xf32>
    %696 = vector.shape_cast %695 : vector<1x4x4x16x16xf32> to vector<4x4x16x16xf32>
    %697 = vector.shape_cast %694 : vector<4x4x16x16xf32> to vector<1x4x4x16x16xf32>
    tpu.vector_store %arg6[%c0_21, %c0_22, %c0_23, %c0_24, %c0_25], %697 {strides = array<i32>} : memref<1x4x4x16x16xf32, #tpu.memory_space<vmem>>, vector<1x4x4x16x16xf32>,
    return
  }
  func.func @transform_0(%arg0: i32, %arg1: i32) -> (i32, i32, i32, i32, i32) {
    %c0_i32 = arith.constant 0 : i32
    %c0_i32_0 = arith.constant 0 : i32
    %c0_i32_1 = arith.constant 0 : i32
    %c0_i32_2 = arith.constant 0 : i32
    return %arg0, %arg1, %c0_i32, %c0_i32_0, %c0_i32_1 : i32, i32, i32, i32, i32
  }
  func.func @transform_1(%arg0: i32, %arg1: i32) -> (i32, i32, i32, i32, i32) {
    %c4_i32 = arith.constant 4 : i32
    %0 = arith.muli %arg1, %c4_i32 : i32
    %c1_i32 = arith.constant 1 : i32
    %1 = arith.subi %0, %c1_i32 : i32
    %c0_i32 = arith.constant 0 : i32
    %2 = arith.maxsi %1, %c0_i32 : i32
    %c0_i32_0 = arith.constant 0 : i32
    %c0_i32_1 = arith.constant 0 : i32
    %c0_i32_2 = arith.constant 0 : i32
    %c0_i32_3 = arith.constant 0 : i32
    return %arg0, %2, %c0_i32_0, %c0_i32_1, %c0_i32_2 : i32, i32, i32, i32, i32
  }
  func.func @transform_2(%arg0: i32, %arg1: i32) -> i32 {
    %c0_i32 = arith.constant 0 : i32
    %c0_i32_0 = arith.constant 0 : i32
    return %c0_i32 : i32
  }
  func.func @transform_3(%arg0: i32, %arg1: i32) -> i32 {
    %c0_i32 = arith.constant 0 : i32
    %c0_i32_0 = arith.constant 0 : i32
    return %c0_i32 : i32
  }
  func.func @transform_4(%arg0: i32, %arg1: i32) -> (i32, i32, i32, i32, i32) {
    %c0_i32 = arith.constant 0 : i32
    %c0_i32_0 = arith.constant 0 : i32
    %c0_i32_1 = arith.constant 0 : i32
    %c0_i32_2 = arith.constant 0 : i32
    return %arg0, %arg1, %c0_i32, %c0_i32_0, %c0_i32_1 : i32, i32, i32, i32, i32
  }
}

</mosaic_0001>

<bundles_post_ra>
// kernel: tpu_custom_call.1
= control target key start
LH: loop header
LB: loop body
LE: loop exit
PB: predicated region body
PF: predicated region fallthrough
CT: control target
= control target key end

     0   :  { %s9567_s0 = inlined_call_operand.hbm [shape: f32[2,4,4,16,16], index: 0, kind: input, shape index: {}]   ;;  %s9568_s1 = inlined_call_operand.hbm [shape: f32[2,4,4,16,16], index: 1, kind: input, shape index: {}]   ;;  %s9569_s2 = inlined_call_operand.vmem [shape: f32[144], index: 2, kind: input, shape index: {}]   ;;  %s9570_s3 = inlined_call_operand.vmem [shape: f32[4], index: 3, kind: input, shape index: {}]   ;;  %s9571_s4 = inlined_call_operand.hbm [shape: f32[2,4,4,16,16], index: 4, kind: output, shape index: {}]  }
   0x1   :  { %9832 = sst [smem:[#allocation189_spill]] %s9567_s0 }
   0x2   :  { %9833 = sst [smem:[#allocation190_spill]] %s9568_s1 }
   0x3   :  { %9834 = sst [smem:[#allocation191_spill]] %s9569_s2 }
   0x4   :  { %9835 = sst [smem:[#allocation192_spill]] %s9570_s3 }
   0x5   :  { %9836 = sst [smem:[#allocation193_spill]] %s9571_s4 }
   0x6   :  { %9 = vsyncpa [#allocation3], 0 }
   0x7   :  { %11 = vsyncpa [#allocation3 + $0x1], 0 }
   0x8   :  { %12 = vsyncpa [#allocation7], 0 }
   0x9   :  { %14 = vsyncpa [#allocation7 + $0x1], 0 }
   0xa   :  { %15 = vsyncpa [#allocation5], 0 }
   0xb   :  { %16 = vsyncpa [#allocation10], 0 }
   0xc   :  { %17 = vsyncpa [#allocation4], 0 }
   0xd   :  { %19 = vsyncpa [#allocation4 + $0x1], 0  ;;  %s4793_s15 = smov 0   ;;  %s4795_s16 = smov 0  }
   0xe   :  { %s4797_s17 = smov 0   ;;  %s4799_s18 = smov 0  }
   0xf   :  { %s4801_s19 = smov 0   ;;  %s4803_s20 = smov 0  }
  0x10 LB: > { %9837 = sst [smem:[#allocation17_spill]] %s4735_s15  ;;  %s4273_s21 = sadd.s32 4294967295, %s4755_s20   ;;  %s4755_s20 = sphi %s4803_s20, %s25_s20   ;;  %s4751_s19 = sphi %s4801_s19, %s10639_s19   ;;  %s4747_s18 = sphi %s4799_s18, %s10638_s18   ;;  %s4743_s17 = sphi %s4797_s17, %s10637_s17   ;;  %s4739_s16 = sphi %s4795_s16, %s10636_s16   ;;  %s4735_s15 = sphi %s4793_s15, %s10635_s15  }
  0x11   : > { %9838 = sst [smem:[#allocation18_spill]] %s4739_s16  ;;  %s4274_s22 = sadd.s32 4294967294, %s4755_s20  }
  0x12   : > { %9839 = sst [smem:[#allocation19_spill]] %s4743_s17  ;;  %s46_s23 = sadd.s32 1, %s4743_s17 }
  0x13   : > { %9840 = sst [smem:[#allocation20_spill]] %s4747_s18  ;;  %p53_p0 = scmp.ne.s32.totalorder %s4743_s17, %s4739_s16 }
  0x14   : > { %9841 = sst [smem:[#allocation21_spill]] %s4751_s19  ;;  %p54_p1 = scmp.eq.s32.totalorder %s4755_s20, 0 }
  0x15   : > { %9842 = sst [smem:[#allocation22_spill]] %s4755_s20  ;;  %p59_p2 = scmp.ne.s32.totalorder %s4739_s16, %s4735_s15 }
  0x16   : > { %p4831_p3 = scmp.eq.s32.totalorder %s4273_s21, 0  ;;  %p163_p4 = scmp.eq.s32.totalorder %s4273_s21, 1 }
  0x17   : > { %p4835_p5 = por %p54_p1, %p53_p0  ;;  %p169_p6 = scmp.eq.s32.totalorder %s4274_s22, 1 }
  0x18   : > { %s9843_s24 = scalar_select %p4831_p3, 1, 0 }
  0x19   : > { %p4841_p7 = por %p4831_p3, %p59_p2  ;;  %p4845_p8 = por %p163_p4, %p53_p0 }
  0x1a   : > { %p4849_p9 = por %p169_p6, %p59_p2  ;;  %p4275_p10 = scmp.ge.s32.totalorder %s4755_s20, 1 }
  0x1b   : > { %s9845_s26 = scalar_select %p4841_p7, 1, 0 }
  0x1c   : > { %s9846_s27 = scalar_select %p4845_p8, 1, 0 }
  0x1d   : > { %s9848_s28 = scalar_select %p4849_p9, 1, 0 }
  0x1e   : > { %9847 = sst [smem:[#allocation23_spill]] %s9846_s27  ;;  %p176_p11 = scmp.lt.s32.totalorder %s4755_s20, 3 }
  0x1f   : > { %9849 = sst [smem:[#allocation24_spill]] %s9848_s28  ;;  %s9850_s2 = sld [smem:[#allocation191_spill]] }
  0x20   : > { %p4858_p12 = pnand %p4275_p10, %p176_p11  ;;  %p4479_p0 = scmp.lt.s32.totalorder %s4755_s20, 2 }
  0x21   : > { %s9852_s3 = sld [smem:[#allocation192_spill]] }
  0x22   : > { %s9851_s6 = scalar_select %p4858_p12, 1, 0 }
  0x23   : > { %p4459_p1 = pneg %p4858_p12  ;;  %p4871_p2 = pnand %p4479_p0, %p4835_p5 }
  0x25   : > { %s189_s5 = sshll.u32 %s9850_s2, 4  ;;  %p4877_p4 = pnand %p4459_p1, %p4831_p3  ;;  %s190_s5 = int_to_ptr.vmem [resolvable:$true] %s189_s5 }
  0x26   : > { %s9853_s10 = scalar_select %p4871_p2, 1, 0 }
  0x27   : > { %s200_s9 = sshll.u32 %s9852_s3, 4  ;;  %s4571_s12 = scalar_lea.vmem %s190_s5, 32  ;;  %s201_s9 = int_to_ptr.vmem [resolvable:$true] %s200_s9 }
  0x28   : > { %p4572_p6 = scmp.ne.s32.totalorder %s190_s5, %s4571_s12  ;;  %p4573_p10 = pneg %p4877_p4 }
  0x29   : > { %p4579_p9 = scmp.lt.s32.totalorder %s190_s5, %s190_s5  ;;  %p4580_p8 = scmp.lt.s32.totalorder %s4571_s12, %s4571_s12 }
  0x2a   : > { %p4574_p11 = pnand %p4573_p10, %p4572_p6 }
  0x2b   : > { %p4581_p7 = por %p4580_p8, %p4579_p9 }
  0x2c   : > { %p4575_p13 = pneg %p4574_p11 }
  0x2e   : > { %p4582_p5 = pnand %p4581_p7, %p4575_p13 }
  0x30   : > { %4585 = shalt.err (!%p4582_p5)
}
  0x31   : > { %s4757_s13 = smov [#allocation8]   ;;  %s4586_s14 = scalar_lea.vmem %s201_s9, 16 }
  0x32   : > { %4462 = dma.vmem_to_smem (!%p4877_p4), %s190_s5, 32, %s4757_s13, [#allocation5]  }
  0x33   : > { %p4587_p0 = scmp.ne.s32.totalorder %s201_s9, %s4586_s14  ;;  %p4594_p12 = scmp.lt.s32.totalorder %s201_s9, %s201_s9 }
  0x34   : > { %p4595_p2 = scmp.lt.s32.totalorder %s4586_s14, %s4586_s14 }
  0x35   : > { %p4589_p1 = pnand %p4587_p0, %p4573_p10 }
  0x36   : > { %p4596_p6 = por %p4595_p2, %p4594_p12 }
  0x37   : > { %p4590_p3 = pneg %p4589_p1 }
  0x39   : > { %p4597_p11 = pnand %p4596_p6, %p4590_p3 }
  0x3b   : > { %4600 = shalt.err (!%p4597_p11)
}
  0x3c   : > { %s4758_s21 = smov [#allocation9]   ;;  %s37_s22 = sadd.s32 1, %s4751_s19 }
  0x3d   : > { %4465 = dma.vmem_to_smem (!%p4877_p4), %s201_s9, 16, %s4758_s21, [#allocation10]  }
  0x3e   : > { %s4889_s25 = sand.u32 1, %s4743_s17   ;;  %p39_p3 = scmp.ge.s32.totalorder %s37_s22, 2 }
  0x3f   : > { %s4279_s29 = sshll.u32 %s4889_s25, 8  ;;  %s4442_s30 = sshll.u32 %s4751_s19, 12 }
  0x40   : > { %s10641_s22 = smov (%p39_p3, %s37_s22), 0  ;;  %s9856_s0 = sld [smem:[#allocation189_spill]] }
  0x41   : > { %9855 = sst [smem:[#allocation25_spill]] %s10641_s22  ;;  %s41_s9 = ssub.s32 %s4751_s19, %s10641_s22 }
  0x42   : > { %s215_s11 = scalar_lea.vmem [#allocation2], %s4279_s29  ;;  %p44_p7 = scmp.eq.s32.totalorder %s41_s9, 0 }
  0x43   : > { %s225_s12 = sshll.u32 %s215_s11, 4  ;;  %s212_s14 = scalar_lea.sflag [#allocation3], %s4889_s25  ;;  %s4904_s12 = int_to_ptr.vmem [resolvable:$true] %s225_s12 }
  0x44   : > { %s4909_s13 = scalar_select %p44_p7, %s4743_s17, %s46_s23  }
  0x45   : > { %p9858_p9 = scmp.ne.s32.totalorder %s9853_s10, 0 }
  0x46   : > { %s4900_s8 = scalar_lea.hbm %s9856_s0, %s4442_s30  ;;  %9857 = sst [smem:[#allocation26_spill]] %s4909_s13 }
  0x47   : > { %s4601_s21 = scalar_lea.hbm %s4900_s8, 4096  ;;  %p4603_p12 = pneg %p9858_p9 }
  0x48   : > { %p4602_p8 = scmp.ne.s32.totalorder %s4900_s8, %s4601_s21  ;;  %s4606_s29 = scalar_lea.hbm %s9856_s0, 8192 }
  0x49   : > { %p4607_p4 = scmp.lt.u32.totalorder %s4900_s8, %s9856_s0  ;;  %p4608_p10 = scmp.lt.u32.totalorder %s4606_s29, %s4601_s21 }
  0x4a   : > { %p4604_p13 = pnand %p4603_p12, %p4602_p8  ;;  %p4610_p0 = scmp.lt.u32.totalorder %s4601_s21, %s4900_s8 }
  0x4b   : > { %p4609_p5 = por %p4608_p10, %p4607_p4 }
  0x4c   : > { %p4605_p2 = pneg %p4604_p13 }
  0x4d   : > { %p4611_p1 = por %p4610_p0, %p4609_p5 }
  0x4f   : > { %p4612_p6 = pnand %p4611_p1, %p4605_p2 }
  0x51   : > { %4615 = shalt.err (!%p4612_p6)
}
  0x52   : > { %s4616_s23 = scalar_lea.vmem %s4904_s12, 4096  ;;  %s4759_s5 = smov [#allocation2]  }
  0x53   : > { %p4617_p11 = scmp.ne.s32.totalorder %s4904_s12, %s4616_s23  ;;  %s4621_s7 = sshll.u32 %s4759_s5, 4  ;;  %s4622_s7 = int_to_ptr.vmem [resolvable:$false] %s4621_s7 }
  0x54   : > { %s4623_s11 = scalar_lea.vmem %s4622_s7, 8192  ;;  %p4624_p8 = scmp.lt.s32.totalorder %s4904_s12, %s4622_s7 }
  0x55   : > { %p4619_p3 = pnand %p4617_p11, %p4603_p12  ;;  %p4625_p13 = scmp.lt.s32.totalorder %s4623_s11, %s4616_s23 }
  0x57   : > { %p4620_p7 = pneg %p4619_p3  ;;  %p4626_p4 = por %p4625_p13, %p4624_p8 }
  0x59   : > { %p4627_p10 = pnand %p4626_p4, %p4620_p7 }
  0x5b   : > { %4630 = shalt.err (!%p4627_p10)
}
  0x5c   : > { %s4760_s21 = smov 128   ;;  %s4761_s29 = smov 8  }
  0x5d   : > { %4469 = dma.hbm_to_vmem [thread:$0]  (!%p9858_p9), %s4900_s8, 4096, %s4904_s12, %s212_s14, %s4760_s21, %s4760_s21, %s4761_s29  }
  0x5e   : > { %s4282_s9 = sshll.u32 %s4889_s25, 6  ;;  %s9859_s1 = sld [smem:[#allocation190_spill]] }
  0x5f   : > { %s239_s11 = scalar_lea.vmem [#allocation6], %s4282_s9  ;;  %s236_s2 = scalar_lea.sflag [#allocation7], %s4889_s25 }
  0x60   : > { %s252_s0 = sshll.u32 %s239_s11, 4  ;;  %s4950_s0 = int_to_ptr.vmem [resolvable:$true] %s252_s0 }
  0x64   : > { %s4948_s7 = scalar_lea.hbm %s9859_s1, %s4442_s30  ;;  %s4636_s30 = scalar_lea.hbm %s9859_s1, 8192 }
  0x65   : > { %s4631_s3 = scalar_lea.hbm %s4948_s7, 1024  ;;  %p4637_p1 = scmp.lt.u32.totalorder %s4948_s7, %s9859_s1 }
  0x66   : > { %p4632_p2 = scmp.ne.s32.totalorder %s4948_s7, %s4631_s3  ;;  %p4638_p6 = scmp.lt.u32.totalorder %s4636_s30, %s4631_s3 }
  0x67   : > { %p4640_p3 = scmp.lt.u32.totalorder %s4631_s3, %s4948_s7 }
  0x68   : > { %p4634_p5 = pnand %p4632_p2, %p4603_p12  ;;  %p4639_p11 = por %p4638_p6, %p4637_p1 }
  0x6a   : > { %p4635_p0 = pneg %p4634_p5  ;;  %p4641_p7 = por %p4640_p3, %p4639_p11 }
  0x6c   : > { %p4642_p8 = pnand %p4641_p7, %p4635_p0 }
  0x6e   : > { %4645 = shalt.err (!%p4642_p8)
}
  0x6f   : > { %s4646_s9 = scalar_lea.vmem %s4950_s0, 1024  ;;  %s4762_s5 = smov [#allocation6]  }
  0x70   : > { %p4647_p13 = scmp.ne.s32.totalorder %s4950_s0, %s4646_s9  ;;  %s4651_s11 = sshll.u32 %s4762_s5, 4  ;;  %s4652_s11 = int_to_ptr.vmem [resolvable:$false] %s4651_s11 }
  0x71   : > { %s4653_s8 = scalar_lea.vmem %s4652_s11, 2048  ;;  %p4654_p2 = scmp.lt.s32.totalorder %s4950_s0, %s4652_s11 }
  0x72   : > { %p4649_p4 = pnand %p4647_p13, %p4603_p12  ;;  %p4655_p5 = scmp.lt.s32.totalorder %s4653_s8, %s4646_s9 }
  0x74   : > { %p4650_p10 = pneg %p4649_p4  ;;  %p4656_p1 = por %p4655_p5, %p4654_p2 }
  0x76   : > { %p4657_p6 = pnand %p4656_p1, %p4650_p10 }
  0x78   : > { %4660 = shalt.err (!%p4657_p6)
}
  0x79   : > { %4472 = dma.hbm_to_vmem [thread:$0]  (!%p9858_p9), %s4948_s7, 1024, %s4950_s0, %s236_s2, %s4760_s21, %s4760_s21, %s4761_s29  }
  0x7a   : > { %p9860_p12 = scmp.ne.s32.totalorder %s9851_s6, 0 }
  0x7c   : > { %264 = sbr.rel (%p9860_p12) target bundleno = 966 (0x3c6), region = 36 }
  0x83   : > { %s4984_s3 = sand.u32 1, %s4739_s16   ;;  %p9861_p0 = scmp.ne.s32.totalorder %s9845_s26, 0 }
  0x84   : > { %s9588_s12 = sshll.u32 %s4984_s3, 8  ;;  %s267_s10 = scalar_lea.sflag [#allocation3], %s4984_s3 }
  0x85   : > { %s4990_s30 = scalar_lea.vmem [#allocation2], %s9588_s12 }
  0x86   : > { %4714 = dma.done.wait (%p9861_p0), %s267_s10, 4096  }
  0x87   : > { %4716 = vsyncadd (%p9861_p0), %s267_s10, 4294963200  ;;  %s4287_s0 = sshll.u32 %s4984_s3, 6  ;;  %s276_s2 = scalar_lea.sflag [#allocation7], %s4984_s3 }
  0x88   : > { %s4998_s6 = scalar_lea.vmem [#allocation6], %s4287_s0 }
  0x89   : > { %4718 = dma.done.wait (%p9861_p0), %s276_s2, 1024  }
  0x8a   : > { %4720 = vsyncadd (%p9861_p0), %s276_s2, 4294966272  ;;  %p9862_p9 = scmp.ne.s32.totalorder %s9843_s24, 0 }
  0x8c   : > { %4722 = dma.done.wait (%p9862_p9), [#allocation5], 32  }
  0x8d   : > { %4724 = vsyncadd (%p9862_p9), [#allocation5], 4294967264 }
  0x8e   : > { %4726 = dma.done.wait (%p9862_p9), [#allocation10], 16  }
  0x8f   : > { %4728 = vsyncadd (%p9862_p9), [#allocation10], 4294967280 }
  0x90   : > { %292 = sfence }
  0x91   : > { %v326_v0 = vld [vmem:[%s4990_s30 + $0x10] sm:$0xff]  ;;  %v324_v2 = vld [vmem:[%s4990_s30] sm:$0xff]  ;;  %v327_v5 = vld [vmem:[%s4990_s30 + $0x18] sm:$0xff]  ;;  %vm436_vm0 = vcmask 1040384   ;;  %s9589_s24 = smov 1   ;;  %s4764_s26 = smov 127  }
  0x92   : > { %v358_v1 = vld [vmem:[%s4998_s6 + $0x10] sm:$0xff]  ;;  %v356_v4 = vld [vmem:[%s4998_s6] sm:$0xff]  ;;  %v359_v6 = vld [vmem:[%s4998_s6 + $0x18] sm:$0xff]  ;;  %s5310_s25 = sld [smem:[#allocation8 + $0x9]]  ;;  %s5314_s21 = sld [smem:[#allocation8 + $0x2d]]  ;;  %vm645_vm1 = vcmask 7168  }
  0x93   : > { %v5015_v3 = vsub.f32 %v326_v0, %v358_v1  ;;  %v5020_v7 = vsub.f32 %v324_v2, %v356_v4  ;;  %v5022_v8 = vsub.f32 %v327_v5, %v359_v6  ;;  %v325_v9 = vld [vmem:[%s4990_s30 + $0x8] sm:$0xff]  ;;  %v328_v11 = vld [vmem:[%s4990_s30 + $0x20] sm:$0xff]  ;;  %v330_v21 = vld [vmem:[%s4990_s30 + $0x30] sm:$0xff]  ;;  %s5316_s29 = sld [smem:[#allocation8 + $0x51]]  ;;  %s5318_s7 = sld [smem:[#allocation8 + $0x75]]  ;;  %vm1350_vm2 = vcmask 121856  }
  0x94   : > { %v357_v10 = vld [vmem:[%s4998_s6 + $0x8] sm:$0xff]  ;;  %v360_v15 = vld [vmem:[%s4998_s6 + $0x20] sm:$0xff]  ;;  %v331_v22 = vld [vmem:[%s4990_s30 + $0x38] sm:$0xff]  ;;  %s5320_s14 = sld [smem:[#allocation9]]  ;;  %s5322_s23 = sld [smem:[#allocation9 + $0x1]]  ;;  %vm2791_vm3 = vcmask 1046528  }
  0x95   : > { %9863 = vst [vmem:[#allocation27_spill] sm:$0xff] %v5015_v3  ;;  %9864 = vst [vmem:[#allocation28_spill] sm:$0xff] %v5020_v7  ;;  %v440_v12 = vrot.slane %v5015_v3, 7  ;;  %v5028_v13 = vsub.f32 %v325_v9, %v357_v10  ;;  %v329_v14 = vld [vmem:[%s4990_s30 + $0x28] sm:$0xff]  ;;  %v437_v17 = vrot.slane %v5020_v7, 7  ;;  %v441_v18 = vrot.slane %v5022_v8, 7 }
  0x96   : > { %9865 = vst [vmem:[#allocation29_spill] sm:$0xff] %v5022_v8  ;;  %v361_v16 = vld [vmem:[%s4998_s6 + $0x28] sm:$0xff]  ;;  %v5035_v19 = vsub.f32 %v328_v11, %v360_v15  ;;  %v362_v23 = vld [vmem:[%s4998_s6 + $0x30] sm:$0xff]  ;;  %v363_v26 = vld [vmem:[%s4998_s6 + $0x38] sm:$0xff]  ;;  %s5324_s9 = sld [smem:[#allocation9 + $0x2]]  ;;  %s5328_s5 = sld [smem:[#allocation9 + $0x3]] }
  0x97   : > { %9866 = vst [vmem:[#allocation30_spill] sm:$0xff] %v5028_v13  ;;  %v5037_v20 = vsub.f32 %v329_v14, %v361_v16  ;;  %v5043_v24 = vsel %vm436_vm0, 0.0, %v440_v12  ;;  %v438_v25 = vrot.slane %v5028_v13, 7  ;;  %v5050_v27 = vsel %vm436_vm0, 0.0, %v437_v17  ;;  %v332_v34 = vld [vmem:[%s4990_s30 + $0x40] sm:$0xff]  ;;  %v333_v35 = vld [vmem:[%s4990_s30 + $0x48] sm:$0xff] }
  0x98   : > { %9867 = vst [vmem:[#allocation31_spill] sm:$0xff] %v5035_v19  ;;  %553 = vrot.lane.b32.xlu1 %v5043_v24, %s9589_s24  ;;  %v5052_v28 = vsub.f32 %v330_v21, %v362_v23  ;;  %549 = vrot.lane.b32.xlu0 %v5050_v27, %s9589_s24  ;;  %v5057_v29 = vsel %vm436_vm0, %v440_v12, %v441_v18  ;;  %v443_v30 = vrot.slane %v5035_v19, 7  ;;  %v334_v41 = vld [vmem:[%s4990_s30 + $0x50] sm:$0xff]  ;;  %v335_v43 = vld [vmem:[%s4990_s30 + $0x58] sm:$0xff]  ;;  %s5330_s11 = sld [smem:[#allocation8]]  ;;  %s5334_s8 = sld [smem:[#allocation8 + $0x24]] }
  0x99   : > { %9868 = vst [vmem:[#allocation32_spill] sm:$0xff] %v5037_v20  ;;  %v444_v31 = vrot.slane %v5037_v20, 7  ;;  %v5061_v32 = vsub.f32 %v331_v22, %v363_v26  ;;  %v5064_v33 = vsel %vm436_vm0, %v437_v17, %v438_v25  ;;  %v5077_v39 = vsub.f32 %v332_v34, %v324_v2  ;;  %v336_v50 = vld [vmem:[%s4990_s30 + $0x60] sm:$0xff]  ;;  %v337_v51 = vld [vmem:[%s4990_s30 + $0x68] sm:$0xff]  ;;  %v338_v57 = vld [vmem:[%s4990_s30 + $0x70] sm:$0xff]  ;;  %s5336_s10 = sld [smem:[#allocation8 + $0x48]] }
  0x9a   : > { %9869 = vst [vmem:[#allocation33_spill] sm:$0xff] %v5052_v28  ;;  %v446_v36 = vrot.slane %v5052_v28, 7  ;;  %v5079_v40 = vsub.f32 %v333_v35, %v325_v9  ;;  %v5083_v42 = vsel %vm436_vm0, 0.0, %v443_v30  ;;  %v5088_v44 = vsub.f32 %v334_v41, %v326_v0  ;;  %v339_v59 = vld [vmem:[%s4990_s30 + $0x78] sm:$0xff]  ;;  %v340_v2 = vld [vmem:[%s4990_s30 + $0x80] sm:$0xff]  ;;  %v341_v4 = vld [vmem:[%s4990_s30 + $0x88] sm:$0xff] }
  0x9b   : > { %9870 = vst [vmem:[#allocation34_spill] sm:$0xff] %v5061_v32  ;;  %v5074_v37 = vsel %vm436_vm0, %v443_v30, %v444_v31  ;;  %v447_v38 = vrot.slane %v5061_v32, 7  ;;  %9871 = vst [vmem:[#allocation35_spill] sm:$0xff] %v5077_v39  ;;  %v449_v46 = vrot.slane %v5077_v39, 7  ;;  %v5097_v48 = vsub.f32 %v335_v43, %v327_v5  ;;  %v342_v12 = vld [vmem:[%s4990_s30 + $0x90] sm:$0xff]  ;;  %v343_v15 = vld [vmem:[%s4990_s30 + $0x98] sm:$0xff] }
  0x9c   : > { %555 = vrot.lane.b32.xlu1 %v5057_v29, %s9589_s24  ;;  %551 = vrot.lane.b32.xlu0 %v5064_v33, %s9589_s24  ;;  %9872 = vst [vmem:[#allocation36_spill] sm:$0xff] %v5079_v40  ;;  %9873 = vst [vmem:[#allocation37_spill] sm:$0xff] %v5088_v44  ;;  %v450_v47 = vrot.slane %v5079_v40, 7  ;;  %v5100_v49 = vsel %vm436_vm0, 0.0, %v446_v36  ;;  %v452_v52 = vrot.slane %v5088_v44, 7  ;;  %v5113_v55 = vsub.f32 %v336_v50, %v328_v11  ;;  %v344_v25 = vld [vmem:[%s4990_s30 + $0xa0] sm:$0xff] }
  0x9d   : > { %v5093_v45 = vsel %vm436_vm0, %v446_v36, %v447_v38  ;;  %9874 = vst [vmem:[#allocation38_spill] sm:$0xff] %v5097_v48  ;;  %v453_v54 = vrot.slane %v5097_v48, 7  ;;  %v5115_v56 = vsub.f32 %v337_v51, %v329_v14  ;;  %v5119_v58 = vsel %vm436_vm0, 0.0, %v449_v46  ;;  %v345_v26 = vld [vmem:[%s4990_s30 + $0xa8] sm:$0xff]  ;;  %v346_v38 = vld [vmem:[%s4990_s30 + $0xb0] sm:$0xff]  ;;  %s5338_s0 = sld [smem:[#allocation8 + $0x6c]] }
  0x9e   : > { %v5110_v53 = vsel %vm436_vm0, %v449_v46, %v450_v47  ;;  %9875 = vst [vmem:[#allocation39_spill] sm:$0xff] %v5113_v55  ;;  %v5124_v60 = vsub.f32 %v338_v57, %v330_v21  ;;  %v455_v62 = vrot.slane %v5113_v55, 7  ;;  %v5133_v0 = vsub.f32 %v339_v59, %v331_v22  ;;  %s5340_s2 = sld [smem:[#allocation8 + $0x12]]  ;;  %s5342_s6 = sld [smem:[#allocation8 + $0x36]] }
  0x9f   : > { %9876 = vst [vmem:[#allocation40_spill] sm:$0xff] %v5115_v56  ;;  %v5129_v61 = vsel %vm436_vm0, %v452_v52, %v453_v54  ;;  %v456_v63 = vrot.slane %v5115_v56, 7  ;;  %v5136_v1 = vsel %vm436_vm0, 0.0, %v452_v52  ;;  %v5149_v10 = vsub.f32 %v340_v2, %v332_v34  ;;  %s5344_s12 = sld [smem:[#allocation8 + $0x5a]]  ;;  %s5350_s1 = sld [smem:[#allocation8 + $0x1b]] }
  0xa0   : > { %559 = vrot.lane.b32.xlu1 %v5074_v37, %s9589_s24  ;;  %557 = vrot.lane.b32.xlu0 %v5083_v42, %s9589_s24  ;;  %9877 = vst [vmem:[#allocation41_spill] sm:$0xff] %v5124_v60  ;;  %9878 = vst [vmem:[#allocation42_spill] sm:$0xff] %v5133_v0  ;;  %v458_v5 = vrot.slane %v5124_v60, 7  ;;  %v459_v9 = vrot.slane %v5133_v0, 7  ;;  %v5151_v11 = vsub.f32 %v341_v4, %v333_v35  ;;  %v5155_v14 = vsel %vm436_vm0, 0.0, %v455_v62  ;;  %s5354_s22 = sld [smem:[#allocation8 + $0x3f]] }
  0xa1   : > { %v5146_v6 = vsel %vm436_vm0, %v455_v62, %v456_v63  ;;  %9879 = vst [vmem:[#allocation43_spill] sm:$0xff] %v5149_v10  ;;  %v5160_v16 = vsub.f32 %v342_v12, %v334_v41  ;;  %v461_v18 = vrot.slane %v5149_v10, 7  ;;  %v5169_v22 = vsub.f32 %v343_v15, %v335_v43  ;;  %v347_v43 = vld [vmem:[%s4990_s30 + $0xb8] sm:$0xff]  ;;  %v348_v62 = vld [vmem:[%s4990_s30 + $0xc0] sm:$0xff]  ;;  %s5356_s19 = sld [smem:[#allocation8 + $0x1]]  ;;  %s5358_s13 = sld [smem:[#allocation8 + $0x25]] }
  0xa2   : > { %9880 = vst [vmem:[#allocation44_spill] sm:$0xff] %v5151_v11  ;;  %v5165_v17 = vsel %vm436_vm0, %v458_v5, %v459_v9  ;;  %v462_v21 = vrot.slane %v5151_v11, 7  ;;  %v5172_v23 = vsel %vm436_vm0, 0.0, %v458_v5  ;;  %v5185_v35 = vsub.f32 %v344_v25, %v336_v50  ;;  %s5360_s17 = sld [smem:[#allocation8 + $0x49]]  ;;  %s5362_s16 = sld [smem:[#allocation8 + $0x6d]] }
  0xa3   : > { %9881 = vst [vmem:[#allocation45_spill] sm:$0xff] %v5160_v16  ;;  %9882 = vst [vmem:[#allocation46_spill] sm:$0xff] %v5169_v22  ;;  %v464_v30 = vrot.slane %v5160_v16, 7  ;;  %v465_v34 = vrot.slane %v5169_v22, 7  ;;  %v5187_v36 = vsub.f32 %v345_v26, %v337_v51  ;;  %v5191_v41 = vsel %vm436_vm0, 0.0, %v461_v18  ;;  %s5364_s20 = sld [smem:[#allocation8 + $0xa]] }
  0xa4   : > { %563 = vrot.lane.b32.xlu1 %v5093_v45, %s9589_s24  ;;  %561 = vrot.lane.b32.xlu0 %v5100_v49, %s9589_s24  ;;  %v5182_v31 = vsel %vm436_vm0, %v461_v18, %v462_v21  ;;  %9883 = vst [vmem:[#allocation47_spill] sm:$0xff] %v5185_v35  ;;  %v5196_v46 = vsub.f32 %v346_v38, %v338_v57  ;;  %v467_v50 = vrot.slane %v5185_v35, 7  ;;  %v349_v57 = vld [vmem:[%s4990_s30 + $0xc8] sm:$0xff]  ;;  %v350_v21 = vld [vmem:[%s4990_s30 + $0xd0] sm:$0xff]  ;;  %s5368_s28 = sld [smem:[#allocation8 + $0x2e]]  ;;  %s5370_s15 = sld [smem:[#allocation8 + $0x52]] }
  0xa5   : > { %9884 = vst [vmem:[#allocation48_spill] sm:$0xff] %v5187_v36  ;;  %v5201_v47 = vsel %vm436_vm0, %v464_v30, %v465_v34  ;;  %v468_v51 = vrot.slane %v5187_v36, 7  ;;  %v5205_v52 = vsub.f32 %v347_v43, %v339_v59  ;;  %v5208_v54 = vsel %vm436_vm0, 0.0, %v464_v30  ;;  %v351_v34 = vld [vmem:[%s4990_s30 + $0xd8] sm:$0xff]  ;;  %s5374_s4 = sld [smem:[#allocation8 + $0x63]]  ;;  %s5376_s27 = sld [smem:[#allocation8 + $0x76]] }
  0xa6   : > { %9885 = vst [vmem:[#allocation49_spill] sm:$0xff] %v5196_v46  ;;  %v470_v63 = vrot.slane %v5196_v46, 7  ;;  %v5221_v9 = vsub.f32 %v348_v62, %v340_v2  ;;  %v5223_v18 = vsub.f32 %v349_v57, %v341_v4  ;;  %v5227_v30 = vsel %vm436_vm0, 0.0, %v467_v50  ;;  %v352_v57 = vld [vmem:[%s4990_s30 + $0xe0] sm:$0xff]  ;;  %s5387_s18 = sld [smem:[#allocation8 + $0x87]] }
  0xa7   : > { %9886 = vst [vmem:[#allocation50_spill] sm:$0xff] %v5205_v52  ;;  %v5218_v5 = vsel %vm436_vm0, %v467_v50, %v468_v51  ;;  %v471_v59 = vrot.slane %v5205_v52, 7  ;;  %9889 = vst [vmem:[#allocation53_spill] sm:$0xff] %v5227_v30  ;;  %v5232_v46 = vsub.f32 %v350_v21, %v342_v12  ;;  %v5241_v50 = vsub.f32 %v351_v34, %v343_v15  ;;  %v353_v12 = vld [vmem:[%s4990_s30 + $0xe8] sm:$0xff]  ;;  %v355_v52 = vld [vmem:[%s4990_s30 + $0xf8] sm:$0xff] }
  0xa8   : > { %567 = vrot.lane.b32.xlu1 %v5110_v53, %s9589_s24  ;;  %565 = vrot.lane.b32.xlu0 %v5119_v58, %s9589_s24  ;;  %9887 = vst [vmem:[#allocation51_spill] sm:$0xff] %v5221_v9  ;;  %9888 = vst [vmem:[#allocation52_spill] sm:$0xff] %v5223_v18  ;;  %v473_v2 = vrot.slane %v5221_v9, 7  ;;  %v474_v4 = vrot.slane %v5223_v18, 7  ;;  %v5244_v62 = vsel %vm436_vm0, 0.0, %v470_v63  ;;  %v5257_v15 = vsub.f32 %v352_v57, %v344_v25 }
  0xa9   : > { %9890 = vst [vmem:[#allocation54_spill] sm:$0xff] %v5232_v46  ;;  %v5237_v51 = vsel %vm436_vm0, %v470_v63, %v471_v59  ;;  %9892 = vst [vmem:[#allocation56_spill] sm:$0xff] %v5241_v50  ;;  %v476_v21 = vrot.slane %v5232_v46, 7  ;;  %v477_v9 = vrot.slane %v5241_v50, 7  ;;  %v5259_v34 = vsub.f32 %v353_v12, %v345_v26  ;;  %v354_v63 = vld [vmem:[%s4990_s30 + $0xf0] sm:$0xff] }
  0xaa   : > { %9891 = vst [vmem:[#allocation55_spill] sm:$0xff] %v5237_v51  ;;  %9893 = vst [vmem:[#allocation57_spill] sm:$0xff] %v5244_v62  ;;  %v5254_v59 = vsel %vm436_vm0, %v473_v2, %v474_v4  ;;  %v5263_v18 = vsel %vm436_vm0, 0.0, %v473_v2  ;;  %v5268_v46 = vsub.f32 %v354_v63, %v346_v38  ;;  %v479_v25 = vrot.slane %v5257_v15, 7 }
  0xab   : > { %9894 = vst [vmem:[#allocation58_spill] sm:$0xff] %v5257_v15  ;;  %9895 = vst [vmem:[#allocation59_spill] sm:$0xff] %v5259_v34  ;;  %v5273_v4 = vsel %vm436_vm0, %v476_v21, %v477_v9  ;;  %v480_v26 = vrot.slane %v5259_v34, 7  ;;  %v5277_v57 = vsub.f32 %v355_v52, %v347_v43  ;;  %v5280_v2 = vsel %vm436_vm0, 0.0, %v476_v21 }
  0xac   : > { %571 = vrot.lane.b32.xlu1 %v5129_v61, %s9589_s24  ;;  %569 = vrot.lane.b32.xlu0 %v5136_v1, %s9589_s24  ;;  %9896 = vst [vmem:[#allocation60_spill] sm:$0xff] %v5268_v46  ;;  %v482_v9 = vrot.slane %v5268_v46, 7  ;;  %v5292_v63 = vsel %vm436_vm0, 0.0, %v479_v25  ;;  %v5379_v21 = vstv %s5310_s25  ;;  %v5396_v46 = vstv %s5322_s23  ;;  %s5447_s25 = sld [smem:[#allocation8 + $0x13]]  ;;  %s5820_s23 = sld [smem:[#allocation8 + $0x80]] }
  0xad   : > { %9897 = vst [vmem:[#allocation61_spill] sm:$0xff] %v5277_v57  ;;  %v5287_v38 = vsel %vm436_vm0, %v479_v25, %v480_v26  ;;  %v483_v12 = vrot.slane %v5277_v57, 7  ;;  %9899 = vst [vmem:[#allocation63_spill] sm:$0xff] %v5292_v63  ;;  %v5382_v25 = vstv %s5314_s21  ;;  %v5385_v26 = vstv %s5316_s29  ;;  %s5778_s21 = sld [smem:[#allocation8 + $0x77]]  ;;  %s5780_s29 = sld [smem:[#allocation8 + $0x14]] }
  0xae   : > { %9898 = vst [vmem:[#allocation62_spill] sm:$0xff] %v5287_v38  ;;  %v5302_v52 = vsel %vm436_vm0, 0.0, %v482_v9  ;;  %v5399_v57 = vstv %s5324_s9  ;;  %v5404_v15 = vstv %s5328_s5  ;;  %v5407_v34 = vstv %s5330_s11  ;;  %s5840_s9 = sld [smem:[#allocation8 + $0x1d]]  ;;  %s5855_s5 = sld [smem:[#allocation8 + $0x41]] }
  0xaf   : > { %v5299_v43 = vsel %vm436_vm0, %v482_v9, %v483_v12  ;;  %9901 = vst [vmem:[#allocation65_spill] sm:$0xff] %v5302_v52  ;;  %v5390_v9 = vstv %s5318_s7  ;;  %v5393_v12 = vstv %s5320_s14  ;;  %v5410_v50 = vstv %s5334_s8  ;;  %s5798_s7 = sld [smem:[#allocation8 + $0x38]]  ;;  %s5800_s14 = sld [smem:[#allocation8 + $0x5c]] }
  0xb0   : > { %575 = vrot.lane.b32.xlu1 %v5146_v6, %s9589_s24  ;;  %573 = vrot.lane.b32.xlu0 %v5155_v14, %s9589_s24  ;;  %9900 = vst [vmem:[#allocation64_spill] sm:$0xff] %v5299_v43  ;;  %v5415_v35 = vstv %s5336_s10  ;;  %v5418_v36 = vstv %s5338_s0  ;;  %s5857_s11 = sld [smem:[#allocation8 + $0x65]]  ;;  %s5874_s8 = sld [smem:[#allocation8 + $0x89]]  ;;  %vm4088_vm4 = vcmask 130048  }
  0xb1   : > { %v5421_v16 = vstv %s5340_s2  ;;  %v5424_v22 = vstv %s5342_s6  ;;  %v5427_v10 = vstv %s5344_s12  ;;  %v5433_v60 = vstv %s5350_s1  ;;  %s5460_s1 = sld [smem:[#allocation8 + $0x37]]  ;;  %s10024_s10 = smov 1  }
  0xb2   : > { %9902 = vst [vmem:[#allocation66_spill] sm:$0xff] %v5433_v60  ;;  %v5436_v0 = vstv %s5356_s19  ;;  %v5439_v55 = vstv %s5358_s13  ;;  %v5442_v56 = vstv %s5360_s17  ;;  %v5445_v44 = vstv %s5362_s16  ;;  %s5462_s19 = sld [smem:[#allocation8 + $0x5b]]  ;;  %s5475_s16 = sld [smem:[#allocation8 + $0x7f]] }
  0xb3   : > { %v5452_v48 = vstv %s5364_s20  ;;  %v5455_v39 = vstv %s5368_s28  ;;  %v5458_v40 = vstv %s5370_s15  ;;  %v5467_v28 = vstv %s5354_s22  ;;  %s5477_s17 = sld [smem:[#allocation8 + $0x1c]]  ;;  %s5680_s20 = sld [smem:[#allocation8 + $0x2]] }
  0xb4   : > { %579 = vrot.lane.b32.xlu1 %v5165_v17, %s9589_s24  ;;  %577 = vrot.lane.b32.xlu0 %v5172_v23, %s9589_s24  ;;  %9903 = vst [vmem:[#allocation67_spill] sm:$0xff] %v5467_v28  ;;  %v5470_v32 = vstv %s5374_s4  ;;  %v5473_v19 = vstv %s5376_s27  ;;  %v5484_v3 = vmul.f32 %v5436_v0, %v5064_v33  ;;  %v5488_v8 = vmul.f32 %v5439_v55, %v5064_v33  ;;  %s5494_s4 = sld [smem:[#allocation8 + $0x40]]  ;;  %s5496_s15 = sld [smem:[#allocation8 + $0x64]] }
  0xb5   : > { %9904 = vst [vmem:[#allocation68_spill] sm:$0xff] %v5470_v32  ;;  %v5480_v20 = vstv %s5387_s18  ;;  %v5492_v28 = vmul.f32 %v5442_v56, %v5064_v33  ;;  %v5500_v32 = vmul.f32 %v5445_v44, %v5064_v33  ;;  %s5514_s18 = sld [smem:[#allocation8 + $0x88]]  ;;  %s5698_s27 = sld [smem:[#allocation8 + $0x26]] }
  0xb6   : > { %9905 = vst [vmem:[#allocation69_spill] sm:$0xff] %v5480_v20  ;;  %9906 = vst [vmem:[#allocation70_spill] sm:$0xff] %v5484_v3  ;;  %v5504_v20 = vmul.f32 %v5452_v48, %v5057_v29  ;;  %v5508_v3 = vmul.f32 %v5455_v39, %v5057_v29  ;;  %s5700_s28 = sld [smem:[#allocation8 + $0x4a]]  ;;  %s5718_s22 = sld [smem:[#allocation8 + $0x6e]] }
  0xb7   : > { %9907 = vst [vmem:[#allocation71_spill] sm:$0xff] %v5488_v8  ;;  %9908 = vst [vmem:[#allocation72_spill] sm:$0xff] %v5492_v28  ;;  %v5512_v8 = vmul.f32 %v5458_v40, %v5057_v29  ;;  %v5648_v28 = vmul.f32 %v5473_v19, %v5136_v1  ;;  %s5738_s13 = sld [smem:[#allocation8 + $0xb]]  ;;  %s5758_s12 = sld [smem:[#allocation8 + $0x2f]] }
  0xb8   : > { %583 = vrot.lane.b32.xlu1 %v5182_v31, %s9589_s24  ;;  %581 = vrot.lane.b32.xlu0 %v5191_v41, %s9589_s24  ;;  %9909 = vst [vmem:[#allocation73_spill] sm:$0xff] %v5500_v32  ;;  %9910 = vst [vmem:[#allocation74_spill] sm:$0xff] %v5504_v20  ;;  %v5524_v20 = vmul.f32 %v5436_v0, %v5050_v27  ;;  %v5538_v32 = vmul.f32 %v5445_v44, %v5050_v27  ;;  %s6803_s0 = sld [smem:[#allocation8 + $0x3]]  ;;  %s6805_s2 = sld [smem:[#allocation8 + $0x27]] }
  0xb9   : > { %9911 = vst [vmem:[#allocation75_spill] sm:$0xff] %v5508_v3  ;;  %9912 = vst [vmem:[#allocation76_spill] sm:$0xff] %v5512_v8  ;;  %v5528_v3 = vmul.f32 %v5439_v55, %v5050_v27  ;;  %v5532_v8 = vmul.f32 %v5442_v56, %v5050_v27  ;;  %s6812_s6 = sld [smem:[#allocation8 + $0x4b]] }
  0xba   : > { %9914 = vst [vmem:[#allocation78_spill] sm:$0xff] %v5524_v20  ;;  %9917 = vst [vmem:[#allocation81_spill] sm:$0xff] %v5538_v32  ;;  %v5631_v32 = vmul.f32 %v5452_v48, %v5136_v1 }
  0xbb   : > { %9915 = vst [vmem:[#allocation79_spill] sm:$0xff] %v5528_v3  ;;  %9916 = vst [vmem:[#allocation80_spill] sm:$0xff] %v5532_v8  ;;  %v5550_v3 = vmul.f32 %v5458_v40, %v5043_v24  ;;  %v5554_v8 = vmul.f32 %v5473_v19, %v5043_v24  ;;  %v5642_v20 = vstv %s5514_s18  ;;  %s6868_s18 = sld [smem:[#allocation8 + $0x5d]] }
  0xbc   : > { %587 = vrot.lane.b32.xlu1 %v5201_v47, %s9589_s24  ;;  %585 = vrot.lane.b32.xlu0 %v5208_v54, %s9589_s24  ;;  %9941 = vst [vmem:[#allocation105_spill] sm:$0xff] %v5631_v32  ;;  %9944 = vst [vmem:[#allocation108_spill] sm:$0xff] %v5642_v20 }
  0xbd   : > { %9920 = vst [vmem:[#allocation84_spill] sm:$0xff] %v5550_v3  ;;  %9921 = vst [vmem:[#allocation85_spill] sm:$0xff] %v5554_v8  ;;  %v5574_v8 = vmul.f32 %v5436_v0, %v5110_v53  ;;  %v5624_v3 = vstv %s5494_s4  ;;  %s6857_s4 = sld [smem:[#allocation8 + $0x15]] }
  0xbe   : > { %9939 = vst [vmem:[#allocation103_spill] sm:$0xff] %v5624_v3 }
  0xbf   : > { %9926 = vst [vmem:[#allocation90_spill] sm:$0xff] %v5574_v8  ;;  %v5618_v8 = vstv %s5475_s16  ;;  %s6847_s16 = sld [smem:[#allocation8 + $0x54]] }
  0xc0   : > { %591 = vrot.lane.b32.xlu1 %v5218_v5, %s9589_s24  ;;  %589 = vrot.lane.b32.xlu0 %v5227_v30, %s9589_s24  ;;  %9937 = vst [vmem:[#allocation101_spill] sm:$0xff] %v5618_v8  ;;  %v5666_v60 = vmul.f32 %v5618_v8, %v5074_v37 }
  0xc2   : > { %9948 = vst [vmem:[#allocation112_spill] sm:$0xff] %v5666_v60  ;;  %v5708_v60 = vmul.f32 %v5452_v48, %v5201_v47 }
  0xc4   : > { %595 = vrot.lane.b32.xlu1 %v5237_v51, %s9589_s24  ;;  %593 = vrot.lane.b32.xlu0 %v5244_v62, %s9589_s24 }
  0xc8   : > { %599 = vrot.lane.b32.xlu1 %v5254_v59, %s9589_s24  ;;  %597 = vrot.lane.b32.xlu0 %v5263_v18, %s9589_s24 }
  0xcc   : > { %603 = vrot.lane.b32.xlu1 %v5273_v4, %s9589_s24  ;;  %601 = vrot.lane.b32.xlu0 %v5280_v2, %s9589_s24 }
  0xd0   : > { %607 = vrot.lane.b32.xlu1 %v5287_v38, %s9589_s24  ;;  %605 = vrot.lane.b32.xlu0 %v5292_v63, %s9589_s24 }
  0xd4   : > { %611 = vrot.lane.b32.xlu1 %v5299_v43, %s9589_s24  ;;  %609 = vrot.lane.b32.xlu0 %v5302_v52, %s9589_s24  ;;  %s5348_s24 = sld [smem:[#allocation8 + $0x7e]] }
  0xd8   : > { %1256 = vrot.lane.b32.xlu1 %v5064_v33, %s4764_s26  ;;  %1254 = vrot.lane.b32.xlu0 %v5050_v27, %s4764_s26  ;;  %v5520_v33 = vmul.f32 %v5473_v19, %v5057_v29  ;;  %v5558_v27 = vmul.f32 %v5452_v48, %v5129_v61 }
  0xda   : > { %v5430_v11 = vstv %s5348_s24  ;;  %9913 = vst [vmem:[#allocation77_spill] sm:$0xff] %v5520_v33  ;;  %v5546_v33 = vmul.f32 %v5455_v39, %v5043_v24  ;;  %9922 = vst [vmem:[#allocation86_spill] sm:$0xff] %v5558_v27  ;;  %v5578_v27 = vmul.f32 %v5439_v55, %v5110_v53  ;;  %s5760_s24 = sld [smem:[#allocation8 + $0x53]] }
  0xdc   : > { %1260 = vrot.lane.b32.xlu1 %v5057_v29, %s4764_s26  ;;  %1258 = vrot.lane.b32.xlu0 %v5043_v24, %s4764_s26  ;;  %v5542_v29 = vmul.f32 %v5452_v48, %v5043_v24  ;;  %9919 = vst [vmem:[#allocation83_spill] sm:$0xff] %v5546_v33  ;;  %v5566_v33 = vmul.f32 %v5458_v40, %v5129_v61  ;;  %9927 = vst [vmem:[#allocation91_spill] sm:$0xff] %v5578_v27 }
  0xdd   : > { %v5570_v24 = vmul.f32 %v5473_v19, %v5129_v61  ;;  %v5600_v27 = vmul.f32 %v5442_v56, %v5119_v58 }
  0xde   : > { %9918 = vst [vmem:[#allocation82_spill] sm:$0xff] %v5542_v29  ;;  %v5562_v29 = vmul.f32 %v5455_v39, %v5129_v61  ;;  %9924 = vst [vmem:[#allocation88_spill] sm:$0xff] %v5566_v33  ;;  %v5596_v33 = vmul.f32 %v5439_v55, %v5119_v58 }
  0xdf   : > { %9925 = vst [vmem:[#allocation89_spill] sm:$0xff] %v5570_v24  ;;  %v5592_v24 = vmul.f32 %v5436_v0, %v5119_v58  ;;  %9932 = vst [vmem:[#allocation96_spill] sm:$0xff] %v5600_v27  ;;  %v5627_v27 = vstv %s5496_s15  ;;  %s6866_s15 = sld [smem:[#allocation8 + $0x39]] }
  0xe0   : > { %1264 = vrot.lane.b32.xlu1 %v5074_v37, %s4764_s26  ;;  %1262 = vrot.lane.b32.xlu0 %v5083_v42, %s4764_s26  ;;  %9923 = vst [vmem:[#allocation87_spill] sm:$0xff] %v5562_v29  ;;  %v5582_v29 = vmul.f32 %v5442_v56, %v5110_v53  ;;  %9931 = vst [vmem:[#allocation95_spill] sm:$0xff] %v5596_v33  ;;  %v5621_v33 = vstv %s5477_s17  ;;  %s6849_s17 = sld [smem:[#allocation8 + $0x78]] }
  0xe1   : > { %9930 = vst [vmem:[#allocation94_spill] sm:$0xff] %v5592_v24  ;;  %v5615_v24 = vstv %s5462_s19  ;;  %9938 = vst [vmem:[#allocation102_spill] sm:$0xff] %v5621_v33  ;;  %s6838_s19 = sld [smem:[#allocation8 + $0x30]] }
  0xe2   : > { %9928 = vst [vmem:[#allocation92_spill] sm:$0xff] %v5582_v29  ;;  %v5612_v29 = vstv %s5460_s1  ;;  %9936 = vst [vmem:[#allocation100_spill] sm:$0xff] %v5615_v24  ;;  %s6836_s1 = sld [smem:[#allocation8 + $0xc]] }
  0xe3   : > { %9935 = vst [vmem:[#allocation99_spill] sm:$0xff] %v5612_v29  ;;  %9940 = vst [vmem:[#allocation104_spill] sm:$0xff] %v5627_v27 }
  0xe4   : > { %1268 = vrot.lane.b32.xlu1 %v5093_v45, %s4764_s26  ;;  %1266 = vrot.lane.b32.xlu0 %v5100_v49, %s4764_s26 }
  0xe8   : > { %1272 = vrot.lane.b32.xlu1 %v5110_v53, %s4764_s26  ;;  %1270 = vrot.lane.b32.xlu0 %v5119_v58, %s4764_s26 }
  0xec   : > { %1276 = vrot.lane.b32.xlu1 %v5129_v61, %s4764_s26  ;;  %1274 = vrot.lane.b32.xlu0 %v5136_v1, %s4764_s26  ;;  %v5588_v61 = vmul.f32 %v5445_v44, %v5110_v53  ;;  %v5606_v53 = vmul.f32 %v5445_v44, %v5119_v58  ;;  %v5635_v58 = vmul.f32 %v5455_v39, %v5136_v1 }
  0xee   : > { %9929 = vst [vmem:[#allocation93_spill] sm:$0xff] %v5588_v61  ;;  %9933 = vst [vmem:[#allocation97_spill] sm:$0xff] %v5606_v53  ;;  %v5609_v61 = vstv %s5447_s25  ;;  %v5639_v53 = vmul.f32 %v5458_v40, %v5136_v1  ;;  %v5670_v1 = vmul.f32 %v5621_v33, %v5093_v45  ;;  %s6817_s25 = sld [smem:[#allocation8 + $0x6f]] }
  0xef   : > { %9934 = vst [vmem:[#allocation98_spill] sm:$0xff] %v5609_v61  ;;  %9942 = vst [vmem:[#allocation106_spill] sm:$0xff] %v5635_v58  ;;  %v5652_v32 = vmul.f32 %v5609_v61, %v5074_v37  ;;  %v5656_v58 = vmul.f32 %v5612_v29, %v5074_v37 }
  0xf0   : > { %1280 = vrot.lane.b32.xlu1 %v5146_v6, %s4764_s26  ;;  %1278 = vrot.lane.b32.xlu0 %v5155_v14, %s4764_s26  ;;  %9943 = vst [vmem:[#allocation107_spill] sm:$0xff] %v5639_v53  ;;  %v5660_v53 = vmul.f32 %v5615_v24, %v5074_v37  ;;  %9949 = vst [vmem:[#allocation113_spill] sm:$0xff] %v5670_v1  ;;  %v5688_v37 = vmul.f32 %v5439_v55, %v5182_v31 }
  0xf1   : > { %9945 = vst [vmem:[#allocation109_spill] sm:$0xff] %v5652_v32  ;;  %9946 = vst [vmem:[#allocation110_spill] sm:$0xff] %v5656_v58  ;;  %v5674_v32 = vmul.f32 %v5624_v3, %v5093_v45  ;;  %v5678_v58 = vmul.f32 %v5627_v27, %v5093_v45  ;;  %v5692_v1 = vmul.f32 %v5442_v56, %v5182_v31 }
  0xf2   : > { %9947 = vst [vmem:[#allocation111_spill] sm:$0xff] %v5660_v53  ;;  %v5684_v53 = vmul.f32 %v5436_v0, %v5182_v31  ;;  %9952 = vst [vmem:[#allocation116_spill] sm:$0xff] %v5688_v37  ;;  %v5712_v37 = vmul.f32 %v5455_v39, %v5201_v47 }
  0xf3   : > { %9950 = vst [vmem:[#allocation114_spill] sm:$0xff] %v5674_v32  ;;  %9951 = vst [vmem:[#allocation115_spill] sm:$0xff] %v5678_v58  ;;  %v5696_v32 = vmul.f32 %v5642_v20, %v5093_v45  ;;  %v5704_v58 = vmul.f32 %v5445_v44, %v5182_v31  ;;  %v5716_v45 = vmul.f32 %v5458_v40, %v5201_v47 }
  0xf4   : > { %1284 = vrot.lane.b32.xlu1 %v5165_v17, %s4764_s26  ;;  %1282 = vrot.lane.b32.xlu0 %v5172_v23, %s4764_s26  ;;  %9954 = vst [vmem:[#allocation118_spill] sm:$0xff] %v5712_v37  ;;  %v5732_v37 = vmul.f32 %v5439_v55, %v5191_v41 }
  0xf5   : > { %9953 = vst [vmem:[#allocation117_spill] sm:$0xff] %v5696_v32  ;;  %9955 = vst [vmem:[#allocation119_spill] sm:$0xff] %v5716_v45  ;;  %v5728_v32 = vmul.f32 %v5436_v0, %v5191_v41  ;;  %v5736_v45 = vmul.f32 %v5442_v56, %v5191_v41 }
  0xf6   : > { %9957 = vst [vmem:[#allocation121_spill] sm:$0xff] %v5732_v37  ;;  %v5752_v37 = vmul.f32 %v5455_v39, %v5208_v54 }
  0xf7   : > { %9956 = vst [vmem:[#allocation120_spill] sm:$0xff] %v5728_v32  ;;  %9958 = vst [vmem:[#allocation122_spill] sm:$0xff] %v5736_v45  ;;  %v5748_v32 = vmul.f32 %v5452_v48, %v5208_v54  ;;  %v5756_v45 = vmul.f32 %v5458_v40, %v5208_v54 }
  0xf8   : > { %1288 = vrot.lane.b32.xlu1 %v5182_v31, %s4764_s26  ;;  %1286 = vrot.lane.b32.xlu0 %v5191_v41, %s4764_s26  ;;  %v5724_v31 = vmul.f32 %v5473_v19, %v5201_v47  ;;  %9961 = vst [vmem:[#allocation125_spill] sm:$0xff] %v5752_v37  ;;  %v5776_v37 = vmul.f32 %v5442_v56, %v5254_v59 }
  0xf9   : > { %9960 = vst [vmem:[#allocation124_spill] sm:$0xff] %v5748_v32  ;;  %v5772_v32 = vmul.f32 %v5439_v55, %v5254_v59 }
  0xfa   : > { %9965 = vst [vmem:[#allocation129_spill] sm:$0xff] %v5776_v37 }
  0xfb   : > { %9964 = vst [vmem:[#allocation128_spill] sm:$0xff] %v5772_v32  ;;  %v5796_v32 = vmul.f32 %v5458_v40, %v5273_v4 }
  0xfc   : > { %1292 = vrot.lane.b32.xlu1 %v5201_v47, %s4764_s26  ;;  %1290 = vrot.lane.b32.xlu0 %v5208_v54, %s4764_s26  ;;  %v5744_v47 = vmul.f32 %v5445_v44, %v5191_v41  ;;  %v5764_v41 = vmul.f32 %v5473_v19, %v5208_v54  ;;  %v5784_v54 = vmul.f32 %v5445_v44, %v5254_v59 }
  0xfd   : > { %9969 = vst [vmem:[#allocation133_spill] sm:$0xff] %v5796_v32  ;;  %v5814_v32 = vmul.f32 %v5439_v55, %v5263_v18  ;;  %v5834_v55 = vmul.f32 %v5455_v39, %v5280_v2 }
  0xfe   : > { %9959 = vst [vmem:[#allocation123_spill] sm:$0xff] %v5744_v47  ;;  %9962 = vst [vmem:[#allocation126_spill] sm:$0xff] %v5764_v41  ;;  %v5768_v47 = vmul.f32 %v5436_v0, %v5254_v59  ;;  %v5788_v41 = vmul.f32 %v5452_v48, %v5273_v4 }
  0xff   : > { %9966 = vst [vmem:[#allocation130_spill] sm:$0xff] %v5784_v54  ;;  %9972 = vst [vmem:[#allocation136_spill] sm:$0xff] %v5814_v32  ;;  %v5818_v54 = vmul.f32 %v5442_v56, %v5263_v18  ;;  %v5838_v56 = vmul.f32 %v5458_v40, %v5280_v2  ;;  %v5868_v40 = vmul.f32 %v5612_v29, %v5083_v42 }
 0x100   : > { %9963 = vst [vmem:[#allocation127_spill] sm:$0xff] %v5768_v47  ;;  %9967 = vst [vmem:[#allocation131_spill] sm:$0xff] %v5788_v41  ;;  %v5792_v47 = vmul.f32 %v5455_v39, %v5273_v4  ;;  %1296 = vrot.lane.b32.xlu1 %v5218_v5, %s4764_s26  ;;  %v5806_v41 = vmul.f32 %v5473_v19, %v5273_v4  ;;  %1294 = vrot.lane.b32.xlu0 %v5227_v30, %s4764_s26  ;;  %v5860_v39 = vstv %s5718_s22  ;;  %s6925_s22 = sld [smem:[#allocation8 + $0x66]] }
 0x101   : > { %9973 = vst [vmem:[#allocation137_spill] sm:$0xff] %v5818_v54  ;;  %9976 = vst [vmem:[#allocation140_spill] sm:$0xff] %v5834_v55  ;;  %v5844_v30 = vmul.f32 %v5473_v19, %v5280_v2  ;;  %v5864_v19 = vmul.f32 %v5609_v61, %v5083_v42  ;;  %v10032_v54 = vld [vmem:[#allocation70_spill] sm:$0xff] }
 0x102   : > { %9968 = vst [vmem:[#allocation132_spill] sm:$0xff] %v5792_v47  ;;  %9970 = vst [vmem:[#allocation134_spill] sm:$0xff] %v5806_v41  ;;  %v5810_v47 = vmul.f32 %v5436_v0, %v5263_v18  ;;  %v5826_v41 = vmul.f32 %v5445_v44, %v5263_v18  ;;  %v5830_v0 = vmul.f32 %v5452_v48, %v5280_v2  ;;  %v5847_v44 = vstv %s5680_s20  ;;  %s6885_s20 = sld [smem:[#allocation8 + $0x81]] }
 0x103   : > { %9977 = vst [vmem:[#allocation141_spill] sm:$0xff] %v5838_v56  ;;  %9978 = vst [vmem:[#allocation142_spill] sm:$0xff] %v5844_v30  ;;  %v5853_v48 = vstv %s5700_s28  ;;  %s6913_s28 = sld [smem:[#allocation8 + $0x42]] }
 0x104   : > { %9971 = vst [vmem:[#allocation135_spill] sm:$0xff] %v5810_v47  ;;  %9974 = vst [vmem:[#allocation138_spill] sm:$0xff] %v5826_v41  ;;  %v5850_v41 = vstv %s5698_s27  ;;  %1300 = vrot.lane.b32.xlu1 %v5237_v51, %s4764_s26  ;;  %1298 = vrot.lane.b32.xlu0 %v5244_v62, %s4764_s26  ;;  %v5921_v62 = vmul.f32 %v5612_v29, %v5146_v6  ;;  %v10033_v47 = vld [vmem:[#allocation71_spill] sm:$0xff]  ;;  %s6887_s27 = sld [smem:[#allocation8 + $0x1e]] }
 0x105   : > { %9975 = vst [vmem:[#allocation139_spill] sm:$0xff] %v5830_v0  ;;  %9979 = vst [vmem:[#allocation143_spill] sm:$0xff] %v5847_v44  ;;  %v5910_v44 = vstv %s5778_s21  ;;  %s6937_s21 = sld [smem:[#allocation8 + $0x4c]] }
 0x106   : > { %9980 = vst [vmem:[#allocation144_spill] sm:$0xff] %v5850_v41  ;;  %9981 = vst [vmem:[#allocation145_spill] sm:$0xff] %v5853_v48  ;;  %v5872_v48 = vmul.f32 %v5615_v24, %v5083_v42  ;;  %v5904_v41 = vstv %s5758_s12  ;;  %s6929_s12 = sld [smem:[#allocation8 + $0x4]] }
 0x107   : > { %9982 = vst [vmem:[#allocation146_spill] sm:$0xff] %v5860_v39  ;;  %9983 = vst [vmem:[#allocation147_spill] sm:$0xff] %v5864_v19  ;;  %v5880_v39 = vmul.f32 %v5618_v8, %v5083_v42  ;;  %v5884_v19 = vmul.f32 %v5621_v33, %v5100_v49  ;;  %v5898_v42 = vmul.f32 %v5642_v20, %v5100_v49 }
 0x108   : > { %9984 = vst [vmem:[#allocation148_spill] sm:$0xff] %v5868_v40  ;;  %9985 = vst [vmem:[#allocation149_spill] sm:$0xff] %v5872_v48  ;;  %v5888_v40 = vmul.f32 %v5624_v3, %v5100_v49  ;;  %v5892_v48 = vmul.f32 %v5627_v27, %v5100_v49  ;;  %v5924_v49 = vstv %s5798_s7  ;;  %1304 = vrot.lane.b32.xlu1 %v5254_v59, %s4764_s26  ;;  %1302 = vrot.lane.b32.xlu0 %v5263_v18, %s4764_s26  ;;  %s6949_s7 = sld [smem:[#allocation8 + $0xd]] }
 0x109   : > { %9986 = vst [vmem:[#allocation150_spill] sm:$0xff] %v5880_v39  ;;  %9987 = vst [vmem:[#allocation151_spill] sm:$0xff] %v5884_v19  ;;  %v5901_v39 = vstv %s5738_s13  ;;  %v5907_v19 = vstv %s5760_s24  ;;  %v5962_v59 = vmul.f32 %v5642_v20, %v5165_v17  ;;  %v5976_v18 = vstv %s5855_s5  ;;  %s6927_s13 = sld [smem:[#allocation8 + $0x8a]]  ;;  %s6931_s24 = sld [smem:[#allocation8 + $0x28]] }
 0x10a   : > { %9988 = vst [vmem:[#allocation152_spill] sm:$0xff] %v5888_v40  ;;  %9989 = vst [vmem:[#allocation153_spill] sm:$0xff] %v5892_v48  ;;  %v5913_v40 = vstv %s5780_s29  ;;  %v5917_v48 = vmul.f32 %v5609_v61, %v5146_v6  ;;  %s6939_s29 = sld [smem:[#allocation8 + $0x70]]  ;;  %s7469_s5 = sld [smem:[#allocation8 + $0x16]] }
 0x10b   : > { %9990 = vst [vmem:[#allocation154_spill] sm:$0xff] %v5898_v42  ;;  %9991 = vst [vmem:[#allocation155_spill] sm:$0xff] %v5901_v39  ;;  %v5927_v39 = vstv %s5800_s14  ;;  %s6951_s14 = sld [smem:[#allocation8 + $0x31]] }
 0x10c   : > { %9992 = vst [vmem:[#allocation156_spill] sm:$0xff] %v5904_v41  ;;  %9993 = vst [vmem:[#allocation157_spill] sm:$0xff] %v5907_v19  ;;  %1308 = vrot.lane.b32.xlu1 %v5273_v4, %s4764_s26  ;;  %1306 = vrot.lane.b32.xlu0 %v5280_v2, %s4764_s26  ;;  %v6016_v4 = vmul.f32 %v5609_v61, %v5218_v5  ;;  %v6029_v2 = vmul.f32 %v5615_v24, %v5218_v5 }
 0x10d   : > { %9994 = vst [vmem:[#allocation158_spill] sm:$0xff] %v5910_v44  ;;  %9995 = vst [vmem:[#allocation159_spill] sm:$0xff] %v5913_v40  ;;  %v5931_v44 = vmul.f32 %v5615_v24, %v5146_v6  ;;  %v5935_v40 = vmul.f32 %v5618_v8, %v5146_v6  ;;  %v5958_v6 = vmul.f32 %v5627_v27, %v5165_v17 }
 0x10e   : > { %9996 = vst [vmem:[#allocation160_spill] sm:$0xff] %v5917_v48  ;;  %9997 = vst [vmem:[#allocation161_spill] sm:$0xff] %v5921_v62  ;;  %v5940_v48 = vstv %s5820_s23  ;;  %v5944_v62 = vmul.f32 %v5621_v33, %v5165_v17  ;;  %s6953_s23 = sld [smem:[#allocation8 + $0x55]] }
 0x10f   : > { %9998 = vst [vmem:[#allocation162_spill] sm:$0xff] %v5924_v49  ;;  %9999 = vst [vmem:[#allocation163_spill] sm:$0xff] %v5927_v39  ;;  %v5948_v39 = vmul.f32 %v5624_v3, %v5165_v17  ;;  %v5987_v49 = vstv %s5874_s8  ;;  %s7481_s8 = sld [smem:[#allocation8 + $0x5e]] }
 0x110   : > { %10000 = vst [vmem:[#allocation164_spill] sm:$0xff] %v5931_v44  ;;  %10001 = vst [vmem:[#allocation165_spill] sm:$0xff] %v5935_v40  ;;  %v5952_v44 = vmul.f32 %v5609_v61, %v5155_v14  ;;  %v5973_v40 = vstv %s5840_s9  ;;  %v6033_v61 = vmul.f32 %v5618_v8, %v5218_v5  ;;  %1312 = vrot.lane.b32.xlu1 %v5287_v38, %s4764_s26  ;;  %1310 = vrot.lane.b32.xlu0 %v5292_v63, %s4764_s26  ;;  %s6955_s9 = sld [smem:[#allocation8 + $0x79]] }
 0x111   : > { %10002 = vst [vmem:[#allocation166_spill] sm:$0xff] %v5940_v48  ;;  %10003 = vst [vmem:[#allocation167_spill] sm:$0xff] %v5944_v62  ;;  %v5966_v62 = vmul.f32 %v5612_v29, %v5155_v14  ;;  %v5979_v48 = vstv %s5857_s11  ;;  %s7471_s11 = sld [smem:[#allocation8 + $0x3a]] }
 0x112   : > { %10004 = vst [vmem:[#allocation168_spill] sm:$0xff] %v5948_v39  ;;  %10005 = vst [vmem:[#allocation169_spill] sm:$0xff] %v5952_v44  ;;  %v5970_v39 = vmul.f32 %v5615_v24, %v5155_v14  ;;  %v554_v44 = vpop.permute.xlu1 %553 }
 0x113   : > { %10006 = vst [vmem:[#allocation170_spill] sm:$0xff] %v5958_v6  ;;  %10007 = vst [vmem:[#allocation171_spill] sm:$0xff] %v5962_v59  ;;  %v5983_v6 = vmul.f32 %v5618_v8, %v5155_v14  ;;  %v648_v17 = vsel %vm645_vm1, 0.0, %v554_v44  ;;  %v550_v59 = vpop.permute.xlu0 %549  ;;  %v6003_v14 = vmul.f32 %v5627_v27, %v5172_v23  ;;  %v6007_v44 = vmul.f32 %v5642_v20, %v5172_v23 }
 0x114   : > { %10008 = vst [vmem:[#allocation172_spill] sm:$0xff] %v5966_v62  ;;  %10009 = vst [vmem:[#allocation173_spill] sm:$0xff] %v5970_v39  ;;  %v5991_v62 = vmul.f32 %v5621_v33, %v5172_v23  ;;  %v5995_v39 = vmul.f32 %v5624_v3, %v5172_v23  ;;  %1316 = vrot.lane.b32.xlu1 %v5299_v43, %s4764_s26  ;;  %1314 = vrot.lane.b32.xlu0 %v5302_v52, %s4764_s26 }
 0x115   : > { %10010 = vst [vmem:[#allocation174_spill] sm:$0xff] %v5973_v40  ;;  %10011 = vst [vmem:[#allocation175_spill] sm:$0xff] %v5976_v18  ;;  %v752_v18 = vmul.f32 %v5379_v21, %v648_v17 }
 0x116   : > { %10012 = vst [vmem:[#allocation176_spill] sm:$0xff] %v5979_v48  ;;  %10013 = vst [vmem:[#allocation177_spill] sm:$0xff] %v5983_v6  ;;  %v770_v48 = vmul.f32 %v5382_v25, %v648_v17  ;;  %v806_v6 = vmul.f32 %v5390_v9, %v648_v17 }
 0x117   : > { %10014 = vst [vmem:[#allocation178_spill] sm:$0xff] %v5987_v49  ;;  %10015 = vst [vmem:[#allocation179_spill] sm:$0xff] %v5991_v62  ;;  %v788_v62 = vmul.f32 %v5385_v26, %v648_v17  ;;  %v552_v49 = vpop.permute.xlu0 %551 }
 0x118   : > { %10016 = vst [vmem:[#allocation180_spill] sm:$0xff] %v5995_v39  ;;  %10017 = vst [vmem:[#allocation181_spill] sm:$0xff] %v6003_v14  ;;  %v646_v39 = vsel %vm645_vm1, 0.0, %v550_v59  ;;  %v6025_v59 = vmul.f32 %v5612_v29, %v5218_v5  ;;  %1673 = vrot.lane.b32.xlu1 %v5028_v13, %s10024_s10  ;;  %1671 = vrot.lane.b32.xlu0 %v5020_v7, %s10024_s10 }
 0x119   : > { %10018 = vst [vmem:[#allocation182_spill] sm:$0xff] %v6007_v44  ;;  %10019 = vst [vmem:[#allocation183_spill] sm:$0xff] %v6016_v4  ;;  %v680_v27 = vmul.f32 %v5407_v34, %v646_v39  ;;  %v698_v14 = vmul.f32 %v5410_v50, %v646_v39  ;;  %v716_v23 = vmul.f32 %v5415_v35, %v646_v39  ;;  %v556_v44 = vpop.permute.xlu1 %555 }
 0x11a   : > { %v734_v20 = vmul.f32 %v5418_v36, %v646_v39  ;;  %v649_v17 = vsel %vm645_vm1, 0.0, %v556_v44  ;;  %10020 = vst [vmem:[#allocation184_spill] sm:$0xff] %v6025_v59  ;;  %10021 = vst [vmem:[#allocation185_spill] sm:$0xff] %v6029_v2 }
 0x11b   : > { %10022 = vst [vmem:[#allocation186_spill] sm:$0xff] %v6033_v61  ;;  %v688_v4 = vadd.f32 %v680_v27, %v5393_v12  ;;  %v706_v39 = vadd.f32 %v698_v14, %v5396_v46  ;;  %v724_v40 = vadd.f32 %v716_v23, %v5399_v57  ;;  %v753_v29 = vmul.f32 %v5379_v21, %v649_v17  ;;  %v558_v41 = vpop.permute.xlu0 %557 }
 0x11c   : > { %v742_v44 = vadd.f32 %v734_v20, %v5404_v15  ;;  %v771_v24 = vmul.f32 %v5382_v25, %v649_v17  ;;  %v789_v2 = vmul.f32 %v5385_v26, %v649_v17  ;;  %v807_v5 = vmul.f32 %v5390_v9, %v649_v17 }
 0x11d   : > { %v647_v27 = vsel %vm645_vm1, 0.0, %v552_v49  ;;  %v560_v14 = vpop.permute.xlu1 %559  ;;  %v760_v23 = vadd.f32 %v752_v18, %v688_v4  ;;  %v778_v8 = vadd.f32 %v770_v48, %v706_v39  ;;  %v796_v20 = vadd.f32 %v788_v62, %v724_v40 }
 0x11e   : > { %v681_v61 = vmul.f32 %v5407_v34, %v647_v27  ;;  %v699_v38 = vmul.f32 %v5410_v50, %v647_v27  ;;  %v717_v59 = vmul.f32 %v5415_v35, %v647_v27  ;;  %v735_v19 = vmul.f32 %v5418_v36, %v647_v27 }
 0x11f   : > { %v651_v17 = vsel %vm645_vm1, 0.0, %v560_v14  ;;  %v814_v42 = vadd.f32 %v806_v6, %v742_v44  ;;  %v650_v63 = vsel %vm645_vm1, 0.0, %v558_v41  ;;  %v6058_v62 = vmul.f32 %v5621_v33, %v5237_v51  ;;  %v562_v43 = vpop.permute.xlu0 %561 }
 0x120   : > { %v689_v48 = vadd.f32 %v681_v61, %v5393_v12  ;;  %v707_v40 = vadd.f32 %v699_v38, %v5396_v46  ;;  %v725_v49 = vadd.f32 %v717_v59, %v5399_v57  ;;  %v743_v18 = vadd.f32 %v735_v19, %v5404_v15 }
 0x121   : > { %10023 = vst [vmem:[#allocation187_spill] sm:$0xff] %v6058_v62  ;;  %v825_v41 = vmul.f32 %v5421_v16, %v651_v17  ;;  %v843_v6 = vmul.f32 %v5424_v22, %v651_v17  ;;  %v861_v4 = vmul.f32 %v5427_v10, %v651_v17  ;;  %v879_v39 = vmul.f32 %v5430_v11, %v651_v17  ;;  %v564_v44 = vpop.permute.xlu1 %563 }
 0x122   : > { %v761_v27 = vadd.f32 %v753_v29, %v689_v48  ;;  %v779_v61 = vadd.f32 %v771_v24, %v707_v40  ;;  %v797_v14 = vadd.f32 %v789_v2, %v725_v49  ;;  %v815_v38 = vadd.f32 %v807_v5, %v743_v18 }
 0x123   : > { %v824_v59 = vmul.f32 %v5421_v16, %v650_v63  ;;  %v842_v19 = vmul.f32 %v5424_v22, %v650_v63  ;;  %v860_v52 = vmul.f32 %v5427_v10, %v650_v63  ;;  %v878_v33 = vmul.f32 %v5430_v11, %v650_v63  ;;  %v566_v18 = vpop.permute.xlu0 %565 }
 0x124   : > { %v833_v62 = vadd.f32 %v825_v41, %v761_v27  ;;  %v851_v30 = vadd.f32 %v843_v6, %v779_v61  ;;  %v869_v17 = vadd.f32 %v861_v4, %v797_v14  ;;  %v887_v56 = vadd.f32 %v879_v39, %v815_v38  ;;  %v10026_v6 = vld [vmem:[#allocation66_spill] sm:$0xff]  ;;  %v10027_v39 = vld [vmem:[#allocation67_spill] sm:$0xff] }
 0x125   : > { %v832_v29 = vadd.f32 %v824_v59, %v760_v23  ;;  %v850_v24 = vadd.f32 %v842_v19, %v778_v8  ;;  %v868_v2 = vadd.f32 %v860_v52, %v796_v20  ;;  %v886_v5 = vadd.f32 %v878_v33, %v814_v42  ;;  %v568_v48 = vpop.permute.xlu1 %567  ;;  %v10028_v23 = vld [vmem:[#allocation68_spill] sm:$0xff]  ;;  %v10029_v52 = vld [vmem:[#allocation69_spill] sm:$0xff]  ;;  %v10031_v14 = vld [vmem:[#allocation27_spill] sm:$0xff] }
 0x126   : > { %v653_v40 = vsel %vm645_vm1, 0.0, %v564_v44  ;;  %v652_v49 = vsel %vm645_vm1, 0.0, %v562_v43  ;;  %v655_v63 = vsel %vm645_vm1, 0.0, %v568_v48  ;;  %v6083_v41 = vmul.f32 %v5624_v3, %v5237_v51  ;;  %v10030_v42 = vld [vmem:[#allocation29_spill] sm:$0xff]  ;;  %1675 = vrot.lane.b32.xlu0 %v10031_v14, %s10024_s10  ;;  %v10036_v14 = vld [vmem:[#allocation32_spill] sm:$0xff] }
 0x127   : > { %v897_v4 = vmul.f32 %v10026_v6, %v653_v40  ;;  %v915_v27 = vmul.f32 %v10027_v39, %v653_v40  ;;  %v933_v8 = vmul.f32 %v10028_v23, %v653_v40  ;;  %v951_v33 = vmul.f32 %v10029_v52, %v653_v40  ;;  %1677 = vrot.lane.b32.xlu1 %v10030_v42, %s10024_s10  ;;  %v570_v0 = vpop.permute.xlu0 %569  ;;  %v10034_v42 = vld [vmem:[#allocation72_spill] sm:$0xff] }
 0x128   : > { %10025 = vst [vmem:[#allocation188_spill] sm:$0xff] %v6083_v41  ;;  %v896_v43 = vmul.f32 %v10026_v6, %v652_v49  ;;  %v914_v20 = vmul.f32 %v10027_v39, %v652_v49  ;;  %v932_v44 = vmul.f32 %v10028_v23, %v652_v49  ;;  %v950_v61 = vmul.f32 %v10029_v52, %v652_v49  ;;  %v10035_v49 = vld [vmem:[#allocation73_spill] sm:$0xff] }
 0x129   : > { %v905_v38 = vadd.f32 %v897_v4, %v833_v62  ;;  %v923_v59 = vadd.f32 %v915_v27, %v851_v30  ;;  %v941_v19 = vadd.f32 %v933_v8, %v869_v17  ;;  %v959_v48 = vadd.f32 %v951_v33, %v887_v56  ;;  %v572_v3 = vpop.permute.xlu1 %571  ;;  %v10037_v30 = vld [vmem:[#allocation78_spill] sm:$0xff]  ;;  %v10038_v56 = vld [vmem:[#allocation79_spill] sm:$0xff]  ;;  %v10045_v33 = vld [vmem:[#allocation76_spill] sm:$0xff] }
 0x12a   : > { %v904_v40 = vadd.f32 %v896_v43, %v832_v29  ;;  %v922_v51 = vadd.f32 %v914_v20, %v850_v24  ;;  %v940_v41 = vadd.f32 %v932_v44, %v868_v2  ;;  %v958_v55 = vadd.f32 %v950_v61, %v886_v5  ;;  %v10039_v29 = vld [vmem:[#allocation80_spill] sm:$0xff]  ;;  %v10040_v2 = vld [vmem:[#allocation81_spill] sm:$0xff]  ;;  %v10041_v4 = vld [vmem:[#allocation31_spill] sm:$0xff] }
 0x12b   : > { %v977_v32 = vadd.f32 %v10032_v54, %v905_v38  ;;  %v995_v37 = vadd.f32 %v10033_v47, %v923_v59  ;;  %v1013_v7 = vadd.f32 %v10034_v42, %v941_v19  ;;  %v1031_v13 = vadd.f32 %v10035_v49, %v959_v48  ;;  %1681 = vrot.lane.b32.xlu1 %v10036_v14, %s10024_s10  ;;  %v10042_v54 = vld [vmem:[#allocation74_spill] sm:$0xff]  ;;  %v10043_v27 = vld [vmem:[#allocation75_spill] sm:$0xff]  ;;  %v10047_v43 = vld [vmem:[#allocation77_spill] sm:$0xff] }
 0x12c   : > { %v976_v62 = vadd.f32 %v10037_v30, %v904_v40  ;;  %v994_v17 = vadd.f32 %v10038_v56, %v922_v51  ;;  %v1012_v24 = vadd.f32 %v10039_v29, %v940_v41  ;;  %v1030_v5 = vadd.f32 %v10040_v2, %v958_v55  ;;  %1679 = vrot.lane.b32.xlu0 %v10041_v4, %s10024_s10  ;;  %v10049_v44 = vld [vmem:[#allocation82_spill] sm:$0xff]  ;;  %v10051_v55 = vld [vmem:[#allocation83_spill] sm:$0xff]  ;;  %v10053_v38 = vld [vmem:[#allocation84_spill] sm:$0xff] }
 0x12d   : > { %v6110_v47 = vadd.f32 %v10042_v54, %v977_v32  ;;  %v6113_v8 = vadd.f32 %v10043_v27, %v995_v37  ;;  %v6116_v42 = vadd.f32 %v10045_v33, %v1013_v7  ;;  %v6119_v20 = vadd.f32 %v10047_v43, %v1031_v13  ;;  %v576_v51 = vpop.permute.xlu1 %575  ;;  %v10055_v32 = vld [vmem:[#allocation85_spill] sm:$0xff]  ;;  %v574_v37 = vpop.permute.xlu0 %573  ;;  %v10057_v49 = vld [vmem:[#allocation34_spill] sm:$0xff] }
 0x12e   : > { %v6122_v41 = vadd.f32 %v10049_v44, %v976_v62  ;;  %v6125_v61 = vadd.f32 %v10051_v55, %v994_v17  ;;  %v6128_v59 = vadd.f32 %v10053_v38, %v1012_v24  ;;  %v6131_v19 = vadd.f32 %v10055_v32, %v1030_v5  ;;  %v10058_v29 = vld [vmem:[#allocation33_spill] sm:$0xff]  ;;  %v10059_v38 = vld [vmem:[#allocation36_spill] sm:$0xff]  ;;  %v10065_v4 = vld [vmem:[#allocation42_spill] sm:$0xff] }
 0x12f   : > { %10044 = vst [vmem:[#allocation66_spill] sm:$0xff] %v6113_v8  ;;  %10046 = vst [vmem:[#allocation67_spill] sm:$0xff] %v6116_v42  ;;  %v683_v7 = vmul.f32 %v5407_v34, %v655_v63  ;;  %v701_v48 = vmul.f32 %v5410_v50, %v655_v63  ;;  %v719_v13 = vmul.f32 %v5415_v35, %v655_v63  ;;  %1685 = vrot.lane.b32.xlu1 %v10057_v49, %s10024_s10 }
 0x130   : > { %10048 = vst [vmem:[#allocation68_spill] sm:$0xff] %v6119_v20  ;;  %10050 = vst [vmem:[#allocation69_spill] sm:$0xff] %v6122_v41  ;;  %v737_v40 = vmul.f32 %v5418_v36, %v655_v63  ;;  %v654_v30 = vsel %vm645_vm1, 0.0, %v566_v18  ;;  %v657_v62 = vsel %vm645_vm1, 0.0, %v572_v3  ;;  %v656_v56 = vsel %vm645_vm1, 0.0, %v570_v0  ;;  %1683 = vrot.lane.b32.xlu0 %v10058_v29, %s10024_s10 }
 0x131   : > { %10052 = vst [vmem:[#allocation70_spill] sm:$0xff] %v6125_v61  ;;  %10054 = vst [vmem:[#allocation71_spill] sm:$0xff] %v6128_v59  ;;  %v659_v17 = vsel %vm645_vm1, 0.0, %v576_v51  ;;  %v691_v24 = vadd.f32 %v683_v7, %v5393_v12  ;;  %v709_v2 = vadd.f32 %v701_v48, %v5396_v46  ;;  %v727_v63 = vadd.f32 %v719_v13, %v5399_v57  ;;  %v580_v54 = vpop.permute.xlu1 %579  ;;  %v578_v55 = vpop.permute.xlu0 %577 }
 0x132   : > { %10056 = vst [vmem:[#allocation72_spill] sm:$0xff] %v6131_v19  ;;  %v745_v5 = vadd.f32 %v737_v40, %v5404_v15  ;;  %v682_v18 = vmul.f32 %v5407_v34, %v654_v30  ;;  %v700_v3 = vmul.f32 %v5410_v50, %v654_v30  ;;  %v718_v0 = vmul.f32 %v5415_v35, %v654_v30  ;;  %v10060_v40 = vld [vmem:[#allocation35_spill] sm:$0xff] }
 0x133   : > { %v736_v27 = vmul.f32 %v5418_v36, %v654_v30  ;;  %v755_v33 = vmul.f32 %v5379_v21, %v657_v62  ;;  %v773_v43 = vmul.f32 %v5382_v25, %v657_v62  ;;  %v791_v51 = vmul.f32 %v5385_v26, %v657_v62  ;;  %1689 = vrot.lane.b32.xlu1 %v10059_v38, %s10024_s10 }
 0x134   : > { %v809_v44 = vmul.f32 %v5390_v9, %v657_v62  ;;  %v690_v32 = vadd.f32 %v682_v18, %v5393_v12  ;;  %v708_v7 = vadd.f32 %v700_v3, %v5396_v46  ;;  %v726_v48 = vadd.f32 %v718_v0, %v5399_v57  ;;  %1687 = vrot.lane.b32.xlu0 %v10060_v40, %s10024_s10 }
 0x135   : > { %v744_v13 = vadd.f32 %v736_v27, %v5404_v15  ;;  %v763_v30 = vadd.f32 %v755_v33, %v691_v24  ;;  %v781_v19 = vadd.f32 %v773_v43, %v709_v2  ;;  %v799_v59 = vadd.f32 %v791_v51, %v727_v63  ;;  %v584_v62 = vpop.permute.xlu1 %583  ;;  %v10061_v2 = vld [vmem:[#allocation38_spill] sm:$0xff]  ;;  %v10062_v51 = vld [vmem:[#allocation37_spill] sm:$0xff]  ;;  %v6177_v42 = vpop.permute.xlu0 %581 }
 0x136   : > { %v817_v61 = vadd.f32 %v809_v44, %v745_v5  ;;  %v754_v41 = vmul.f32 %v5379_v21, %v656_v56  ;;  %v772_v38 = vmul.f32 %v5382_v25, %v656_v56  ;;  %v790_v18 = vmul.f32 %v5385_v26, %v656_v56 }
 0x137   : > { %v808_v3 = vmul.f32 %v5390_v9, %v656_v56  ;;  %v827_v0 = vmul.f32 %v5421_v16, %v659_v17  ;;  %v845_v27 = vmul.f32 %v5424_v22, %v659_v17  ;;  %v863_v29 = vmul.f32 %v5427_v10, %v659_v17  ;;  %1693 = vrot.lane.b32.xlu1 %v10061_v2, %s10024_s10 }
 0x138   : > { %v881_v24 = vmul.f32 %v5430_v11, %v659_v17  ;;  %v762_v63 = vadd.f32 %v754_v41, %v690_v32  ;;  %v780_v5 = vadd.f32 %v772_v38, %v708_v7  ;;  %v798_v33 = vadd.f32 %v790_v18, %v726_v48  ;;  %1691 = vrot.lane.b32.xlu0 %v10062_v51, %s10024_s10  ;;  %v10064_v48 = vld [vmem:[#allocation39_spill] sm:$0xff] }
 0x139   : > { %v816_v43 = vadd.f32 %v808_v3, %v744_v13  ;;  %v835_v44 = vadd.f32 %v827_v0, %v763_v30  ;;  %v853_v56 = vadd.f32 %v845_v27, %v781_v19  ;;  %v871_v40 = vadd.f32 %v863_v29, %v799_v59  ;;  %v588_v59 = vpop.permute.xlu1 %587 }
 0x13a   : > { %v889_v20 = vadd.f32 %v881_v24, %v817_v61  ;;  %v658_v8 = vsel %vm645_vm1, 0.0, %v574_v37  ;;  %v661_v17 = vsel %vm645_vm1, 0.0, %v580_v54  ;;  %v660_v49 = vsel %vm645_vm1, 0.0, %v578_v55  ;;  %v10063_v61 = vld [vmem:[#allocation40_spill] sm:$0xff] }
 0x13b   : > { %v663_v41 = vsel %vm645_vm1, 0.0, %v584_v62  ;;  %v826_v38 = vmul.f32 %v5421_v16, %v658_v8  ;;  %v844_v32 = vmul.f32 %v5424_v22, %v658_v8  ;;  %v862_v7 = vmul.f32 %v5427_v10, %v658_v8  ;;  %1697 = vrot.lane.b32.xlu1 %v10063_v61, %s10024_s10 }
 0x13c   : > { %v880_v19 = vmul.f32 %v5430_v11, %v658_v8  ;;  %v899_v37 = vmul.f32 %v10026_v6, %v661_v17  ;;  %v917_v29 = vmul.f32 %v10027_v39, %v661_v17  ;;  %v935_v54 = vmul.f32 %v10028_v23, %v661_v17  ;;  %1695 = vrot.lane.b32.xlu0 %v10064_v48, %s10024_s10 }
 0x13d   : > { %v953_v55 = vmul.f32 %v10029_v52, %v661_v17  ;;  %v834_v13 = vadd.f32 %v826_v38, %v762_v63  ;;  %v852_v30 = vadd.f32 %v844_v32, %v780_v5  ;;  %v870_v62 = vadd.f32 %v862_v7, %v798_v33  ;;  %v586_v17 = vpop.permute.xlu0 %585  ;;  %v10066_v63 = vld [vmem:[#allocation90_spill] sm:$0xff]  ;;  %v10067_v33 = vld [vmem:[#allocation91_spill] sm:$0xff]  ;;  %v10070_v38 = vld [vmem:[#allocation41_spill] sm:$0xff] }
 0x13e   : > { %v888_v18 = vadd.f32 %v880_v19, %v816_v43  ;;  %v907_v8 = vadd.f32 %v899_v37, %v835_v44  ;;  %v925_v3 = vadd.f32 %v917_v29, %v853_v56  ;;  %v943_v0 = vadd.f32 %v935_v54, %v871_v40  ;;  %v10068_v44 = vld [vmem:[#allocation92_spill] sm:$0xff]  ;;  %v10069_v40 = vld [vmem:[#allocation93_spill] sm:$0xff]  ;;  %v10071_v29 = vld [vmem:[#allocation86_spill] sm:$0xff] }
 0x13f   : > { %v961_v27 = vadd.f32 %v953_v55, %v889_v20  ;;  %v898_v24 = vmul.f32 %v10026_v6, %v660_v49  ;;  %v916_v61 = vmul.f32 %v10027_v39, %v660_v49  ;;  %v934_v51 = vmul.f32 %v10028_v23, %v660_v49  ;;  %1701 = vrot.lane.b32.xlu1 %v10065_v4, %s10024_s10  ;;  %v10072_v55 = vld [vmem:[#allocation87_spill] sm:$0xff] }
 0x140   : > { %v952_v2 = vmul.f32 %v10029_v52, %v660_v49  ;;  %v979_v5 = vadd.f32 %v10066_v63, %v907_v8  ;;  %v997_v43 = vadd.f32 %v10067_v33, %v925_v3  ;;  %v1015_v56 = vadd.f32 %v10068_v44, %v943_v0  ;;  %1699 = vrot.lane.b32.xlu0 %v10070_v38, %s10024_s10  ;;  %v592_v49 = vpop.permute.xlu1 %591  ;;  %v10074_v8 = vld [vmem:[#allocation88_spill] sm:$0xff]  ;;  %v10076_v0 = vld [vmem:[#allocation89_spill] sm:$0xff]  ;;  %v10079_v44 = vld [vmem:[#allocation95_spill] sm:$0xff] }
 0x141   : > { %v1033_v20 = vadd.f32 %v10069_v40, %v961_v27  ;;  %v906_v32 = vadd.f32 %v898_v24, %v834_v13  ;;  %v924_v7 = vadd.f32 %v916_v61, %v852_v30  ;;  %v942_v19 = vadd.f32 %v934_v51, %v870_v62  ;;  %v10078_v27 = vld [vmem:[#allocation94_spill] sm:$0xff]  ;;  %v10080_v61 = vld [vmem:[#allocation96_spill] sm:$0xff]  ;;  %v10084_v40 = vld [vmem:[#allocation105_spill] sm:$0xff] }
 0x142   : > { %v960_v37 = vadd.f32 %v952_v2, %v888_v18  ;;  %v6208_v54 = vadd.f32 %v10071_v29, %v979_v5  ;;  %v6211_v4 = vadd.f32 %v10072_v55, %v997_v43  ;;  %v6214_v3 = vadd.f32 %v10074_v8, %v1015_v56  ;;  %v10081_v2 = vld [vmem:[#allocation97_spill] sm:$0xff]  ;;  %v10082_v62 = vld [vmem:[#allocation44_spill] sm:$0xff]  ;;  %v10083_v56 = vld [vmem:[#allocation43_spill] sm:$0xff]  ;;  %v590_v55 = vpop.permute.xlu0 %589 }
 0x143   : > { %v6217_v63 = vadd.f32 %v10076_v0, %v1033_v20  ;;  %v978_v33 = vadd.f32 %v10078_v27, %v906_v32  ;;  %v996_v13 = vadd.f32 %v10079_v44, %v924_v7  ;;  %v1014_v51 = vadd.f32 %v10080_v61, %v942_v19  ;;  %1705 = vrot.lane.b32.xlu1 %v10082_v62, %s10024_s10  ;;  %v10086_v32 = vld [vmem:[#allocation106_spill] sm:$0xff]  ;;  %v10088_v19 = vld [vmem:[#allocation107_spill] sm:$0xff] }
 0x144   : > { %10073 = vst [vmem:[#allocation73_spill] sm:$0xff] %v6211_v4  ;;  %10075 = vst [vmem:[#allocation78_spill] sm:$0xff] %v6214_v3  ;;  %v1032_v30 = vadd.f32 %v10081_v2, %v960_v37  ;;  %v685_v18 = vmul.f32 %v5407_v34, %v663_v41  ;;  %v703_v24 = vmul.f32 %v5410_v50, %v663_v41  ;;  %1703 = vrot.lane.b32.xlu0 %v10083_v56, %s10024_s10  ;;  %v10095_v4 = vld [vmem:[#allocation50_spill] sm:$0xff] }
 0x145   : > { %10077 = vst [vmem:[#allocation79_spill] sm:$0xff] %v6217_v63  ;;  %v721_v5 = vmul.f32 %v5415_v35, %v663_v41  ;;  %v739_v43 = vmul.f32 %v5418_v36, %v663_v41  ;;  %v6232_v20 = vadd.f32 %v10084_v40, %v978_v33  ;;  %v6235_v7 = vadd.f32 %v10086_v32, %v996_v13 }
 0x146   : > { %v6238_v37 = vadd.f32 %v10088_v19, %v1014_v51  ;;  %v6241_v29 = vadd.f32 %v5648_v28, %v1032_v30  ;;  %v693_v8 = vadd.f32 %v685_v18, %v5393_v12  ;;  %v711_v41 = vadd.f32 %v703_v24, %v5396_v46  ;;  %v596_v28 = vpop.permute.xlu1 %595  ;;  %v10091_v51 = vld [vmem:[#allocation46_spill] sm:$0xff] }
 0x147   : > { %10085 = vst [vmem:[#allocation80_spill] sm:$0xff] %v6232_v20  ;;  %10087 = vst [vmem:[#allocation81_spill] sm:$0xff] %v6235_v7  ;;  %v729_v0 = vadd.f32 %v721_v5, %v5399_v57  ;;  %v747_v27 = vadd.f32 %v739_v43, %v5404_v15  ;;  %v662_v33 = vsel %vm645_vm1, 0.0, %v6177_v42  ;;  %v665_v44 = vsel %vm645_vm1, 0.0, %v588_v59  ;;  %1709 = vrot.lane.b32.xlu1 %v10091_v51, %s10024_s10  ;;  %v10092_v42 = vld [vmem:[#allocation45_spill] sm:$0xff]  ;;  %v594_v20 = vpop.permute.xlu0 %593 }
 0x148   : > { %10089 = vst [vmem:[#allocation74_spill] sm:$0xff] %v6238_v37  ;;  %10090 = vst [vmem:[#allocation75_spill] sm:$0xff] %v6241_v29  ;;  %v664_v13 = vsel %vm645_vm1, 0.0, %v586_v17  ;;  %v667_v61 = vsel %vm645_vm1, 0.0, %v592_v49  ;;  %v684_v2 = vmul.f32 %v5407_v34, %v662_v33  ;;  %v702_v30 = vmul.f32 %v5410_v50, %v662_v33  ;;  %1707 = vrot.lane.b32.xlu0 %v10092_v42, %s10024_s10  ;;  %v10093_v42 = vld [vmem:[#allocation48_spill] sm:$0xff] }
 0x149   : > { %v720_v18 = vmul.f32 %v5415_v35, %v662_v33  ;;  %v738_v24 = vmul.f32 %v5418_v36, %v662_v33  ;;  %v757_v59 = vmul.f32 %v5379_v21, %v665_v44  ;;  %v775_v17 = vmul.f32 %v5382_v25, %v665_v44 }
 0x14a   : > { %v793_v49 = vmul.f32 %v5385_v26, %v665_v44  ;;  %v811_v5 = vmul.f32 %v5390_v9, %v665_v44  ;;  %v692_v43 = vadd.f32 %v684_v2, %v5393_v12  ;;  %v710_v40 = vadd.f32 %v702_v30, %v5396_v46 }
 0x14b   : > { %v728_v32 = vadd.f32 %v720_v18, %v5399_v57  ;;  %v746_v19 = vadd.f32 %v738_v24, %v5404_v15  ;;  %v765_v33 = vadd.f32 %v757_v59, %v693_v8  ;;  %v783_v29 = vadd.f32 %v775_v17, %v711_v41  ;;  %1713 = vrot.lane.b32.xlu1 %v10093_v42, %s10024_s10  ;;  %v10094_v18 = vld [vmem:[#allocation47_spill] sm:$0xff]  ;;  %v600_v24 = vpop.permute.xlu1 %599 }
 0x14c   : > { %v801_v37 = vadd.f32 %v793_v49, %v729_v0  ;;  %v819_v7 = vadd.f32 %v811_v5, %v747_v27  ;;  %v756_v51 = vmul.f32 %v5379_v21, %v664_v13  ;;  %v774_v44 = vmul.f32 %v5382_v25, %v664_v13  ;;  %1711 = vrot.lane.b32.xlu0 %v10094_v18, %s10024_s10 }
 0x14d   : > { %v792_v2 = vmul.f32 %v5385_v26, %v664_v13  ;;  %v810_v30 = vmul.f32 %v5390_v9, %v664_v13  ;;  %v829_v8 = vmul.f32 %v5421_v16, %v667_v61  ;;  %v847_v41 = vmul.f32 %v5424_v22, %v667_v61 }
 0x14e   : > { %v865_v0 = vmul.f32 %v5427_v10, %v667_v61  ;;  %v883_v27 = vmul.f32 %v5430_v11, %v667_v61  ;;  %v764_v59 = vadd.f32 %v756_v51, %v692_v43  ;;  %v782_v17 = vadd.f32 %v774_v44, %v710_v40  ;;  %v10096_v51 = vld [vmem:[#allocation49_spill] sm:$0xff]  ;;  %v598_v40 = vpop.permute.xlu0 %597 }
 0x14f   : > { %v800_v49 = vadd.f32 %v792_v2, %v728_v32  ;;  %v818_v5 = vadd.f32 %v810_v30, %v746_v19  ;;  %v837_v42 = vadd.f32 %v829_v8, %v765_v33  ;;  %v855_v63 = vadd.f32 %v847_v41, %v783_v29  ;;  %1717 = vrot.lane.b32.xlu1 %v10095_v4, %s10024_s10  ;;  %v10097_v30 = vld [vmem:[#allocation52_spill] sm:$0xff] }
 0x150   : > { %v873_v3 = vadd.f32 %v865_v0, %v801_v37  ;;  %v891_v13 = vadd.f32 %v883_v27, %v819_v7  ;;  %v666_v18 = vsel %vm645_vm1, 0.0, %v590_v55  ;;  %v669_v56 = vsel %vm645_vm1, 0.0, %v596_v28  ;;  %1715 = vrot.lane.b32.xlu0 %v10096_v51, %s10024_s10  ;;  %v604_v27 = vpop.permute.xlu1 %603 }
 0x151   : > { %v668_v62 = vsel %vm645_vm1, 0.0, %v594_v20  ;;  %v671_v61 = vsel %vm645_vm1, 0.0, %v600_v24  ;;  %v828_v43 = vmul.f32 %v5421_v16, %v666_v18  ;;  %v846_v29 = vmul.f32 %v5424_v22, %v666_v18  ;;  %v10098_v24 = vld [vmem:[#allocation51_spill] sm:$0xff] }
 0x152   : > { %v864_v7 = vmul.f32 %v5427_v10, %v666_v18  ;;  %v882_v37 = vmul.f32 %v5430_v11, %v666_v18  ;;  %v901_v55 = vmul.f32 %v10026_v6, %v669_v56  ;;  %v919_v28 = vmul.f32 %v10027_v39, %v669_v56 }
 0x153   : > { %v937_v20 = vmul.f32 %v10028_v23, %v669_v56  ;;  %v955_v32 = vmul.f32 %v10029_v52, %v669_v56  ;;  %v836_v19 = vadd.f32 %v828_v43, %v764_v59  ;;  %v854_v33 = vadd.f32 %v846_v29, %v782_v17  ;;  %1721 = vrot.lane.b32.xlu1 %v10097_v30, %s10024_s10 }
 0x154   : > { %v872_v44 = vadd.f32 %v864_v7, %v800_v49  ;;  %v890_v2 = vadd.f32 %v882_v37, %v818_v5  ;;  %v909_v8 = vadd.f32 %v901_v55, %v837_v42  ;;  %v927_v41 = vadd.f32 %v919_v28, %v855_v63  ;;  %1719 = vrot.lane.b32.xlu0 %v10098_v24, %s10024_s10  ;;  %v10099_v49 = vld [vmem:[#allocation116_spill] sm:$0xff]  ;;  %v602_v7 = vpop.permute.xlu0 %601 }
 0x155   : > { %v945_v0 = vadd.f32 %v937_v20, %v873_v3  ;;  %v963_v18 = vadd.f32 %v955_v32, %v891_v13  ;;  %v900_v51 = vmul.f32 %v10026_v6, %v668_v62  ;;  %v918_v4 = vmul.f32 %v10027_v39, %v668_v62  ;;  %v10100_v37 = vld [vmem:[#allocation56_spill] sm:$0xff]  ;;  %v10105_v32 = vld [vmem:[#allocation121_spill] sm:$0xff] }
 0x156   : > { %v936_v56 = vmul.f32 %v10028_v23, %v668_v62  ;;  %v954_v59 = vmul.f32 %v10029_v52, %v668_v62  ;;  %v981_v17 = vadd.f32 %v5684_v53, %v909_v8  ;;  %v999_v5 = vadd.f32 %v10099_v49, %v927_v41  ;;  %v10101_v62 = vld [vmem:[#allocation118_spill] sm:$0xff]  ;;  %v10102_v53 = vld [vmem:[#allocation119_spill] sm:$0xff] }
 0x157   : > { %v1017_v63 = vadd.f32 %v5692_v1, %v945_v0  ;;  %v1035_v3 = vadd.f32 %v5704_v58, %v963_v18  ;;  %v908_v42 = vadd.f32 %v900_v51, %v836_v19  ;;  %v926_v13 = vadd.f32 %v918_v4, %v854_v33  ;;  %1725 = vrot.lane.b32.xlu1 %v10100_v37, %s10024_s10  ;;  %v10103_v58 = vld [vmem:[#allocation54_spill] sm:$0xff]  ;;  %v10104_v4 = vld [vmem:[#allocation120_spill] sm:$0xff]  ;;  %v608_v18 = vpop.permute.xlu1 %607 }
 0x158   : > { %v944_v43 = vadd.f32 %v936_v56, %v872_v44  ;;  %v962_v29 = vadd.f32 %v954_v59, %v890_v2  ;;  %v6311_v55 = vadd.f32 %v5708_v60, %v981_v17  ;;  %v6314_v28 = vadd.f32 %v10101_v62, %v999_v5  ;;  %1723 = vrot.lane.b32.xlu0 %v10103_v58, %s10024_s10  ;;  %v10106_v33 = vld [vmem:[#allocation122_spill] sm:$0xff]  ;;  %v10107_v60 = vld [vmem:[#allocation123_spill] sm:$0xff]  ;;  %v10108_v56 = vld [vmem:[#allocation124_spill] sm:$0xff] }
 0x159   : > { %v6317_v20 = vadd.f32 %v10102_v53, %v1017_v63  ;;  %v6320_v1 = vadd.f32 %v5724_v31, %v1035_v3  ;;  %v980_v51 = vadd.f32 %v10104_v4, %v908_v42  ;;  %v998_v19 = vadd.f32 %v10105_v32, %v926_v13  ;;  %v10109_v17 = vld [vmem:[#allocation125_spill] sm:$0xff]  ;;  %v10110_v63 = vld [vmem:[#allocation126_spill] sm:$0xff]  ;;  %v10112_v42 = vld [vmem:[#allocation59_spill] sm:$0xff]  ;;  %v606_v32 = vpop.permute.xlu0 %605 }
 0x15a   : > { %v1016_v44 = vadd.f32 %v10106_v33, %v944_v43  ;;  %v1034_v2 = vadd.f32 %v10107_v60, %v962_v29  ;;  %v687_v8 = vmul.f32 %v5407_v34, %v671_v61  ;;  %v705_v41 = vmul.f32 %v5410_v50, %v671_v61  ;;  %v10113_v62 = vld [vmem:[#allocation58_spill] sm:$0xff] }
 0x15b   : > { %v723_v0 = vmul.f32 %v5415_v35, %v671_v61  ;;  %v741_v31 = vmul.f32 %v5418_v36, %v671_v61  ;;  %v6333_v59 = vadd.f32 %v10108_v56, %v980_v51  ;;  %v6336_v49 = vadd.f32 %v10109_v17, %v998_v19  ;;  %1729 = vrot.lane.b32.xlu1 %v10112_v42, %s10024_s10 }
 0x15c   : > { %v6339_v5 = vadd.f32 %v5756_v45, %v1016_v44  ;;  %v6342_v3 = vadd.f32 %v10110_v63, %v1034_v2  ;;  %v695_v13 = vadd.f32 %v687_v8, %v5393_v12  ;;  %v713_v61 = vadd.f32 %v705_v41, %v5396_v46  ;;  %1727 = vrot.lane.b32.xlu0 %v10113_v62, %s10024_s10 }
 0x15d   : > { %v731_v43 = vadd.f32 %v723_v0, %v5399_v57  ;;  %v749_v29 = vadd.f32 %v741_v31, %v5404_v15  ;;  %v670_v45 = vsel %vm645_vm1, 0.0, %v598_v40  ;;  %v673_v53 = vsel %vm645_vm1, 0.0, %v604_v27  ;;  %v10115_v0 = vld [vmem:[#allocation60_spill] sm:$0xff] }
 0x15e   : > { %10111 = vst [vmem:[#allocation76_spill] sm:$0xff] %v6342_v3  ;;  %v672_v4 = vsel %vm645_vm1, 0.0, %v602_v7  ;;  %v675_v51 = vsel %vm645_vm1, 0.0, %v608_v18  ;;  %v686_v19 = vmul.f32 %v5407_v34, %v670_v45  ;;  %v704_v33 = vmul.f32 %v5410_v50, %v670_v45  ;;  %v10114_v7 = vld [vmem:[#allocation61_spill] sm:$0xff] }
 0x15f   : > { %v722_v44 = vmul.f32 %v5415_v35, %v670_v45  ;;  %v740_v60 = vmul.f32 %v5418_v36, %v670_v45  ;;  %v759_v2 = vmul.f32 %v5379_v21, %v673_v53  ;;  %v777_v8 = vmul.f32 %v5382_v25, %v673_v53  ;;  %1733 = vrot.lane.b32.xlu1 %v10114_v7, %s10024_s10  ;;  %v612_v36 = vpop.permute.xlu1 %611 }
 0x160   : > { %v795_v40 = vmul.f32 %v5385_v26, %v673_v53  ;;  %v813_v27 = vmul.f32 %v5390_v9, %v673_v53  ;;  %v694_v41 = vadd.f32 %v686_v19, %v5393_v12  ;;  %v712_v34 = vadd.f32 %v704_v33, %v5396_v46  ;;  %1731 = vrot.lane.b32.xlu0 %v10115_v0, %s10024_s10 }
 0x161   : > { %v730_v50 = vadd.f32 %v722_v44, %v5399_v57  ;;  %v748_v35 = vadd.f32 %v740_v60, %v5404_v15  ;;  %v767_v31 = vadd.f32 %v759_v2, %v695_v13  ;;  %v785_v18 = vadd.f32 %v777_v8, %v713_v61  ;;  %v610_v13 = vpop.permute.xlu0 %609  ;;  %v10116_v61 = vld [vmem:[#allocation30_spill] sm:$0xff] }
 0x162   : > { %v803_v56 = vadd.f32 %v795_v40, %v731_v43  ;;  %v821_v17 = vadd.f32 %v813_v27, %v749_v29  ;;  %v758_v63 = vmul.f32 %v5379_v21, %v672_v4  ;;  %v776_v45 = vmul.f32 %v5382_v25, %v672_v4  ;;  %v10118_v40 = vld [vmem:[#allocation109_spill] sm:$0xff] }
 0x163   : > { %v794_v12 = vmul.f32 %v5385_v26, %v672_v4  ;;  %v812_v46 = vmul.f32 %v5390_v9, %v672_v4  ;;  %v831_v57 = vmul.f32 %v5421_v16, %v675_v51  ;;  %v849_v15 = vmul.f32 %v5424_v22, %v675_v51  ;;  %2377 = vrot.lane.b32.xlu1 %v10116_v61, %s4764_s26  ;;  %v10117_v26 = vld [vmem:[#allocation28_spill] sm:$0xff]  ;;  %v1257_v8 = vpop.permute.xlu1 %1256  ;;  %v10174_v61 = vld [vmem:[#allocation153_spill] sm:$0xff] }
 0x164   : > { %v867_v53 = vmul.f32 %v5427_v10, %v675_v51  ;;  %v885_v19 = vmul.f32 %v5430_v11, %v675_v51  ;;  %v766_v43 = vadd.f32 %v758_v63, %v694_v41  ;;  %v784_v21 = vadd.f32 %v776_v45, %v712_v34  ;;  %2375 = vrot.lane.b32.xlu0 %v10117_v26, %s4764_s26  ;;  %v10172_v26 = vld [vmem:[#allocation151_spill] sm:$0xff] }
 0x165   : > { %v802_v29 = vadd.f32 %v794_v12, %v730_v50  ;;  %v820_v25 = vadd.f32 %v812_v46, %v748_v35  ;;  %v839_v9 = vadd.f32 %v831_v57, %v767_v31  ;;  %v857_v4 = vadd.f32 %v849_v15, %v785_v18  ;;  %v10119_v31 = vld [vmem:[#allocation29_spill] sm:$0xff] }
 0x166   : > { %v875_v33 = vadd.f32 %v867_v53, %v803_v56  ;;  %v893_v44 = vadd.f32 %v885_v19, %v821_v17  ;;  %v674_v60 = vsel %vm645_vm1, 0.0, %v606_v32  ;;  %v677_v2 = vsel %vm645_vm1, 0.0, %v612_v36 }
 0x167   : > { %v676_v51 = vsel %vm645_vm1, 0.0, %v610_v13  ;;  %v1121_v27 = vadd.f32 %v10118_v40, %v6110_v47  ;;  %v830_v41 = vmul.f32 %v5421_v16, %v674_v60  ;;  %v848_v34 = vmul.f32 %v5424_v22, %v674_v60  ;;  %2381 = vrot.lane.b32.xlu1 %v10119_v31, %s4764_s26  ;;  %v10120_v16 = vld [vmem:[#allocation27_spill] sm:$0xff]  ;;  %v10128_v40 = vld [vmem:[#allocation132_spill] sm:$0xff] }
 0x168   : > { %v866_v50 = vmul.f32 %v5427_v10, %v674_v60  ;;  %v884_v35 = vmul.f32 %v5430_v11, %v674_v60  ;;  %v903_v32 = vmul.f32 %v10026_v6, %v677_v2  ;;  %v921_v36 = vmul.f32 %v10027_v39, %v677_v2  ;;  %2379 = vrot.lane.b32.xlu0 %v10120_v16, %s4764_s26  ;;  %v6401_v11 = vpop.permute.xlu0 %1254  ;;  %v10121_v13 = vld [vmem:[#allocation127_spill] sm:$0xff] }
 0x169   : > { %v939_v18 = vmul.f32 %v10028_v23, %v677_v2  ;;  %v957_v47 = vmul.f32 %v10029_v52, %v677_v2  ;;  %v838_v22 = vadd.f32 %v830_v41, %v766_v43  ;;  %v856_v56 = vadd.f32 %v848_v34, %v784_v21  ;;  %v10122_v21 = vld [vmem:[#allocation128_spill] sm:$0xff]  ;;  %v10130_v34 = vld [vmem:[#allocation133_spill] sm:$0xff] }
 0x16a   : > { %v874_v10 = vadd.f32 %v866_v50, %v802_v29  ;;  %v892_v17 = vadd.f32 %v884_v35, %v820_v25  ;;  %v911_v63 = vadd.f32 %v903_v32, %v839_v9  ;;  %v929_v45 = vadd.f32 %v921_v36, %v857_v4  ;;  %v10123_v25 = vld [vmem:[#allocation129_spill] sm:$0xff]  ;;  %v10124_v4 = vld [vmem:[#allocation130_spill] sm:$0xff]  ;;  %v10134_v36 = vld [vmem:[#allocation135_spill] sm:$0xff] }
 0x16b   : > { %v947_v12 = vadd.f32 %v939_v18, %v875_v33  ;;  %v965_v46 = vadd.f32 %v957_v47, %v893_v44  ;;  %v902_v57 = vmul.f32 %v10026_v6, %v676_v51  ;;  %v920_v15 = vmul.f32 %v10027_v39, %v676_v51  ;;  %2385 = vrot.lane.b32.xlu1 %v10036_v14, %s4764_s26  ;;  %v1261_v44 = vpop.permute.xlu1 %1260  ;;  %v10125_v6 = vld [vmem:[#allocation31_spill] sm:$0xff]  ;;  %v10132_v35 = vld [vmem:[#allocation134_spill] sm:$0xff]  ;;  %v10135_v47 = vld [vmem:[#allocation136_spill] sm:$0xff] }
 0x16c   : > { %v938_v53 = vmul.f32 %v10028_v23, %v676_v51  ;;  %v956_v19 = vmul.f32 %v10029_v52, %v676_v51  ;;  %v983_v43 = vadd.f32 %v10121_v13, %v911_v63  ;;  %v1001_v29 = vadd.f32 %v10122_v21, %v929_v45  ;;  %2383 = vrot.lane.b32.xlu0 %v10125_v6, %s4764_s26  ;;  %v10126_v52 = vld [vmem:[#allocation131_spill] sm:$0xff]  ;;  %v1259_v45 = vpop.permute.xlu0 %1258  ;;  %v10144_v21 = vld [vmem:[#allocation112_spill] sm:$0xff] }
 0x16d   : > { %v1019_v9 = vadd.f32 %v10123_v25, %v947_v12  ;;  %v1037_v33 = vadd.f32 %v10124_v4, %v965_v46  ;;  %v910_v39 = vadd.f32 %v902_v57, %v838_v22  ;;  %v928_v60 = vadd.f32 %v920_v15, %v856_v56  ;;  %v10136_v22 = vld [vmem:[#allocation137_spill] sm:$0xff]  ;;  %v10138_v12 = vld [vmem:[#allocation34_spill] sm:$0xff] }
 0x16e   : > { %v946_v23 = vadd.f32 %v938_v53, %v874_v10  ;;  %v964_v2 = vadd.f32 %v956_v19, %v892_v17  ;;  %v6416_v51 = vadd.f32 %v10126_v52, %v983_v43  ;;  %v6419_v41 = vadd.f32 %v10128_v40, %v1001_v29  ;;  %v10137_v10 = vld [vmem:[#allocation138_spill] sm:$0xff]  ;;  %v10141_v53 = vld [vmem:[#allocation67_spill] sm:$0xff]  ;;  %v10143_v43 = vld [vmem:[#allocation68_spill] sm:$0xff] }
 0x16f   : > { %v6422_v50 = vadd.f32 %v10130_v34, %v1019_v9  ;;  %v6425_v32 = vadd.f32 %v10132_v35, %v1037_v33  ;;  %v982_v18 = vadd.f32 %v10134_v36, %v910_v39  ;;  %v1000_v63 = vadd.f32 %v10135_v47, %v928_v60  ;;  %2389 = vrot.lane.b32.xlu1 %v10138_v12, %s4764_s26  ;;  %v10139_v46 = vld [vmem:[#allocation66_spill] sm:$0xff]  ;;  %v10142_v19 = vld [vmem:[#allocation111_spill] sm:$0xff]  ;;  %v10145_v25 = vld [vmem:[#allocation113_spill] sm:$0xff] }
 0x170   : > { %10127 = vst [vmem:[#allocation77_spill] sm:$0xff] %v6416_v51  ;;  %10129 = vst [vmem:[#allocation82_spill] sm:$0xff] %v6419_v41  ;;  %v1018_v56 = vadd.f32 %v10136_v22, %v946_v23  ;;  %v1036_v17 = vadd.f32 %v10137_v10, %v964_v2  ;;  %v10140_v57 = vld [vmem:[#allocation110_spill] sm:$0xff]  ;;  %v1157_v13 = vadd.f32 %v10142_v19, %v10141_v53  ;;  %v10146_v4 = vld [vmem:[#allocation33_spill] sm:$0xff] }
 0x171   : > { %10131 = vst [vmem:[#allocation83_spill] sm:$0xff] %v6422_v50  ;;  %10133 = vst [vmem:[#allocation84_spill] sm:$0xff] %v6425_v32  ;;  %v1139_v15 = vadd.f32 %v10140_v57, %v10139_v46  ;;  %v1175_v29 = vadd.f32 %v10144_v21, %v10143_v43  ;;  %v1193_v9 = vadd.f32 %v10145_v25, %v1121_v27  ;;  %2387 = vrot.lane.b32.xlu0 %v10146_v4, %s4764_s26  ;;  %v10147_v33 = vld [vmem:[#allocation139_spill] sm:$0xff]  ;;  %v10149_v60 = vld [vmem:[#allocation140_spill] sm:$0xff]  ;;  %v1265_v57 = vpop.permute.xlu1 %1264 }
 0x172   : > { %v6443_v39 = vadd.f32 %v10147_v33, %v982_v18  ;;  %v6446_v23 = vadd.f32 %v10149_v60, %v1000_v63  ;;  %v10151_v2 = vld [vmem:[#allocation141_spill] sm:$0xff]  ;;  %v10153_v40 = vld [vmem:[#allocation142_spill] sm:$0xff]  ;;  %v10156_v47 = vld [vmem:[#allocation115_spill] sm:$0xff]  ;;  %v1352_v46 = vsel %vm1350_vm2, %v1257_v8, 0.0 }
 0x173   : > { %v6449_v52 = vadd.f32 %v10151_v2, %v1018_v56  ;;  %v6452_v34 = vadd.f32 %v10153_v40, %v1036_v17  ;;  %v10155_v35 = vld [vmem:[#allocation114_spill] sm:$0xff]  ;;  %v1229_v22 = vadd.f32 %v10156_v47, %v1157_v13  ;;  %v10157_v27 = vld [vmem:[#allocation117_spill] sm:$0xff]  ;;  %v10158_v18 = vld [vmem:[#allocation143_spill] sm:$0xff] }
 0x174   : > { %10148 = vst [vmem:[#allocation85_spill] sm:$0xff] %v6443_v39  ;;  %10150 = vst [vmem:[#allocation90_spill] sm:$0xff] %v6446_v23  ;;  %v1211_v36 = vadd.f32 %v10155_v35, %v1139_v15  ;;  %v1247_v10 = vadd.f32 %v10157_v27, %v1175_v29  ;;  %v1386_v53 = vmul.f32 %v10158_v18, %v1352_v46  ;;  %v10159_v19 = vld [vmem:[#allocation144_spill] sm:$0xff]  ;;  %v10160_v43 = vld [vmem:[#allocation145_spill] sm:$0xff] }
 0x175   : > { %10152 = vst [vmem:[#allocation91_spill] sm:$0xff] %v6449_v52  ;;  %10154 = vst [vmem:[#allocation92_spill] sm:$0xff] %v6452_v34  ;;  %v1404_v63 = vmul.f32 %v10159_v19, %v1352_v46  ;;  %v1422_v21 = vmul.f32 %v10160_v43, %v1352_v46  ;;  %v10161_v56 = vld [vmem:[#allocation146_spill] sm:$0xff]  ;;  %v10162_v17 = vld [vmem:[#allocation36_spill] sm:$0xff] }
 0x176   : > { %v1440_v25 = vmul.f32 %v10161_v56, %v1352_v46  ;;  %2393 = vrot.lane.b32.xlu1 %v10162_v17, %s4764_s26  ;;  %v10163_v33 = vld [vmem:[#allocation69_spill] sm:$0xff]  ;;  %v10164_v15 = vld [vmem:[#allocation147_spill] sm:$0xff]  ;;  %v10165_v13 = vld [vmem:[#allocation70_spill] sm:$0xff]  ;;  %v1394_v6 = vadd.f32 %v1386_v53, %v1193_v9  ;;  %v1263_v17 = vpop.permute.xlu0 %1262  ;;  %v1356_v9 = vsel %vm1350_vm2, %v1265_v57, 0.0 }
 0x177   : > { %v1120_v60 = vadd.f32 %v10164_v15, %v10163_v33  ;;  %v10166_v2 = vld [vmem:[#allocation148_spill] sm:$0xff]  ;;  %v10167_v40 = vld [vmem:[#allocation71_spill] sm:$0xff]  ;;  %v10168_v8 = vld [vmem:[#allocation149_spill] sm:$0xff]  ;;  %v1412_v46 = vadd.f32 %v1404_v63, %v1211_v36  ;;  %v1430_v14 = vadd.f32 %v1422_v21, %v1229_v22 }
 0x178   : > { %v1138_v29 = vadd.f32 %v10166_v2, %v10165_v13  ;;  %v1156_v35 = vadd.f32 %v10168_v8, %v10167_v40  ;;  %v10169_v47 = vld [vmem:[#allocation72_spill] sm:$0xff]  ;;  %v10170_v27 = vld [vmem:[#allocation150_spill] sm:$0xff]  ;;  %v10171_v12 = vld [vmem:[#allocation35_spill] sm:$0xff]  ;;  %v1448_v16 = vadd.f32 %v1440_v25, %v1247_v10  ;;  %v1351_v40 = vsel %vm1350_vm2, %v6401_v11, 0.0  ;;  %v1269_v10 = vpop.permute.xlu1 %1268 }
 0x179   : > { %v1174_v4 = vadd.f32 %v10170_v27, %v10169_v47  ;;  %2391 = vrot.lane.b32.xlu0 %v10171_v12, %s4764_s26  ;;  %v1192_v31 = vadd.f32 %v10172_v26, %v1120_v60  ;;  %v10173_v33 = vld [vmem:[#allocation152_spill] sm:$0xff]  ;;  %v10175_v2 = vld [vmem:[#allocation154_spill] sm:$0xff]  ;;  %v1354_v8 = vsel %vm1350_vm2, %v1261_v44, 0.0  ;;  %v1353_v47 = vsel %vm1350_vm2, %v1259_v45, 0.0  ;;  %v10177_v11 = vld [vmem:[#allocation37_spill] sm:$0xff] }
 0x17a   : > { %v1210_v15 = vadd.f32 %v10173_v33, %v1138_v29  ;;  %v1228_v13 = vadd.f32 %v10174_v61, %v1156_v35  ;;  %v10176_v36 = vld [vmem:[#allocation38_spill] sm:$0xff]  ;;  %v1385_v26 = vmul.f32 %v10158_v18, %v1351_v40  ;;  %v1403_v22 = vmul.f32 %v10159_v19, %v1351_v40  ;;  %v10178_v44 = vld [vmem:[#allocation155_spill] sm:$0xff]  ;;  %v10179_v45 = vld [vmem:[#allocation156_spill] sm:$0xff]  ;;  %v1267_v52 = vpop.permute.xlu0 %1266 }
 0x17b   : > { %v1246_v34 = vadd.f32 %v10175_v2, %v1174_v4  ;;  %2397 = vrot.lane.b32.xlu1 %v10176_v36, %s4764_s26  ;;  %v1421_v61 = vmul.f32 %v10160_v43, %v1351_v40  ;;  %v1439_v4 = vmul.f32 %v10161_v56, %v1351_v40  ;;  %v1458_v53 = vmul.f32 %v10178_v44, %v1354_v8  ;;  %v10180_v57 = vld [vmem:[#allocation157_spill] sm:$0xff]  ;;  %v10181_v25 = vld [vmem:[#allocation158_spill] sm:$0xff]  ;;  %v10182_v23 = vld [vmem:[#allocation40_spill] sm:$0xff] }
 0x17c   : > { %v1476_v63 = vmul.f32 %v10179_v45, %v1354_v8  ;;  %v1494_v21 = vmul.f32 %v10180_v57, %v1354_v8  ;;  %v1512_v60 = vmul.f32 %v10181_v25, %v1354_v8  ;;  %v1393_v29 = vadd.f32 %v1385_v26, %v1192_v31  ;;  %v10183_v31 = vld [vmem:[#allocation159_spill] sm:$0xff] }
 0x17d   : > { %2395 = vrot.lane.b32.xlu0 %v10177_v11, %s4764_s26  ;;  %v1411_v35 = vadd.f32 %v1403_v22, %v1210_v15  ;;  %v1429_v27 = vadd.f32 %v1421_v61, %v1228_v13  ;;  %v1447_v33 = vadd.f32 %v1439_v4, %v1246_v34  ;;  %v1466_v2 = vadd.f32 %v1458_v53, %v1394_v6  ;;  %v10184_v34 = vld [vmem:[#allocation162_spill] sm:$0xff]  ;;  %v1273_v53 = vpop.permute.xlu1 %1272  ;;  %v10198_v51 = vld [vmem:[#allocation43_spill] sm:$0xff] }
 0x17e   : > { %v1484_v12 = vadd.f32 %v1476_v63, %v1412_v46  ;;  %v1502_v36 = vadd.f32 %v1494_v21, %v1430_v14  ;;  %v1520_v40 = vadd.f32 %v1512_v60, %v1448_v16  ;;  %v1457_v11 = vmul.f32 %v10178_v44, %v1353_v47  ;;  %v10185_v16 = vld [vmem:[#allocation163_spill] sm:$0xff]  ;;  %v10186_v15 = vld [vmem:[#allocation166_spill] sm:$0xff] }
 0x17f   : > { %2401 = vrot.lane.b32.xlu1 %v10182_v23, %s4764_s26  ;;  %v1475_v39 = vmul.f32 %v10179_v45, %v1353_v47  ;;  %v1493_v32 = vmul.f32 %v10180_v57, %v1353_v47  ;;  %v1511_v8 = vmul.f32 %v10181_v25, %v1353_v47  ;;  %v1530_v6 = vmul.f32 %v10183_v31, %v1356_v9  ;;  %v10187_v23 = vld [vmem:[#allocation42_spill] sm:$0xff] }
 0x180   : > { %v1548_v14 = vmul.f32 %v10184_v34, %v1356_v9  ;;  %v1566_v46 = vmul.f32 %v10185_v16, %v1356_v9  ;;  %v1584_v13 = vmul.f32 %v10186_v15, %v1356_v9  ;;  %v1465_v26 = vadd.f32 %v1457_v11, %v1393_v29  ;;  %v10188_v9 = vld [vmem:[#allocation160_spill] sm:$0xff]  ;;  %v1271_v29 = vpop.permute.xlu0 %1270 }
 0x181   : > { %2399 = vrot.lane.b32.xlu0 %v10064_v48, %s4764_s26  ;;  %v1483_v22 = vadd.f32 %v1475_v39, %v1411_v35  ;;  %v1501_v61 = vadd.f32 %v1493_v32, %v1429_v27  ;;  %v1519_v4 = vadd.f32 %v1511_v8, %v1447_v33  ;;  %v1538_v63 = vadd.f32 %v1530_v6, %v1466_v2  ;;  %v10192_v2 = vld [vmem:[#allocation178_spill] sm:$0xff] }
 0x182   : > { %v1556_v21 = vadd.f32 %v1548_v14, %v1484_v12  ;;  %v1574_v60 = vadd.f32 %v1566_v46, %v1502_v36  ;;  %v1592_v47 = vadd.f32 %v1584_v13, %v1520_v40  ;;  %v1355_v48 = vsel %vm1350_vm2, %v1263_v17, 0.0  ;;  %v10189_v17 = vld [vmem:[#allocation174_spill] sm:$0xff]  ;;  %v10193_v46 = vld [vmem:[#allocation44_spill] sm:$0xff] }
 0x183   : > { %2405 = vrot.lane.b32.xlu1 %v10187_v23, %s4764_s26  ;;  %v1358_v50 = vsel %vm1350_vm2, %v1269_v10, 0.0  ;;  %v1357_v41 = vsel %vm1350_vm2, %v1267_v52, 0.0  ;;  %v1123_v11 = vadd.f32 %v10188_v9, %v6208_v54  ;;  %v1529_v32 = vmul.f32 %v10183_v31, %v1355_v48  ;;  %v10190_v10 = vld [vmem:[#allocation175_spill] sm:$0xff]  ;;  %v10191_v52 = vld [vmem:[#allocation176_spill] sm:$0xff]  ;;  %v1277_v23 = vpop.permute.xlu1 %1276 }
 0x184   : > { %v1547_v12 = vmul.f32 %v10184_v34, %v1355_v48  ;;  %v1565_v39 = vmul.f32 %v10185_v16, %v1355_v48  ;;  %v1583_v36 = vmul.f32 %v10186_v15, %v1355_v48  ;;  %v1602_v35 = vmul.f32 %v10189_v17, %v1358_v50 }
 0x185   : > { %2403 = vrot.lane.b32.xlu0 %v10070_v38, %s4764_s26  ;;  %v1620_v27 = vmul.f32 %v10190_v10, %v1358_v50  ;;  %v1638_v33 = vmul.f32 %v10191_v52, %v1358_v50  ;;  %v1656_v54 = vmul.f32 %v10192_v2, %v1358_v50  ;;  %v1537_v40 = vadd.f32 %v1529_v32, %v1465_v26  ;;  %v10201_v32 = vld [vmem:[#allocation78_spill] sm:$0xff] }
 0x186   : > { %v1555_v8 = vadd.f32 %v1547_v12, %v1483_v22  ;;  %v1573_v6 = vadd.f32 %v1565_v39, %v1501_v61  ;;  %v1591_v14 = vadd.f32 %v1583_v36, %v1519_v4  ;;  %v6526_v13 = vadd.f32 %v1602_v35, %v1538_v63  ;;  %v10199_v4 = vld [vmem:[#allocation73_spill] sm:$0xff]  ;;  %v10205_v35 = vld [vmem:[#allocation167_spill] sm:$0xff] }
 0x187   : > { %2409 = vrot.lane.b32.xlu1 %v10193_v46, %s4764_s26  ;;  %v6528_v9 = vadd.f32 %v1620_v27, %v1556_v21  ;;  %v6530_v48 = vadd.f32 %v1638_v33, %v1574_v60  ;;  %v6532_v38 = vadd.f32 %v1656_v54, %v1592_v47  ;;  %v1601_v50 = vmul.f32 %v10189_v17, %v1357_v41  ;;  %v10200_v63 = vld [vmem:[#allocation161_spill] sm:$0xff]  ;;  %v10202_v60 = vld [vmem:[#allocation164_spill] sm:$0xff]  ;;  %v10203_v47 = vld [vmem:[#allocation79_spill] sm:$0xff] }
 0x188   : > { %10194 = vst [vmem:[#allocation93_spill] sm:$0xff] %v6526_v13  ;;  %v1619_v26 = vmul.f32 %v10190_v10, %v1357_v41  ;;  %v1637_v22 = vmul.f32 %v10191_v52, %v1357_v41  ;;  %v1655_v61 = vmul.f32 %v10192_v2, %v1357_v41  ;;  %v1141_v21 = vadd.f32 %v10200_v63, %v10199_v4  ;;  %v10204_v39 = vld [vmem:[#allocation165_spill] sm:$0xff]  ;;  %v1275_v41 = vpop.permute.xlu0 %1274  ;;  %v10211_v4 = vld [vmem:[#allocation168_spill] sm:$0xff] }
 0x189   : > { %10195 = vst [vmem:[#allocation86_spill] sm:$0xff] %v6528_v9  ;;  %10196 = vst [vmem:[#allocation87_spill] sm:$0xff] %v6530_v48  ;;  %2407 = vrot.lane.b32.xlu0 %v10198_v51, %s4764_s26  ;;  %v1159_v12 = vadd.f32 %v10202_v60, %v10201_v32  ;;  %v1177_v36 = vadd.f32 %v10204_v39, %v10203_v47  ;;  %v1195_v27 = vadd.f32 %v10205_v35, %v1123_v11  ;;  %v10212_v32 = vld [vmem:[#allocation170_spill] sm:$0xff]  ;;  %v10213_v48 = vld [vmem:[#allocation171_spill] sm:$0xff] }
 0x18a   : > { %10197 = vst [vmem:[#allocation88_spill] sm:$0xff] %v6532_v38  ;;  %v6547_v33 = vadd.f32 %v1601_v50, %v1537_v40  ;;  %v6549_v54 = vadd.f32 %v1619_v26, %v1555_v8  ;;  %v6551_v51 = vadd.f32 %v1637_v22, %v1573_v6  ;;  %v6553_v46 = vadd.f32 %v1655_v61, %v1591_v14  ;;  %v10210_v38 = vld [vmem:[#allocation46_spill] sm:$0xff]  ;;  %v10214_v40 = vld [vmem:[#allocation45_spill] sm:$0xff]  ;;  %v10215_v26 = vld [vmem:[#allocation80_spill] sm:$0xff] }
 0x18b   : > { %2413 = vrot.lane.b32.xlu1 %v10210_v38, %s4764_s26  ;;  %v1213_v63 = vadd.f32 %v10211_v4, %v1141_v21  ;;  %v1231_v60 = vadd.f32 %v10212_v32, %v1159_v12  ;;  %v1249_v47 = vadd.f32 %v10213_v48, %v1177_v36  ;;  %v1360_v11 = vsel %vm1350_vm2, %v1273_v53, 0.0  ;;  %v10216_v22 = vld [vmem:[#allocation169_spill] sm:$0xff]  ;;  %v10218_v12 = vld [vmem:[#allocation172_spill] sm:$0xff]  ;;  %v10219_v48 = vld [vmem:[#allocation74_spill] sm:$0xff] }
 0x18c   : > { %10206 = vst [vmem:[#allocation89_spill] sm:$0xff] %v6547_v33  ;;  %10207 = vst [vmem:[#allocation94_spill] sm:$0xff] %v6549_v54  ;;  %v1388_v8 = vmul.f32 %v10158_v18, %v1360_v11  ;;  %v1406_v6 = vmul.f32 %v10159_v19, %v1360_v11  ;;  %v1424_v14 = vmul.f32 %v10160_v43, %v1360_v11  ;;  %v10217_v21 = vld [vmem:[#allocation81_spill] sm:$0xff]  ;;  %v10221_v35 = vld [vmem:[#allocation75_spill] sm:$0xff] }
 0x18d   : > { %10208 = vst [vmem:[#allocation95_spill] sm:$0xff] %v6551_v51  ;;  %10209 = vst [vmem:[#allocation96_spill] sm:$0xff] %v6553_v46  ;;  %2411 = vrot.lane.b32.xlu0 %v10214_v40, %s4764_s26  ;;  %v1442_v50 = vmul.f32 %v10161_v56, %v1360_v11  ;;  %v1122_v61 = vadd.f32 %v10216_v22, %v10215_v26  ;;  %v1140_v39 = vadd.f32 %v10218_v12, %v10217_v21  ;;  %v10220_v36 = vld [vmem:[#allocation173_spill] sm:$0xff]  ;;  %v1281_v40 = vpop.permute.xlu1 %1280  ;;  %v10223_v33 = vld [vmem:[#allocation48_spill] sm:$0xff] }
 0x18e   : > { %v1158_v53 = vadd.f32 %v10220_v36, %v10219_v48  ;;  %v10222_v4 = vld [vmem:[#allocation177_spill] sm:$0xff]  ;;  %v1396_v38 = vadd.f32 %v1388_v8, %v1195_v27  ;;  %v1414_v46 = vadd.f32 %v1406_v6, %v1213_v63  ;;  %v1432_v51 = vadd.f32 %v1424_v14, %v1231_v60  ;;  %v10224_v11 = vld [vmem:[#allocation179_spill] sm:$0xff]  ;;  %v10225_v26 = vld [vmem:[#allocation180_spill] sm:$0xff] }
 0x18f   : > { %v1176_v32 = vadd.f32 %v10222_v4, %v10221_v35  ;;  %v1450_v54 = vadd.f32 %v1442_v50, %v1249_v47  ;;  %2417 = vrot.lane.b32.xlu1 %v10223_v33, %s4764_s26  ;;  %v1194_v9 = vadd.f32 %v10224_v11, %v1122_v61  ;;  %v1212_v22 = vadd.f32 %v10225_v26, %v1140_v39  ;;  %v10226_v13 = vld [vmem:[#allocation181_spill] sm:$0xff]  ;;  %v10227_v12 = vld [vmem:[#allocation182_spill] sm:$0xff]  ;;  %v10228_v48 = vld [vmem:[#allocation47_spill] sm:$0xff]  ;;  %v1279_v47 = vpop.permute.xlu0 %1278 }
 0x190   : > { %v1230_v21 = vadd.f32 %v10226_v13, %v1158_v53  ;;  %v1359_v36 = vsel %vm1350_vm2, %v1271_v29, 0.0  ;;  %v1362_v27 = vsel %vm1350_vm2, %v1277_v23, 0.0  ;;  %v1361_v63 = vsel %vm1350_vm2, %v1275_v41, 0.0  ;;  %v10229_v41 = vld [vmem:[#allocation50_spill] sm:$0xff]  ;;  %v10230_v4 = vld [vmem:[#allocation49_spill] sm:$0xff] }
 0x191   : > { %v1248_v3 = vadd.f32 %v10227_v12, %v1176_v32  ;;  %2415 = vrot.lane.b32.xlu0 %v10228_v48, %s4764_s26  ;;  %v1364_v60 = vsel %vm1350_vm2, %v1281_v40, 0.0  ;;  %v1387_v8 = vmul.f32 %v10158_v18, %v1359_v36  ;;  %v1405_v6 = vmul.f32 %v10159_v19, %v1359_v36 }
 0x192   : > { %v1423_v13 = vmul.f32 %v10160_v43, %v1359_v36  ;;  %v1441_v14 = vmul.f32 %v10161_v56, %v1359_v36  ;;  %v1460_v50 = vmul.f32 %v10178_v44, %v1362_v27  ;;  %v1478_v61 = vmul.f32 %v10179_v45, %v1362_v27 }
 0x193   : > { %v1496_v29 = vmul.f32 %v10180_v57, %v1362_v27  ;;  %v1514_v23 = vmul.f32 %v10181_v25, %v1362_v27  ;;  %2421 = vrot.lane.b32.xlu1 %v10229_v41, %s4764_s26  ;;  %v1395_v40 = vadd.f32 %v1387_v8, %v1194_v9  ;;  %v1413_v39 = vadd.f32 %v1405_v6, %v1212_v22  ;;  %v1285_v41 = vpop.permute.xlu1 %1284 }
 0x194   : > { %v1431_v53 = vadd.f32 %v1423_v13, %v1230_v21  ;;  %v1449_v35 = vadd.f32 %v1441_v14, %v1248_v3  ;;  %v1468_v32 = vadd.f32 %v1460_v50, %v1396_v38  ;;  %v1486_v11 = vadd.f32 %v1478_v61, %v1414_v46  ;;  %v1283_v46 = vpop.permute.xlu0 %1282 }
 0x195   : > { %2419 = vrot.lane.b32.xlu0 %v10230_v4, %s4764_s26  ;;  %v1504_v26 = vadd.f32 %v1496_v29, %v1432_v51  ;;  %v1522_v12 = vadd.f32 %v1514_v23, %v1450_v54  ;;  %v1459_v36 = vmul.f32 %v10178_v44, %v1361_v63  ;;  %v1477_v48 = vmul.f32 %v10179_v45, %v1361_v63  ;;  %v10231_v29 = vld [vmem:[#allocation183_spill] sm:$0xff]  ;;  %v10245_v4 = vld [vmem:[#allocation76_spill] sm:$0xff] }
 0x196   : > { %v1495_v27 = vmul.f32 %v10180_v57, %v1361_v63  ;;  %v1513_v33 = vmul.f32 %v10181_v25, %v1361_v63  ;;  %v1532_v9 = vmul.f32 %v10183_v31, %v1364_v60  ;;  %v1550_v3 = vmul.f32 %v10184_v34, %v1364_v60 }
 0x197   : > { %v1568_v22 = vmul.f32 %v10185_v16, %v1364_v60  ;;  %v1586_v38 = vmul.f32 %v10186_v15, %v1364_v60  ;;  %2425 = vrot.lane.b32.xlu1 %v10097_v30, %s4764_s26  ;;  %v1467_v51 = vadd.f32 %v1459_v36, %v1395_v40  ;;  %v1485_v54 = vadd.f32 %v1477_v48, %v1413_v39 }
 0x198   : > { %v1503_v21 = vadd.f32 %v1495_v27, %v1431_v53  ;;  %v1521_v8 = vadd.f32 %v1513_v33, %v1449_v35  ;;  %v1540_v63 = vadd.f32 %v1532_v9, %v1468_v32  ;;  %v1558_v6 = vadd.f32 %v1550_v3, %v1486_v11 }
 0x199   : > { %2423 = vrot.lane.b32.xlu0 %v10098_v24, %s4764_s26  ;;  %v1576_v13 = vadd.f32 %v1568_v22, %v1504_v26  ;;  %v1594_v14 = vadd.f32 %v1586_v38, %v1522_v12  ;;  %v1363_v50 = vsel %vm1350_vm2, %v1279_v47, 0.0  ;;  %v1366_v61 = vsel %vm1350_vm2, %v1285_v41, 0.0  ;;  %v10261_v24 = vld [vmem:[#allocation84_spill] sm:$0xff] }
 0x19a   : > { %v1365_v60 = vsel %vm1350_vm2, %v1283_v46, 0.0  ;;  %v1125_v23 = vadd.f32 %v10231_v29, %v6311_v55  ;;  %v1531_v48 = vmul.f32 %v10183_v31, %v1363_v50  ;;  %v1549_v33 = vmul.f32 %v10184_v34, %v1363_v50  ;;  %v1289_v55 = vpop.permute.xlu1 %1288 }
 0x19b   : > { %v1567_v40 = vmul.f32 %v10185_v16, %v1363_v50  ;;  %v1585_v39 = vmul.f32 %v10186_v15, %v1363_v50  ;;  %2429 = vrot.lane.b32.xlu1 %v10100_v37, %s4764_s26  ;;  %v1604_v47 = vmul.f32 %v10189_v17, %v1366_v61  ;;  %v1622_v41 = vmul.f32 %v10190_v10, %v1366_v61 }
 0x19c   : > { %v1640_v53 = vmul.f32 %v10191_v52, %v1366_v61  ;;  %v1658_v35 = vmul.f32 %v10192_v2, %v1366_v61  ;;  %v1539_v32 = vadd.f32 %v1531_v48, %v1467_v51  ;;  %v1557_v11 = vadd.f32 %v1549_v33, %v1485_v54  ;;  %v1287_v51 = vpop.permute.xlu0 %1286  ;;  %v10232_v54 = vld [vmem:[#allocation184_spill] sm:$0xff] }
 0x19d   : > { %2427 = vrot.lane.b32.xlu0 %v10103_v58, %s4764_s26  ;;  %v1575_v26 = vadd.f32 %v1567_v40, %v1503_v21  ;;  %v1593_v12 = vadd.f32 %v1585_v39, %v1521_v8  ;;  %v6628_v36 = vadd.f32 %v1604_v47, %v1540_v63  ;;  %v6630_v27 = vadd.f32 %v1622_v41, %v1558_v6  ;;  %v10233_v8 = vld [vmem:[#allocation185_spill] sm:$0xff]  ;;  %v10234_v6 = vld [vmem:[#allocation186_spill] sm:$0xff]  ;;  %v10237_v39 = vld [vmem:[#allocation55_spill] sm:$0xff] }
 0x19e   : > { %v6632_v9 = vadd.f32 %v1640_v53, %v1576_v13  ;;  %v6634_v3 = vadd.f32 %v1658_v35, %v1594_v14  ;;  %v1603_v22 = vmul.f32 %v10189_v17, %v1365_v60  ;;  %v1621_v38 = vmul.f32 %v10190_v10, %v1365_v60  ;;  %v10235_v14 = vld [vmem:[#allocation187_spill] sm:$0xff]  ;;  %v1293_v53 = vpop.permute.xlu1 %1292 }
 0x19f   : > { %v1639_v46 = vmul.f32 %v10191_v52, %v1365_v60  ;;  %v1657_v50 = vmul.f32 %v10192_v2, %v1365_v60  ;;  %2433 = vrot.lane.b32.xlu1 %v10112_v42, %s4764_s26  ;;  %v1143_v21 = vadd.f32 %v10232_v54, %v6314_v28  ;;  %v1161_v63 = vadd.f32 %v10233_v8, %v6317_v20  ;;  %v10236_v28 = vld [vmem:[#allocation188_spill] sm:$0xff]  ;;  %v10242_v54 = vld [vmem:[#allocation99_spill] sm:$0xff] }
 0x1a0   : > { %v1179_v13 = vadd.f32 %v10234_v6, %v6320_v1  ;;  %v1197_v61 = vadd.f32 %v10235_v14, %v1125_v23  ;;  %v6651_v29 = vadd.f32 %v1603_v22, %v1539_v32  ;;  %v6653_v60 = vadd.f32 %v1621_v38, %v1557_v11  ;;  %v10238_v20 = vld [vmem:[#allocation104_spill] sm:$0xff]  ;;  %v10240_v38 = vld [vmem:[#allocation53_spill] sm:$0xff] }
 0x1a1   : > { %2431 = vrot.lane.b32.xlu0 %v10113_v62, %s4764_s26  ;;  %v6655_v48 = vadd.f32 %v1639_v46, %v1575_v26  ;;  %v6657_v33 = vadd.f32 %v1657_v50, %v1593_v12  ;;  %v1215_v40 = vadd.f32 %v10236_v28, %v1143_v21  ;;  %v1225_v47 = vmul.f32 %v10238_v20, %v10237_v39  ;;  %v10239_v1 = vld [vmem:[#allocation108_spill] sm:$0xff]  ;;  %v10241_v46 = vld [vmem:[#allocation98_spill] sm:$0xff]  ;;  %v10244_v28 = vld [vmem:[#allocation101_spill] sm:$0xff] }
 0x1a2   : > { %v1243_v41 = vmul.f32 %v10239_v1, %v10237_v39  ;;  %v1368_v23 = vsel %vm1350_vm2, %v1289_v55, 0.0  ;;  %v1116_v50 = vmul.f32 %v10241_v46, %v10240_v38  ;;  %v1134_v55 = vmul.f32 %v10242_v54, %v10240_v38  ;;  %v10243_v6 = vld [vmem:[#allocation100_spill] sm:$0xff] }
 0x1a3   : > { %v1390_v35 = vmul.f32 %v10158_v18, %v1368_v23  ;;  %v1408_v32 = vmul.f32 %v10159_v19, %v1368_v23  ;;  %v1426_v11 = vmul.f32 %v10160_v43, %v1368_v23  ;;  %v1444_v26 = vmul.f32 %v10161_v56, %v1368_v23  ;;  %2437 = vrot.lane.b32.xlu1 %v10114_v7, %s4764_s26  ;;  %v1291_v23 = vpop.permute.xlu0 %1290 }
 0x1a4   : > { %v1233_v12 = vadd.f32 %v1225_v47, %v1161_v63  ;;  %v1251_v22 = vadd.f32 %v1243_v41, %v1179_v13  ;;  %v1152_v14 = vmul.f32 %v10243_v6, %v10240_v38  ;;  %v1170_v39 = vmul.f32 %v10244_v28, %v10240_v38 }
 0x1a5   : > { %2435 = vrot.lane.b32.xlu0 %v10115_v0, %s4764_s26  ;;  %v1398_v21 = vadd.f32 %v1390_v35, %v1197_v61  ;;  %v1416_v8 = vadd.f32 %v1408_v32, %v1215_v40  ;;  %v1124_v47 = vadd.f32 %v1116_v50, %v6333_v59  ;;  %v1142_v41 = vadd.f32 %v1134_v55, %v6336_v49  ;;  %v10246_v0 = vld [vmem:[#allocation57_spill] sm:$0xff]  ;;  %v10247_v61 = vld [vmem:[#allocation102_spill] sm:$0xff]  ;;  %v10248_v35 = vld [vmem:[#allocation103_spill] sm:$0xff] }
 0x1a6   : > { %v1434_v63 = vadd.f32 %v1426_v11, %v1233_v12  ;;  %v1452_v13 = vadd.f32 %v1444_v26, %v1251_v22  ;;  %v1160_v7 = vadd.f32 %v1152_v14, %v6339_v5  ;;  %v1178_v62 = vadd.f32 %v1170_v39, %v10245_v4  ;;  %v1297_v26 = vpop.permute.xlu1 %1296 }
 0x1a7   : > { %v1188_v40 = vmul.f32 %v10247_v61, %v10246_v0  ;;  %v1206_v32 = vmul.f32 %v10248_v35, %v10246_v0  ;;  %v1224_v38 = vmul.f32 %v10238_v20, %v10246_v0  ;;  %v1242_v11 = vmul.f32 %v10239_v1, %v10246_v0 }
 0x1a8   : > { %v1367_v59 = vsel %vm1350_vm2, %v1287_v51, 0.0  ;;  %v1370_v49 = vsel %vm1350_vm2, %v1293_v53, 0.0  ;;  %v1295_v53 = vpop.permute.xlu0 %1294 }
 0x1a9   : > { %v1196_v5 = vadd.f32 %v1188_v40, %v1124_v47  ;;  %v1214_v12 = vadd.f32 %v1206_v32, %v1142_v41  ;;  %v1389_v4 = vmul.f32 %v10158_v18, %v1367_v59  ;;  %v1407_v22 = vmul.f32 %v10159_v19, %v1367_v59 }
 0x1aa   : > { %v1232_v50 = vadd.f32 %v1224_v38, %v1160_v7  ;;  %v1250_v55 = vadd.f32 %v1242_v11, %v1178_v62  ;;  %v1425_v14 = vmul.f32 %v10160_v43, %v1367_v59  ;;  %v1443_v39 = vmul.f32 %v10161_v56, %v1367_v59 }
 0x1ab   : > { %v1397_v42 = vadd.f32 %v1389_v4, %v1196_v5  ;;  %v1415_v58 = vadd.f32 %v1407_v22, %v1214_v12  ;;  %v1462_v0 = vmul.f32 %v10178_v44, %v1370_v49  ;;  %v1480_v51 = vmul.f32 %v10179_v45, %v1370_v49  ;;  %v1301_v4 = vpop.permute.xlu1 %1300 }
 0x1ac   : > { %v1433_v37 = vadd.f32 %v1425_v14, %v1232_v50  ;;  %v1451_v47 = vadd.f32 %v1443_v39, %v1250_v55  ;;  %v1498_v41 = vmul.f32 %v10180_v57, %v1370_v49  ;;  %v1516_v40 = vmul.f32 %v10181_v25, %v1370_v49 }
 0x1ad   : > { %v1470_v32 = vadd.f32 %v1462_v0, %v1398_v21  ;;  %v1488_v7 = vadd.f32 %v1480_v51, %v1416_v8  ;;  %v1369_v62 = vsel %vm1350_vm2, %v1291_v23, 0.0  ;;  %v1372_v38 = vsel %vm1350_vm2, %v1297_v26, 0.0  ;;  %v1299_v0 = vpop.permute.xlu0 %1298 }
 0x1ae   : > { %v1506_v11 = vadd.f32 %v1498_v41, %v1434_v63  ;;  %v1524_v59 = vadd.f32 %v1516_v40, %v1452_v13  ;;  %v1461_v5 = vmul.f32 %v10178_v44, %v1369_v62  ;;  %v1479_v12 = vmul.f32 %v10179_v45, %v1369_v62 }
 0x1af   : > { %v1497_v22 = vmul.f32 %v10180_v57, %v1369_v62  ;;  %v1515_v50 = vmul.f32 %v10181_v25, %v1369_v62  ;;  %v1534_v55 = vmul.f32 %v10183_v31, %v1372_v38  ;;  %v1552_v21 = vmul.f32 %v10184_v34, %v1372_v38 }
 0x1b0   : > { %v1469_v8 = vadd.f32 %v1461_v5, %v1397_v42  ;;  %v1487_v49 = vadd.f32 %v1479_v12, %v1415_v58  ;;  %v1570_v23 = vmul.f32 %v10185_v16, %v1372_v38  ;;  %v1588_v63 = vmul.f32 %v10186_v15, %v1372_v38  ;;  %v1305_v38 = vpop.permute.xlu1 %1304 }
 0x1b1   : > { %v1505_v13 = vadd.f32 %v1497_v22, %v1433_v37  ;;  %v1523_v26 = vadd.f32 %v1515_v50, %v1451_v47  ;;  %v1542_v14 = vadd.f32 %v1534_v55, %v1470_v32  ;;  %v1560_v39 = vadd.f32 %v1552_v21, %v1488_v7 }
 0x1b2   : > { %v1578_v51 = vadd.f32 %v1570_v23, %v1506_v11  ;;  %v1596_v41 = vadd.f32 %v1588_v63, %v1524_v59  ;;  %v1371_v40 = vsel %vm1350_vm2, %v1295_v53, 0.0  ;;  %v1374_v62 = vsel %vm1350_vm2, %v1301_v4, 0.0  ;;  %v10253_v23 = vld [vmem:[#allocation62_spill] sm:$0xff] }
 0x1b3   : > { %v1533_v30 = vmul.f32 %v10183_v31, %v1371_v40  ;;  %v1551_v42 = vmul.f32 %v10184_v34, %v1371_v40  ;;  %v1569_v58 = vmul.f32 %v10185_v16, %v1371_v40  ;;  %v1587_v5 = vmul.f32 %v10186_v15, %v1371_v40 }
 0x1b4   : > { %v1606_v37 = vmul.f32 %v10189_v17, %v1374_v62  ;;  %v1624_v47 = vmul.f32 %v10190_v10, %v1374_v62  ;;  %v1642_v32 = vmul.f32 %v10191_v52, %v1374_v62  ;;  %v1660_v7 = vmul.f32 %v10192_v2, %v1374_v62  ;;  %v10256_v62 = vld [vmem:[#allocation83_spill] sm:$0xff] }
 0x1b5   : > { %v1541_v53 = vadd.f32 %v1533_v30, %v1469_v8  ;;  %v1559_v11 = vadd.f32 %v1551_v42, %v1487_v49  ;;  %v1577_v59 = vadd.f32 %v1569_v58, %v1505_v13  ;;  %v1595_v12 = vadd.f32 %v1587_v5, %v1523_v26  ;;  %v1303_v8 = vpop.permute.xlu0 %1302 }
 0x1b6   : > { %v6723_v4 = vadd.f32 %v1606_v37, %v1542_v14  ;;  %v6725_v22 = vadd.f32 %v1624_v47, %v1560_v39  ;;  %v6727_v50 = vadd.f32 %v1642_v32, %v1578_v51  ;;  %v6729_v55 = vadd.f32 %v1660_v7, %v1596_v41  ;;  %v10254_v39 = vld [vmem:[#allocation77_spill] sm:$0xff]  ;;  %v10255_v51 = vld [vmem:[#allocation82_spill] sm:$0xff]  ;;  %v1309_v7 = vpop.permute.xlu1 %1308 }
 0x1b7   : > { %v1373_v21 = vsel %vm1350_vm2, %v1299_v0, 0.0  ;;  %v1119_v63 = vmul.f32 %v10241_v46, %v10253_v23  ;;  %v1137_v40 = vmul.f32 %v10242_v54, %v10253_v23  ;;  %v1155_v30 = vmul.f32 %v10243_v6, %v10253_v23 }
 0x1b8   : > { %10249 = vst [vmem:[#allocation97_spill] sm:$0xff] %v6723_v4  ;;  %10250 = vst [vmem:[#allocation105_spill] sm:$0xff] %v6725_v22  ;;  %v1605_v49 = vmul.f32 %v10189_v17, %v1373_v21  ;;  %v1623_v13 = vmul.f32 %v10190_v10, %v1373_v21  ;;  %v1641_v26 = vmul.f32 %v10191_v52, %v1373_v21 }
 0x1b9   : > { %10251 = vst [vmem:[#allocation106_spill] sm:$0xff] %v6727_v50  ;;  %10252 = vst [vmem:[#allocation107_spill] sm:$0xff] %v6729_v55  ;;  %v1659_v14 = vmul.f32 %v10192_v2, %v1373_v21  ;;  %v1127_v0 = vadd.f32 %v1119_v63, %v10254_v39  ;;  %v1145_v41 = vadd.f32 %v1137_v40, %v10255_v51  ;;  %v10262_v55 = vld [vmem:[#allocation64_spill] sm:$0xff] }
 0x1ba   : > { %v1163_v42 = vadd.f32 %v1155_v30, %v10256_v62  ;;  %v1173_v58 = vmul.f32 %v10244_v28, %v10253_v23  ;;  %v6747_v5 = vadd.f32 %v1605_v49, %v1541_v53  ;;  %v6749_v37 = vadd.f32 %v1623_v13, %v1559_v11 }
 0x1bb   : > { %v6751_v47 = vadd.f32 %v1641_v26, %v1577_v59  ;;  %v6753_v32 = vadd.f32 %v1659_v14, %v1595_v12  ;;  %v1191_v63 = vmul.f32 %v10247_v61, %v10262_v55  ;;  %v1209_v40 = vmul.f32 %v10248_v35, %v10262_v55  ;;  %v10263_v59 = vld [vmem:[#allocation63_spill] sm:$0xff]  ;;  %v1307_v14 = vpop.permute.xlu0 %1306 }
 0x1bc   : > { %10257 = vst [vmem:[#allocation116_spill] sm:$0xff] %v6747_v5  ;;  %10258 = vst [vmem:[#allocation118_spill] sm:$0xff] %v6749_v37  ;;  %v1181_v21 = vadd.f32 %v1173_v58, %v10261_v24  ;;  %v1227_v23 = vmul.f32 %v10238_v20, %v10262_v55  ;;  %v1245_v53 = vmul.f32 %v10239_v1, %v10262_v55  ;;  %v1376_v11 = vsel %vm1350_vm2, %v1305_v38, 0.0  ;;  %v10264_v58 = vld [vmem:[#allocation85_spill] sm:$0xff] }
 0x1bd   : > { %10259 = vst [vmem:[#allocation119_spill] sm:$0xff] %v6751_v47  ;;  %10260 = vst [vmem:[#allocation120_spill] sm:$0xff] %v6753_v32  ;;  %v1118_v12 = vmul.f32 %v10241_v46, %v10263_v59  ;;  %v1136_v24 = vmul.f32 %v10242_v54, %v10263_v59  ;;  %v1199_v30 = vadd.f32 %v1191_v63, %v1127_v0  ;;  %v10265_v46 = vld [vmem:[#allocation90_spill] sm:$0xff]  ;;  %v1313_v63 = vpop.permute.xlu1 %1312 }
 0x1be   : > { %v1217_v49 = vadd.f32 %v1209_v40, %v1145_v41  ;;  %v1235_v13 = vadd.f32 %v1227_v23, %v1163_v42  ;;  %v1392_v26 = vmul.f32 %v10158_v18, %v1376_v11  ;;  %v1253_v39 = vadd.f32 %v1245_v53, %v1181_v21  ;;  %v10266_v40 = vld [vmem:[#allocation91_spill] sm:$0xff]  ;;  %v10267_v53 = vld [vmem:[#allocation65_spill] sm:$0xff] }
 0x1bf   : > { %v1410_v51 = vmul.f32 %v10159_v19, %v1376_v11  ;;  %v1428_v62 = vmul.f32 %v10160_v43, %v1376_v11  ;;  %v1446_v55 = vmul.f32 %v10161_v56, %v1376_v11  ;;  %v1126_v32 = vadd.f32 %v1118_v12, %v10264_v58 }
 0x1c0   : > { %v1400_v38 = vadd.f32 %v1392_v26, %v1199_v30  ;;  %v1144_v47 = vadd.f32 %v1136_v24, %v10265_v46  ;;  %v1154_v54 = vmul.f32 %v10243_v6, %v10263_v59  ;;  %v1172_v21 = vmul.f32 %v10244_v28, %v10263_v59  ;;  %v10268_v30 = vld [vmem:[#allocation92_spill] sm:$0xff] }
 0x1c1   : > { %v1418_v0 = vadd.f32 %v1410_v51, %v1217_v49  ;;  %v1436_v41 = vadd.f32 %v1428_v62, %v1235_v13  ;;  %v1454_v42 = vadd.f32 %v1446_v55, %v1253_v39  ;;  %v1190_v11 = vmul.f32 %v10247_v61, %v10267_v53  ;;  %v1311_v51 = vpop.permute.xlu0 %1310 }
 0x1c2   : > { %v1162_v23 = vadd.f32 %v1154_v54, %v10266_v40  ;;  %v1208_v12 = vmul.f32 %v10248_v35, %v10267_v53  ;;  %v1226_v24 = vmul.f32 %v10238_v20, %v10267_v53  ;;  %v1180_v6 = vadd.f32 %v1172_v21, %v10268_v30  ;;  %v1317_v54 = vpop.permute.xlu1 %1316 }
 0x1c3   : > { %v1244_v49 = vmul.f32 %v10239_v1, %v10267_v53  ;;  %v1375_v13 = vsel %vm1350_vm2, %v1303_v8, 0.0  ;;  %v1378_v28 = vsel %vm1350_vm2, %v1309_v7, 0.0  ;;  %v1198_v59 = vadd.f32 %v1190_v11, %v1126_v32 }
 0x1c4   : > { %v1216_v26 = vadd.f32 %v1208_v12, %v1144_v47  ;;  %v1234_v39 = vadd.f32 %v1226_v24, %v1162_v23  ;;  %v1391_v61 = vmul.f32 %v10158_v18, %v1375_v13  ;;  %v1409_v35 = vmul.f32 %v10159_v19, %v1375_v13 }
 0x1c5   : > { %v1252_v62 = vadd.f32 %v1244_v49, %v1180_v6  ;;  %v1427_v20 = vmul.f32 %v10160_v43, %v1375_v13  ;;  %v1445_v55 = vmul.f32 %v10161_v56, %v1375_v13  ;;  %v1464_v1 = vmul.f32 %v10178_v44, %v1378_v28 }
 0x1c6   : > { %v1399_v58 = vadd.f32 %v1391_v61, %v1198_v59  ;;  %v1482_v8 = vmul.f32 %v10179_v45, %v1378_v28  ;;  %v1500_v7 = vmul.f32 %v10180_v57, %v1378_v28  ;;  %v1417_v32 = vadd.f32 %v1409_v35, %v1216_v26 }
 0x1c7   : > { %v1435_v47 = vadd.f32 %v1427_v20, %v1234_v39  ;;  %v1453_v46 = vadd.f32 %v1445_v55, %v1252_v62  ;;  %v1518_v18 = vmul.f32 %v10181_v25, %v1378_v28  ;;  %v1472_v21 = vadd.f32 %v1464_v1, %v1400_v38 }
 0x1c8   : > { %v1490_v40 = vadd.f32 %v1482_v8, %v1418_v0  ;;  %v1508_v19 = vadd.f32 %v1500_v7, %v1436_v41  ;;  %v1377_v43 = vsel %vm1350_vm2, %v1307_v14, 0.0  ;;  %v1380_v24 = vsel %vm1350_vm2, %v1313_v63, 0.0  ;;  %v1315_v14 = vpop.permute.xlu0 %1314 }
 0x1c9   : > { %v1526_v23 = vadd.f32 %v1518_v18, %v1454_v42  ;;  %v1463_v56 = vmul.f32 %v10178_v44, %v1377_v43  ;;  %v1481_v53 = vmul.f32 %v10179_v45, %v1377_v43  ;;  %v1499_v11 = vmul.f32 %v10180_v57, %v1377_v43 }
 0x1ca   : > { %v1517_v12 = vmul.f32 %v10181_v25, %v1377_v43  ;;  %v1379_v38 = vsel %vm1350_vm2, %v1311_v51, 0.0  ;;  %v1382_v0 = vsel %vm1350_vm2, %v1317_v54, 0.0  ;;  %v1536_v45 = vmul.f32 %v10183_v31, %v1380_v24 }
 0x1cb   : > { %v1471_v41 = vadd.f32 %v1463_v56, %v1399_v58  ;;  %v1489_v42 = vadd.f32 %v1481_v53, %v1417_v32  ;;  %v1507_v44 = vadd.f32 %v1499_v11, %v1435_v47  ;;  %v1554_v30 = vmul.f32 %v10184_v34, %v1380_v24 }
 0x1cc   : > { %v1525_v57 = vadd.f32 %v1517_v12, %v1453_v46  ;;  %v1572_v6 = vmul.f32 %v10185_v16, %v1380_v24  ;;  %v1590_v25 = vmul.f32 %v10186_v15, %v1380_v24  ;;  %v1544_v63 = vadd.f32 %v1536_v45, %v1472_v21  ;;  %v1672_v1 = vpop.permute.xlu0 %1671 }
 0x1cd   : > { %v1535_v49 = vmul.f32 %v10183_v31, %v1379_v38  ;;  %v1553_v13 = vmul.f32 %v10184_v34, %v1379_v38  ;;  %v1571_v28 = vmul.f32 %v10185_v16, %v1379_v38  ;;  %v1562_v59 = vadd.f32 %v1554_v30, %v1490_v40  ;;  %v1674_v16 = vpop.permute.xlu1 %1673 }
 0x1ce   : > { %v1580_v26 = vadd.f32 %v1572_v6, %v1508_v19  ;;  %v1598_v39 = vadd.f32 %v1590_v25, %v1526_v23  ;;  %v1589_v61 = vmul.f32 %v10186_v15, %v1379_v38  ;;  %v1608_v20 = vmul.f32 %v10189_v17, %v1382_v0  ;;  %v10278_v6 = vld [vmem:[#allocation86_spill] sm:$0xff] }
 0x1cf   : > { %v1543_v51 = vadd.f32 %v1535_v49, %v1471_v41  ;;  %v1561_v62 = vadd.f32 %v1553_v13, %v1489_v42  ;;  %v1579_v35 = vadd.f32 %v1571_v28, %v1507_v44  ;;  %v1626_v58 = vmul.f32 %v10190_v10, %v1382_v0  ;;  %v10277_v42 = vld [vmem:[#allocation93_spill] sm:$0xff]  ;;  %v10280_v13 = vld [vmem:[#allocation88_spill] sm:$0xff] }
 0x1d0   : > { %v1597_v55 = vadd.f32 %v1589_v61, %v1525_v57  ;;  %v1644_v31 = vmul.f32 %v10191_v52, %v1382_v0  ;;  %v1662_v34 = vmul.f32 %v10192_v2, %v1382_v0  ;;  %v6827_v8 = vadd.f32 %v1608_v20, %v1544_v63  ;;  %v1676_v41 = vpop.permute.xlu0 %1675  ;;  %v10279_v63 = vld [vmem:[#allocation87_spill] sm:$0xff] }
 0x1d1   : > { %v1381_v7 = vsel %vm1350_vm2, %v1315_v14, 0.0  ;;  %v6831_v15 = vstv %s6803_s0  ;;  %v6834_v32 = vstv %s6805_s2  ;;  %v6840_v47 = vadd.f32 %v1626_v58, %v1562_v59  ;;  %v1678_v14 = vpop.permute.xlu1 %1677  ;;  %v10281_v59 = vld [vmem:[#allocation89_spill] sm:$0xff]  ;;  %s7483_s0 = sld [smem:[#allocation8 + $0x82]]  ;;  %s7490_s2 = sld [smem:[#allocation8 + $0x1f]] }
 0x1d2   : > { %10269 = vst [vmem:[#allocation121_spill] sm:$0xff] %v6827_v8  ;;  %v6842_v46 = vadd.f32 %v1644_v31, %v1580_v26  ;;  %v6844_v18 = vadd.f32 %v1662_v34, %v1598_v39  ;;  %v1607_v54 = vmul.f32 %v10189_v17, %v1381_v7  ;;  %v1625_v21 = vmul.f32 %v10190_v10, %v1381_v7  ;;  %v10282_v39 = vld [vmem:[#allocation94_spill] sm:$0xff] }
 0x1d3   : > { %10270 = vst [vmem:[#allocation122_spill] sm:$0xff] %v6840_v47  ;;  %v1643_v40 = vmul.f32 %v10191_v52, %v1381_v7  ;;  %v1661_v19 = vmul.f32 %v10192_v2, %v1381_v7  ;;  %v6855_v43 = vstv %s6812_s6  ;;  %v6862_v56 = vstv %s6817_s25  ;;  %v10299_v47 = vld [vmem:[#allocation28_spill] sm:$0xff]  ;;  %s7492_s6 = sld [smem:[#allocation8 + $0x43]]  ;;  %s7498_s25 = sld [smem:[#allocation8 + $0x67]] }
 0x1d4   : > { %10271 = vst [vmem:[#allocation123_spill] sm:$0xff] %v6842_v46  ;;  %10272 = vst [vmem:[#allocation124_spill] sm:$0xff] %v6844_v18  ;;  %v6859_v23 = vadd.f32 %v1607_v54, %v1543_v51  ;;  %v1768_v17 = vsel %vm645_vm1, 0.0, %v1674_v16  ;;  %v1767_v53 = vsel %vm645_vm1, 0.0, %v1672_v1  ;;  %v6870_v10 = vadd.f32 %v1625_v21, %v1561_v62  ;;  %v10283_v51 = vld [vmem:[#allocation95_spill] sm:$0xff] }
 0x1d5   : > { %v6872_v52 = vadd.f32 %v1643_v40, %v1579_v35  ;;  %v6874_v2 = vadd.f32 %v1661_v19, %v1597_v55  ;;  %v1802_v11 = vmul.f32 %v6831_v15, %v1768_v17  ;;  %v1820_v12 = vmul.f32 %v6834_v32, %v1768_v17  ;;  %v10284_v35 = vld [vmem:[#allocation96_spill] sm:$0xff] }
 0x1d6   : > { %10273 = vst [vmem:[#allocation125_spill] sm:$0xff] %v6859_v23  ;;  %10274 = vst [vmem:[#allocation126_spill] sm:$0xff] %v6870_v10  ;;  %v1838_v24 = vmul.f32 %v6855_v43, %v1768_v17  ;;  %v1856_v38 = vmul.f32 %v6862_v56, %v1768_v17  ;;  %v1801_v0 = vmul.f32 %v6831_v15, %v1767_v53  ;;  %v6897_v55 = vstv %s6836_s1  ;;  %s7500_s1 = sld [smem:[#allocation8 + $0x8b]] }
 0x1d7   : > { %10275 = vst [vmem:[#allocation109_spill] sm:$0xff] %v6872_v52  ;;  %10276 = vst [vmem:[#allocation127_spill] sm:$0xff] %v6874_v2  ;;  %v1810_v44 = vadd.f32 %v1802_v11, %v10277_v42  ;;  %v1819_v45 = vmul.f32 %v6834_v32, %v1767_v53  ;;  %v1837_v57 = vmul.f32 %v6855_v43, %v1767_v53  ;;  %v6900_v58 = vstv %s6838_s19  ;;  %v1682_v11 = vpop.permute.xlu1 %1681  ;;  %s7510_s19 = sld [smem:[#allocation8 + $0x5]] }
 0x1d8   : > { %v1855_v30 = vmul.f32 %v6862_v56, %v1767_v53  ;;  %v1828_v25 = vadd.f32 %v1820_v12, %v10278_v6  ;;  %v1846_v49 = vadd.f32 %v1838_v24, %v10279_v63  ;;  %v1864_v28 = vadd.f32 %v1856_v38, %v10280_v13  ;;  %v1680_v12 = vpop.permute.xlu0 %1679 }
 0x1d9   : > { %v1809_v26 = vadd.f32 %v1801_v0, %v10281_v59  ;;  %v1827_v61 = vadd.f32 %v1819_v45, %v10282_v39  ;;  %v1845_v62 = vadd.f32 %v1837_v57, %v10283_v51  ;;  %v6903_v31 = vstv %s6847_s16  ;;  %s7512_s16 = sld [smem:[#allocation8 + $0x29]] }
 0x1da   : > { %v1863_v20 = vadd.f32 %v1855_v30, %v10284_v35  ;;  %v6906_v34 = vstv %s6849_s17  ;;  %v1770_v16 = vsel %vm645_vm1, 0.0, %v1678_v14  ;;  %v1769_v40 = vsel %vm645_vm1, 0.0, %v1676_v41  ;;  %s7514_s17 = sld [smem:[#allocation8 + $0x4d]] }
 0x1db   : > { %10285 = vst [vmem:[#allocation128_spill] sm:$0xff] %v6906_v34  ;;  %v1874_v1 = vmul.f32 %v6897_v55, %v1770_v16  ;;  %v1892_v7 = vmul.f32 %v6900_v58, %v1770_v16  ;;  %v1910_v54 = vmul.f32 %v6903_v31, %v1770_v16  ;;  %v1928_v21 = vmul.f32 %v6906_v34, %v1770_v16 }
 0x1dc   : > { %v6917_v19 = vstv %s6857_s4  ;;  %v6920_v17 = vstv %s6866_s15  ;;  %v6923_v53 = vstv %s6868_s18  ;;  %v1873_v41 = vmul.f32 %v6897_v55, %v1769_v40  ;;  %v1684_v52 = vpop.permute.xlu0 %1683  ;;  %s7516_s4 = sld [smem:[#allocation8 + $0x71]]  ;;  %s7599_s15 = sld [smem:[#allocation8 + $0xe]] }
 0x1dd   : > { %10286 = vst [vmem:[#allocation129_spill] sm:$0xff] %v6917_v19  ;;  %10287 = vst [vmem:[#allocation130_spill] sm:$0xff] %v6920_v17  ;;  %v1882_v24 = vadd.f32 %v1874_v1, %v1810_v44  ;;  %v1900_v38 = vadd.f32 %v1892_v7, %v1828_v25  ;;  %v1918_v0 = vadd.f32 %v1910_v54, %v1846_v49  ;;  %v6942_v44 = vstv %s6885_s20  ;;  %s7601_s18 = sld [smem:[#allocation8 + $0x32]]  ;;  %s7606_s20 = sld [smem:[#allocation8 + $0x56]] }
 0x1de   : > { %10288 = vst [vmem:[#allocation131_spill] sm:$0xff] %v6923_v53  ;;  %v1936_v14 = vadd.f32 %v1928_v21, %v1864_v28  ;;  %v1891_v42 = vmul.f32 %v6900_v58, %v1769_v40  ;;  %v1909_v45 = vmul.f32 %v6903_v31, %v1769_v40  ;;  %v1927_v57 = vmul.f32 %v6906_v34, %v1769_v40 }
 0x1df   : > { %10289 = vst [vmem:[#allocation132_spill] sm:$0xff] %v6942_v44  ;;  %v1772_v30 = vsel %vm645_vm1, 0.0, %v1682_v11  ;;  %v1771_v6 = vsel %vm645_vm1, 0.0, %v1680_v12  ;;  %v6947_v25 = vstv %s6887_s27  ;;  %v1881_v63 = vadd.f32 %v1873_v41, %v1809_v26  ;;  %s7608_s27 = sld [smem:[#allocation8 + $0x7a]] }
 0x1e0   : > { %v1899_v49 = vadd.f32 %v1891_v42, %v1827_v61  ;;  %v1917_v13 = vadd.f32 %v1909_v45, %v1845_v62  ;;  %v1935_v28 = vadd.f32 %v1927_v57, %v1863_v20  ;;  %v1946_v59 = vmul.f32 %v6917_v19, %v1772_v30 }
 0x1e1   : > { %v1964_v39 = vmul.f32 %v6920_v17, %v1772_v30  ;;  %v1982_v51 = vmul.f32 %v6923_v53, %v1772_v30  ;;  %v2000_v35 = vmul.f32 %v6942_v44, %v1772_v30  ;;  %v1945_v26 = vmul.f32 %v6917_v19, %v1771_v6 }
 0x1e2   : > { %v1963_v61 = vmul.f32 %v6920_v17, %v1771_v6  ;;  %v1981_v62 = vmul.f32 %v6923_v53, %v1771_v6  ;;  %v1999_v20 = vmul.f32 %v6942_v44, %v1771_v6  ;;  %v1954_v16 = vadd.f32 %v1946_v59, %v1882_v24  ;;  %v1686_v6 = vpop.permute.xlu1 %1685  ;;  %v10296_v59 = vld [vmem:[#allocation29_spill] sm:$0xff]  ;;  %v10300_v53 = vld [vmem:[#allocation27_spill] sm:$0xff] }
 0x1e3   : > { %v1972_v1 = vadd.f32 %v1964_v39, %v1900_v38  ;;  %v1990_v7 = vadd.f32 %v1982_v51, %v1918_v0  ;;  %v2008_v54 = vadd.f32 %v2000_v35, %v1936_v14  ;;  %v6965_v21 = vadd.f32 %v1945_v26, %v1881_v63  ;;  %v10291_v0 = vld [vmem:[#allocation30_spill] sm:$0xff] }
 0x1e4   : > { %v6967_v40 = vadd.f32 %v1963_v61, %v1899_v49  ;;  %v6969_v11 = vadd.f32 %v1981_v62, %v1917_v13  ;;  %v6971_v12 = vadd.f32 %v1999_v20, %v1935_v28  ;;  %v6974_v41 = vstv %s6913_s28  ;;  %s7632_s28 = sld [smem:[#allocation8 + $0x17]] }
 0x1e5   : > { %v6977_v42 = vstv %s6925_s22  ;;  %v6980_v24 = vstv %s6927_s13  ;;  %v6983_v38 = vstv %s6929_s12  ;;  %v6988_v45 = vstv %s6931_s24  ;;  %s7634_s22 = sld [smem:[#allocation8 + $0x3b]]  ;;  %s7642_s13 = sld [smem:[#allocation8 + $0x5f]] }
 0x1e6   : > { %10290 = vst [vmem:[#allocation133_spill] sm:$0xff] %v6983_v38  ;;  %v2090_v14 = vmul.f32 %v6983_v38, %v10291_v0  ;;  %10292 = vst [vmem:[#allocation134_spill] sm:$0xff] %v6988_v45  ;;  %v6991_v57 = vstv %s6937_s21  ;;  %v6994_v30 = vstv %s6939_s29  ;;  %v2108_v63 = vmul.f32 %v6988_v45, %v10291_v0  ;;  %s7644_s12 = sld [smem:[#allocation8 + $0x83]]  ;;  %s7674_s24 = sld [smem:[#allocation8 + $0x20]] }
 0x1e7   : > { %10293 = vst [vmem:[#allocation135_spill] sm:$0xff] %v6991_v57  ;;  %10294 = vst [vmem:[#allocation136_spill] sm:$0xff] %v6994_v30  ;;  %v2126_v49 = vmul.f32 %v6991_v57, %v10291_v0  ;;  %v2144_v13 = vmul.f32 %v6994_v30, %v10291_v0  ;;  %v7003_v28 = vstv %s6949_s7  ;;  %v7008_v51 = vstv %s6951_s14  ;;  %s7676_s21 = sld [smem:[#allocation8 + $0x44]]  ;;  %s7678_s29 = sld [smem:[#allocation8 + $0x68]] }
 0x1e8   : > { %10295 = vst [vmem:[#allocation137_spill] sm:$0xff] %v7003_v28  ;;  %v2162_v39 = vmul.f32 %v7003_v28, %v10296_v59  ;;  %10297 = vst [vmem:[#allocation138_spill] sm:$0xff] %v7008_v51  ;;  %v7011_v35 = vstv %s6953_s23  ;;  %v7014_v26 = vstv %s6955_s9  ;;  %v2180_v61 = vmul.f32 %v7008_v51, %v10296_v59  ;;  %s7680_s7 = sld [smem:[#allocation8 + $0x8c]]  ;;  %s8094_s14 = sld [smem:[#allocation8 + $0x4e]] }
 0x1e9   : > { %10298 = vst [vmem:[#allocation66_spill] sm:$0xff] %v7014_v26  ;;  %v2198_v62 = vmul.f32 %v7011_v35, %v10296_v59  ;;  %v2216_v20 = vmul.f32 %v7014_v26, %v10296_v59  ;;  %v1774_v2 = vsel %vm645_vm1, 0.0, %v1686_v6  ;;  %v2089_v8 = vmul.f32 %v6983_v38, %v10299_v47  ;;  %s8096_s23 = sld [smem:[#allocation8 + $0x72]]  ;;  %s8107_s9 = sld [smem:[#allocation8 + $0xf]] }
 0x1ea   : > { %v2018_v10 = vmul.f32 %v6947_v25, %v1774_v2  ;;  %v2036_v23 = vmul.f32 %v6974_v41, %v1774_v2  ;;  %v2054_v18 = vmul.f32 %v6977_v42, %v1774_v2  ;;  %v2072_v46 = vmul.f32 %v6980_v24, %v1774_v2 }
 0x1eb   : > { %v2107_v37 = vmul.f32 %v6988_v45, %v10299_v47  ;;  %v2125_v5 = vmul.f32 %v6991_v57, %v10299_v47  ;;  %v2143_v6 = vmul.f32 %v6994_v30, %v10299_v47  ;;  %v2161_v17 = vmul.f32 %v7003_v28, %v10300_v53 }
 0x1ec   : > { %v2026_v50 = vadd.f32 %v2018_v10, %v1954_v16  ;;  %v2044_v22 = vadd.f32 %v2036_v23, %v1972_v1  ;;  %v2062_v4 = vadd.f32 %v2054_v18, %v1990_v7  ;;  %v2080_v44 = vadd.f32 %v2072_v46, %v2008_v54  ;;  %v1690_v10 = vpop.permute.xlu1 %1689  ;;  %v1688_v16 = vpop.permute.xlu0 %1687 }
 0x1ed   : > { %v2179_v2 = vmul.f32 %v7008_v51, %v10300_v53  ;;  %v2197_v38 = vmul.f32 %v7011_v35, %v10300_v53  ;;  %v2215_v45 = vmul.f32 %v7014_v26, %v10300_v53  ;;  %v1773_v23 = vsel %vm645_vm1, 0.0, %v1684_v52 }
 0x1ee   : > { %v2098_v57 = vadd.f32 %v2090_v14, %v2026_v50  ;;  %v2116_v19 = vadd.f32 %v2108_v63, %v2044_v22  ;;  %v2134_v34 = vadd.f32 %v2126_v49, %v2062_v4  ;;  %v2152_v30 = vadd.f32 %v2144_v13, %v2080_v44 }
 0x1ef   : > { %v2793_v46 = vrot.slane %v10291_v0, 1  ;;  %v2792_v18 = vrot.slane %v10299_v47, 1  ;;  %v2017_v4 = vmul.f32 %v6947_v25, %v1773_v23  ;;  %v2035_v22 = vmul.f32 %v6974_v41, %v1773_v23 }
 0x1f0   : > { %v7046_v1 = vadd.f32 %v2162_v39, %v2098_v57  ;;  %v7048_v7 = vadd.f32 %v2180_v61, %v2116_v19  ;;  %v7050_v54 = vadd.f32 %v2198_v62, %v2134_v34  ;;  %v7052_v26 = vadd.f32 %v2216_v20, %v2152_v30 }
 0x1f1   : > { %v2053_v50 = vmul.f32 %v6977_v42, %v1773_v23  ;;  %v2071_v52 = vmul.f32 %v6980_v24, %v1773_v23  ;;  %v7059_v47 = vsel %vm2791_vm3, %v2793_v46, 0.0  ;;  %v7062_v44 = vsel %vm2791_vm3, %v2792_v18, %v2793_v46  ;;  %v1694_v46 = vpop.permute.xlu1 %1693  ;;  %v1692_v18 = vpop.permute.xlu0 %1691 }
 0x1f2   : > { %10301 = vst [vmem:[#allocation110_spill] sm:$0xff] %v7046_v1  ;;  %10302 = vst [vmem:[#allocation67_spill] sm:$0xff] %v7048_v7  ;;  %v1776_v19 = vsel %vm645_vm1, 0.0, %v1690_v10  ;;  %v1775_v34 = vsel %vm645_vm1, 0.0, %v1688_v16  ;;  %v2025_v0 = vadd.f32 %v2017_v4, %v6965_v21  ;;  %v2043_v14 = vadd.f32 %v2035_v22, %v6967_v40  ;;  %2906 = vrot.lane.b32.xlu1 %v7059_v47, %s10024_s10 }
 0x1f3   : > { %10303 = vst [vmem:[#allocation111_spill] sm:$0xff] %v7050_v54  ;;  %10304 = vst [vmem:[#allocation68_spill] sm:$0xff] %v7052_v26  ;;  %v2061_v57 = vadd.f32 %v2053_v50, %v6969_v11  ;;  %v2079_v30 = vadd.f32 %v2071_v52, %v6971_v12  ;;  %2904 = vrot.lane.b32.xlu0 %v7062_v44, %s10024_s10  ;;  %v1804_v63 = vmul.f32 %v6831_v15, %v1776_v19 }
 0x1f4   : > { %10305 = vst [vmem:[#allocation112_spill] sm:$0xff] %v7059_v47  ;;  %10306 = vst [vmem:[#allocation113_spill] sm:$0xff] %v7062_v44  ;;  %v1822_v49 = vmul.f32 %v6834_v32, %v1776_v19  ;;  %v1840_v13 = vmul.f32 %v6855_v43, %v1776_v19  ;;  %v1858_v21 = vmul.f32 %v6862_v56, %v1776_v19  ;;  %v10314_v19 = vld [vmem:[#allocation32_spill] sm:$0xff] }
 0x1f5   : > { %v2097_v39 = vadd.f32 %v2089_v8, %v2025_v0  ;;  %v2115_v40 = vadd.f32 %v2107_v37, %v2043_v14  ;;  %v2133_v61 = vadd.f32 %v2125_v5, %v2061_v57  ;;  %v2151_v11 = vadd.f32 %v2143_v6, %v2079_v30 }
 0x1f6   : > { %v1812_v12 = vadd.f32 %v1804_v63, %v6628_v36  ;;  %v1830_v62 = vadd.f32 %v1822_v49, %v6630_v27  ;;  %v1848_v20 = vadd.f32 %v1840_v13, %v6632_v9  ;;  %v1866_v23 = vadd.f32 %v1858_v21, %v6634_v3  ;;  %v1698_v63 = vpop.permute.xlu1 %1697  ;;  %v1696_v49 = vpop.permute.xlu0 %1695 }
 0x1f7   : > { %v7082_v10 = vadd.f32 %v2161_v17, %v2097_v39  ;;  %v7084_v16 = vadd.f32 %v2179_v2, %v2115_v40  ;;  %v7086_v4 = vadd.f32 %v2197_v38, %v2133_v61  ;;  %v7088_v8 = vadd.f32 %v2215_v45, %v2151_v11 }
 0x1f8   : > { %v1803_v5 = vmul.f32 %v6831_v15, %v1775_v34  ;;  %v1821_v36 = vmul.f32 %v6834_v32, %v1775_v34  ;;  %v1839_v27 = vmul.f32 %v6855_v43, %v1775_v34  ;;  %v1857_v9 = vmul.f32 %v6862_v56, %v1775_v34 }
 0x1f9   : > { %10307 = vst [vmem:[#allocation139_spill] sm:$0xff] %v7082_v10  ;;  %10308 = vst [vmem:[#allocation140_spill] sm:$0xff] %v7084_v16  ;;  %v2796_v3 = vrot.slane %v10296_v59, 1  ;;  %v2795_v37 = vrot.slane %v10300_v53, 1  ;;  %v1778_v17 = vsel %vm645_vm1, 0.0, %v1694_v46  ;;  %v1777_v6 = vsel %vm645_vm1, 0.0, %v1692_v18 }
 0x1fa   : > { %10309 = vst [vmem:[#allocation141_spill] sm:$0xff] %v7086_v4  ;;  %10310 = vst [vmem:[#allocation142_spill] sm:$0xff] %v7088_v8  ;;  %v1811_v38 = vadd.f32 %v1803_v5, %v6651_v29  ;;  %v1829_v45 = vadd.f32 %v1821_v36, %v6653_v60  ;;  %v1847_v2 = vadd.f32 %v1839_v27, %v6655_v48  ;;  %v10313_v60 = vld [vmem:[#allocation128_spill] sm:$0xff]  ;;  %v2799_v34 = vrot.slane %v10314_v19, 1  ;;  %v10316_v18 = vld [vmem:[#allocation31_spill] sm:$0xff]  ;;  %v1702_v44 = vpop.permute.xlu1 %1701 }
 0x1fb   : > { %v1865_v22 = vadd.f32 %v1857_v9, %v6657_v33  ;;  %v7103_v50 = vsel %vm2791_vm3, %v2796_v3, 0.0  ;;  %v7106_v52 = vsel %vm2791_vm3, %v2795_v37, %v2796_v3  ;;  %v1876_v53 = vmul.f32 %v6897_v55, %v1778_v17  ;;  %v10319_v9 = vld [vmem:[#allocation129_spill] sm:$0xff]  ;;  %v10320_v37 = vld [vmem:[#allocation130_spill] sm:$0xff] }
 0x1fc   : > { %10311 = vst [vmem:[#allocation114_spill] sm:$0xff] %v7103_v50  ;;  %10312 = vst [vmem:[#allocation115_spill] sm:$0xff] %v7106_v52  ;;  %v1894_v59 = vmul.f32 %v6900_v58, %v1778_v17  ;;  %2910 = vrot.lane.b32.xlu1 %v7103_v50, %s10024_s10  ;;  %2908 = vrot.lane.b32.xlu0 %v7106_v52, %s10024_s10  ;;  %v1912_v29 = vmul.f32 %v6903_v31, %v1778_v17  ;;  %v7122_v46 = vsel %vm2791_vm3, %v2799_v34, 0.0  ;;  %v10326_v52 = vld [vmem:[#allocation133_spill] sm:$0xff] }
 0x1fd   : > { %v1930_v48 = vmul.f32 %v10313_v60, %v1778_v17  ;;  %v1875_v33 = vmul.f32 %v6897_v55, %v1777_v6  ;;  %v1884_v0 = vadd.f32 %v1876_v53, %v1812_v12  ;;  %v1893_v57 = vmul.f32 %v6900_v58, %v1777_v6  ;;  %10315 = vst [vmem:[#allocation117_spill] sm:$0xff] %v7122_v46  ;;  %v10334_v4 = vld [vmem:[#allocation37_spill] sm:$0xff] }
 0x1fe   : > { %v1902_v14 = vadd.f32 %v1894_v59, %v1830_v62  ;;  %v1911_v30 = vmul.f32 %v6903_v31, %v1777_v6  ;;  %v1920_v13 = vadd.f32 %v1912_v29, %v1848_v20  ;;  %v1929_v40 = vmul.f32 %v10313_v60, %v1777_v6  ;;  %v10317_v20 = vld [vmem:[#allocation34_spill] sm:$0xff]  ;;  %v10321_v6 = vld [vmem:[#allocation131_spill] sm:$0xff] }
 0x1ff   : > { %v1938_v21 = vadd.f32 %v1930_v48, %v1866_v23  ;;  %v1883_v39 = vadd.f32 %v1875_v33, %v1811_v38  ;;  %v1901_v61 = vadd.f32 %v1893_v57, %v1829_v45  ;;  %v2798_v5 = vrot.slane %v10316_v18, 1  ;;  %v10322_v45 = vld [vmem:[#allocation132_spill] sm:$0xff] }
 0x200   : > { %v1919_v11 = vadd.f32 %v1911_v30, %v1847_v2  ;;  %v1937_v12 = vadd.f32 %v1929_v40, %v1865_v22  ;;  %2914 = vrot.lane.b32.xlu1 %v7122_v46, %s10024_s10  ;;  %v1780_v62 = vsel %vm645_vm1, 0.0, %v1698_v63  ;;  %v1779_v36 = vsel %vm645_vm1, 0.0, %v1696_v49  ;;  %v10325_v46 = vld [vmem:[#allocation36_spill] sm:$0xff] }
 0x201   : > { %v2802_v23 = vrot.slane %v10317_v20, 1  ;;  %v7131_v27 = vsel %vm2791_vm3, %v2798_v5, %v2799_v34  ;;  %v1948_v3 = vmul.f32 %v10319_v9, %v1780_v62  ;;  %v1966_v17 = vmul.f32 %v10320_v37, %v1780_v62 }
 0x202   : > { %10318 = vst [vmem:[#allocation143_spill] sm:$0xff] %v7131_v27  ;;  %v1984_v38 = vmul.f32 %v10321_v6, %v1780_v62  ;;  %2912 = vrot.lane.b32.xlu0 %v7131_v27, %s10024_s10  ;;  %v2002_v2 = vmul.f32 %v10322_v45, %v1780_v62  ;;  %v1947_v22 = vmul.f32 %v10319_v9, %v1779_v36  ;;  %v10324_v62 = vld [vmem:[#allocation33_spill] sm:$0xff]  ;;  %v2805_v20 = vrot.slane %v10325_v46, 1 }
 0x203   : > { %v1965_v53 = vmul.f32 %v10320_v37, %v1779_v36  ;;  %v1983_v59 = vmul.f32 %v10321_v6, %v1779_v36  ;;  %v1956_v29 = vadd.f32 %v1948_v3, %v1884_v0  ;;  %v1974_v48 = vadd.f32 %v1966_v17, %v1902_v14  ;;  %v10327_v0 = vld [vmem:[#allocation134_spill] sm:$0xff] }
 0x204   : > { %v1992_v33 = vadd.f32 %v1984_v38, %v1920_v13  ;;  %v2001_v34 = vmul.f32 %v10322_v45, %v1779_v36  ;;  %v2010_v57 = vadd.f32 %v2002_v2, %v1938_v21  ;;  %v1955_v30 = vadd.f32 %v1947_v22, %v1883_v39  ;;  %v10328_v13 = vld [vmem:[#allocation135_spill] sm:$0xff]  ;;  %v10329_v39 = vld [vmem:[#allocation136_spill] sm:$0xff]  ;;  %v10332_v38 = vld [vmem:[#allocation66_spill] sm:$0xff] }
 0x205   : > { %v1973_v63 = vadd.f32 %v1965_v53, %v1901_v61  ;;  %v1991_v49 = vadd.f32 %v1983_v59, %v1919_v11  ;;  %v7144_v5 = vsel %vm2791_vm3, %v2802_v23, 0.0  ;;  %v2801_v27 = vrot.slane %v10324_v62, 1  ;;  %v10330_v11 = vld [vmem:[#allocation38_spill] sm:$0xff]  ;;  %v10333_v53 = vld [vmem:[#allocation35_spill] sm:$0xff] }
 0x206   : > { %v2009_v40 = vadd.f32 %v2001_v34, %v1937_v12  ;;  %10323 = vst [vmem:[#allocation144_spill] sm:$0xff] %v7144_v5  ;;  %v2092_v50 = vmul.f32 %v10326_v52, %v10325_v46  ;;  %2918 = vrot.lane.b32.xlu1 %v7144_v5, %s10024_s10  ;;  %v2110_v14 = vmul.f32 %v10327_v0, %v10325_v46  ;;  %v1782_v22 = vsel %vm645_vm1, 0.0, %v1702_v44  ;;  %v1700_v34 = vpop.permute.xlu0 %1699 }
 0x207   : > { %v2128_v21 = vmul.f32 %v10328_v13, %v10325_v46  ;;  %v2146_v61 = vmul.f32 %v10329_v39, %v10325_v46  ;;  %v2164_v12 = vmul.f32 %v7003_v28, %v10330_v11  ;;  %v7160_v36 = vsel %vm2791_vm3, %v2801_v27, %v2802_v23 }
 0x208   : > { %10331 = vst [vmem:[#allocation145_spill] sm:$0xff] %v7160_v36  ;;  %v2182_v3 = vmul.f32 %v7008_v51, %v10330_v11  ;;  %v2200_v17 = vmul.f32 %v7011_v35, %v10330_v11  ;;  %v2218_v2 = vmul.f32 %v10332_v38, %v10330_v11  ;;  %2916 = vrot.lane.b32.xlu0 %v7160_v36, %s10024_s10  ;;  %v2804_v19 = vrot.slane %v10333_v53, 1 }
 0x209   : > { %v2091_v59 = vmul.f32 %v10326_v52, %v10333_v53  ;;  %v2109_v23 = vmul.f32 %v10327_v0, %v10333_v53  ;;  %v2127_v27 = vmul.f32 %v10328_v13, %v10333_v53  ;;  %v2020_v5 = vmul.f32 %v6947_v25, %v1782_v22 }
 0x20a   : > { %v2038_v47 = vmul.f32 %v6974_v41, %v1782_v22  ;;  %v2056_v8 = vmul.f32 %v6977_v42, %v1782_v22  ;;  %v2074_v36 = vmul.f32 %v6980_v24, %v1782_v22  ;;  %v2145_v44 = vmul.f32 %v10329_v39, %v10333_v53 }
 0x20b   : > { %v2163_v62 = vmul.f32 %v7003_v28, %v10334_v4  ;;  %v2181_v16 = vmul.f32 %v7008_v51, %v10334_v4  ;;  %v2199_v10 = vmul.f32 %v7011_v35, %v10334_v4  ;;  %v2028_v18 = vadd.f32 %v2020_v5, %v1956_v29 }
 0x20c   : > { %v2046_v26 = vadd.f32 %v2038_v47, %v1974_v48  ;;  %v2064_v54 = vadd.f32 %v2056_v8, %v1992_v33  ;;  %v2082_v7 = vadd.f32 %v2074_v36, %v2010_v57  ;;  %v2217_v1 = vmul.f32 %v10332_v38, %v10334_v4  ;;  %v1706_v48 = vpop.permute.xlu1 %1705  ;;  %v1704_v33 = vpop.permute.xlu0 %1703 }
 0x20d   : > { %v1781_v22 = vsel %vm645_vm1, 0.0, %v1700_v34  ;;  %v2100_v28 = vadd.f32 %v2092_v50, %v2028_v18 }
 0x20e   : > { %v2118_v39 = vadd.f32 %v2110_v14, %v2046_v26  ;;  %v2136_v13 = vadd.f32 %v2128_v21, %v2064_v54  ;;  %v2154_v51 = vadd.f32 %v2146_v61, %v2082_v7  ;;  %v2019_v0 = vmul.f32 %v6947_v25, %v1781_v22 }
 0x20f   : > { %v2037_v29 = vmul.f32 %v6974_v41, %v1781_v22  ;;  %v2055_v47 = vmul.f32 %v6977_v42, %v1781_v22  ;;  %v2073_v8 = vmul.f32 %v6980_v24, %v1781_v22  ;;  %v7198_v57 = vadd.f32 %v2164_v12, %v2100_v28 }
 0x210   : > { %v7200_v5 = vadd.f32 %v2182_v3, %v2118_v39  ;;  %v7202_v46 = vadd.f32 %v2200_v17, %v2136_v13  ;;  %v7204_v50 = vadd.f32 %v2218_v2, %v2154_v51  ;;  %v2027_v26 = vadd.f32 %v2019_v0, %v1955_v30  ;;  %v1710_v3 = vpop.permute.xlu1 %1709  ;;  %v1708_v17 = vpop.permute.xlu0 %1707  ;;  %v10345_v2 = vld [vmem:[#allocation97_spill] sm:$0xff] }
 0x211   : > { %10335 = vst [vmem:[#allocation146_spill] sm:$0xff] %v7198_v57  ;;  %v2045_v7 = vadd.f32 %v2037_v29, %v1973_v63  ;;  %v2063_v54 = vadd.f32 %v2055_v47, %v1991_v49  ;;  %v2081_v18 = vadd.f32 %v2073_v8, %v2009_v40  ;;  %v7207_v14 = vsel %vm2791_vm3, %v2805_v20, 0.0 }
 0x212   : > { %10336 = vst [vmem:[#allocation69_spill] sm:$0xff] %v7200_v5  ;;  %10337 = vst [vmem:[#allocation147_spill] sm:$0xff] %v7202_v46  ;;  %v7210_v21 = vsel %vm2791_vm3, %v2804_v19, %v2805_v20  ;;  %v1784_v61 = vsel %vm645_vm1, 0.0, %v1706_v48  ;;  %v1783_v28 = vsel %vm645_vm1, 0.0, %v1704_v33  ;;  %v2099_v39 = vadd.f32 %v2091_v59, %v2027_v26  ;;  %2922 = vrot.lane.b32.xlu1 %v7207_v14, %s10024_s10  ;;  %v10346_v59 = vld [vmem:[#allocation105_spill] sm:$0xff]  ;;  %v10349_v33 = vld [vmem:[#allocation116_spill] sm:$0xff] }
 0x213   : > { %10338 = vst [vmem:[#allocation70_spill] sm:$0xff] %v7204_v50  ;;  %10339 = vst [vmem:[#allocation148_spill] sm:$0xff] %v7207_v14  ;;  %v2117_v12 = vadd.f32 %v2109_v23, %v2045_v7  ;;  %v2135_v13 = vadd.f32 %v2127_v27, %v2063_v54  ;;  %v2153_v36 = vadd.f32 %v2145_v44, %v2081_v18  ;;  %2920 = vrot.lane.b32.xlu0 %v7210_v21, %s10024_s10  ;;  %v10347_v27 = vld [vmem:[#allocation106_spill] sm:$0xff]  ;;  %v10348_v44 = vld [vmem:[#allocation107_spill] sm:$0xff] }
 0x214   : > { %10340 = vst [vmem:[#allocation71_spill] sm:$0xff] %v7210_v21  ;;  %v1806_v51 = vmul.f32 %v6831_v15, %v1784_v61  ;;  %v1824_v30 = vmul.f32 %v6834_v32, %v1784_v61  ;;  %v1842_v19 = vmul.f32 %v6855_v43, %v1784_v61  ;;  %v1860_v20 = vmul.f32 %v6862_v56, %v1784_v61  ;;  %v10350_v7 = vld [vmem:[#allocation118_spill] sm:$0xff]  ;;  %v10351_v18 = vld [vmem:[#allocation119_spill] sm:$0xff] }
 0x215   : > { %v7222_v63 = vadd.f32 %v2163_v62, %v2099_v39  ;;  %v7224_v49 = vadd.f32 %v2181_v16, %v2117_v12  ;;  %v7226_v40 = vadd.f32 %v2199_v10, %v2135_v13  ;;  %v7228_v0 = vadd.f32 %v2217_v1, %v2153_v36  ;;  %v10352_v39 = vld [vmem:[#allocation120_spill] sm:$0xff] }
 0x216   : > { %v1814_v53 = vadd.f32 %v1806_v51, %v10345_v2  ;;  %v1832_v23 = vadd.f32 %v1824_v30, %v10346_v59  ;;  %v1850_v34 = vadd.f32 %v1842_v19, %v10347_v27  ;;  %v1868_v22 = vadd.f32 %v1860_v20, %v10348_v44  ;;  %v10355_v19 = vld [vmem:[#allocation40_spill] sm:$0xff]  ;;  %v1714_v27 = vpop.permute.xlu1 %1713  ;;  %v1712_v44 = vpop.permute.xlu0 %1711 }
 0x217   : > { %10341 = vst [vmem:[#allocation149_spill] sm:$0xff] %v7222_v63  ;;  %10342 = vst [vmem:[#allocation72_spill] sm:$0xff] %v7224_v49  ;;  %v1805_v29 = vmul.f32 %v6831_v15, %v1783_v28  ;;  %v1823_v62 = vmul.f32 %v6834_v32, %v1783_v28  ;;  %v1841_v16 = vmul.f32 %v6855_v43, %v1783_v28  ;;  %v2808_v1 = vrot.slane %v10330_v11, 1  ;;  %v10371_v49 = vld [vmem:[#allocation45_spill] sm:$0xff] }
 0x218   : > { %10343 = vst [vmem:[#allocation150_spill] sm:$0xff] %v7226_v40  ;;  %10344 = vst [vmem:[#allocation151_spill] sm:$0xff] %v7228_v0  ;;  %v1859_v10 = vmul.f32 %v6862_v56, %v1783_v28  ;;  %v2807_v47 = vrot.slane %v10334_v4, 1  ;;  %v1786_v8 = vsel %vm645_vm1, 0.0, %v1710_v3  ;;  %v1785_v48 = vsel %vm645_vm1, 0.0, %v1708_v17 }
 0x219   : > { %v1813_v26 = vadd.f32 %v1805_v29, %v10349_v33  ;;  %v1831_v54 = vadd.f32 %v1823_v62, %v10350_v7  ;;  %v1849_v61 = vadd.f32 %v1841_v16, %v10351_v18  ;;  %v7247_v13 = vsel %vm2791_vm3, %v2808_v1, 0.0  ;;  %v10357_v33 = vld [vmem:[#allocation39_spill] sm:$0xff] }
 0x21a   : > { %v1867_v12 = vadd.f32 %v1859_v10, %v10352_v39  ;;  %10353 = vst [vmem:[#allocation152_spill] sm:$0xff] %v7247_v13  ;;  %v7250_v28 = vsel %vm2791_vm3, %v2807_v47, %v2808_v1  ;;  %v1878_v4 = vmul.f32 %v6897_v55, %v1786_v8  ;;  %v1896_v11 = vmul.f32 %v6900_v58, %v1786_v8 }
 0x21b   : > { %10354 = vst [vmem:[#allocation153_spill] sm:$0xff] %v7250_v28  ;;  %2926 = vrot.lane.b32.xlu1 %v7247_v13, %s10024_s10  ;;  %2924 = vrot.lane.b32.xlu0 %v7250_v28, %s10024_s10  ;;  %v1914_v36 = vmul.f32 %v6903_v31, %v1786_v8  ;;  %v1932_v51 = vmul.f32 %v10313_v60, %v1786_v8  ;;  %v2811_v20 = vrot.slane %v10355_v19, 1  ;;  %v2810_v7 = vrot.slane %v10357_v33, 1  ;;  %v1718_v13 = vpop.permute.xlu1 %1717 }
 0x21c   : > { %v1877_v30 = vmul.f32 %v6897_v55, %v1785_v48  ;;  %v1886_v3 = vadd.f32 %v1878_v4, %v1814_v53  ;;  %v1904_v17 = vadd.f32 %v1896_v11, %v1832_v23  ;;  %v1895_v2 = vmul.f32 %v6900_v58, %v1785_v48 }
 0x21d   : > { %v1913_v59 = vmul.f32 %v6903_v31, %v1785_v48  ;;  %v1922_v29 = vadd.f32 %v1914_v36, %v1850_v34  ;;  %v1940_v62 = vadd.f32 %v1932_v51, %v1868_v22  ;;  %v1931_v10 = vmul.f32 %v10313_v60, %v1785_v48  ;;  %v10358_v34 = vld [vmem:[#allocation42_spill] sm:$0xff] }
 0x21e   : > { %v1885_v16 = vadd.f32 %v1877_v30, %v1813_v26  ;;  %v1903_v1 = vadd.f32 %v1895_v2, %v1831_v54  ;;  %v7266_v8 = vsel %vm2791_vm3, %v2811_v20, 0.0  ;;  %v1788_v23 = vsel %vm645_vm1, 0.0, %v1714_v27 }
 0x21f   : > { %v1921_v47 = vadd.f32 %v1913_v59, %v1849_v61  ;;  %10356 = vst [vmem:[#allocation154_spill] sm:$0xff] %v7266_v8  ;;  %v1939_v53 = vadd.f32 %v1931_v10, %v1867_v12  ;;  %2930 = vrot.lane.b32.xlu1 %v7266_v8, %s10024_s10  ;;  %v1787_v18 = vsel %vm645_vm1, 0.0, %v1712_v44  ;;  %v2814_v22 = vrot.slane %v10358_v34, 1  ;;  %v10362_v8 = vld [vmem:[#allocation44_spill] sm:$0xff] }
 0x220   : > { %v7275_v26 = vsel %vm2791_vm3, %v2810_v7, %v2811_v20  ;;  %v1950_v48 = vmul.f32 %v10319_v9, %v1788_v23  ;;  %v1968_v54 = vmul.f32 %v10320_v37, %v1788_v23  ;;  %v1986_v61 = vmul.f32 %v10321_v6, %v1788_v23 }
 0x221   : > { %10359 = vst [vmem:[#allocation155_spill] sm:$0xff] %v7275_v26  ;;  %2928 = vrot.lane.b32.xlu0 %v7275_v26, %s10024_s10  ;;  %v2004_v39 = vmul.f32 %v10322_v45, %v1788_v23  ;;  %v1949_v12 = vmul.f32 %v10319_v9, %v1787_v18  ;;  %v1967_v4 = vmul.f32 %v10320_v37, %v1787_v18  ;;  %v7288_v7 = vsel %vm2791_vm3, %v2814_v22, 0.0  ;;  %v10361_v23 = vld [vmem:[#allocation41_spill] sm:$0xff] }
 0x222   : > { %v1985_v11 = vmul.f32 %v10321_v6, %v1787_v18  ;;  %v1958_v36 = vadd.f32 %v1950_v48, %v1886_v3  ;;  %v1976_v51 = vadd.f32 %v1968_v54, %v1904_v17  ;;  %v1994_v30 = vadd.f32 %v1986_v61, %v1922_v29  ;;  %10360 = vst [vmem:[#allocation156_spill] sm:$0xff] %v7288_v7  ;;  %v10363_v3 = vld [vmem:[#allocation134_spill] sm:$0xff]  ;;  %v10364_v29 = vld [vmem:[#allocation135_spill] sm:$0xff] }
 0x223   : > { %v2003_v20 = vmul.f32 %v10322_v45, %v1787_v18  ;;  %v2012_v2 = vadd.f32 %v2004_v39, %v1940_v62  ;;  %v1957_v59 = vadd.f32 %v1949_v12, %v1885_v16  ;;  %v1975_v27 = vadd.f32 %v1967_v4, %v1903_v1  ;;  %2934 = vrot.lane.b32.xlu1 %v7288_v7, %s10024_s10  ;;  %v10365_v16 = vld [vmem:[#allocation136_spill] sm:$0xff]  ;;  %v10369_v54 = vld [vmem:[#allocation138_spill] sm:$0xff]  ;;  %v1716_v7 = vpop.permute.xlu0 %1715 }
 0x224   : > { %v1993_v44 = vadd.f32 %v1985_v11, %v1921_v47  ;;  %v2813_v26 = vrot.slane %v10361_v23, 1  ;;  %v2094_v28 = vmul.f32 %v10326_v52, %v10362_v8  ;;  %v2112_v17 = vmul.f32 %v10363_v3, %v10362_v8  ;;  %v10366_v47 = vld [vmem:[#allocation46_spill] sm:$0xff]  ;;  %v10370_v11 = vld [vmem:[#allocation43_spill] sm:$0xff] }
 0x225   : > { %v2011_v10 = vadd.f32 %v2003_v20, %v1939_v53  ;;  %v2130_v62 = vmul.f32 %v10364_v29, %v10362_v8  ;;  %v2148_v1 = vmul.f32 %v10365_v16, %v10362_v8  ;;  %v10367_v53 = vld [vmem:[#allocation137_spill] sm:$0xff]  ;;  %v2184_v61 = vmul.f32 %v10369_v54, %v10366_v47 }
 0x226   : > { %v2166_v18 = vmul.f32 %v10367_v53, %v10366_v47  ;;  %v7304_v48 = vsel %vm2791_vm3, %v2813_v26, %v2814_v22  ;;  %v2202_v39 = vmul.f32 %v7011_v35, %v10366_v47  ;;  %v2220_v12 = vmul.f32 %v10332_v38, %v10366_v47 }
 0x227   : > { %10368 = vst [vmem:[#allocation157_spill] sm:$0xff] %v7304_v48  ;;  %2932 = vrot.lane.b32.xlu0 %v7304_v48, %s10024_s10  ;;  %v1790_v4 = vsel %vm645_vm1, 0.0, %v1718_v13  ;;  %v2093_v20 = vmul.f32 %v10326_v52, %v10370_v11  ;;  %v2111_v22 = vmul.f32 %v10363_v3, %v10370_v11  ;;  %v2129_v26 = vmul.f32 %v10364_v29, %v10370_v11 }
 0x228   : > { %v2022_v0 = vmul.f32 %v6947_v25, %v1790_v4  ;;  %v2040_v40 = vmul.f32 %v6974_v41, %v1790_v4  ;;  %v2058_v23 = vmul.f32 %v6977_v42, %v1790_v4  ;;  %v2076_v48 = vmul.f32 %v6980_v24, %v1790_v4 }
 0x229   : > { %v2147_v13 = vmul.f32 %v10365_v16, %v10370_v11  ;;  %v2165_v63 = vmul.f32 %v10367_v53, %v10371_v49  ;;  %v2183_v21 = vmul.f32 %v10369_v54, %v10371_v49  ;;  %v2201_v33 = vmul.f32 %v7011_v35, %v10371_v49 }
 0x22a   : > { %v2030_v14 = vadd.f32 %v2022_v0, %v1958_v36  ;;  %v2048_v50 = vadd.f32 %v2040_v40, %v1976_v51  ;;  %v2066_v46 = vadd.f32 %v2058_v23, %v1994_v30  ;;  %v2084_v34 = vadd.f32 %v2076_v48, %v2012_v2  ;;  %v1722_v51 = vpop.permute.xlu1 %1721  ;;  %v1720_v30 = vpop.permute.xlu0 %1719 }
 0x22b   : > { %v2219_v5 = vmul.f32 %v10332_v38, %v10371_v49  ;;  %v1789_v4 = vsel %vm645_vm1, 0.0, %v1716_v7  ;;  %v2817_v57 = vrot.slane %v10362_v8, 1  ;;  %v2816_v19 = vrot.slane %v10370_v11, 1  ;;  %v10381_v11 = vld [vmem:[#allocation123_spill] sm:$0xff] }
 0x22c   : > { %v2102_v53 = vadd.f32 %v2094_v28, %v2030_v14  ;;  %v2120_v16 = vadd.f32 %v2112_v17, %v2048_v50  ;;  %v2138_v29 = vadd.f32 %v2130_v62, %v2066_v46  ;;  %v2156_v54 = vadd.f32 %v2148_v1, %v2084_v34 }
 0x22d   : > { %v2021_v3 = vmul.f32 %v6947_v25, %v1789_v4  ;;  %v2039_v0 = vmul.f32 %v6974_v41, %v1789_v4  ;;  %v2057_v40 = vmul.f32 %v6977_v42, %v1789_v4  ;;  %v2075_v36 = vmul.f32 %v6980_v24, %v1789_v4 }
 0x22e   : > { %v7342_v2 = vadd.f32 %v2166_v18, %v2102_v53  ;;  %v7344_v7 = vadd.f32 %v2184_v61, %v2120_v16  ;;  %v7346_v8 = vadd.f32 %v2202_v39, %v2138_v29  ;;  %v7348_v14 = vadd.f32 %v2220_v12, %v2156_v54  ;;  %v10379_v54 = vld [vmem:[#allocation121_spill] sm:$0xff]  ;;  %v10380_v39 = vld [vmem:[#allocation122_spill] sm:$0xff]  ;;  %v1724_v4 = vpop.permute.xlu0 %1723 }
 0x22f   : > { %v2029_v46 = vadd.f32 %v2021_v3, %v1957_v59  ;;  %v2047_v50 = vadd.f32 %v2039_v0, %v1975_v27  ;;  %v2065_v28 = vadd.f32 %v2057_v40, %v1993_v44  ;;  %v2083_v34 = vadd.f32 %v2075_v36, %v2011_v10  ;;  %v10384_v36 = vld [vmem:[#allocation52_spill] sm:$0xff] }
 0x230   : > { %10372 = vst [vmem:[#allocation158_spill] sm:$0xff] %v7348_v14  ;;  %v7351_v23 = vsel %vm2791_vm3, %v2817_v57, 0.0  ;;  %v7354_v17 = vsel %vm2791_vm3, %v2816_v19, %v2817_v57  ;;  %v1792_v62 = vsel %vm645_vm1, 0.0, %v1722_v51  ;;  %v1791_v1 = vsel %vm645_vm1, 0.0, %v1720_v30 }
 0x231   : > { %10373 = vst [vmem:[#allocation159_spill] sm:$0xff] %v7351_v23  ;;  %10374 = vst [vmem:[#allocation162_spill] sm:$0xff] %v7354_v17  ;;  %v2101_v16 = vadd.f32 %v2093_v20, %v2029_v46  ;;  %v2119_v53 = vadd.f32 %v2111_v22, %v2047_v50  ;;  %v2137_v29 = vadd.f32 %v2129_v26, %v2065_v28  ;;  %2938 = vrot.lane.b32.xlu1 %v7351_v23, %s10024_s10  ;;  %v10382_v22 = vld [vmem:[#allocation124_spill] sm:$0xff]  ;;  %v10385_v50 = vld [vmem:[#allocation125_spill] sm:$0xff] }
 0x232   : > { %v2155_v18 = vadd.f32 %v2147_v13, %v2083_v34  ;;  %2936 = vrot.lane.b32.xlu0 %v7354_v17, %s10024_s10  ;;  %v1808_v59 = vmul.f32 %v6831_v15, %v1792_v62  ;;  %v1826_v27 = vmul.f32 %v6834_v32, %v1792_v62  ;;  %v1844_v57 = vmul.f32 %v6855_v43, %v1792_v62  ;;  %v1726_v13 = vpop.permute.xlu1 %1725  ;;  %v10386_v34 = vld [vmem:[#allocation126_spill] sm:$0xff] }
 0x233   : > { %v1862_v19 = vmul.f32 %v6862_v56, %v1792_v62  ;;  %v7366_v44 = vadd.f32 %v2165_v63, %v2101_v16  ;;  %v7368_v10 = vadd.f32 %v2183_v21, %v2119_v53  ;;  %v7370_v3 = vadd.f32 %v2201_v33, %v2137_v29  ;;  %v10387_v16 = vld [vmem:[#allocation109_spill] sm:$0xff]  ;;  %v10388_v53 = vld [vmem:[#allocation127_spill] sm:$0xff] }
 0x234   : > { %v7372_v48 = vadd.f32 %v2219_v5, %v2155_v18  ;;  %v1816_v61 = vadd.f32 %v1808_v59, %v10379_v54  ;;  %v1834_v12 = vadd.f32 %v1826_v27, %v10380_v39  ;;  %v1852_v20 = vadd.f32 %v1844_v57, %v10381_v11  ;;  %v10383_v5 = vld [vmem:[#allocation51_spill] sm:$0xff]  ;;  %v1728_v11 = vpop.permute.xlu0 %1727 }
 0x235   : > { %10375 = vst [vmem:[#allocation163_spill] sm:$0xff] %v7366_v44  ;;  %10376 = vst [vmem:[#allocation166_spill] sm:$0xff] %v7368_v10  ;;  %v1870_v26 = vadd.f32 %v1862_v19, %v10382_v22  ;;  %v1807_v0 = vmul.f32 %v6831_v15, %v1791_v1  ;;  %v1825_v63 = vmul.f32 %v6834_v32, %v1791_v1  ;;  %v2828_v40 = vrot.slane %v10383_v5, 1  ;;  %v10434_v10 = vld [vmem:[#allocation61_spill] sm:$0xff] }
 0x236   : > { %10377 = vst [vmem:[#allocation160_spill] sm:$0xff] %v7370_v3  ;;  %10378 = vst [vmem:[#allocation174_spill] sm:$0xff] %v7372_v48  ;;  %v1843_v21 = vmul.f32 %v6855_v43, %v1791_v1  ;;  %v1861_v33 = vmul.f32 %v6862_v56, %v1791_v1  ;;  %v2829_v51 = vrot.slane %v10384_v36, 1  ;;  %v2819_v30 = vrot.slane %v10371_v49, 1  ;;  %v1730_v39 = vpop.permute.xlu1 %1729 }
 0x237   : > { %v2820_v46 = vrot.slane %v10366_v47, 1  ;;  %v1815_v28 = vadd.f32 %v1807_v0, %v10385_v50  ;;  %v1833_v62 = vadd.f32 %v1825_v63, %v10386_v34  ;;  %v1794_v1 = vsel %vm645_vm1, 0.0, %v1726_v13 }
 0x238   : > { %v1851_v15 = vadd.f32 %v1843_v21, %v10387_v16  ;;  %v1869_v32 = vadd.f32 %v1861_v33, %v10388_v53  ;;  %v7391_v43 = vsel %vm2791_vm3, %v2828_v40, %v2829_v51  ;;  %v1793_v49 = vsel %vm645_vm1, 0.0, %v1724_v4 }
 0x239   : > { %10389 = vst [vmem:[#allocation175_spill] sm:$0xff] %v7391_v43  ;;  %v7394_v56 = vsel %vm2791_vm3, %v2819_v30, %v2820_v46  ;;  %2952 = vrot.lane.b32.xlu1 %v7391_v43, %s10024_s10  ;;  %v1880_v47 = vmul.f32 %v6897_v55, %v1794_v1  ;;  %v1898_v29 = vmul.f32 %v6900_v58, %v1794_v1  ;;  %v7406_v59 = vsel %vm2791_vm3, %v2820_v46, 0.0 }
 0x23a   : > { %10390 = vst [vmem:[#allocation176_spill] sm:$0xff] %v7394_v56  ;;  %2940 = vrot.lane.b32.xlu0 %v7394_v56, %s10024_s10  ;;  %v1916_v18 = vmul.f32 %v6903_v31, %v1794_v1  ;;  %10391 = vst [vmem:[#allocation178_spill] sm:$0xff] %v7406_v59  ;;  %v1934_v27 = vmul.f32 %v10313_v60, %v1794_v1  ;;  %v1879_v57 = vmul.f32 %v6897_v55, %v1793_v49 }
 0x23b   : > { %v1897_v19 = vmul.f32 %v6900_v58, %v1793_v49  ;;  %v1915_v54 = vmul.f32 %v6903_v31, %v1793_v49  ;;  %v1888_v22 = vadd.f32 %v1880_v47, %v1816_v61  ;;  %v1906_v13 = vadd.f32 %v1898_v29, %v1834_v12  ;;  %v10394_v29 = vld [vmem:[#allocation54_spill] sm:$0xff] }
 0x23c   : > { %v1924_v4 = vadd.f32 %v1916_v18, %v1852_v20  ;;  %v1933_v0 = vmul.f32 %v10313_v60, %v1793_v49  ;;  %v1942_v63 = vadd.f32 %v1934_v27, %v1870_v26  ;;  %v1887_v21 = vadd.f32 %v1879_v57, %v1815_v28  ;;  %v10393_v49 = vld [vmem:[#allocation56_spill] sm:$0xff]  ;;  %v1734_v27 = vpop.permute.xlu1 %1733 }
 0x23d   : > { %v1905_v33 = vadd.f32 %v1897_v19, %v1833_v62  ;;  %v1923_v40 = vadd.f32 %v1915_v54, %v1851_v15  ;;  %2942 = vrot.lane.b32.xlu1 %v7406_v59, %s10024_s10  ;;  %v7416_v55 = vsel %vm2791_vm3, %v2829_v51, 0.0  ;;  %v1796_v58 = vsel %vm645_vm1, 0.0, %v1730_v39  ;;  %v10397_v19 = vld [vmem:[#allocation136_spill] sm:$0xff]  ;;  %v10398_v39 = vld [vmem:[#allocation137_spill] sm:$0xff] }
 0x23e   : > { %v1941_v30 = vadd.f32 %v1933_v0, %v1869_v32  ;;  %10392 = vst [vmem:[#allocation73_spill] sm:$0xff] %v7416_v55  ;;  %v1795_v31 = vsel %vm645_vm1, 0.0, %v1728_v11  ;;  %2954 = vrot.lane.b32.xlu0 %v7416_v55, %s10024_s10  ;;  %v1952_v60 = vmul.f32 %v10319_v9, %v1796_v58  ;;  %v1970_v61 = vmul.f32 %v10320_v37, %v1796_v58 }
 0x23f   : > { %v1988_v12 = vmul.f32 %v10321_v6, %v1796_v58  ;;  %v2006_v20 = vmul.f32 %v10322_v45, %v1796_v58  ;;  %v1951_v26 = vmul.f32 %v10319_v9, %v1795_v31  ;;  %v1969_v51 = vmul.f32 %v10320_v37, %v1795_v31  ;;  %v10395_v37 = vld [vmem:[#allocation134_spill] sm:$0xff] }
 0x240   : > { %v1987_v46 = vmul.f32 %v10321_v6, %v1795_v31  ;;  %v2005_v50 = vmul.f32 %v10322_v45, %v1795_v31  ;;  %v1960_v28 = vadd.f32 %v1952_v60, %v1888_v22  ;;  %v1978_v34 = vadd.f32 %v1970_v61, %v1906_v13  ;;  %v10396_v45 = vld [vmem:[#allocation135_spill] sm:$0xff]  ;;  %v10399_v22 = vld [vmem:[#allocation138_spill] sm:$0xff] }
 0x241   : > { %v1996_v62 = vadd.f32 %v1988_v12, %v1924_v4  ;;  %v2014_v16 = vadd.f32 %v2006_v20, %v1942_v63  ;;  %v1959_v15 = vadd.f32 %v1951_v26, %v1887_v21  ;;  %v1977_v53 = vadd.f32 %v1969_v51, %v1905_v33  ;;  %v1732_v12 = vpop.permute.xlu0 %1731 }
 0x242   : > { %v1995_v32 = vadd.f32 %v1987_v46, %v1923_v40  ;;  %v2013_v1 = vadd.f32 %v2005_v50, %v1941_v30  ;;  %v2832_v47 = vrot.slane %v10393_v49, 1  ;;  %v2831_v18 = vrot.slane %v10394_v29, 1 }
 0x243   : > { %v2096_v9 = vmul.f32 %v10326_v52, %v10384_v36  ;;  %v2114_v6 = vmul.f32 %v10395_v37, %v10384_v36  ;;  %v2132_v57 = vmul.f32 %v10396_v45, %v10384_v36  ;;  %v2150_v54 = vmul.f32 %v10397_v19, %v10384_v36 }
 0x244   : > { %v2168_v11 = vmul.f32 %v10398_v39, %v10393_v49  ;;  %v2186_v13 = vmul.f32 %v10399_v22, %v10393_v49  ;;  %v7445_v4 = vsel %vm2791_vm3, %v2832_v47, 0.0  ;;  %v7448_v0 = vsel %vm2791_vm3, %v2831_v18, %v2832_v47 }
 0x245   : > { %10400 = vst [vmem:[#allocation161_spill] sm:$0xff] %v7445_v4  ;;  %10401 = vst [vmem:[#allocation78_spill] sm:$0xff] %v7448_v0  ;;  %v2204_v63 = vmul.f32 %v7011_v35, %v10393_v49  ;;  %v2222_v21 = vmul.f32 %v10332_v38, %v10393_v49  ;;  %2958 = vrot.lane.b32.xlu1 %v7445_v4, %s10024_s10  ;;  %2956 = vrot.lane.b32.xlu0 %v7448_v0, %s10024_s10  ;;  %v1798_v36 = vsel %vm645_vm1, 0.0, %v1734_v27  ;;  %v10435_v0 = vld [vmem:[#allocation60_spill] sm:$0xff] }
 0x246   : > { %v2095_v33 = vmul.f32 %v10326_v52, %v10383_v5  ;;  %v2113_v40 = vmul.f32 %v10395_v37, %v10383_v5  ;;  %v2131_v30 = vmul.f32 %v10396_v45, %v10383_v5  ;;  %v2024_v58 = vmul.f32 %v6947_v25, %v1798_v36  ;;  %v10402_v37 = vld [vmem:[#allocation48_spill] sm:$0xff]  ;;  %v10403_v45 = vld [vmem:[#allocation47_spill] sm:$0xff] }
 0x247   : > { %v2042_v31 = vmul.f32 %v6974_v41, %v1798_v36  ;;  %v2060_v60 = vmul.f32 %v6977_v42, %v1798_v36  ;;  %v2078_v61 = vmul.f32 %v6980_v24, %v1798_v36  ;;  %v2149_v52 = vmul.f32 %v10397_v19, %v10383_v5 }
 0x248   : > { %v2167_v20 = vmul.f32 %v10398_v39, %v10394_v29  ;;  %v2185_v26 = vmul.f32 %v10399_v22, %v10394_v29  ;;  %v2203_v51 = vmul.f32 %v7011_v35, %v10394_v29  ;;  %v2032_v46 = vadd.f32 %v2024_v58, %v1960_v28 }
 0x249   : > { %v2050_v50 = vadd.f32 %v2042_v31, %v1978_v34  ;;  %v2068_v49 = vadd.f32 %v2060_v60, %v1996_v62  ;;  %v2086_v47 = vadd.f32 %v2078_v61, %v2014_v16  ;;  %v2221_v5 = vmul.f32 %v10332_v38, %v10394_v29 }
 0x24a   : > { %v1797_v18 = vsel %vm645_vm1, 0.0, %v1732_v12  ;;  %v2823_v27 = vrot.slane %v10402_v37, 1  ;;  %v2822_v19 = vrot.slane %v10403_v45, 1  ;;  %v2104_v39 = vadd.f32 %v2096_v9, %v2032_v46 }
 0x24b   : > { %v2122_v22 = vadd.f32 %v2114_v6, %v2050_v50  ;;  %v2140_v35 = vadd.f32 %v2132_v57, %v2068_v49  ;;  %v2158_v28 = vadd.f32 %v2150_v54, %v2086_v47  ;;  %v2023_v34 = vmul.f32 %v6947_v25, %v1797_v18 }
 0x24c   : > { %v2041_v62 = vmul.f32 %v6974_v41, %v1797_v18  ;;  %v2059_v38 = vmul.f32 %v6977_v42, %v1797_v18  ;;  %v2077_v16 = vmul.f32 %v6980_v24, %v1797_v18  ;;  %v7502_v29 = vadd.f32 %v2168_v11, %v2104_v39 }
 0x24d   : > { %v7504_v9 = vadd.f32 %v2186_v13, %v2122_v22  ;;  %v7506_v6 = vadd.f32 %v2204_v63, %v2140_v35  ;;  %v7508_v57 = vadd.f32 %v2222_v21, %v2158_v28  ;;  %v2031_v25 = vadd.f32 %v2023_v34, %v1959_v15  ;;  %v10410_v21 = vld [vmem:[#allocation32_spill] sm:$0xff]  ;;  %v10416_v28 = vld [vmem:[#allocation110_spill] sm:$0xff] }
 0x24e   : > { %10404 = vst [vmem:[#allocation164_spill] sm:$0xff] %v7502_v29  ;;  %v2049_v41 = vadd.f32 %v2041_v62, %v1977_v53  ;;  %v2067_v42 = vadd.f32 %v2059_v38, %v1995_v32  ;;  %v2085_v24 = vadd.f32 %v2077_v16, %v2013_v1  ;;  %v7519_v54 = vsel %vm2791_vm3, %v2823_v27, 0.0  ;;  %v10417_v62 = vld [vmem:[#allocation67_spill] sm:$0xff] }
 0x24f   : > { %10405 = vst [vmem:[#allocation79_spill] sm:$0xff] %v7504_v9  ;;  %10406 = vst [vmem:[#allocation165_spill] sm:$0xff] %v7506_v6  ;;  %v7522_v11 = vsel %vm2791_vm3, %v2822_v19, %v2823_v27  ;;  %v7525_v13 = vstv %s7469_s5  ;;  %v7528_v63 = vstv %s7471_s11  ;;  %v2103_v15 = vadd.f32 %v2095_v33, %v2031_v25  ;;  %2946 = vrot.lane.b32.xlu1 %v7519_v54, %s10024_s10  ;;  %v10418_v16 = vld [vmem:[#allocation111_spill] sm:$0xff]  ;;  %s8109_s5 = sld [smem:[#allocation8 + $0x33]]  ;;  %s8117_s11 = sld [smem:[#allocation8 + $0x57]] }
 0x250   : > { %10407 = vst [vmem:[#allocation167_spill] sm:$0xff] %v7508_v57  ;;  %10408 = vst [vmem:[#allocation168_spill] sm:$0xff] %v7519_v54  ;;  %v2121_v53 = vadd.f32 %v2113_v40, %v2049_v41  ;;  %v2139_v32 = vadd.f32 %v2131_v30, %v2067_v42  ;;  %v2157_v1 = vadd.f32 %v2149_v52, %v2085_v24  ;;  %2944 = vrot.lane.b32.xlu0 %v7522_v11, %s10024_s10  ;;  %v10419_v41 = vld [vmem:[#allocation68_spill] sm:$0xff] }
 0x251   : > { %10409 = vst [vmem:[#allocation170_spill] sm:$0xff] %v7522_v11  ;;  %v2234_v36 = vmul.f32 %v7525_v13, %v10410_v21  ;;  %v2252_v58 = vmul.f32 %v7528_v63, %v10410_v21  ;;  %v7539_v33 = vstv %s7481_s8  ;;  %v7542_v40 = vstv %s7483_s0  ;;  %s8119_s8 = sld [smem:[#allocation8 + $0x7b]]  ;;  %s8128_s0 = sld [smem:[#allocation8 + $0x18]] }
 0x252   : > { %v7544_v30 = vadd.f32 %v2167_v20, %v2103_v15  ;;  %v7546_v31 = vadd.f32 %v2185_v26, %v2121_v53  ;;  %v7548_v60 = vadd.f32 %v2203_v51, %v2139_v32  ;;  %v7550_v61 = vadd.f32 %v2221_v5, %v2157_v1  ;;  %v10415_v20 = vld [vmem:[#allocation34_spill] sm:$0xff]  ;;  %v2378_v5 = vpop.permute.xlu1 %2377  ;;  %v10420_v15 = vld [vmem:[#allocation31_spill] sm:$0xff] }
 0x253   : > { %v2270_v12 = vmul.f32 %v7539_v33, %v10410_v21  ;;  %v2288_v52 = vmul.f32 %v7542_v40, %v10410_v21  ;;  %v7557_v46 = vstv %s7490_s2  ;;  %v7560_v50 = vstv %s7492_s6  ;;  %s8146_s2 = sld [smem:[#allocation8 + $0x3c]]  ;;  %s8161_s6 = sld [smem:[#allocation8 + $0x60]] }
 0x254   : > { %10411 = vst [vmem:[#allocation171_spill] sm:$0xff] %v7544_v30  ;;  %10412 = vst [vmem:[#allocation80_spill] sm:$0xff] %v7546_v31  ;;  %v2306_v26 = vmul.f32 %v7557_v46, %v10415_v20  ;;  %v2324_v51 = vmul.f32 %v7560_v50, %v10415_v20  ;;  %v7567_v49 = vstv %s7498_s25  ;;  %v7570_v47 = vstv %s7500_s1  ;;  %s8163_s25 = sld [smem:[#allocation8 + $0x84]]  ;;  %s8187_s1 = sld [smem:[#allocation8 + $0x21]] }
 0x255   : > { %10413 = vst [vmem:[#allocation169_spill] sm:$0xff] %v7548_v60  ;;  %10414 = vst [vmem:[#allocation81_spill] sm:$0xff] %v7550_v61  ;;  %v2342_v18 = vmul.f32 %v7567_v49, %v10415_v20  ;;  %v2360_v27 = vmul.f32 %v7570_v47, %v10415_v20  ;;  %v7577_v19 = vstv %s7510_s19  ;;  %v7580_v39 = vstv %s7512_s16  ;;  %s8189_s19 = sld [smem:[#allocation8 + $0x45]]  ;;  %s8195_s16 = sld [smem:[#allocation8 + $0x69]] }
 0x256   : > { %v7583_v22 = vstv %s7514_s17  ;;  %v7586_v35 = vstv %s7516_s4  ;;  %v2242_v34 = vadd.f32 %v2234_v36, %v10416_v28  ;;  %v2260_v38 = vadd.f32 %v2252_v58, %v10417_v62  ;;  %s8197_s17 = sld [smem:[#allocation8 + $0x8d]]  ;;  %s8205_s4 = sld [smem:[#allocation8 + $0x7]] }
 0x257   : > { %v2278_v25 = vadd.f32 %v2270_v12, %v10418_v16  ;;  %v2296_v42 = vadd.f32 %v2288_v52, %v10419_v41  ;;  %v2472_v24 = vsel %vm1350_vm2, %v2378_v5, 0.0  ;;  %v2233_v53 = vmul.f32 %v7525_v13, %v10420_v15  ;;  %v10421_v5 = vld [vmem:[#allocation139_spill] sm:$0xff] }
 0x258   : > { %v2314_v32 = vadd.f32 %v2306_v26, %v2242_v34  ;;  %v2332_v1 = vadd.f32 %v2324_v51, %v2260_v38  ;;  %v2506_v21 = vmul.f32 %v7577_v19, %v2472_v24  ;;  %v2524_v20 = vmul.f32 %v7580_v39, %v2472_v24  ;;  %v2376_v51 = vpop.permute.xlu0 %2375  ;;  %v10422_v38 = vld [vmem:[#allocation140_spill] sm:$0xff] }
 0x259   : > { %v2350_v61 = vadd.f32 %v2342_v18, %v2278_v25  ;;  %v2368_v60 = vadd.f32 %v2360_v27, %v2296_v42  ;;  %v2542_v36 = vmul.f32 %v7583_v22, %v2472_v24  ;;  %v2560_v58 = vmul.f32 %v7586_v35, %v2472_v24  ;;  %v10423_v25 = vld [vmem:[#allocation33_spill] sm:$0xff] }
 0x25a   : > { %v2514_v12 = vadd.f32 %v2506_v21, %v2314_v32  ;;  %v2532_v52 = vadd.f32 %v2524_v20, %v2332_v1  ;;  %v2241_v28 = vadd.f32 %v2233_v53, %v10421_v5  ;;  %v2251_v26 = vmul.f32 %v7528_v63, %v10420_v15  ;;  %v10424_v53 = vld [vmem:[#allocation141_spill] sm:$0xff] }
 0x25b   : > { %v2550_v18 = vadd.f32 %v2542_v36, %v2350_v61  ;;  %v2568_v27 = vadd.f32 %v2560_v58, %v2368_v60  ;;  %v2269_v34 = vmul.f32 %v7539_v33, %v10420_v15  ;;  %v2287_v62 = vmul.f32 %v7542_v40, %v10420_v15  ;;  %v10425_v60 = vld [vmem:[#allocation142_spill] sm:$0xff] }
 0x25c   : > { %v2259_v16 = vadd.f32 %v2251_v26, %v10422_v38  ;;  %v2305_v41 = vmul.f32 %v7557_v46, %v10423_v25  ;;  %v2323_v42 = vmul.f32 %v7560_v50, %v10423_v25  ;;  %v2341_v24 = vmul.f32 %v7567_v49, %v10423_v25 }
 0x25d   : > { %v2277_v61 = vadd.f32 %v2269_v34, %v10424_v53  ;;  %v2295_v32 = vadd.f32 %v2287_v62, %v10425_v60  ;;  %v2359_v1 = vmul.f32 %v7570_v47, %v10423_v25  ;;  %v2471_v15 = vsel %vm1350_vm2, %v2376_v51, 0.0  ;;  %v10426_v25 = vld [vmem:[#allocation59_spill] sm:$0xff] }
 0x25e   : > { %v2313_v21 = vadd.f32 %v2305_v41, %v2241_v28  ;;  %v2331_v20 = vadd.f32 %v2323_v42, %v2259_v16  ;;  %v2505_v36 = vmul.f32 %v7577_v19, %v2471_v15  ;;  %v2523_v58 = vmul.f32 %v7580_v39, %v2471_v15  ;;  %v10427_v28 = vld [vmem:[#allocation58_spill] sm:$0xff]  ;;  %v2382_v41 = vpop.permute.xlu1 %2381  ;;  %v2380_v42 = vpop.permute.xlu0 %2379 }
 0x25f   : > { %v2349_v5 = vadd.f32 %v2341_v24, %v2277_v61  ;;  %v2367_v26 = vadd.f32 %v2359_v1, %v2295_v32  ;;  %v2541_v38 = vmul.f32 %v7583_v22, %v2471_v15  ;;  %v2559_v34 = vmul.f32 %v7586_v35, %v2471_v15 }
 0x260   : > { %v2513_v62 = vadd.f32 %v2505_v36, %v2313_v21  ;;  %v2531_v53 = vadd.f32 %v2523_v58, %v2331_v20  ;;  %v2835_v51 = vrot.slane %v10426_v25, 1  ;;  %v2834_v16 = vrot.slane %v10427_v28, 1 }
 0x261   : > { %v2549_v24 = vadd.f32 %v2541_v38, %v2349_v5  ;;  %v2567_v61 = vadd.f32 %v2559_v34, %v2367_v26  ;;  %v7637_v60 = vstv %s7599_s15  ;;  %v7640_v32 = vstv %s7601_s18  ;;  %v10430_v5 = vld [vmem:[#allocation50_spill] sm:$0xff]  ;;  %v10431_v38 = vld [vmem:[#allocation49_spill] sm:$0xff]  ;;  %s8207_s15 = sld [smem:[#allocation8 + $0x2b]]  ;;  %s8210_s18 = sld [smem:[#allocation8 + $0x4f]] }
 0x262   : > { %v7647_v1 = vsel %vm2791_vm3, %v2835_v51, 0.0  ;;  %v7650_v15 = vsel %vm2791_vm3, %v2834_v16, %v2835_v51  ;;  %v7653_v21 = vstv %s7606_s20  ;;  %v7656_v20 = vstv %s7608_s27  ;;  %s8212_s20 = sld [smem:[#allocation8 + $0x73]]  ;;  %s8214_s27 = sld [smem:[#allocation8 + $0x10]] }
 0x263   : > { %10428 = vst [vmem:[#allocation172_spill] sm:$0xff] %v7647_v1  ;;  %10429 = vst [vmem:[#allocation74_spill] sm:$0xff] %v7650_v15  ;;  %2962 = vrot.lane.b32.xlu1 %v7647_v1, %s10024_s10  ;;  %2960 = vrot.lane.b32.xlu0 %v7650_v15, %s10024_s10  ;;  %v2474_v36 = vsel %vm1350_vm2, %v2382_v41, 0.0  ;;  %v2473_v58 = vsel %vm1350_vm2, %v2380_v42, 0.0  ;;  %v2826_v26 = vrot.slane %v10430_v5, 1  ;;  %v2825_v34 = vrot.slane %v10431_v38, 1  ;;  %v2386_v15 = vpop.permute.xlu1 %2385  ;;  %v2384_v1 = vpop.permute.xlu0 %2383 }
 0x264   : > { %v2578_v51 = vmul.f32 %v7637_v60, %v2474_v36  ;;  %v2596_v16 = vmul.f32 %v7640_v32, %v2474_v36  ;;  %v2614_v31 = vmul.f32 %v7653_v21, %v2474_v36  ;;  %v2632_v30 = vmul.f32 %v7656_v20, %v2474_v36 }
 0x265   : > { %v2577_v28 = vmul.f32 %v7637_v60, %v2473_v58  ;;  %v2595_v57 = vmul.f32 %v7640_v32, %v2473_v58  ;;  %v2613_v41 = vmul.f32 %v7653_v21, %v2473_v58  ;;  %v2631_v42 = vmul.f32 %v7656_v20, %v2473_v58 }
 0x266   : > { %v2586_v6 = vadd.f32 %v2578_v51, %v2514_v12  ;;  %v2604_v9 = vadd.f32 %v2596_v16, %v2532_v52  ;;  %v2622_v29 = vadd.f32 %v2614_v31, %v2550_v18  ;;  %v2640_v25 = vadd.f32 %v2632_v30, %v2568_v27 }
 0x267   : > { %v2585_v36 = vadd.f32 %v2577_v28, %v2513_v62  ;;  %v2603_v11 = vadd.f32 %v2595_v57, %v2531_v53  ;;  %v2621_v54 = vadd.f32 %v2613_v41, %v2549_v24  ;;  %v2639_v48 = vadd.f32 %v2631_v42, %v2567_v61  ;;  %v2390_v42 = vpop.permute.xlu1 %2389 }
 0x268   : > { %v7683_v12 = vsel %vm2791_vm3, %v2826_v26, 0.0  ;;  %v7686_v30 = vsel %vm2791_vm3, %v2825_v34, %v2826_v26  ;;  %v7689_v31 = vstv %s7632_s28  ;;  %v7692_v52 = vstv %s7634_s22  ;;  %s8216_s28 = sld [smem:[#allocation8 + $0x34]]  ;;  %s8226_s22 = sld [smem:[#allocation8 + $0x58]] }
 0x269   : > { %10432 = vst [vmem:[#allocation173_spill] sm:$0xff] %v7683_v12  ;;  %10433 = vst [vmem:[#allocation75_spill] sm:$0xff] %v7686_v30  ;;  %2950 = vrot.lane.b32.xlu1 %v7683_v12, %s10024_s10  ;;  %2948 = vrot.lane.b32.xlu0 %v7686_v30, %s10024_s10  ;;  %v7699_v57 = vstv %s7642_s13  ;;  %v7702_v18 = vstv %s7644_s12  ;;  %v2476_v27 = vsel %vm1350_vm2, %v2386_v15, 0.0  ;;  %v2475_v62 = vsel %vm1350_vm2, %v2384_v1, 0.0  ;;  %v2388_v30 = vpop.permute.xlu0 %2387  ;;  %s8228_s13 = sld [smem:[#allocation8 + $0x7c]]  ;;  %s8576_s12 = sld [smem:[#allocation8 + $0x19]] }
 0x26a   : > { %v2650_v53 = vmul.f32 %v7689_v31, %v2476_v27  ;;  %v2668_v28 = vmul.f32 %v7692_v52, %v2476_v27  ;;  %v2686_v24 = vmul.f32 %v7699_v57, %v2476_v27  ;;  %v2704_v61 = vmul.f32 %v7702_v18, %v2476_v27 }
 0x26b   : > { %v2649_v58 = vmul.f32 %v7689_v31, %v2475_v62  ;;  %v2667_v26 = vmul.f32 %v7692_v52, %v2475_v62  ;;  %v2685_v34 = vmul.f32 %v7699_v57, %v2475_v62  ;;  %v2703_v15 = vmul.f32 %v7702_v18, %v2475_v62 }
 0x26c   : > { %v2658_v1 = vadd.f32 %v2650_v53, %v2586_v6  ;;  %v2676_v51 = vadd.f32 %v2668_v28, %v2604_v9  ;;  %v2694_v16 = vadd.f32 %v2686_v24, %v2622_v29  ;;  %v2712_v41 = vadd.f32 %v2704_v61, %v2640_v25  ;;  %v2394_v61 = vpop.permute.xlu1 %2393 }
 0x26d   : > { %v2657_v12 = vadd.f32 %v2649_v58, %v2585_v36  ;;  %v2675_v27 = vadd.f32 %v2667_v26, %v2603_v11  ;;  %v2693_v3 = vadd.f32 %v2685_v34, %v2621_v54  ;;  %v2711_v38 = vadd.f32 %v2703_v15, %v2639_v48 }
 0x26e   : > { %v2838_v44 = vrot.slane %v10434_v10, 1  ;;  %v2837_v4 = vrot.slane %v10435_v0, 1  ;;  %v7717_v45 = vstv %s7674_s24  ;;  %v7720_v14 = vstv %s7676_s21  ;;  %s8594_s24 = sld [smem:[#allocation8 + $0x3d]]  ;;  %s8607_s21 = sld [smem:[#allocation8 + $0x61]] }
 0x26f   : > { %v7723_v62 = vstv %s7678_s29  ;;  %v7726_v6 = vstv %s7680_s7  ;;  %v2478_v29 = vsel %vm1350_vm2, %v2390_v42, 0.0  ;;  %v2477_v9 = vsel %vm1350_vm2, %v2388_v30, 0.0  ;;  %s8609_s29 = sld [smem:[#allocation8 + $0x85]]  ;;  %s8623_s7 = sld [smem:[#allocation8 + $0x22]] }
 0x270   : > { %v7731_v11 = vsel %vm2791_vm3, %v2838_v44, 0.0  ;;  %v7734_v48 = vsel %vm2791_vm3, %v2837_v4, %v2838_v44  ;;  %v2722_v54 = vmul.f32 %v7717_v45, %v2478_v29  ;;  %v2740_v25 = vmul.f32 %v7720_v14, %v2478_v29 }
 0x271   : > { %10436 = vst [vmem:[#allocation177_spill] sm:$0xff] %v7731_v11  ;;  %10437 = vst [vmem:[#allocation179_spill] sm:$0xff] %v7734_v48  ;;  %2966 = vrot.lane.b32.xlu1 %v7731_v11, %s10024_s10  ;;  %2964 = vrot.lane.b32.xlu0 %v7734_v48, %s10024_s10  ;;  %v2758_v36 = vmul.f32 %v7723_v62, %v2478_v29  ;;  %v2776_v30 = vmul.f32 %v7726_v6, %v2478_v29  ;;  %s8082_s10 = sld [smem:[#allocation8 + $0x2a]] }
 0x272   : > { %v2721_v53 = vmul.f32 %v7717_v45, %v2477_v9  ;;  %v7745_v28 = vadd.f32 %v2722_v54, %v2658_v1  ;;  %v7747_v44 = vadd.f32 %v2740_v25, %v2676_v51  ;;  %v2739_v4 = vmul.f32 %v7720_v14, %v2477_v9  ;;  %v10445_v1 = vld [vmem:[#allocation40_spill] sm:$0xff] }
 0x273   : > { %v2757_v24 = vmul.f32 %v7723_v62, %v2477_v9  ;;  %v7751_v58 = vadd.f32 %v2758_v36, %v2694_v16  ;;  %v7753_v26 = vadd.f32 %v2776_v30, %v2712_v41  ;;  %v2775_v15 = vmul.f32 %v7726_v6, %v2477_v9  ;;  %v10447_v16 = vld [vmem:[#allocation112_spill] sm:$0xff]  ;;  %v2392_v9 = vpop.permute.xlu0 %2391  ;;  %v10449_v36 = vld [vmem:[#allocation146_spill] sm:$0xff] }
 0x274   : > { %10438 = vst [vmem:[#allocation180_spill] sm:$0xff] %v7745_v28  ;;  %10439 = vst [vmem:[#allocation181_spill] sm:$0xff] %v7747_v44  ;;  %v7755_v34 = vadd.f32 %v2721_v53, %v2657_v12  ;;  %v7758_v42 = vadd.f32 %v2739_v4, %v2675_v27  ;;  %v2236_v51 = vmul.f32 %v7525_v13, %v10445_v1  ;;  %v10448_v12 = vld [vmem:[#allocation113_spill] sm:$0xff]  ;;  %v2480_v27 = vsel %vm1350_vm2, %v2394_v61, 0.0  ;;  %v10451_v4 = vld [vmem:[#allocation42_spill] sm:$0xff] }
 0x275   : > { %10440 = vst [vmem:[#allocation182_spill] sm:$0xff] %v7751_v58  ;;  %10441 = vst [vmem:[#allocation183_spill] sm:$0xff] %v7753_v26  ;;  %v7760_v29 = vadd.f32 %v2757_v24, %v2693_v3  ;;  %v2254_v54 = vmul.f32 %v7528_v63, %v10445_v1  ;;  %v7766_v25 = vadd.f32 %v2775_v15, %v2711_v38  ;;  %3610 = vrot.lane.b32.xlu1 %v10447_v16, %s4764_s26  ;;  %v10450_v53 = vld [vmem:[#allocation69_spill] sm:$0xff]  ;;  %v10455_v58 = vld [vmem:[#allocation39_spill] sm:$0xff] }
 0x276   : > { %10442 = vst [vmem:[#allocation184_spill] sm:$0xff] %v7755_v34  ;;  %10443 = vst [vmem:[#allocation185_spill] sm:$0xff] %v7758_v42  ;;  %3608 = vrot.lane.b32.xlu0 %v10448_v12, %s4764_s26  ;;  %v2272_v41 = vmul.f32 %v7539_v33, %v10445_v1  ;;  %v2290_v3 = vmul.f32 %v7542_v40, %v10445_v1  ;;  %v2244_v30 = vadd.f32 %v2236_v51, %v10449_v36  ;;  %v10452_v12 = vld [vmem:[#allocation147_spill] sm:$0xff] }
 0x277   : > { %10444 = vst [vmem:[#allocation186_spill] sm:$0xff] %v7760_v29  ;;  %10446 = vst [vmem:[#allocation187_spill] sm:$0xff] %v7766_v25  ;;  %v2262_v38 = vadd.f32 %v2254_v54, %v10450_v53  ;;  %v2308_v24 = vmul.f32 %v7557_v46, %v10451_v4  ;;  %v2326_v15 = vmul.f32 %v7560_v50, %v10451_v4  ;;  %v10453_v25 = vld [vmem:[#allocation70_spill] sm:$0xff]  ;;  %v2479_v36 = vsel %vm1350_vm2, %v2392_v9, 0.0 }
 0x278   : > { %v2280_v16 = vadd.f32 %v2272_v41, %v10452_v12  ;;  %v2298_v29 = vadd.f32 %v2290_v3, %v10453_v25  ;;  %v2344_v1 = vmul.f32 %v7567_v49, %v10451_v4  ;;  %v2362_v61 = vmul.f32 %v7570_v47, %v10451_v4  ;;  %v10454_v25 = vld [vmem:[#allocation148_spill] sm:$0xff] }
 0x279   : > { %v2316_v42 = vadd.f32 %v2308_v24, %v2244_v30  ;;  %v2508_v51 = vmul.f32 %v7577_v19, %v2480_v27  ;;  %v2526_v54 = vmul.f32 %v7580_v39, %v2480_v27  ;;  %v2334_v53 = vadd.f32 %v2326_v15, %v2262_v38  ;;  %3626 = vrot.lane.b32.xlu1 %v10454_v25, %s4764_s26  ;;  %v10456_v24 = vld [vmem:[#allocation71_spill] sm:$0xff]  ;;  %v2396_v15 = vpop.permute.xlu0 %2395  ;;  %v10459_v25 = vld [vmem:[#allocation41_spill] sm:$0xff] }
 0x27a   : > { %v2352_v34 = vadd.f32 %v2344_v1, %v2280_v16  ;;  %v2370_v26 = vadd.f32 %v2362_v61, %v2298_v29  ;;  %v2544_v12 = vmul.f32 %v7583_v22, %v2480_v27  ;;  %v2562_v3 = vmul.f32 %v7586_v35, %v2480_v27  ;;  %3624 = vrot.lane.b32.xlu0 %v10456_v24, %s4764_s26  ;;  %v10457_v27 = vld [vmem:[#allocation149_spill] sm:$0xff]  ;;  %v10458_v61 = vld [vmem:[#allocation72_spill] sm:$0xff] }
 0x27b   : > { %v2516_v41 = vadd.f32 %v2508_v51, %v2316_v42  ;;  %v2235_v30 = vmul.f32 %v7525_v13, %v10455_v58  ;;  %v2253_v4 = vmul.f32 %v7528_v63, %v10455_v58  ;;  %v2534_v9 = vadd.f32 %v2526_v54, %v2334_v53  ;;  %v2398_v42 = vpop.permute.xlu1 %2397  ;;  %v10460_v54 = vld [vmem:[#allocation150_spill] sm:$0xff]  ;;  %v10461_v53 = vld [vmem:[#allocation151_spill] sm:$0xff] }
 0x27c   : > { %v2552_v16 = vadd.f32 %v2544_v12, %v2352_v34  ;;  %v2271_v29 = vmul.f32 %v7539_v33, %v10455_v58  ;;  %v2289_v38 = vmul.f32 %v7542_v40, %v10455_v58  ;;  %v2307_v44 = vmul.f32 %v7557_v46, %v10459_v25 }
 0x27d   : > { %v2243_v1 = vadd.f32 %v2235_v30, %v10457_v27  ;;  %v2261_v51 = vadd.f32 %v2253_v4, %v10458_v61  ;;  %v2325_v24 = vmul.f32 %v7560_v50, %v10459_v25  ;;  %v2343_v28 = vmul.f32 %v7567_v49, %v10459_v25  ;;  %3642 = vrot.lane.b32.xlu1 %v7351_v23, %s4764_s26 }
 0x27e   : > { %v2279_v34 = vadd.f32 %v2271_v29, %v10460_v54  ;;  %v2297_v12 = vadd.f32 %v2289_v38, %v10461_v53  ;;  %v2361_v58 = vmul.f32 %v7570_v47, %v10459_v25  ;;  %v2570_v30 = vadd.f32 %v2562_v3, %v2370_v26  ;;  %3640 = vrot.lane.b32.xlu0 %v7354_v17, %s4764_s26  ;;  %v2400_v17 = vpop.permute.xlu0 %2399 }
 0x27f   : > { %v2315_v4 = vadd.f32 %v2307_v44, %v2243_v1  ;;  %v2507_v27 = vmul.f32 %v7577_v19, %v2479_v36  ;;  %v2525_v61 = vmul.f32 %v7580_v39, %v2479_v36  ;;  %v2333_v29 = vadd.f32 %v2325_v24, %v2261_v51  ;;  %v2402_v0 = vpop.permute.xlu1 %2401 }
 0x280   : > { %v2351_v38 = vadd.f32 %v2343_v28, %v2279_v34  ;;  %v2543_v54 = vmul.f32 %v7583_v22, %v2479_v36  ;;  %v2561_v53 = vmul.f32 %v7586_v35, %v2479_v36  ;;  %v2369_v48 = vadd.f32 %v2361_v58, %v2297_v12 }
 0x281   : > { %v2515_v25 = vadd.f32 %v2507_v27, %v2315_v4  ;;  %v2482_v11 = vsel %vm1350_vm2, %v2398_v42, 0.0  ;;  %v2481_v26 = vsel %vm1350_vm2, %v2396_v15, 0.0  ;;  %v2533_v44 = vadd.f32 %v2525_v61, %v2333_v29  ;;  %3658 = vrot.lane.b32.xlu1 %v7416_v55, %s4764_s26  ;;  %v10462_v55 = vld [vmem:[#allocation114_spill] sm:$0xff] }
 0x282   : > { %v2551_v3 = vadd.f32 %v2543_v54, %v2351_v38  ;;  %v2580_v1 = vmul.f32 %v7637_v60, %v2482_v11  ;;  %v2598_v23 = vmul.f32 %v7640_v32, %v2482_v11  ;;  %v2616_v28 = vmul.f32 %v7653_v21, %v2482_v11  ;;  %3656 = vrot.lane.b32.xlu0 %v7391_v43, %s4764_s26 }
 0x283   : > { %v2634_v36 = vmul.f32 %v7656_v20, %v2482_v11  ;;  %v2579_v24 = vmul.f32 %v7637_v60, %v2481_v26  ;;  %v2597_v42 = vmul.f32 %v7640_v32, %v2481_v26  ;;  %v2569_v15 = vadd.f32 %v2561_v53, %v2369_v48 }
 0x284   : > { %v2588_v51 = vadd.f32 %v2580_v1, %v2516_v41  ;;  %v2615_v34 = vmul.f32 %v7653_v21, %v2481_v26  ;;  %v2633_v12 = vmul.f32 %v7656_v20, %v2481_v26  ;;  %v2606_v58 = vadd.f32 %v2598_v23, %v2534_v9  ;;  %v10463_v9 = vld [vmem:[#allocation115_spill] sm:$0xff]  ;;  %v2404_v26 = vpop.permute.xlu0 %2403 }
 0x285   : > { %v2624_v4 = vadd.f32 %v2616_v28, %v2552_v16  ;;  %v2642_v27 = vadd.f32 %v2634_v36, %v2570_v30  ;;  %v2587_v61 = vadd.f32 %v2579_v24, %v2515_v25  ;;  %v2605_v29 = vadd.f32 %v2597_v42, %v2533_v44  ;;  %3614 = vrot.lane.b32.xlu1 %v10462_v55, %s4764_s26  ;;  %v2406_v25 = vpop.permute.xlu1 %2405 }
 0x286   : > { %v2623_v38 = vadd.f32 %v2615_v34, %v2551_v3  ;;  %v2484_v11 = vsel %vm1350_vm2, %v2402_v0, 0.0  ;;  %v2483_v54 = vsel %vm1350_vm2, %v2400_v17, 0.0  ;;  %3612 = vrot.lane.b32.xlu0 %v10463_v9, %s4764_s26  ;;  %v2641_v16 = vadd.f32 %v2633_v12, %v2569_v15 }
 0x287   : > { %v2652_v48 = vmul.f32 %v7689_v31, %v2484_v11  ;;  %v2670_v41 = vmul.f32 %v7692_v52, %v2484_v11  ;;  %v2688_v53 = vmul.f32 %v7699_v57, %v2484_v11  ;;  %v2706_v23 = vmul.f32 %v7702_v18, %v2484_v11  ;;  %v10464_v11 = vld [vmem:[#allocation152_spill] sm:$0xff] }
 0x288   : > { %v2651_v30 = vmul.f32 %v7689_v31, %v2483_v54  ;;  %v2669_v0 = vmul.f32 %v7692_v52, %v2483_v54  ;;  %v2687_v17 = vmul.f32 %v7699_v57, %v2483_v54  ;;  %v2705_v28 = vmul.f32 %v7702_v18, %v2483_v54 }
 0x289   : > { %v2660_v44 = vadd.f32 %v2652_v48, %v2588_v51  ;;  %v2678_v3 = vadd.f32 %v2670_v41, %v2606_v58  ;;  %v2696_v1 = vadd.f32 %v2688_v53, %v2624_v4  ;;  %v2714_v36 = vadd.f32 %v2706_v23, %v2642_v27  ;;  %3630 = vrot.lane.b32.xlu1 %v10464_v11, %s4764_s26  ;;  %v10465_v58 = vld [vmem:[#allocation153_spill] sm:$0xff] }
 0x28a   : > { %v2659_v24 = vadd.f32 %v2651_v30, %v2587_v61  ;;  %v2677_v42 = vadd.f32 %v2669_v0, %v2605_v29  ;;  %v2695_v34 = vadd.f32 %v2687_v17, %v2623_v38  ;;  %v2486_v15 = vsel %vm1350_vm2, %v2406_v25, 0.0  ;;  %3628 = vrot.lane.b32.xlu0 %v10465_v58, %s4764_s26 }
 0x28b   : > { %v2485_v12 = vsel %vm1350_vm2, %v2404_v26, 0.0  ;;  %v2238_v43 = vmul.f32 %v7525_v13, %v10402_v37  ;;  %v2256_v51 = vmul.f32 %v7528_v63, %v10402_v37  ;;  %v2724_v4 = vmul.f32 %v7717_v45, %v2486_v15 }
 0x28c   : > { %v2742_v27 = vmul.f32 %v7720_v14, %v2486_v15  ;;  %v2760_v61 = vmul.f32 %v7723_v62, %v2486_v15  ;;  %v2778_v29 = vmul.f32 %v7726_v6, %v2486_v15  ;;  %v2713_v38 = vadd.f32 %v2705_v28, %v2641_v16  ;;  %v2410_v28 = vpop.permute.xlu1 %2409 }
 0x28d   : > { %v2723_v54 = vmul.f32 %v7717_v45, %v2485_v12  ;;  %v2741_v48 = vmul.f32 %v7720_v14, %v2485_v12  ;;  %v2759_v41 = vmul.f32 %v7723_v62, %v2485_v12  ;;  %v7871_v53 = vadd.f32 %v2724_v4, %v2660_v44  ;;  %3646 = vrot.lane.b32.xlu1 %v7406_v59, %s4764_s26 }
 0x28e   : > { %v7873_v23 = vadd.f32 %v2742_v27, %v2678_v3  ;;  %v7875_v30 = vadd.f32 %v2760_v61, %v2696_v1  ;;  %v2777_v0 = vmul.f32 %v7726_v6, %v2485_v12  ;;  %v7880_v17 = vadd.f32 %v2778_v29, %v2714_v36  ;;  %3644 = vrot.lane.b32.xlu0 %v7394_v56, %s4764_s26  ;;  %v10470_v27 = vld [vmem:[#allocation161_spill] sm:$0xff]  ;;  %v10473_v56 = vld [vmem:[#allocation163_spill] sm:$0xff] }
 0x28f   : > { %v7882_v16 = vadd.f32 %v2723_v54, %v2659_v24  ;;  %v7884_v25 = vadd.f32 %v2741_v48, %v2677_v42  ;;  %v7886_v26 = vadd.f32 %v2759_v41, %v2695_v34  ;;  %v2246_v44 = vadd.f32 %v2238_v43, %v7342_v2  ;;  %v2408_v24 = vpop.permute.xlu0 %2407  ;;  %v10468_v43 = vld [vmem:[#allocation158_spill] sm:$0xff] }
 0x290   : > { %v2264_v3 = vadd.f32 %v2256_v51, %v7344_v7  ;;  %v2274_v1 = vmul.f32 %v7539_v33, %v10402_v37  ;;  %v2292_v36 = vmul.f32 %v7542_v40, %v10402_v37  ;;  %v2310_v42 = vmul.f32 %v7557_v46, %v10430_v5  ;;  %v10469_v37 = vld [vmem:[#allocation47_spill] sm:$0xff] }
 0x291   : > { %10466 = vst [vmem:[#allocation188_spill] sm:$0xff] %v7884_v25  ;;  %10467 = vst [vmem:[#allocation55_spill] sm:$0xff] %v7886_v26  ;;  %v2328_v34 = vmul.f32 %v7560_v50, %v10430_v5  ;;  %v2346_v15 = vmul.f32 %v7567_v49, %v10430_v5  ;;  %v2364_v2 = vmul.f32 %v7570_v47, %v10430_v5  ;;  %v2488_v51 = vsel %vm1350_vm2, %v2410_v28, 0.0  ;;  %v10472_v5 = vld [vmem:[#allocation78_spill] sm:$0xff] }
 0x292   : > { %v2282_v7 = vadd.f32 %v2274_v1, %v7346_v8  ;;  %v2300_v12 = vadd.f32 %v2292_v36, %v10468_v43  ;;  %v2237_v4 = vmul.f32 %v7525_v13, %v10469_v37  ;;  %3662 = vrot.lane.b32.xlu1 %v10470_v27, %s4764_s26  ;;  %v7911_v61 = vadd.f32 %v2777_v0, %v2713_v38 }
 0x293   : > { %v2318_v29 = vadd.f32 %v2310_v42, %v2246_v44  ;;  %v2510_v54 = vmul.f32 %v7577_v19, %v2488_v51  ;;  %v2528_v48 = vmul.f32 %v7580_v39, %v2488_v51  ;;  %3660 = vrot.lane.b32.xlu0 %v10472_v5, %s4764_s26  ;;  %v2336_v8 = vadd.f32 %v2328_v34, %v2264_v3  ;;  %v2414_v34 = vpop.permute.xlu1 %2413 }
 0x294   : > { %10471 = vst [vmem:[#allocation104_spill] sm:$0xff] %v7911_v61  ;;  %v2354_v41 = vadd.f32 %v2346_v15, %v2282_v7  ;;  %v2372_v1 = vadd.f32 %v2364_v2, %v2300_v12  ;;  %v2546_v28 = vmul.f32 %v7583_v22, %v2488_v51  ;;  %v2564_v43 = vmul.f32 %v7586_v35, %v2488_v51  ;;  %v2412_v15 = vpop.permute.xlu0 %2411  ;;  %v10474_v2 = vld [vmem:[#allocation117_spill] sm:$0xff]  ;;  %v10475_v7 = vld [vmem:[#allocation166_spill] sm:$0xff] }
 0x295   : > { %v2518_v36 = vadd.f32 %v2510_v54, %v2318_v29  ;;  %v2245_v27 = vadd.f32 %v2237_v4, %v10473_v56  ;;  %v2255_v38 = vmul.f32 %v7528_v63, %v10469_v37  ;;  %v2536_v0 = vadd.f32 %v2528_v48, %v2336_v8  ;;  %v10476_v51 = vld [vmem:[#allocation49_spill] sm:$0xff]  ;;  %v10477_v54 = vld [vmem:[#allocation143_spill] sm:$0xff]  ;;  %v10479_v8 = vld [vmem:[#allocation174_spill] sm:$0xff] }
 0x296   : > { %v2554_v44 = vadd.f32 %v2546_v28, %v2354_v41  ;;  %v2273_v42 = vmul.f32 %v7539_v33, %v10469_v37  ;;  %v2291_v3 = vmul.f32 %v7542_v40, %v10469_v37  ;;  %3618 = vrot.lane.b32.xlu1 %v10474_v2, %s4764_s26  ;;  %v2309_v56 = vmul.f32 %v7557_v46, %v10476_v51  ;;  %v10478_v37 = vld [vmem:[#allocation160_spill] sm:$0xff] }
 0x297   : > { %v2263_v12 = vadd.f32 %v2255_v38, %v10475_v7  ;;  %v2327_v4 = vmul.f32 %v7560_v50, %v10476_v51  ;;  %v2345_v29 = vmul.f32 %v7567_v49, %v10476_v51  ;;  %3616 = vrot.lane.b32.xlu0 %v10477_v54, %s4764_s26  ;;  %v2363_v28 = vmul.f32 %v7570_v47, %v10476_v51 }
 0x298   : > { %v2281_v48 = vadd.f32 %v2273_v42, %v10478_v37  ;;  %v2299_v41 = vadd.f32 %v2291_v3, %v10479_v8  ;;  %v2487_v38 = vsel %vm1350_vm2, %v2408_v24, 0.0  ;;  %v2572_v7 = vadd.f32 %v2564_v43, %v2372_v1  ;;  %v10480_v42 = vld [vmem:[#allocation154_spill] sm:$0xff] }
 0x299   : > { %v2317_v2 = vadd.f32 %v2309_v56, %v2245_v27  ;;  %v2509_v5 = vmul.f32 %v7577_v19, %v2487_v38  ;;  %v2527_v59 = vmul.f32 %v7580_v39, %v2487_v38  ;;  %v2335_v58 = vadd.f32 %v2327_v4, %v2263_v12  ;;  %v10481_v27 = vld [vmem:[#allocation155_spill] sm:$0xff]  ;;  %v2418_v4 = vpop.permute.xlu1 %2417 }
 0x29a   : > { %v2353_v11 = vadd.f32 %v2345_v29, %v2281_v48  ;;  %v2545_v61 = vmul.f32 %v7583_v22, %v2487_v38  ;;  %v2563_v54 = vmul.f32 %v7586_v35, %v2487_v38  ;;  %3634 = vrot.lane.b32.xlu1 %v10480_v42, %s4764_s26  ;;  %v2371_v3 = vadd.f32 %v2363_v28, %v2299_v41  ;;  %v2416_v29 = vpop.permute.xlu0 %2415 }
 0x29b   : > { %v2517_v37 = vadd.f32 %v2509_v5, %v2317_v2  ;;  %v2490_v51 = vsel %vm1350_vm2, %v2414_v34, 0.0  ;;  %v2489_v24 = vsel %vm1350_vm2, %v2412_v15, 0.0  ;;  %3632 = vrot.lane.b32.xlu0 %v10481_v27, %s4764_s26  ;;  %v2535_v1 = vadd.f32 %v2527_v59, %v2335_v58  ;;  %v10483_v27 = vld [vmem:[#allocation170_spill] sm:$0xff] }
 0x29c   : > { %v2553_v43 = vadd.f32 %v2545_v61, %v2353_v11  ;;  %v2582_v12 = vmul.f32 %v7637_v60, %v2490_v51  ;;  %v2600_v56 = vmul.f32 %v7640_v32, %v2490_v51  ;;  %v2618_v48 = vmul.f32 %v7653_v21, %v2490_v51  ;;  %v10482_v11 = vld [vmem:[#allocation168_spill] sm:$0xff] }
 0x29d   : > { %v2636_v8 = vmul.f32 %v7656_v20, %v2490_v51  ;;  %v2581_v5 = vmul.f32 %v7637_v60, %v2489_v24  ;;  %v2599_v34 = vmul.f32 %v7640_v32, %v2489_v24  ;;  %v2571_v15 = vadd.f32 %v2563_v54, %v2371_v3 }
 0x29e   : > { %v2590_v2 = vadd.f32 %v2582_v12, %v2518_v36  ;;  %v2617_v41 = vmul.f32 %v7653_v21, %v2489_v24  ;;  %v2635_v59 = vmul.f32 %v7656_v20, %v2489_v24  ;;  %3650 = vrot.lane.b32.xlu1 %v10482_v11, %s4764_s26  ;;  %v2608_v58 = vadd.f32 %v2600_v56, %v2536_v0  ;;  %v2420_v12 = vpop.permute.xlu0 %2419  ;;  %v10484_v56 = vld [vmem:[#allocation172_spill] sm:$0xff]  ;;  %v10486_v11 = vld [vmem:[#allocation59_spill] sm:$0xff] }
 0x29f   : > { %v2626_v61 = vadd.f32 %v2618_v48, %v2554_v44  ;;  %v2644_v28 = vadd.f32 %v2636_v8, %v2572_v7  ;;  %v2589_v38 = vadd.f32 %v2581_v5, %v2517_v37  ;;  %3648 = vrot.lane.b32.xlu0 %v10483_v27, %s4764_s26  ;;  %v2607_v51 = vadd.f32 %v2599_v34, %v2535_v1  ;;  %v10485_v5 = vld [vmem:[#allocation74_spill] sm:$0xff] }
 0x2a0   : > { %v2625_v42 = vadd.f32 %v2617_v41, %v2553_v43  ;;  %v2492_v26 = vsel %vm1350_vm2, %v2418_v4, 0.0  ;;  %v2491_v36 = vsel %vm1350_vm2, %v2416_v29, 0.0  ;;  %v2643_v44 = vadd.f32 %v2635_v59, %v2571_v15  ;;  %v2422_v43 = vpop.permute.xlu1 %2421 }
 0x2a1   : > { %v2654_v54 = vmul.f32 %v7689_v31, %v2492_v26  ;;  %v2672_v3 = vmul.f32 %v7692_v52, %v2492_v26  ;;  %v2690_v24 = vmul.f32 %v7699_v57, %v2492_v26  ;;  %v2708_v0 = vmul.f32 %v7702_v18, %v2492_v26 }
 0x2a2   : > { %v2653_v7 = vmul.f32 %v7689_v31, %v2491_v36  ;;  %v2671_v37 = vmul.f32 %v7692_v52, %v2491_v36  ;;  %v2689_v1 = vmul.f32 %v7699_v57, %v2491_v36  ;;  %3666 = vrot.lane.b32.xlu1 %v10484_v56, %s4764_s26  ;;  %v2707_v8 = vmul.f32 %v7702_v18, %v2491_v36  ;;  %v10496_v56 = vld [vmem:[#allocation164_spill] sm:$0xff] }
 0x2a3   : > { %v2662_v4 = vadd.f32 %v2654_v54, %v2590_v2  ;;  %v2680_v29 = vadd.f32 %v2672_v3, %v2608_v58  ;;  %v2698_v48 = vadd.f32 %v2690_v24, %v2626_v61  ;;  %3664 = vrot.lane.b32.xlu0 %v10485_v5, %s4764_s26  ;;  %v2716_v26 = vadd.f32 %v2708_v0, %v2644_v28  ;;  %v10488_v24 = vld [vmem:[#allocation145_spill] sm:$0xff] }
 0x2a4   : > { %v2661_v34 = vadd.f32 %v2653_v7, %v2589_v38  ;;  %v2679_v15 = vadd.f32 %v2671_v37, %v2607_v51  ;;  %v2697_v41 = vadd.f32 %v2689_v1, %v2625_v42  ;;  %v2494_v59 = vsel %vm1350_vm2, %v2422_v43, 0.0  ;;  %v10487_v42 = vld [vmem:[#allocation144_spill] sm:$0xff]  ;;  %v2426_v43 = vpop.permute.xlu1 %2425 }
 0x2a5   : > { %v2493_v27 = vsel %vm1350_vm2, %v2420_v12, 0.0  ;;  %v2240_v25 = vmul.f32 %v7525_v13, %v10486_v11  ;;  %v2258_v2 = vmul.f32 %v7528_v63, %v10486_v11  ;;  %v2726_v58 = vmul.f32 %v7717_v45, %v2494_v59  ;;  %v2424_v12 = vpop.permute.xlu0 %2423 }
 0x2a6   : > { %v2744_v61 = vmul.f32 %v7720_v14, %v2494_v59  ;;  %v2762_v36 = vmul.f32 %v7723_v62, %v2494_v59  ;;  %v2780_v28 = vmul.f32 %v7726_v6, %v2494_v59  ;;  %3622 = vrot.lane.b32.xlu1 %v10487_v42, %s4764_s26  ;;  %v2715_v38 = vadd.f32 %v2707_v8, %v2643_v44 }
 0x2a7   : > { %v2725_v51 = vmul.f32 %v7717_v45, %v2493_v27  ;;  %v2743_v54 = vmul.f32 %v7720_v14, %v2493_v27  ;;  %v2761_v3 = vmul.f32 %v7723_v62, %v2493_v27  ;;  %3620 = vrot.lane.b32.xlu0 %v10488_v24, %s4764_s26  ;;  %v7995_v0 = vadd.f32 %v2726_v58, %v2662_v4  ;;  %v10497_v4 = vld [vmem:[#allocation79_spill] sm:$0xff] }
 0x2a8   : > { %v7997_v7 = vadd.f32 %v2744_v61, %v2680_v29  ;;  %v7999_v37 = vadd.f32 %v2762_v36, %v2698_v48  ;;  %v2779_v1 = vmul.f32 %v7726_v6, %v2493_v27  ;;  %v8002_v44 = vadd.f32 %v2780_v28, %v2716_v26  ;;  %v10498_v48 = vld [vmem:[#allocation156_spill] sm:$0xff]  ;;  %v10502_v28 = vld [vmem:[#allocation58_spill] sm:$0xff] }
 0x2a9   : > { %10489 = vst [vmem:[#allocation108_spill] sm:$0xff] %v7995_v0  ;;  %v8004_v8 = vadd.f32 %v2725_v51, %v2661_v34  ;;  %v8006_v59 = vadd.f32 %v2743_v54, %v2679_v15  ;;  %v8008_v5 = vadd.f32 %v2761_v3, %v2697_v41  ;;  %v2248_v24 = vadd.f32 %v2240_v25, %v10496_v56  ;;  %v10499_v15 = vld [vmem:[#allocation157_spill] sm:$0xff] }
 0x2aa   : > { %10490 = vst [vmem:[#allocation53_spill] sm:$0xff] %v7997_v7  ;;  %10491 = vst [vmem:[#allocation98_spill] sm:$0xff] %v7999_v37  ;;  %v2266_v58 = vadd.f32 %v2258_v2, %v10497_v4  ;;  %v2276_v29 = vmul.f32 %v7539_v33, %v10486_v11  ;;  %v2294_v27 = vmul.f32 %v7542_v40, %v10486_v11  ;;  %3638 = vrot.lane.b32.xlu1 %v10498_v48, %s4764_s26  ;;  %v10500_v41 = vld [vmem:[#allocation165_spill] sm:$0xff]  ;;  %v10501_v2 = vld [vmem:[#allocation167_spill] sm:$0xff] }
 0x2ab   : > { %10492 = vst [vmem:[#allocation99_spill] sm:$0xff] %v8002_v44  ;;  %10493 = vst [vmem:[#allocation100_spill] sm:$0xff] %v8004_v8  ;;  %v2312_v26 = vmul.f32 %v7557_v46, %v10434_v10  ;;  %v2330_v34 = vmul.f32 %v7560_v50, %v10434_v10  ;;  %v2348_v25 = vmul.f32 %v7567_v49, %v10434_v10  ;;  %3636 = vrot.lane.b32.xlu0 %v10499_v15, %s4764_s26 }
 0x2ac   : > { %10494 = vst [vmem:[#allocation101_spill] sm:$0xff] %v8006_v59  ;;  %10495 = vst [vmem:[#allocation76_spill] sm:$0xff] %v8008_v5  ;;  %v2366_v56 = vmul.f32 %v7570_v47, %v10434_v10  ;;  %v2284_v11 = vadd.f32 %v2276_v29, %v10500_v41  ;;  %v2302_v61 = vadd.f32 %v2294_v27, %v10501_v2  ;;  %v2496_v36 = vsel %vm1350_vm2, %v2426_v43, 0.0  ;;  %v2430_v29 = vpop.permute.xlu1 %2429  ;;  %v2428_v41 = vpop.permute.xlu0 %2427  ;;  %v10504_v27 = vld [vmem:[#allocation173_spill] sm:$0xff] }
 0x2ad   : > { %v2239_v51 = vmul.f32 %v7525_v13, %v10502_v28  ;;  %v8033_v54 = vadd.f32 %v2779_v1, %v2715_v38  ;;  %v2320_v3 = vadd.f32 %v2312_v26, %v2248_v24  ;;  %v2512_v4 = vmul.f32 %v7577_v19, %v2496_v36  ;;  %v10505_v38 = vld [vmem:[#allocation171_spill] sm:$0xff] }
 0x2ae   : > { %v2530_v48 = vmul.f32 %v7580_v39, %v2496_v36  ;;  %v2338_v10 = vadd.f32 %v2330_v34, %v2266_v58  ;;  %v2356_v42 = vadd.f32 %v2348_v25, %v2284_v11  ;;  %v2374_v5 = vadd.f32 %v2366_v56, %v2302_v61  ;;  %3654 = vrot.lane.b32.xlu1 %v10504_v27, %s4764_s26  ;;  %v10506_v26 = vld [vmem:[#allocation75_spill] sm:$0xff]  ;;  %v10507_v11 = vld [vmem:[#allocation80_spill] sm:$0xff] }
 0x2af   : > { %10503 = vst [vmem:[#allocation57_spill] sm:$0xff] %v8033_v54  ;;  %v2548_v15 = vmul.f32 %v7583_v22, %v2496_v36  ;;  %v2520_v43 = vadd.f32 %v2512_v4, %v2320_v3  ;;  %v2566_v13 = vmul.f32 %v7586_v35, %v2496_v36  ;;  %v2247_v1 = vadd.f32 %v2239_v51, %v10505_v38  ;;  %v10508_v61 = vld [vmem:[#allocation60_spill] sm:$0xff]  ;;  %v10509_v3 = vld [vmem:[#allocation169_spill] sm:$0xff] }
 0x2b0   : > { %v2257_v24 = vmul.f32 %v7528_v63, %v10502_v28  ;;  %3652 = vrot.lane.b32.xlu0 %v10506_v26, %s4764_s26  ;;  %v2538_v58 = vadd.f32 %v2530_v48, %v2338_v10  ;;  %v2275_v25 = vmul.f32 %v7539_v33, %v10502_v28  ;;  %v2293_v56 = vmul.f32 %v7542_v40, %v10502_v28  ;;  %v10511_v28 = vld [vmem:[#allocation177_spill] sm:$0xff] }
 0x2b1   : > { %v2556_v34 = vadd.f32 %v2548_v15, %v2356_v42  ;;  %v2311_v36 = vmul.f32 %v7557_v46, %v10508_v61  ;;  %v2329_v51 = vmul.f32 %v7560_v50, %v10508_v61  ;;  %v2347_v63 = vmul.f32 %v7567_v49, %v10508_v61  ;;  %v10510_v42 = vld [vmem:[#allocation81_spill] sm:$0xff]  ;;  %v10512_v49 = vld [vmem:[#allocation179_spill] sm:$0xff] }
 0x2b2   : > { %v2265_v2 = vadd.f32 %v2257_v24, %v10507_v11  ;;  %v2283_v48 = vadd.f32 %v2275_v25, %v10509_v3  ;;  %v2301_v15 = vadd.f32 %v2293_v56, %v10510_v42  ;;  %v2365_v33 = vmul.f32 %v7570_v47, %v10508_v61  ;;  %3670 = vrot.lane.b32.xlu1 %v10511_v28, %s4764_s26  ;;  %v2434_v56 = vpop.permute.xlu1 %2433 }
 0x2b3   : > { %v2495_v40 = vsel %vm1350_vm2, %v2424_v12, 0.0  ;;  %v2574_v4 = vadd.f32 %v2566_v13, %v2374_v5  ;;  %v2319_v46 = vadd.f32 %v2311_v36, %v2247_v1  ;;  %v2432_v12 = vpop.permute.xlu0 %2431  ;;  %v2498_v5 = vsel %vm1350_vm2, %v2430_v29, 0.0 }
 0x2b4   : > { %v2511_v10 = vmul.f32 %v7577_v19, %v2495_v40  ;;  %v2529_v50 = vmul.f32 %v7580_v39, %v2495_v40  ;;  %3668 = vrot.lane.b32.xlu0 %v10512_v49, %s4764_s26  ;;  %v2337_v38 = vadd.f32 %v2329_v51, %v2265_v2  ;;  %v2355_v24 = vadd.f32 %v2347_v63, %v2283_v48  ;;  %s8078_s26 = sld [smem:[#allocation8 + $0x6]] }
 0x2b5   : > { %v2547_v25 = vmul.f32 %v7583_v22, %v2495_v40  ;;  %v2565_v47 = vmul.f32 %v7586_v35, %v2495_v40  ;;  %v2373_v11 = vadd.f32 %v2365_v33, %v2301_v15  ;;  %v2497_v13 = vsel %vm1350_vm2, %v2428_v41, 0.0 }
 0x2b6   : > { %v2519_v61 = vadd.f32 %v2511_v10, %v2319_v46  ;;  %v2537_v19 = vadd.f32 %v2529_v50, %v2337_v38  ;;  %v2584_v39 = vmul.f32 %v7637_v60, %v2498_v5  ;;  %v2602_v36 = vmul.f32 %v7640_v32, %v2498_v5  ;;  %v2438_v10 = vpop.permute.xlu1 %2437 }
 0x2b7   : > { %v2555_v1 = vadd.f32 %v2547_v25, %v2355_v24  ;;  %v2620_v2 = vmul.f32 %v7653_v21, %v2498_v5  ;;  %v2638_v22 = vmul.f32 %v7656_v20, %v2498_v5  ;;  %v2583_v35 = vmul.f32 %v7637_v60, %v2497_v13  ;;  %v2436_v50 = vpop.permute.xlu0 %2435 }
 0x2b8   : > { %v2601_v51 = vmul.f32 %v7640_v32, %v2497_v13  ;;  %v2573_v63 = vadd.f32 %v2565_v47, %v2373_v11  ;;  %v2592_v29 = vadd.f32 %v2584_v39, %v2520_v43  ;;  %v2610_v3 = vadd.f32 %v2602_v36, %v2538_v58 }
 0x2b9   : > { %v2619_v41 = vmul.f32 %v7653_v21, %v2497_v13  ;;  %v2628_v48 = vadd.f32 %v2620_v2, %v2556_v34  ;;  %v2646_v42 = vadd.f32 %v2638_v22, %v2574_v4  ;;  %v2591_v15 = vadd.f32 %v2583_v35, %v2519_v61 }
 0x2ba   : > { %v2637_v33 = vmul.f32 %v7656_v20, %v2497_v13  ;;  %v2609_v40 = vadd.f32 %v2601_v51, %v2537_v19  ;;  %v2500_v60 = vsel %vm1350_vm2, %v2434_v56, 0.0  ;;  %v2499_v32 = vsel %vm1350_vm2, %v2432_v12, 0.0  ;;  %v2907_v2 = vpop.permute.xlu1 %2906 }
 0x2bb   : > { %v2627_v46 = vadd.f32 %v2619_v41, %v2555_v1  ;;  %v2656_v43 = vmul.f32 %v7689_v31, %v2500_v60  ;;  %v2674_v58 = vmul.f32 %v7692_v52, %v2500_v60  ;;  %v2692_v21 = vmul.f32 %v7699_v57, %v2500_v60  ;;  %v2905_v22 = vpop.permute.xlu0 %2904 }
 0x2bc   : > { %v2710_v34 = vmul.f32 %v7702_v18, %v2500_v60  ;;  %v2655_v20 = vmul.f32 %v7689_v31, %v2499_v32  ;;  %v2673_v4 = vmul.f32 %v7692_v52, %v2499_v32  ;;  %v2691_v38 = vmul.f32 %v7699_v57, %v2499_v32 }
 0x2bd   : > { %v2709_v24 = vmul.f32 %v7702_v18, %v2499_v32  ;;  %v2645_v25 = vadd.f32 %v2637_v33, %v2573_v63  ;;  %v2664_v47 = vadd.f32 %v2656_v43, %v2592_v29  ;;  %v2682_v56 = vadd.f32 %v2674_v58, %v2610_v3 }
 0x2be   : > { %v2700_v12 = vadd.f32 %v2692_v21, %v2628_v48  ;;  %v2718_v11 = vadd.f32 %v2710_v34, %v2646_v42  ;;  %v2663_v61 = vadd.f32 %v2655_v20, %v2591_v15  ;;  %v2681_v5 = vadd.f32 %v2673_v4, %v2609_v40  ;;  %v2911_v20 = vpop.permute.xlu1 %2910 }
 0x2bf   : > { %v2699_v13 = vadd.f32 %v2691_v38, %v2627_v46  ;;  %v2717_v31 = vadd.f32 %v2709_v24, %v2645_v25  ;;  %v2502_v52 = vsel %vm1350_vm2, %v2438_v10, 0.0  ;;  %v2501_v57 = vsel %vm1350_vm2, %v2436_v50, 0.0  ;;  %v2909_v4 = vpop.permute.xlu0 %2908  ;;  %v10521_v24 = vld [vmem:[#allocation180_spill] sm:$0xff] }
 0x2c0   : > { %v8101_v19 = vstv %s8078_s26  ;;  %v2728_v18 = vmul.f32 %v7717_v45, %v2502_v52  ;;  %v2746_v1 = vmul.f32 %v7720_v14, %v2502_v52  ;;  %v2764_v39 = vmul.f32 %v7723_v62, %v2502_v52  ;;  %s8625_s26 = sld [smem:[#allocation8 + $0x46]] }
 0x2c1   : > { %v2782_v36 = vmul.f32 %v7726_v6, %v2502_v52  ;;  %v2727_v35 = vmul.f32 %v7717_v45, %v2501_v57  ;;  %v2745_v51 = vmul.f32 %v7720_v14, %v2501_v57  ;;  %v2763_v63 = vmul.f32 %v7723_v62, %v2501_v57 }
 0x2c2   : > { %v8115_v29 = vstv %s8082_s10  ;;  %v8121_v3 = vadd.f32 %v2728_v18, %v2664_v47  ;;  %v8123_v41 = vadd.f32 %v2746_v1, %v2682_v56  ;;  %v8125_v48 = vadd.f32 %v2764_v39, %v2700_v12  ;;  %v10522_v47 = vld [vmem:[#allocation181_spill] sm:$0xff]  ;;  %v10523_v12 = vld [vmem:[#allocation182_spill] sm:$0xff]  ;;  %s8635_s10 = sld [smem:[#allocation8 + $0x6a]] }
 0x2c3   : > { %v2781_v42 = vmul.f32 %v7726_v6, %v2501_v57  ;;  %v8130_v45 = vadd.f32 %v2782_v36, %v2718_v11  ;;  %v8132_v14 = vadd.f32 %v2727_v35, %v2663_v61  ;;  %v8134_v62 = vadd.f32 %v2745_v51, %v2681_v5  ;;  %v10524_v61 = vld [vmem:[#allocation183_spill] sm:$0xff]  ;;  %v10526_v57 = vld [vmem:[#allocation185_spill] sm:$0xff]  ;;  %v10527_v1 = vld [vmem:[#allocation186_spill] sm:$0xff] }
 0x2c4   : > { %10513 = vst [vmem:[#allocation102_spill] sm:$0xff] %v8121_v3  ;;  %10514 = vst [vmem:[#allocation103_spill] sm:$0xff] %v8123_v41  ;;  %v8136_v15 = vadd.f32 %v2763_v63, %v2699_v13  ;;  %v8139_v33 = vstv %s8094_s14  ;;  %v8142_v40 = vstv %s8096_s23  ;;  %v3001_v46 = vsel %vm645_vm1, 0.0, %v2907_v2  ;;  %v10525_v13 = vld [vmem:[#allocation184_spill] sm:$0xff]  ;;  %v10528_v35 = vld [vmem:[#allocation187_spill] sm:$0xff]  ;;  %s8637_s14 = sld [smem:[#allocation8 + $0x8e]] }
 0x2c5   : > { %10515 = vst [vmem:[#allocation62_spill] sm:$0xff] %v8125_v48  ;;  %10516 = vst [vmem:[#allocation77_spill] sm:$0xff] %v8130_v45  ;;  %v3000_v60 = vsel %vm645_vm1, 0.0, %v2905_v22  ;;  %v3035_v6 = vmul.f32 %v8101_v19, %v3001_v46  ;;  %v3053_v32 = vmul.f32 %v8115_v29, %v3001_v46  ;;  %v3071_v10 = vmul.f32 %v8139_v33, %v3001_v46  ;;  %v10538_v3 = vld [vmem:[#allocation113_spill] sm:$0xff]  ;;  %s8643_s23 = sld [smem:[#allocation8 + $0x8]] }
 0x2c6   : > { %10517 = vst [vmem:[#allocation82_spill] sm:$0xff] %v8132_v14  ;;  %10518 = vst [vmem:[#allocation83_spill] sm:$0xff] %v8134_v62  ;;  %v3089_v50 = vmul.f32 %v8142_v40, %v3001_v46  ;;  %v3034_v43 = vmul.f32 %v8101_v19, %v3000_v60  ;;  %v3052_v58 = vmul.f32 %v8115_v29, %v3000_v60  ;;  %v8170_v39 = vstv %s8107_s9  ;;  %s8645_s9 = sld [smem:[#allocation8 + $0x2c]] }
 0x2c7   : > { %10519 = vst [vmem:[#allocation84_spill] sm:$0xff] %v8136_v15  ;;  %v3070_v21 = vmul.f32 %v8139_v33, %v3000_v60  ;;  %v3088_v34 = vmul.f32 %v8142_v40, %v3000_v60  ;;  %v8156_v38 = vadd.f32 %v2781_v42, %v2717_v31  ;;  %v3043_v25 = vadd.f32 %v3035_v6, %v10521_v24 }
 0x2c8   : > { %v3061_v56 = vadd.f32 %v3053_v32, %v10522_v47  ;;  %v3079_v11 = vadd.f32 %v3071_v10, %v10523_v12  ;;  %v3097_v5 = vadd.f32 %v3089_v50, %v10524_v61  ;;  %v3042_v52 = vadd.f32 %v3034_v43, %v10525_v13 }
 0x2c9   : > { %10520 = vst [vmem:[#allocation64_spill] sm:$0xff] %v8156_v38  ;;  %v3060_v18 = vadd.f32 %v3052_v58, %v10526_v57  ;;  %v3078_v31 = vadd.f32 %v3070_v21, %v10527_v1  ;;  %v8173_v36 = vstv %s8109_s5  ;;  %v8176_v2 = vstv %s8117_s11  ;;  %s8656_s5 = sld [smem:[#allocation8 + $0x50]]  ;;  %s8658_s11 = sld [smem:[#allocation8 + $0x74]] }
 0x2ca   : > { %v8179_v22 = vstv %s8119_s8  ;;  %v3096_v51 = vadd.f32 %v3088_v34, %v10528_v35  ;;  %v3003_v63 = vsel %vm645_vm1, 0.0, %v2911_v20  ;;  %v3002_v42 = vsel %vm645_vm1, 0.0, %v2909_v4  ;;  %v2915_v34 = vpop.permute.xlu1 %2914  ;;  %v2913_v20 = vpop.permute.xlu0 %2912  ;;  %s8926_s8 = sld [smem:[#allocation8 + $0x11]] }
 0x2cb   : > { %v8185_v46 = vstv %s8128_s0  ;;  %v3107_v60 = vmul.f32 %v8170_v39, %v3003_v63  ;;  %v3125_v6 = vmul.f32 %v8173_v36, %v3003_v63  ;;  %v3143_v32 = vmul.f32 %v8176_v2, %v3003_v63  ;;  %s8932_s0 = sld [smem:[#allocation8 + $0x35]] }
 0x2cc   : > { %v3161_v10 = vmul.f32 %v8179_v22, %v3003_v63  ;;  %v3106_v50 = vmul.f32 %v8170_v39, %v3002_v42  ;;  %v3124_v43 = vmul.f32 %v8173_v36, %v3002_v42  ;;  %v3142_v58 = vmul.f32 %v8176_v2, %v3002_v42 }
 0x2cd   : > { %v8203_v21 = vstv %s8146_s2  ;;  %v3115_v4 = vadd.f32 %v3107_v60, %v3043_v25  ;;  %v3133_v24 = vadd.f32 %v3125_v6, %v3061_v56  ;;  %v3151_v47 = vadd.f32 %v3143_v32, %v3079_v11  ;;  %s8948_s2 = sld [smem:[#allocation8 + $0x59]] }
 0x2ce   : > { %v3160_v12 = vmul.f32 %v8179_v22, %v3002_v42  ;;  %v3169_v61 = vadd.f32 %v3161_v10, %v3097_v5  ;;  %v3114_v13 = vadd.f32 %v3106_v50, %v3042_v52  ;;  %v3132_v57 = vadd.f32 %v3124_v43, %v3060_v18  ;;  %v2917_v28 = vpop.permute.xlu0 %2916 }
 0x2cf   : > { %v3150_v1 = vadd.f32 %v3142_v58, %v3078_v31  ;;  %v8219_v35 = vstv %s8161_s6  ;;  %v8222_v63 = vstv %s8163_s25  ;;  %v3005_v25 = vsel %vm645_vm1, 0.0, %v2915_v34  ;;  %v2919_v58 = vpop.permute.xlu1 %2918  ;;  %s8950_s6 = sld [smem:[#allocation8 + $0x7d]]  ;;  %s9054_s25 = sld [smem:[#allocation8 + $0x1a]] }
 0x2d0   : > { %10529 = vst [vmem:[#allocation63_spill] sm:$0xff] %v8219_v35  ;;  %10530 = vst [vmem:[#allocation85_spill] sm:$0xff] %v8222_v63  ;;  %v3004_v56 = vsel %vm645_vm1, 0.0, %v2913_v20  ;;  %v3179_v11 = vmul.f32 %v8185_v46, %v3005_v25  ;;  %v3197_v5 = vmul.f32 %v8203_v21, %v3005_v25  ;;  %v3215_v52 = vmul.f32 %v8219_v35, %v3005_v25 }
 0x2d1   : > { %v3233_v18 = vmul.f32 %v8222_v63, %v3005_v25  ;;  %v3178_v31 = vmul.f32 %v8185_v46, %v3004_v56  ;;  %v3196_v42 = vmul.f32 %v8203_v21, %v3004_v56  ;;  %v3214_v60 = vmul.f32 %v8219_v35, %v3004_v56 }
 0x2d2   : > { %v3232_v6 = vmul.f32 %v8222_v63, %v3004_v56  ;;  %v3168_v32 = vadd.f32 %v3160_v12, %v3096_v51  ;;  %v3187_v10 = vadd.f32 %v3179_v11, %v3115_v4  ;;  %v3205_v50 = vadd.f32 %v3197_v5, %v3133_v24  ;;  %v2921_v15 = vpop.permute.xlu0 %2920 }
 0x2d3   : > { %v3223_v43 = vadd.f32 %v3215_v52, %v3151_v47  ;;  %v3241_v34 = vadd.f32 %v3233_v18, %v3169_v61  ;;  %v3186_v20 = vadd.f32 %v3178_v31, %v3114_v13  ;;  %v3204_v25 = vadd.f32 %v3196_v42, %v3132_v57  ;;  %v10535_v57 = vld [vmem:[#allocation112_spill] sm:$0xff]  ;;  %v2923_v45 = vpop.permute.xlu1 %2922 }
 0x2d4   : > { %v3222_v49 = vadd.f32 %v3214_v60, %v3150_v1  ;;  %v3240_v26 = vadd.f32 %v3232_v6, %v3168_v32  ;;  %v8239_v56 = vstv %s8187_s1  ;;  %v8242_v51 = vstv %s8189_s19  ;;  %s9088_s1 = sld [smem:[#allocation8 + $0x3e]]  ;;  %s9100_s19 = sld [smem:[#allocation8 + $0x62]] }
 0x2d5   : > { %v8245_v4 = vstv %s8195_s16  ;;  %v8248_v24 = vstv %s8205_s4  ;;  %v8251_v47 = vstv %s8207_s15  ;;  %v8254_v12 = vstv %s8210_s18  ;;  %s9102_s16 = sld [smem:[#allocation8 + $0x86]]  ;;  %s9231_s4 = sld [smem:[#allocation8 + $0x47]] }
 0x2d6   : > { %10531 = vst [vmem:[#allocation90_spill] sm:$0xff] %v8248_v24  ;;  %10532 = vst [vmem:[#allocation91_spill] sm:$0xff] %v8251_v47  ;;  %v8257_v61 = vstv %s8212_s20  ;;  %v8260_v13 = vstv %s8197_s17  ;;  %v3323_v1 = vmul.f32 %v8248_v24, %v10535_v57  ;;  %v3341_v11 = vmul.f32 %v8251_v47, %v10535_v57  ;;  %s9215_s17 = sld [smem:[#allocation8 + $0x23]]  ;;  %s9255_s18 = sld [smem:[#allocation8 + $0x8f]] }
 0x2d7   : > { %10533 = vst [vmem:[#allocation65_spill] sm:$0xff] %v8254_v12  ;;  %10534 = vst [vmem:[#allocation92_spill] sm:$0xff] %v8257_v61  ;;  %v3359_v5 = vmul.f32 %v8254_v12, %v10535_v57  ;;  %v8269_v52 = vstv %s8214_s27  ;;  %v8272_v18 = vstv %s8216_s28  ;;  %v8275_v31 = vstv %s8226_s22  ;;  %s9253_s15 = sld [smem:[#allocation8 + $0x6b]]  ;;  %s10625_s20 = sshll.u32 %s4984_s3, 8 }
 0x2d8   : > { %10536 = vst [vmem:[#allocation93_spill] sm:$0xff] %v8269_v52  ;;  %10537 = vst [vmem:[#allocation86_spill] sm:$0xff] %v8272_v18  ;;  %v8278_v42 = vstv %s8228_s13  ;;  %v3377_v60 = vmul.f32 %v8257_v61, %v10535_v57  ;;  %v3395_v6 = vmul.f32 %v8269_v52, %v10462_v55  ;;  %v3413_v32 = vmul.f32 %v8272_v18, %v10462_v55  ;;  %s9362_s27 = scalar_lea.vmem [#allocation11], %s10625_s20  ;;  %s10626_s28 = sld [smem:[#allocation20_spill]] }
 0x2d9   : > { %v3431_v27 = vmul.f32 %v8275_v31, %v10462_v55  ;;  %v3449_v48 = vmul.f32 %v8278_v42, %v10462_v55  ;;  %v3007_v41 = vsel %vm645_vm1, 0.0, %v2919_v58  ;;  %v3322_v38 = vmul.f32 %v8248_v24, %v10538_v3  ;;  %s4138_s13 = sshll.u32 %s9362_s27, 4  ;;  %s9510_s13 = int_to_ptr.vmem [resolvable:$true] %s4138_s13 }
 0x2da   : > { %v3340_v57 = vmul.f32 %v8251_v47, %v10538_v3  ;;  %v3251_v62 = vmul.f32 %v8239_v56, %v3007_v41  ;;  %v3269_v14 = vmul.f32 %v8242_v51, %v3007_v41  ;;  %v3287_v54 = vmul.f32 %v8245_v4, %v3007_v41 }
 0x2db   : > { %v3305_v59 = vmul.f32 %v8260_v13, %v3007_v41  ;;  %v3358_v55 = vmul.f32 %v8254_v12, %v10538_v3  ;;  %v3376_v58 = vmul.f32 %v8257_v61, %v10538_v3  ;;  %v3394_v8 = vmul.f32 %v8269_v52, %v10463_v9 }
 0x2dc   : > { %v3412_v44 = vmul.f32 %v8272_v18, %v10463_v9  ;;  %v3259_v37 = vadd.f32 %v3251_v62, %v3187_v10  ;;  %v3277_v7 = vadd.f32 %v3269_v14, %v3205_v50  ;;  %v3295_v0 = vadd.f32 %v3287_v54, %v3223_v43  ;;  %v2927_v18 = vpop.permute.xlu1 %2926  ;;  %v2925_v10 = vpop.permute.xlu0 %2924 }
 0x2dd   : > { %v3313_v47 = vadd.f32 %v3305_v59, %v3241_v34  ;;  %v3430_v24 = vmul.f32 %v8275_v31, %v10463_v9  ;;  %v3448_v41 = vmul.f32 %v8278_v42, %v10463_v9  ;;  %v3006_v12 = vsel %vm645_vm1, 0.0, %v2917_v28 }
 0x2de   : > { %v3009_v3 = vsel %vm645_vm1, 0.0, %v2923_v45  ;;  %v3331_v61 = vadd.f32 %v3323_v1, %v3259_v37  ;;  %v3349_v63 = vadd.f32 %v3341_v11, %v3277_v7  ;;  %v3367_v52 = vadd.f32 %v3359_v5, %v3295_v0  ;;  %s4444_s22 = sshll.u32 %s10626_s28, 12 }
 0x2df   : > { %v3008_v35 = vsel %vm645_vm1, 0.0, %v2921_v15  ;;  %v3250_v14 = vmul.f32 %v8239_v56, %v3006_v12  ;;  %v3268_v59 = vmul.f32 %v8242_v51, %v3006_v12  ;;  %v3286_v54 = vmul.f32 %v8245_v4, %v3006_v12 }
 0x2e0   : > { %v3304_v62 = vmul.f32 %v8260_v13, %v3006_v12  ;;  %v3385_v9 = vadd.f32 %v3377_v60, %v3313_v47  ;;  %v8318_v50 = vadd.f32 %v3395_v6, %v3331_v61  ;;  %v8320_v28 = vadd.f32 %v3413_v32, %v3349_v63  ;;  %v2929_v6 = vpop.permute.xlu0 %2928 }
 0x2e1   : > { %v8322_v37 = vadd.f32 %v3431_v27, %v3367_v52  ;;  %v3258_v0 = vadd.f32 %v3250_v14, %v3186_v20  ;;  %v3276_v7 = vadd.f32 %v3268_v59, %v3204_v25  ;;  %v3294_v45 = vadd.f32 %v3286_v54, %v3222_v49  ;;  %v2931_v49 = vpop.permute.xlu1 %2930  ;;  %v10549_v54 = vld [vmem:[#allocation104_spill] sm:$0xff] }
 0x2e2   : > { %10539 = vst [vmem:[#allocation87_spill] sm:$0xff] %v8318_v50  ;;  %10540 = vst [vmem:[#allocation88_spill] sm:$0xff] %v8320_v28  ;;  %v3312_v15 = vadd.f32 %v3304_v62, %v3240_v26  ;;  %v3037_v43 = vmul.f32 %v8101_v19, %v3009_v3  ;;  %v3055_v34 = vmul.f32 %v8115_v29, %v3009_v3  ;;  %v3012_v14 = vsel %vm645_vm1, 0.0, %v2929_v6 }
 0x2e3   : > { %10541 = vst [vmem:[#allocation89_spill] sm:$0xff] %v8322_v37  ;;  %v3073_v1 = vmul.f32 %v8139_v33, %v3009_v3  ;;  %v3091_v12 = vmul.f32 %v8142_v40, %v3009_v3  ;;  %v3330_v11 = vadd.f32 %v3322_v38, %v3258_v0  ;;  %v3348_v47 = vadd.f32 %v3340_v57, %v3276_v7 }
 0x2e4   : > { %v3366_v61 = vadd.f32 %v3358_v55, %v3294_v45  ;;  %v3384_v5 = vadd.f32 %v3376_v58, %v3312_v15  ;;  %v8328_v63 = vadd.f32 %v3449_v48, %v3385_v9  ;;  %v3045_v27 = vadd.f32 %v3037_v43, %v7871_v53  ;;  %v10548_v58 = vld [vmem:[#allocation55_spill] sm:$0xff] }
 0x2e5   : > { %v3063_v20 = vadd.f32 %v3055_v34, %v7873_v23  ;;  %v3081_v26 = vadd.f32 %v3073_v1, %v7875_v30  ;;  %v8333_v25 = vadd.f32 %v3394_v8, %v3330_v11  ;;  %v8335_v52 = vadd.f32 %v3412_v44, %v3348_v47  ;;  %v2935_v0 = vpop.permute.xlu1 %2934  ;;  %v2933_v47 = vpop.permute.xlu0 %2932 }
 0x2e6   : > { %10542 = vst [vmem:[#allocation94_spill] sm:$0xff] %v8328_v63  ;;  %v8337_v60 = vadd.f32 %v3430_v24, %v3366_v61  ;;  %v3099_v38 = vadd.f32 %v3091_v12, %v7880_v17  ;;  %v3036_v32 = vmul.f32 %v8101_v19, %v3008_v35  ;;  %v3054_v48 = vmul.f32 %v8115_v29, %v3008_v35  ;;  %v10547_v17 = vld [vmem:[#allocation188_spill] sm:$0xff] }
 0x2e7   : > { %10543 = vst [vmem:[#allocation95_spill] sm:$0xff] %v8333_v25  ;;  %10544 = vst [vmem:[#allocation96_spill] sm:$0xff] %v8335_v52  ;;  %v3072_v53 = vmul.f32 %v8139_v33, %v3008_v35  ;;  %v3090_v23 = vmul.f32 %v8142_v40, %v3008_v35  ;;  %v8344_v57 = vadd.f32 %v3448_v41, %v3384_v5  ;;  %v3011_v30 = vsel %vm645_vm1, 0.0, %v2927_v18 }
 0x2e8   : > { %10545 = vst [vmem:[#allocation30_spill] sm:$0xff] %v8337_v60  ;;  %v3010_v44 = vsel %vm645_vm1, 0.0, %v2925_v10  ;;  %v3013_v8 = vsel %vm645_vm1, 0.0, %v2931_v49  ;;  %v3044_v24 = vadd.f32 %v3036_v32, %v7882_v16  ;;  %v3062_v55 = vadd.f32 %v3054_v48, %v10547_v17  ;;  %v10550_v49 = vld [vmem:[#allocation63_spill] sm:$0xff]  ;;  %v10551_v32 = vld [vmem:[#allocation85_spill] sm:$0xff] }
 0x2e9   : > { %10546 = vst [vmem:[#allocation29_spill] sm:$0xff] %v8344_v57  ;;  %v3080_v3 = vadd.f32 %v3072_v53, %v10548_v58  ;;  %v3109_v59 = vmul.f32 %v8170_v39, %v3011_v30  ;;  %v3127_v35 = vmul.f32 %v8173_v36, %v3011_v30  ;;  %v3145_v41 = vmul.f32 %v8176_v2, %v3011_v30 }
 0x2ea   : > { %v3163_v18 = vmul.f32 %v8179_v22, %v3011_v30  ;;  %v3098_v62 = vadd.f32 %v3090_v23, %v10549_v54  ;;  %v3108_v10 = vmul.f32 %v8170_v39, %v3010_v44  ;;  %v3126_v16 = vmul.f32 %v8173_v36, %v3010_v44 }
 0x2eb   : > { %v3144_v9 = vmul.f32 %v8176_v2, %v3010_v44  ;;  %v3117_v7 = vadd.f32 %v3109_v59, %v3045_v27  ;;  %v3135_v45 = vadd.f32 %v3127_v35, %v3063_v20  ;;  %v3153_v15 = vadd.f32 %v3145_v41, %v3081_v26  ;;  %v10552_v35 = vld [vmem:[#allocation148_spill] sm:$0xff] }
 0x2ec   : > { %v3162_v43 = vmul.f32 %v8179_v22, %v3010_v44  ;;  %v3171_v34 = vadd.f32 %v3163_v18, %v3099_v38  ;;  %v3116_v1 = vadd.f32 %v3108_v10, %v3044_v24  ;;  %v3134_v12 = vadd.f32 %v3126_v16, %v3062_v55  ;;  %v10554_v18 = vld [vmem:[#allocation91_spill] sm:$0xff]  ;;  %v10555_v10 = vld [vmem:[#allocation65_spill] sm:$0xff] }
 0x2ed   : > { %v3152_v11 = vadd.f32 %v3144_v9, %v3080_v3  ;;  %v3181_v61 = vmul.f32 %v8185_v46, %v3013_v8  ;;  %v3199_v5 = vmul.f32 %v8203_v21, %v3013_v8  ;;  %v3217_v6 = vmul.f32 %v10550_v49, %v3013_v8  ;;  %v2939_v3 = vpop.permute.xlu1 %2938  ;;  %v10557_v9 = vld [vmem:[#allocation152_spill] sm:$0xff] }
 0x2ee   : > { %v3235_v48 = vmul.f32 %v10551_v32, %v3013_v8  ;;  %v3180_v53 = vmul.f32 %v8185_v46, %v3012_v14  ;;  %v3198_v27 = vmul.f32 %v8203_v21, %v3012_v14  ;;  %v3216_v20 = vmul.f32 %v10550_v49, %v3012_v14  ;;  %v10553_v8 = vld [vmem:[#allocation90_spill] sm:$0xff] }
 0x2ef   : > { %v3234_v26 = vmul.f32 %v10551_v32, %v3012_v14  ;;  %v3170_v38 = vadd.f32 %v3162_v43, %v3098_v62  ;;  %v3189_v23 = vadd.f32 %v3181_v61, %v3117_v7  ;;  %v3207_v30 = vadd.f32 %v3199_v5, %v3135_v45  ;;  %v10556_v14 = vld [vmem:[#allocation92_spill] sm:$0xff]  ;;  %v10558_v7 = vld [vmem:[#allocation93_spill] sm:$0xff]  ;;  %v10560_v61 = vld [vmem:[#allocation71_spill] sm:$0xff] }
 0x2f0   : > { %v3225_v44 = vadd.f32 %v3217_v6, %v3153_v15  ;;  %v3243_v24 = vadd.f32 %v3235_v48, %v3171_v34  ;;  %v3188_v17 = vadd.f32 %v3180_v53, %v3116_v1  ;;  %v3206_v55 = vadd.f32 %v3198_v27, %v3134_v12  ;;  %v10559_v15 = vld [vmem:[#allocation86_spill] sm:$0xff]  ;;  %v2937_v1 = vpop.permute.xlu0 %2936 }
 0x2f1   : > { %v3224_v58 = vadd.f32 %v3216_v20, %v3152_v11  ;;  %v3242_v59 = vadd.f32 %v3234_v26, %v3170_v38  ;;  %v3325_v41 = vmul.f32 %v10553_v8, %v10552_v35  ;;  %v3343_v54 = vmul.f32 %v10554_v18, %v10552_v35  ;;  %v10561_v38 = vld [vmem:[#allocation153_spill] sm:$0xff]  ;;  %v2953_v63 = vpop.permute.xlu1 %2952 }
 0x2f2   : > { %v3361_v16 = vmul.f32 %v10555_v10, %v10552_v35  ;;  %v3379_v62 = vmul.f32 %v10556_v14, %v10552_v35  ;;  %v3397_v45 = vmul.f32 %v10558_v7, %v10557_v9  ;;  %v3415_v43 = vmul.f32 %v10559_v15, %v10557_v9 }
 0x2f3   : > { %v3433_v34 = vmul.f32 %v8275_v31, %v10557_v9  ;;  %v3451_v12 = vmul.f32 %v8278_v42, %v10557_v9  ;;  %v3015_v11 = vsel %vm645_vm1, 0.0, %v2935_v0  ;;  %v3324_v5 = vmul.f32 %v10553_v8, %v10560_v61 }
 0x2f4   : > { %v3342_v6 = vmul.f32 %v10554_v18, %v10560_v61  ;;  %v3253_v48 = vmul.f32 %v8239_v56, %v3015_v11  ;;  %v3271_v53 = vmul.f32 %v8242_v51, %v3015_v11  ;;  %v3289_v27 = vmul.f32 %v8245_v4, %v3015_v11 }
 0x2f5   : > { %v3307_v20 = vmul.f32 %v8260_v13, %v3015_v11  ;;  %v3360_v26 = vmul.f32 %v10555_v10, %v10560_v61  ;;  %v3378_v0 = vmul.f32 %v10556_v14, %v10560_v61  ;;  %v3396_v35 = vmul.f32 %v10558_v7, %v10561_v38 }
 0x2f6   : > { %v3414_v9 = vmul.f32 %v10559_v15, %v10561_v38  ;;  %v3261_v57 = vadd.f32 %v3253_v48, %v3189_v23  ;;  %v3279_v60 = vadd.f32 %v3271_v53, %v3207_v30  ;;  %v3297_v52 = vadd.f32 %v3289_v27, %v3225_v44  ;;  %v2941_v23 = vpop.permute.xlu0 %2940 }
 0x2f7   : > { %v3315_v25 = vadd.f32 %v3307_v20, %v3243_v24  ;;  %v3432_v11 = vmul.f32 %v8275_v31, %v10561_v38  ;;  %v3450_v37 = vmul.f32 %v8278_v42, %v10561_v38  ;;  %v3014_v28 = vsel %vm645_vm1, 0.0, %v2933_v47 }
 0x2f8   : > { %v3017_v61 = vsel %vm645_vm1, 0.0, %v2939_v3  ;;  %v3333_v50 = vadd.f32 %v3325_v41, %v3261_v57  ;;  %v3351_v7 = vadd.f32 %v3343_v54, %v3279_v60  ;;  %v3369_v14 = vadd.f32 %v3361_v16, %v3297_v52 }
 0x2f9   : > { %v3016_v15 = vsel %vm645_vm1, 0.0, %v2937_v1  ;;  %v3252_v30 = vmul.f32 %v8239_v56, %v3014_v28  ;;  %v3270_v44 = vmul.f32 %v8242_v51, %v3014_v28  ;;  %v3288_v24 = vmul.f32 %v8245_v4, %v3014_v28 }
 0x2fa   : > { %v3306_v48 = vmul.f32 %v8260_v13, %v3014_v28  ;;  %v3387_v53 = vadd.f32 %v3379_v62, %v3315_v25  ;;  %v8414_v27 = vadd.f32 %v3397_v45, %v3333_v50  ;;  %v8416_v47 = vadd.f32 %v3415_v43, %v3351_v7  ;;  %v2943_v28 = vpop.permute.xlu1 %2942 }
 0x2fb   : > { %v8418_v3 = vadd.f32 %v3433_v34, %v3369_v14  ;;  %v3260_v60 = vadd.f32 %v3252_v30, %v3188_v17  ;;  %v3278_v52 = vadd.f32 %v3270_v44, %v3206_v55  ;;  %v3296_v57 = vadd.f32 %v3288_v24, %v3224_v58  ;;  %v10562_v14 = vld [vmem:[#allocation108_spill] sm:$0xff]  ;;  %v10563_v55 = vld [vmem:[#allocation53_spill] sm:$0xff]  ;;  %v2955_v34 = vpop.permute.xlu0 %2954 }
 0x2fc   : > { %v3314_v41 = vadd.f32 %v3306_v48, %v3242_v59  ;;  %v3039_v54 = vmul.f32 %v8101_v19, %v3017_v61  ;;  %v3057_v16 = vmul.f32 %v8115_v29, %v3017_v61  ;;  %v3075_v1 = vmul.f32 %v8139_v33, %v3017_v61  ;;  %v10564_v59 = vld [vmem:[#allocation98_spill] sm:$0xff] }
 0x2fd   : > { %v3093_v20 = vmul.f32 %v8142_v40, %v3017_v61  ;;  %v3332_v25 = vadd.f32 %v3324_v5, %v3260_v60  ;;  %v3350_v50 = vadd.f32 %v3342_v6, %v3278_v52  ;;  %v3368_v62 = vadd.f32 %v3360_v26, %v3296_v57  ;;  %v10567_v61 = vld [vmem:[#allocation99_spill] sm:$0xff]  ;;  %v10570_v60 = vld [vmem:[#allocation101_spill] sm:$0xff]  ;;  %v10571_v57 = vld [vmem:[#allocation76_spill] sm:$0xff] }
 0x2fe   : > { %v3386_v7 = vadd.f32 %v3378_v0, %v3314_v41  ;;  %v8424_v45 = vadd.f32 %v3451_v12, %v3387_v53  ;;  %v3047_v17 = vadd.f32 %v3039_v54, %v10562_v14  ;;  %v3065_v58 = vadd.f32 %v3057_v16, %v10563_v55  ;;  %v2959_v16 = vpop.permute.xlu1 %2958  ;;  %v10574_v55 = vld [vmem:[#allocation83_spill] sm:$0xff] }
 0x2ff   : > { %v3083_v43 = vadd.f32 %v3075_v1, %v10564_v59  ;;  %v8429_v38 = vadd.f32 %v3396_v35, %v3332_v25  ;;  %v8431_v30 = vadd.f32 %v3414_v9, %v3350_v50  ;;  %v8433_v44 = vadd.f32 %v3432_v11, %v3368_v62  ;;  %v10569_v11 = vld [vmem:[#allocation100_spill] sm:$0xff]  ;;  %v2957_v62 = vpop.permute.xlu0 %2956 }
 0x300   : > { %v3101_v5 = vadd.f32 %v3093_v20, %v10567_v61  ;;  %v3038_v6 = vmul.f32 %v8101_v19, %v3016_v15  ;;  %v3056_v12 = vmul.f32 %v8115_v29, %v3016_v15  ;;  %v3074_v26 = vmul.f32 %v8139_v33, %v3016_v15 }
 0x301   : > { %10565 = vst [vmem:[#allocation28_spill] sm:$0xff] %v8431_v30  ;;  %10566 = vst [vmem:[#allocation27_spill] sm:$0xff] %v8433_v44  ;;  %v3092_v0 = vmul.f32 %v8142_v40, %v3016_v15  ;;  %v8440_v24 = vadd.f32 %v3450_v37, %v3386_v7  ;;  %v3024_v48 = vsel %vm645_vm1, 0.0, %v2953_v63  ;;  %v3018_v35 = vsel %vm645_vm1, 0.0, %v2941_v23  ;;  %v10572_v23 = vld [vmem:[#allocation57_spill] sm:$0xff]  ;;  %v10573_v7 = vld [vmem:[#allocation82_spill] sm:$0xff] }
 0x302   : > { %v3019_v9 = vsel %vm645_vm1, 0.0, %v2943_v28  ;;  %v3046_v53 = vadd.f32 %v3038_v6, %v10569_v11  ;;  %v3064_v52 = vadd.f32 %v3056_v12, %v10570_v60  ;;  %v3082_v41 = vadd.f32 %v3074_v26, %v10571_v57  ;;  %v10576_v12 = vld [vmem:[#allocation64_spill] sm:$0xff] }
 0x303   : > { %10568 = vst [vmem:[#allocation128_spill] sm:$0xff] %v8440_v24  ;;  %v3025_v54 = vsel %vm645_vm1, 0.0, %v2955_v34  ;;  %v3040_v1 = vmul.f32 %v8101_v19, %v3024_v48  ;;  %v3058_v37 = vmul.f32 %v8115_v29, %v3024_v48  ;;  %v3076_v15 = vmul.f32 %v8139_v33, %v3024_v48  ;;  %v10575_v34 = vld [vmem:[#allocation84_spill] sm:$0xff]  ;;  %v2945_v44 = vpop.permute.xlu0 %2944 }
 0x304   : > { %v3094_v63 = vmul.f32 %v8142_v40, %v3024_v48  ;;  %v3100_v20 = vadd.f32 %v3092_v0, %v10572_v23  ;;  %v3110_v28 = vmul.f32 %v8170_v39, %v3018_v35  ;;  %v3128_v25 = vmul.f32 %v8173_v36, %v3018_v35 }
 0x305   : > { %v3146_v50 = vmul.f32 %v8176_v2, %v3018_v35  ;;  %v3048_v14 = vadd.f32 %v3040_v1, %v10573_v7  ;;  %v3066_v59 = vadd.f32 %v3058_v37, %v10574_v55  ;;  %v3084_v61 = vadd.f32 %v3076_v15, %v10575_v34  ;;  %v10578_v55 = vld [vmem:[#allocation103_spill] sm:$0xff] }
 0x306   : > { %v3164_v6 = vmul.f32 %v8179_v22, %v3018_v35  ;;  %v3102_v26 = vadd.f32 %v3094_v63, %v10576_v12  ;;  %v3118_v48 = vadd.f32 %v3110_v28, %v3046_v53  ;;  %v3136_v11 = vadd.f32 %v3128_v25, %v3064_v52  ;;  %v2947_v63 = vpop.permute.xlu1 %2946  ;;  %v10579_v12 = vld [vmem:[#allocation62_spill] sm:$0xff] }
 0x307   : > { %v3154_v0 = vadd.f32 %v3146_v50, %v3082_v41  ;;  %v3111_v60 = vmul.f32 %v8170_v39, %v3019_v9  ;;  %v3129_v57 = vmul.f32 %v8173_v36, %v3019_v9  ;;  %v3147_v23 = vmul.f32 %v8176_v2, %v3019_v9  ;;  %v10577_v50 = vld [vmem:[#allocation102_spill] sm:$0xff] }
 0x308   : > { %v3165_v24 = vmul.f32 %v8179_v22, %v3019_v9  ;;  %v3041_v1 = vmul.f32 %v8101_v19, %v3025_v54  ;;  %v3059_v37 = vmul.f32 %v8115_v29, %v3025_v54  ;;  %v3077_v15 = vmul.f32 %v8139_v33, %v3025_v54  ;;  %v10580_v19 = vld [vmem:[#allocation77_spill] sm:$0xff] }
 0x309   : > { %v3095_v35 = vmul.f32 %v8142_v40, %v3025_v54  ;;  %v3172_v53 = vadd.f32 %v3164_v6, %v3100_v20  ;;  %v3119_v52 = vadd.f32 %v3111_v60, %v3047_v17  ;;  %v3137_v41 = vadd.f32 %v3129_v57, %v3065_v58 }
 0x30a   : > { %v3155_v28 = vadd.f32 %v3147_v23, %v3083_v43  ;;  %v3173_v25 = vadd.f32 %v3165_v24, %v3101_v5  ;;  %v3049_v7 = vadd.f32 %v3041_v1, %v10577_v50  ;;  %v3067_v34 = vadd.f32 %v3059_v37, %v10578_v55 }
 0x30b   : > { %v3085_v9 = vadd.f32 %v3077_v15, %v10579_v12  ;;  %v3103_v30 = vadd.f32 %v3095_v35, %v10580_v19  ;;  %v3027_v29 = vsel %vm645_vm1, 0.0, %v2959_v16  ;;  %v3026_v33 = vsel %vm645_vm1, 0.0, %v2957_v62 }
 0x30c   : > { %v3021_v40 = vsel %vm645_vm1, 0.0, %v2947_v63  ;;  %v3113_v17 = vmul.f32 %v8170_v39, %v3027_v29  ;;  %v3131_v58 = vmul.f32 %v8173_v36, %v3027_v29  ;;  %v3149_v43 = vmul.f32 %v8176_v2, %v3027_v29 }
 0x30d   : > { %v3167_v5 = vmul.f32 %v8179_v22, %v3027_v29  ;;  %v3112_v24 = vmul.f32 %v8170_v39, %v3026_v33  ;;  %v3130_v54 = vmul.f32 %v8173_v36, %v3026_v33  ;;  %v3148_v20 = vmul.f32 %v8176_v2, %v3026_v33 }
 0x30e   : > { %v3020_v16 = vsel %vm645_vm1, 0.0, %v2945_v44  ;;  %v3121_v6 = vadd.f32 %v3113_v17, %v3049_v7  ;;  %v3139_v62 = vadd.f32 %v3131_v58, %v3067_v34  ;;  %v3157_v60 = vadd.f32 %v3149_v43, %v3085_v9  ;;  %v10581_v17 = vld [vmem:[#allocation159_spill] sm:$0xff] }
 0x30f   : > { %v3166_v57 = vmul.f32 %v8179_v22, %v3026_v33  ;;  %v3175_v23 = vadd.f32 %v3167_v5, %v3103_v30  ;;  %v3120_v1 = vadd.f32 %v3112_v24, %v3048_v14  ;;  %v3138_v37 = vadd.f32 %v3130_v54, %v3066_v59  ;;  %v2963_v30 = vpop.permute.xlu1 %2962  ;;  %v2961_v14 = vpop.permute.xlu0 %2960 }
 0x310   : > { %v3156_v15 = vadd.f32 %v3148_v20, %v3084_v61  ;;  %v3183_v35 = vmul.f32 %v8185_v46, %v3021_v40  ;;  %v3201_v63 = vmul.f32 %v8203_v21, %v3021_v40  ;;  %v3219_v39 = vmul.f32 %v10550_v49, %v3021_v40 }
 0x311   : > { %v3237_v36 = vmul.f32 %v10551_v32, %v3021_v40  ;;  %v3182_v2 = vmul.f32 %v8185_v46, %v3020_v16  ;;  %v3200_v44 = vmul.f32 %v8203_v21, %v3020_v16  ;;  %v3218_v50 = vmul.f32 %v10550_v49, %v3020_v16 }
 0x312   : > { %v3236_v22 = vmul.f32 %v10551_v32, %v3020_v16  ;;  %v3174_v59 = vadd.f32 %v3166_v57, %v3102_v26  ;;  %v3191_v61 = vadd.f32 %v3183_v35, %v3119_v52  ;;  %v3209_v7 = vadd.f32 %v3201_v63, %v3137_v41  ;;  %v10584_v57 = vld [vmem:[#allocation93_spill] sm:$0xff] }
 0x313   : > { %v3227_v55 = vadd.f32 %v3219_v39, %v3155_v28  ;;  %v3190_v34 = vadd.f32 %v3182_v2, %v3118_v48  ;;  %v3208_v12 = vadd.f32 %v3200_v44, %v3136_v11  ;;  %v3226_v9 = vadd.f32 %v3218_v50, %v3154_v0  ;;  %v2951_v54 = vpop.permute.xlu1 %2950  ;;  %v2949_v50 = vpop.permute.xlu0 %2948 }
 0x314   : > { %v3244_v19 = vadd.f32 %v3236_v22, %v3172_v53  ;;  %v3245_v29 = vadd.f32 %v3237_v36, %v3173_v25  ;;  %v3029_v33 = vsel %vm645_vm1, 0.0, %v2963_v30  ;;  %v3028_v40 = vsel %vm645_vm1, 0.0, %v2961_v14  ;;  %v10586_v22 = vld [vmem:[#allocation162_spill] sm:$0xff] }
 0x315   : > { %v3327_v58 = vmul.f32 %v10553_v8, %v10581_v17  ;;  %v3185_v43 = vmul.f32 %v8185_v46, %v3029_v33  ;;  %v3203_v5 = vmul.f32 %v8203_v21, %v3029_v33  ;;  %v3221_v26 = vmul.f32 %v10550_v49, %v3029_v33 }
 0x316   : > { %v3239_v52 = vmul.f32 %v10551_v32, %v3029_v33  ;;  %v3184_v48 = vmul.f32 %v8185_v46, %v3028_v40  ;;  %v3202_v11 = vmul.f32 %v8203_v21, %v3028_v40  ;;  %v3220_v0 = vmul.f32 %v10550_v49, %v3028_v40 }
 0x317   : > { %v3238_v53 = vmul.f32 %v10551_v32, %v3028_v40  ;;  %v8506_v41 = vadd.f32 %v3185_v43, %v3121_v6  ;;  %v8508_v28 = vadd.f32 %v3203_v5, %v3139_v62  ;;  %v8510_v25 = vadd.f32 %v3221_v26, %v3157_v60  ;;  %v10582_v6 = vld [vmem:[#allocation92_spill] sm:$0xff]  ;;  %v10583_v60 = vld [vmem:[#allocation178_spill] sm:$0xff] }
 0x318   : > { %v8512_v24 = vadd.f32 %v3239_v52, %v3175_v23  ;;  %v8514_v20 = vadd.f32 %v3184_v48, %v3120_v1  ;;  %v8516_v16 = vadd.f32 %v3202_v11, %v3138_v37  ;;  %v8518_v46 = vadd.f32 %v3220_v0, %v3156_v15  ;;  %v10585_v1 = vld [vmem:[#allocation86_spill] sm:$0xff]  ;;  %v10587_v26 = vld [vmem:[#allocation176_spill] sm:$0xff] }
 0x319   : > { %v8520_v21 = vadd.f32 %v3238_v53, %v3174_v59  ;;  %v3345_v49 = vmul.f32 %v10554_v18, %v10581_v17  ;;  %v3363_v32 = vmul.f32 %v10555_v10, %v10581_v17  ;;  %v3381_v62 = vmul.f32 %v10582_v6, %v10581_v17 }
 0x31a   : > { %v3399_v23 = vmul.f32 %v10584_v57, %v10583_v60  ;;  %v3417_v37 = vmul.f32 %v10585_v1, %v10583_v60  ;;  %v3435_v15 = vmul.f32 %v8275_v31, %v10583_v60  ;;  %v3453_v35 = vmul.f32 %v8278_v42, %v10583_v60 }
 0x31b   : > { %v3023_v63 = vsel %vm645_vm1, 0.0, %v2951_v54  ;;  %v3326_v30 = vmul.f32 %v10553_v8, %v10586_v22  ;;  %v3344_v14 = vmul.f32 %v10554_v18, %v10586_v22  ;;  %v3362_v59 = vmul.f32 %v10555_v10, %v10586_v22 }
 0x31c   : > { %v3255_v39 = vmul.f32 %v8239_v56, %v3023_v63  ;;  %v3273_v36 = vmul.f32 %v8242_v51, %v3023_v63  ;;  %v3291_v2 = vmul.f32 %v8245_v4, %v3023_v63  ;;  %v3309_v44 = vmul.f32 %v8260_v13, %v3023_v63 }
 0x31d   : > { %v3380_v33 = vmul.f32 %v10582_v6, %v10586_v22  ;;  %v3398_v52 = vmul.f32 %v10584_v57, %v10587_v26  ;;  %v3416_v48 = vmul.f32 %v10585_v1, %v10587_v26  ;;  %v3434_v11 = vmul.f32 %v8275_v31, %v10587_v26  ;;  %v10588_v22 = vld [vmem:[#allocation73_spill] sm:$0xff] }
 0x31e   : > { %v3263_v40 = vadd.f32 %v3255_v39, %v3191_v61  ;;  %v3281_v17 = vadd.f32 %v3273_v36, %v3209_v7  ;;  %v3299_v43 = vadd.f32 %v3291_v2, %v3227_v55  ;;  %v3317_v5 = vadd.f32 %v3309_v44, %v3245_v29 }
 0x31f   : > { %v3022_v0 = vsel %vm645_vm1, 0.0, %v2949_v50 }
 0x320   : > { %v3335_v53 = vadd.f32 %v3327_v58, %v3263_v40  ;;  %v3353_v54 = vadd.f32 %v3345_v49, %v3281_v17  ;;  %v3371_v60 = vadd.f32 %v3363_v32, %v3299_v43  ;;  %v3389_v63 = vadd.f32 %v3381_v62, %v3317_v5 }
 0x321   : > { %v3254_v61 = vmul.f32 %v8239_v56, %v3022_v0  ;;  %v3272_v7 = vmul.f32 %v8242_v51, %v3022_v0  ;;  %v3290_v55 = vmul.f32 %v8245_v4, %v3022_v0  ;;  %v3308_v29 = vmul.f32 %v8260_v13, %v3022_v0 }
 0x322   : > { %v8560_v39 = vadd.f32 %v3399_v23, %v3335_v53  ;;  %v8562_v36 = vadd.f32 %v3417_v37, %v3353_v54  ;;  %v8564_v2 = vadd.f32 %v3435_v15, %v3371_v60  ;;  %v3452_v58 = vmul.f32 %v8278_v42, %v10587_v26  ;;  %v10590_v54 = vld [vmem:[#allocation175_spill] sm:$0xff] }
 0x323   : > { %v3262_v49 = vadd.f32 %v3254_v61, %v3190_v34  ;;  %v3280_v32 = vadd.f32 %v3272_v7, %v3208_v12  ;;  %v3298_v62 = vadd.f32 %v3290_v55, %v3226_v9  ;;  %v3316_v44 = vadd.f32 %v3308_v29, %v3244_v19  ;;  %v2967_v12 = vpop.permute.xlu1 %2966  ;;  %v10589_v19 = vld [vmem:[#allocation161_spill] sm:$0xff]  ;;  %v2965_v7 = vpop.permute.xlu0 %2964  ;;  %v10591_v55 = vld [vmem:[#allocation78_spill] sm:$0xff] }
 0x324   : > { %v8568_v50 = vadd.f32 %v3453_v35, %v3389_v63  ;;  %v3329_v40 = vmul.f32 %v10553_v8, %v10588_v22  ;;  %v3347_v23 = vmul.f32 %v10554_v18, %v10588_v22  ;;  %v3365_v37 = vmul.f32 %v10555_v10, %v10588_v22 }
 0x325   : > { %v3334_v15 = vadd.f32 %v3326_v30, %v3262_v49  ;;  %v3352_v17 = vadd.f32 %v3344_v14, %v3280_v32  ;;  %v3370_v43 = vadd.f32 %v3362_v59, %v3298_v62  ;;  %v3388_v34 = vadd.f32 %v3380_v33, %v3316_v44 }
 0x326   : > { %v3383_v9 = vmul.f32 %v10582_v6, %v10588_v22  ;;  %v3401_v35 = vmul.f32 %v10584_v57, %v10589_v19  ;;  %v3419_v5 = vmul.f32 %v10585_v1, %v10589_v19  ;;  %v3437_v26 = vmul.f32 %v8275_v31, %v10589_v19 }
 0x327   : > { %v8586_v0 = vadd.f32 %v3398_v52, %v3334_v15  ;;  %v8588_v53 = vadd.f32 %v3416_v48, %v3352_v17  ;;  %v8590_v30 = vadd.f32 %v3434_v11, %v3370_v43  ;;  %v3455_v14 = vmul.f32 %v8278_v42, %v10589_v19 }
 0x328   : > { %v8596_v59 = vadd.f32 %v3452_v58, %v3388_v34  ;;  %v3031_v33 = vsel %vm645_vm1, 0.0, %v2967_v12  ;;  %v3328_v60 = vmul.f32 %v10553_v8, %v10590_v54  ;;  %v3346_v52 = vmul.f32 %v10554_v18, %v10590_v54  ;;  %v10592_v34 = vld [vmem:[#allocation117_spill] sm:$0xff] }
 0x329   : > { %v3257_v48 = vmul.f32 %v8239_v56, %v3031_v33  ;;  %v3275_v11 = vmul.f32 %v8242_v51, %v3031_v33  ;;  %v3293_v63 = vmul.f32 %v8245_v4, %v3031_v33  ;;  %v3311_v61 = vmul.f32 %v8260_v13, %v3031_v33 }
 0x32a   : > { %v3364_v8 = vmul.f32 %v10555_v10, %v10590_v54  ;;  %v3382_v18 = vmul.f32 %v10582_v6, %v10590_v54  ;;  %v3400_v29 = vmul.f32 %v10584_v57, %v10591_v55  ;;  %v3418_v58 = vmul.f32 %v10585_v1, %v10591_v55 }
 0x32b   : > { %v3265_v49 = vadd.f32 %v3257_v48, %v8506_v41  ;;  %v3283_v32 = vadd.f32 %v3275_v11, %v8508_v28  ;;  %v3301_v62 = vadd.f32 %v3293_v63, %v8510_v25  ;;  %v3319_v44 = vadd.f32 %v3311_v61, %v8512_v24  ;;  %v10593_v48 = vld [vmem:[#allocation144_spill] sm:$0xff] }
 0x32c   : > { %v3436_v10 = vmul.f32 %v8275_v31, %v10591_v55  ;;  %v3454_v6 = vmul.f32 %v8278_v42, %v10591_v55  ;;  %v3030_v57 = vsel %vm645_vm1, 0.0, %v2965_v7  ;;  %v8633_v1 = vstv %s8576_s12  ;;  %s10627_s12 = sld [smem:[#allocation23_spill]] }
 0x32d   : > { %v3337_v41 = vadd.f32 %v3329_v40, %v3265_v49  ;;  %v3355_v28 = vadd.f32 %v3347_v23, %v3283_v32  ;;  %v3373_v25 = vadd.f32 %v3365_v37, %v3301_v62  ;;  %v3391_v22 = vadd.f32 %v3383_v9, %v3319_v44  ;;  %v10594_v62 = vld [vmem:[#allocation87_spill] sm:$0xff] }
 0x32e   : > { %v3256_v24 = vmul.f32 %v8239_v56, %v3030_v57  ;;  %v3274_v31 = vmul.f32 %v8242_v51, %v3030_v57  ;;  %v3292_v15 = vmul.f32 %v8245_v4, %v3030_v57  ;;  %v3310_v42 = vmul.f32 %v8260_v13, %v3030_v57 }
 0x32f   : > { %v8647_v40 = vadd.f32 %v3401_v35, %v3337_v41  ;;  %v8649_v23 = vadd.f32 %v3419_v5, %v3355_v28  ;;  %v8651_v37 = vadd.f32 %v3437_v26, %v3373_v25  ;;  %v8654_v17 = vstv %s8594_s24  ;;  %v10596_v41 = vld [vmem:[#allocation89_spill] sm:$0xff]  ;;  %v10597_v25 = vld [vmem:[#allocation94_spill] sm:$0xff] }
 0x330   : > { %v3264_v56 = vadd.f32 %v3256_v24, %v8514_v20  ;;  %v3282_v51 = vadd.f32 %v3274_v31, %v8516_v16  ;;  %v3300_v4 = vadd.f32 %v3292_v15, %v8518_v46  ;;  %v3318_v13 = vadd.f32 %v3310_v42, %v8520_v21  ;;  %v10598_v31 = vld [vmem:[#allocation143_spill] sm:$0xff] }
 0x331   : > { %v8664_v43 = vadd.f32 %v3455_v14, %v3391_v22  ;;  %v3467_v12 = vmul.f32 %v8633_v1, %v10592_v34  ;;  %v8669_v9 = vstv %s8607_s21  ;;  %v8672_v19 = vstv %s8609_s29  ;;  %s10628_s29 = sld [smem:[#allocation193_spill]] }
 0x332   : > { %v3336_v35 = vadd.f32 %v3328_v60, %v3264_v56  ;;  %v3354_v5 = vadd.f32 %v3346_v52, %v3282_v51  ;;  %v3372_v20 = vadd.f32 %v3364_v8, %v3300_v4  ;;  %v3485_v16 = vmul.f32 %v8654_v17, %v10592_v34  ;;  %v3611_v8 = vpop.permute.xlu1 %3610  ;;  %p10629_p3 = scmp.ne.s32.totalorder %s10627_s12, 0 }
 0x333   : > { %v3390_v46 = vadd.f32 %v3382_v18, %v3318_v13  ;;  %v3503_v21 = vmul.f32 %v8669_v9, %v10592_v34  ;;  %v8679_v26 = vstv %s8623_s7  ;;  %v8682_v14 = vstv %s8625_s26  ;;  %s4661_s26 = scalar_lea.vmem %s9510_s13, 4096 }
 0x334   : > { %v8684_v33 = vadd.f32 %v3400_v29, %v3336_v35  ;;  %v8686_v54 = vadd.f32 %v3418_v58, %v3354_v5  ;;  %v8688_v60 = vadd.f32 %v3436_v10, %v3372_v20  ;;  %v3521_v52 = vmul.f32 %v8672_v19, %v10592_v34  ;;  %v10595_v10 = vld [vmem:[#allocation88_spill] sm:$0xff]  ;;  %p4662_p11 = scmp.ne.s32.totalorder %s9510_s13, %s4661_s26 }
 0x335   : > { %v3539_v11 = vmul.f32 %v8679_v26, %v10593_v48  ;;  %v3557_v63 = vmul.f32 %v8682_v14, %v10593_v48  ;;  %v8697_v61 = vstv %s8635_s10  ;;  %v8700_v7 = vstv %s8637_s14  ;;  %s4765_s10 = smov [#allocation11]  }
 0x336   : > { %v3575_v18 = vmul.f32 %v8697_v61, %v10593_v48  ;;  %v3593_v55 = vmul.f32 %v8700_v7, %v10593_v48  ;;  %v8707_v29 = vstv %s8643_s23  ;;  %v8710_v58 = vstv %s8645_s9  ;;  %p4663_p7 = pnand %p4662_p11, %p10629_p3  ;;  %s4665_s14 = sshll.u32 %s4765_s10, 4  ;;  %s4666_s14 = int_to_ptr.vmem [resolvable:$false] %s4665_s14 }
 0x337   : > { %v8713_v49 = vstv %s8656_s5  ;;  %v8716_v32 = vstv %s8658_s11  ;;  %v3475_v44 = vadd.f32 %v3467_v12, %v10594_v62  ;;  %v3493_v57 = vadd.f32 %v3485_v16, %v10595_v10  ;;  %v10599_v16 = vld [vmem:[#allocation95_spill] sm:$0xff]  ;;  %s9508_s7 = scalar_lea.hbm %s10628_s29, %s4444_s22  ;;  %s4667_s23 = scalar_lea.vmem %s4666_s14, 8192 }
 0x338   : > { %v3511_v28 = vadd.f32 %v3503_v21, %v10596_v41  ;;  %v3529_v22 = vadd.f32 %v3521_v52, %v10597_v25  ;;  %v3705_v24 = vsel %vm1350_vm2, %v3611_v8, 0.0  ;;  %v3466_v15 = vmul.f32 %v8633_v1, %v10598_v31  ;;  %v10600_v8 = vld [vmem:[#allocation96_spill] sm:$0xff]  ;;  %p4664_p8 = pneg %p4663_p7  ;;  %p4668_p13 = scmp.lt.s32.totalorder %s9510_s13, %s4666_s14 }
 0x339   : > { %v8725_v42 = vadd.f32 %v3454_v6, %v3390_v46  ;;  %v3547_v56 = vadd.f32 %v3539_v11, %v3475_v44  ;;  %v3739_v51 = vmul.f32 %v8707_v29, %v3705_v24  ;;  %v3757_v4 = vmul.f32 %v8710_v58, %v3705_v24  ;;  %v3609_v46 = vpop.permute.xlu0 %3608  ;;  %p4669_p4 = scmp.lt.s32.totalorder %s4667_s23, %s4661_s26 }
 0x33a   : > { %v3565_v13 = vadd.f32 %v3557_v63, %v3493_v57  ;;  %v3583_v34 = vadd.f32 %v3575_v18, %v3511_v28  ;;  %v3601_v12 = vadd.f32 %v3593_v55, %v3529_v22  ;;  %v3775_v35 = vmul.f32 %v8713_v49, %v3705_v24  ;;  %v10601_v55 = vld [vmem:[#allocation145_spill] sm:$0xff]  ;;  %v10602_v57 = vld [vmem:[#allocation30_spill] sm:$0xff] }
 0x33b   : > { %v8730_v5 = vadd.f32 %v3739_v51, %v3547_v56  ;;  %v3793_v20 = vmul.f32 %v8716_v32, %v3705_v24  ;;  %v3474_v21 = vadd.f32 %v3466_v15, %v10599_v16  ;;  %v3484_v6 = vmul.f32 %v8654_v17, %v10598_v31  ;;  %v10603_v28 = vld [vmem:[#allocation29_spill] sm:$0xff]  ;;  %p4670_p10 = por %p4669_p4, %p4668_p13 }
 0x33c   : > { %v8736_v52 = vadd.f32 %v3757_v4, %v3565_v13  ;;  %v8738_v48 = vadd.f32 %v3775_v35, %v3583_v34  ;;  %v3502_v11 = vmul.f32 %v8669_v9, %v10598_v31  ;;  %v3520_v63 = vmul.f32 %v8672_v19, %v10598_v31  ;;  %v3627_v4 = vpop.permute.xlu1 %3626 }
 0x33d   : > { %v3492_v18 = vadd.f32 %v3484_v6, %v10600_v8  ;;  %v3538_v62 = vmul.f32 %v8679_v26, %v10601_v55  ;;  %v3556_v44 = vmul.f32 %v8682_v14, %v10601_v55  ;;  %v3574_v10 = vmul.f32 %v8697_v61, %v10601_v55  ;;  %p4671_p2 = pnand %p4670_p10, %p4664_p8 }
 0x33e   : > { %v3510_v41 = vadd.f32 %v3502_v11, %v10602_v57  ;;  %v3528_v25 = vadd.f32 %v3520_v63, %v10603_v28  ;;  %v3592_v22 = vmul.f32 %v8700_v7, %v10601_v55  ;;  %v3704_v24 = vsel %vm1350_vm2, %v3609_v46, 0.0  ;;  %v10604_v63 = vld [vmem:[#allocation154_spill] sm:$0xff] }
 0x33f   : > { %v8756_v31 = vadd.f32 %v3793_v20, %v3601_v12  ;;  %v3546_v15 = vadd.f32 %v3538_v62, %v3474_v21  ;;  %v3738_v56 = vmul.f32 %v8707_v29, %v3704_v24  ;;  %v3756_v51 = vmul.f32 %v8710_v58, %v3704_v24 }
 0x340   : > { %v3564_v13 = vadd.f32 %v3556_v44, %v3492_v18  ;;  %v3582_v34 = vadd.f32 %v3574_v10, %v3510_v41  ;;  %v3600_v35 = vadd.f32 %v3592_v22, %v3528_v25  ;;  %v3774_v16 = vmul.f32 %v8713_v49, %v3704_v24  ;;  %v10605_v44 = vld [vmem:[#allocation156_spill] sm:$0xff] }
 0x341   : > { %v8761_v6 = vadd.f32 %v3738_v56, %v3546_v15  ;;  %v3792_v11 = vmul.f32 %v8716_v32, %v3704_v24  ;;  %v3469_v46 = vmul.f32 %v8633_v1, %v10604_v63  ;;  %v3487_v12 = vmul.f32 %v8654_v17, %v10604_v63  ;;  %v10606_v15 = vld [vmem:[#allocation155_spill] sm:$0xff] }
 0x342   : > { %v8768_v20 = vadd.f32 %v3756_v51, %v3564_v13  ;;  %v8770_v21 = vadd.f32 %v3774_v16, %v3582_v34  ;;  %v3505_v8 = vmul.f32 %v8669_v9, %v10604_v63  ;;  %v3523_v18 = vmul.f32 %v8672_v19, %v10604_v63  ;;  %v3625_v51 = vpop.permute.xlu0 %3624  ;;  %v3643_v13 = vpop.permute.xlu1 %3642 }
 0x343   : > { %v3477_v55 = vadd.f32 %v3469_v46, %v8414_v27  ;;  %v3495_v62 = vadd.f32 %v3487_v12, %v8416_v47  ;;  %v3541_v10 = vmul.f32 %v8679_v26, %v10605_v44  ;;  %v3559_v57 = vmul.f32 %v8682_v14, %v10605_v44 }
 0x344   : > { %v3513_v41 = vadd.f32 %v3505_v8, %v8418_v3  ;;  %v3531_v28 = vadd.f32 %v3523_v18, %v8424_v45  ;;  %v3577_v25 = vmul.f32 %v8697_v61, %v10605_v44  ;;  %v3595_v22 = vmul.f32 %v8700_v7, %v10605_v44  ;;  %v10607_v44 = vld [vmem:[#allocation28_spill] sm:$0xff] }
 0x345   : > { %v8788_v24 = vadd.f32 %v3792_v11, %v3600_v35  ;;  %v3549_v27 = vadd.f32 %v3541_v10, %v3477_v55  ;;  %v3713_v47 = vsel %vm1350_vm2, %v3627_v4, 0.0  ;;  %v3468_v56 = vmul.f32 %v8633_v1, %v10606_v15 }
 0x346   : > { %v3567_v34 = vadd.f32 %v3559_v57, %v3495_v62  ;;  %v3585_v3 = vadd.f32 %v3577_v25, %v3513_v41  ;;  %v3741_v45 = vmul.f32 %v8707_v29, %v3713_v47  ;;  %v3759_v16 = vmul.f32 %v8710_v58, %v3713_v47  ;;  %v10608_v57 = vld [vmem:[#allocation157_spill] sm:$0xff] }
 0x347   : > { %v3603_v63 = vadd.f32 %v3595_v22, %v3531_v28  ;;  %v3777_v46 = vmul.f32 %v8713_v49, %v3713_v47  ;;  %v3795_v35 = vmul.f32 %v8716_v32, %v3713_v47  ;;  %v3486_v11 = vmul.f32 %v8654_v17, %v10606_v15  ;;  %v10609_v28 = vld [vmem:[#allocation27_spill] sm:$0xff]  ;;  %v10610_v22 = vld [vmem:[#allocation128_spill] sm:$0xff] }
 0x348   : > { %v8799_v4 = vadd.f32 %v3741_v45, %v3549_v27  ;;  %v3476_v12 = vadd.f32 %v3468_v56, %v8429_v38  ;;  %v3504_v8 = vmul.f32 %v8669_v9, %v10606_v15  ;;  %v3522_v18 = vmul.f32 %v8672_v19, %v10606_v15 }
 0x349   : > { %v8806_v55 = vadd.f32 %v3759_v16, %v3567_v34  ;;  %v8808_v62 = vadd.f32 %v3777_v46, %v3585_v3  ;;  %v3494_v10 = vadd.f32 %v3486_v11, %v10607_v44  ;;  %v3540_v41 = vmul.f32 %v8679_v26, %v10608_v57  ;;  %v10612_v3 = vld [vmem:[#allocation168_spill] sm:$0xff]  ;;  %v3641_v16 = vpop.permute.xlu0 %3640  ;;  %v8826_v46 = vpop.permute.xlu1 %3658 }
 0x34a   : > { %v3512_v25 = vadd.f32 %v3504_v8, %v10609_v28  ;;  %v3530_v27 = vadd.f32 %v3522_v18, %v10610_v22  ;;  %v3558_v38 = vmul.f32 %v8682_v14, %v10608_v57  ;;  %v3576_v47 = vmul.f32 %v8697_v61, %v10608_v57 }
 0x34b   : > { %v8819_v15 = vadd.f32 %v3795_v35, %v3603_v63  ;;  %v3594_v56 = vmul.f32 %v8700_v7, %v10608_v57  ;;  %v3712_v34 = vsel %vm1350_vm2, %v3625_v51, 0.0  ;;  %v3471_v45 = vmul.f32 %v8633_v1, %v10612_v3 }
 0x34c   : > { %v3548_v11 = vadd.f32 %v3540_v41, %v3476_v12  ;;  %v3566_v8 = vadd.f32 %v3558_v38, %v3494_v10  ;;  %v3740_v18 = vmul.f32 %v8707_v29, %v3712_v34  ;;  %v3758_v44 = vmul.f32 %v8710_v58, %v3712_v34 }
 0x34d   : > { %10611 = vst [vmem:[#allocation129_spill] sm:$0xff] %v8819_v15  ;;  %v3584_v28 = vadd.f32 %v3576_v47, %v3512_v25  ;;  %v3602_v63 = vadd.f32 %v3594_v56, %v3530_v27  ;;  %v3776_v35 = vmul.f32 %v8713_v49, %v3712_v34  ;;  %v3794_v57 = vmul.f32 %v8716_v32, %v3712_v34  ;;  %v10613_v27 = vld [vmem:[#allocation173_spill] sm:$0xff] }
 0x34e   : > { %v8832_v22 = vadd.f32 %v3740_v18, %v3548_v11  ;;  %v3479_v51 = vadd.f32 %v3471_v45, %v8560_v39  ;;  %v3489_v15 = vmul.f32 %v8654_v17, %v10612_v3  ;;  %v3507_v12 = vmul.f32 %v8669_v9, %v10612_v3  ;;  %v8859_v18 = vpop.permute.xlu0 %3656 }
 0x34f   : > { %v8839_v10 = vadd.f32 %v3758_v44, %v3566_v8  ;;  %v8841_v41 = vadd.f32 %v3776_v35, %v3584_v28  ;;  %v3525_v25 = vmul.f32 %v8672_v19, %v10612_v3  ;;  %v3543_v38 = vmul.f32 %v8679_v26, %v10613_v27 }
 0x350   : > { %v3497_v47 = vadd.f32 %v3489_v15, %v8562_v36  ;;  %v3515_v39 = vadd.f32 %v3507_v12, %v8564_v2  ;;  %v3561_v56 = vmul.f32 %v8682_v14, %v10613_v27  ;;  %v3579_v34 = vmul.f32 %v8697_v61, %v10613_v27  ;;  %v8861_v36 = vpop.permute.xlu1 %3614 }
 0x351   : > { %v8853_v45 = vadd.f32 %v3794_v57, %v3602_v63  ;;  %v3533_v11 = vadd.f32 %v3525_v25, %v8568_v50  ;;  %v3597_v3 = vmul.f32 %v8700_v7, %v10613_v27  ;;  %v3721_v8 = vsel %vm1350_vm2, %v3643_v13, 0.0  ;;  %v10614_v50 = vld [vmem:[#allocation170_spill] sm:$0xff] }
 0x352   : > { %v3551_v2 = vadd.f32 %v3543_v38, %v3479_v51  ;;  %v3569_v15 = vadd.f32 %v3561_v56, %v3497_v47  ;;  %v3743_v44 = vmul.f32 %v8707_v29, %v3721_v8  ;;  %v3761_v28 = vmul.f32 %v8710_v58, %v3721_v8 }
 0x353   : > { %v3587_v35 = vadd.f32 %v3579_v34, %v3515_v39  ;;  %v3605_v63 = vadd.f32 %v3597_v3, %v3533_v11  ;;  %v3779_v57 = vmul.f32 %v8713_v49, %v3721_v8  ;;  %v3470_v12 = vmul.f32 %v8633_v1, %v10614_v50  ;;  %v10617_v3 = vld [vmem:[#allocation75_spill] sm:$0xff] }
 0x354   : > { %v8868_v25 = vadd.f32 %v3743_v44, %v3551_v2  ;;  %v3797_v13 = vmul.f32 %v8716_v32, %v3721_v8  ;;  %v3488_v27 = vmul.f32 %v8654_v17, %v10614_v50  ;;  %v3506_v51 = vmul.f32 %v8669_v9, %v10614_v50 }
 0x355   : > { %v8875_v38 = vadd.f32 %v3761_v28, %v3569_v15  ;;  %v8877_v47 = vadd.f32 %v3779_v57, %v3587_v35  ;;  %v3478_v39 = vadd.f32 %v3470_v12, %v8586_v0  ;;  %v3524_v56 = vmul.f32 %v8672_v19, %v10614_v50  ;;  %v8894_v35 = vpop.permute.xlu0 %3612 }
 0x356   : > { %v3496_v34 = vadd.f32 %v3488_v27, %v8588_v53  ;;  %v3514_v11 = vadd.f32 %v3506_v51, %v8590_v30  ;;  %v3542_v8 = vmul.f32 %v8679_v26, %v10617_v3  ;;  %v3560_v2 = vmul.f32 %v8682_v14, %v10617_v3  ;;  %v8896_v53 = vpop.permute.xlu1 %3630 }
 0x357   : > { %10615 = vst [vmem:[#allocation130_spill] sm:$0xff] %v8875_v38  ;;  %10616 = vst [vmem:[#allocation131_spill] sm:$0xff] %v8877_v47  ;;  %v3532_v15 = vadd.f32 %v3524_v56, %v8596_v59  ;;  %v3578_v44 = vmul.f32 %v8697_v61, %v10617_v3  ;;  %v3596_v0 = vmul.f32 %v8700_v7, %v10617_v3  ;;  %v3720_v28 = vsel %vm1350_vm2, %v3641_v16, 0.0  ;;  %v10618_v3 = vld [vmem:[#allocation172_spill] sm:$0xff] }
 0x358   : > { %v8898_v30 = vadd.f32 %v3797_v13, %v3605_v63  ;;  %v3550_v57 = vadd.f32 %v3542_v8, %v3478_v39  ;;  %v3742_v50 = vmul.f32 %v8707_v29, %v3720_v28  ;;  %v3760_v12 = vmul.f32 %v8710_v58, %v3720_v28  ;;  %v10619_v8 = vld [vmem:[#allocation177_spill] sm:$0xff] }
 0x359   : > { %v3568_v59 = vadd.f32 %v3560_v2, %v3496_v34  ;;  %v3586_v27 = vadd.f32 %v3578_v44, %v3514_v11  ;;  %v3604_v51 = vadd.f32 %v3596_v0, %v3532_v15  ;;  %v3778_v56 = vmul.f32 %v8713_v49, %v3720_v28 }
 0x35a   : > { %v8903_v47 = vadd.f32 %v3742_v50, %v3550_v57  ;;  %v3796_v16 = vmul.f32 %v8716_v32, %v3720_v28  ;;  %v3473_v38 = vmul.f32 %v8633_v1, %v10618_v3  ;;  %v3491_v63 = vmul.f32 %v8654_v17, %v10618_v3 }
 0x35b   : > { %v8910_v13 = vadd.f32 %v3760_v12, %v3568_v59  ;;  %v8912_v39 = vadd.f32 %v3778_v56, %v3586_v27  ;;  %v3509_v34 = vmul.f32 %v8669_v9, %v10618_v3  ;;  %v3527_v11 = vmul.f32 %v8672_v19, %v10618_v3  ;;  %v8934_v59 = vpop.permute.xlu0 %3628  ;;  %v8936_v27 = vpop.permute.xlu1 %3646  ;;  %v10620_v3 = vld [vmem:[#allocation74_spill] sm:$0xff] }
 0x35c   : > { %v3545_v2 = vmul.f32 %v8679_v26, %v10619_v8  ;;  %v3563_v15 = vmul.f32 %v8682_v14, %v10619_v8  ;;  %v3581_v44 = vmul.f32 %v8697_v61, %v10619_v8  ;;  %v3599_v0 = vmul.f32 %v8700_v7, %v10619_v8 }
 0x35d   : > { %v3481_v28 = vadd.f32 %v3473_v38, %v8647_v40  ;;  %v3499_v57 = vadd.f32 %v3491_v63, %v8649_v23  ;;  %v3517_v50 = vadd.f32 %v3509_v34, %v8651_v37  ;;  %v3535_v12 = vadd.f32 %v3527_v11, %v8664_v43 }
 0x35e   : > { %v3729_v56 = vsel %vm1350_vm2, %v8826_v46, 0.0  ;;  %v3472_v8 = vmul.f32 %v8633_v1, %v10620_v3  ;;  %v3490_v40 = vmul.f32 %v8654_v17, %v10620_v3  ;;  %v3508_v23 = vmul.f32 %v8669_v9, %v10620_v3 }
 0x35f   : > { %v8946_v37 = vadd.f32 %v3796_v16, %v3604_v51  ;;  %v3553_v43 = vadd.f32 %v3545_v2, %v3481_v28  ;;  %v3571_v38 = vadd.f32 %v3563_v15, %v3499_v57  ;;  %v3589_v63 = vadd.f32 %v3581_v44, %v3517_v50  ;;  %v3645_v50 = vpop.permute.xlu0 %3644 }
 0x360   : > { %v3745_v46 = vmul.f32 %v8707_v29, %v3729_v56  ;;  %v3763_v34 = vmul.f32 %v8710_v58, %v3729_v56  ;;  %v3781_v1 = vmul.f32 %v8713_v49, %v3729_v56  ;;  %v3799_v17 = vmul.f32 %v8716_v32, %v3729_v56 }
 0x361   : > { %v3607_v11 = vadd.f32 %v3599_v0, %v3535_v12  ;;  %v3480_v9 = vadd.f32 %v3472_v8, %v8684_v33  ;;  %v3498_v51 = vadd.f32 %v3490_v40, %v8686_v54  ;;  %v3526_v16 = vmul.f32 %v8672_v19, %v10620_v3  ;;  %v10621_v0 = vld [vmem:[#allocation179_spill] sm:$0xff]  ;;  %v8974_v12 = vpop.permute.xlu1 %3662 }
 0x362   : > { %v8960_v2 = vadd.f32 %v3745_v46, %v3553_v43  ;;  %v8962_v15 = vadd.f32 %v3763_v34, %v3571_v38  ;;  %v8964_v44 = vadd.f32 %v3781_v1, %v3589_v63  ;;  %v3516_v28 = vadd.f32 %v3508_v23, %v8688_v60 }
 0x363   : > { %v3534_v57 = vadd.f32 %v3526_v16, %v8725_v42  ;;  %v3544_v33 = vmul.f32 %v8679_v26, %v10621_v0  ;;  %v3562_v54 = vmul.f32 %v8682_v14, %v10621_v0  ;;  %v3580_v19 = vmul.f32 %v8697_v61, %v10621_v0 }
 0x364   : > { %v8976_v56 = vadd.f32 %v3799_v17, %v3607_v11  ;;  %v3598_v60 = vmul.f32 %v8700_v7, %v10621_v0  ;;  %v3728_v42 = vsel %vm1350_vm2, %v8859_v18, 0.0  ;;  %v8983_v26 = vstv %s8926_s8 }
 0x365   : > { %v3552_v3 = vadd.f32 %v3544_v33, %v3480_v9  ;;  %v3570_v14 = vadd.f32 %v3562_v54, %v3498_v51  ;;  %v3744_v8 = vmul.f32 %v8707_v29, %v3728_v42  ;;  %v8987_v61 = vstv %s8932_s0  ;;  %v3661_v9 = vpop.permute.xlu0 %3660  ;;  %v9012_v51 = vpop.permute.xlu1 %3618 }
 0x366   : > { %v3588_v40 = vadd.f32 %v3580_v19, %v3516_v28  ;;  %v3762_v23 = vmul.f32 %v8710_v58, %v3728_v42  ;;  %v3780_v43 = vmul.f32 %v8713_v49, %v3728_v42  ;;  %v3798_v38 = vmul.f32 %v8716_v32, %v3728_v42 }
 0x367   : > { %v3606_v63 = vadd.f32 %v3598_v60, %v3534_v57  ;;  %v8993_v7 = vstv %s8948_s2  ;;  %v8996_v46 = vstv %s8950_s6  ;;  %v3707_v18 = vsel %vm1350_vm2, %v8861_v36, 0.0 }
 0x368   : > { %v9000_v34 = vadd.f32 %v3744_v8, %v3552_v3  ;;  %v9002_v29 = vadd.f32 %v3762_v23, %v3570_v14  ;;  %v9004_v1 = vadd.f32 %v3780_v43, %v3588_v40  ;;  %v3811_v58 = vmul.f32 %v8983_v26, %v3707_v18 }
 0x369   : > { %v3829_v49 = vmul.f32 %v8987_v61, %v3707_v18  ;;  %v3847_v32 = vmul.f32 %v8993_v7, %v3707_v18  ;;  %v3865_v17 = vmul.f32 %v8996_v46, %v3707_v18  ;;  %v3706_v11 = vsel %vm1350_vm2, %v8894_v35, 0.0  ;;  %v3617_v23 = vpop.permute.xlu0 %3616  ;;  %v9064_v43 = vpop.permute.xlu1 %3634 }
 0x36a   : > { %v9014_v36 = vadd.f32 %v3798_v38, %v3606_v63  ;;  %v3810_v16 = vmul.f32 %v8983_v26, %v3706_v11  ;;  %v3828_v28 = vmul.f32 %v8987_v61, %v3706_v11  ;;  %v3846_v57 = vmul.f32 %v8993_v7, %v3706_v11  ;;  %v10622_v63 = vld [vmem:[#allocation129_spill] sm:$0xff] }
 0x36b   : > { %v9020_v0 = vadd.f32 %v3811_v58, %v8730_v5  ;;  %v9023_v33 = vadd.f32 %v3829_v49, %v8736_v52  ;;  %v9026_v54 = vadd.f32 %v3847_v32, %v8738_v48  ;;  %v3864_v35 = vmul.f32 %v8996_v46, %v3706_v11 }
 0x36c   : > { %v9030_v19 = vadd.f32 %v3865_v17, %v8756_v31  ;;  %v9033_v60 = vadd.f32 %v3810_v16, %v8761_v6  ;;  %v9036_v42 = vadd.f32 %v3828_v28, %v8768_v20  ;;  %v3715_v5 = vsel %vm1350_vm2, %v8896_v53, 0.0  ;;  %v10623_v28 = vld [vmem:[#allocation130_spill] sm:$0xff] }
 0x36d   : > { %v9041_v52 = vadd.f32 %v3846_v57, %v8770_v21  ;;  %v3813_v48 = vmul.f32 %v8983_v26, %v3715_v5  ;;  %v3831_v3 = vmul.f32 %v8987_v61, %v3715_v5  ;;  %v3849_v14 = vmul.f32 %v8993_v7, %v3715_v5 }
 0x36e   : > { %v9047_v31 = vadd.f32 %v3864_v35, %v8788_v24  ;;  %v3867_v6 = vmul.f32 %v8996_v46, %v3715_v5  ;;  %v3714_v20 = vsel %vm1350_vm2, %v8934_v59, 0.0  ;;  %v3723_v53 = vsel %vm1350_vm2, %v8936_v27, 0.0 }
 0x36f   : > { %v9057_v21 = vadd.f32 %v3813_v48, %v8799_v4  ;;  %v9060_v8 = vadd.f32 %v3831_v3, %v8806_v55  ;;  %v3812_v40 = vmul.f32 %v8983_v26, %v3714_v20  ;;  %v3722_v24 = vsel %vm1350_vm2, %v3645_v50, 0.0 }
 0x370   : > { %v9067_v59 = vadd.f32 %v3849_v14, %v8808_v62  ;;  %v3830_v27 = vmul.f32 %v8987_v61, %v3714_v20  ;;  %v3848_v38 = vmul.f32 %v8993_v7, %v3714_v20  ;;  %v3866_v4 = vmul.f32 %v8996_v46, %v3714_v20  ;;  %v3651_v20 = vpop.permute.xlu1 %3650 }
 0x371   : > { %v9073_v18 = vadd.f32 %v3867_v6, %v10622_v63  ;;  %v3815_v55 = vmul.f32 %v8983_v26, %v3723_v53  ;;  %v3833_v58 = vmul.f32 %v8987_v61, %v3723_v53  ;;  %v3851_v50 = vmul.f32 %v8993_v7, %v3723_v53  ;;  %v3633_v6 = vpop.permute.xlu0 %3632 }
 0x372   : > { %v9079_v49 = vadd.f32 %v3812_v40, %v8832_v22  ;;  %v9082_v62 = vadd.f32 %v3830_v27, %v8839_v10  ;;  %v9085_v32 = vadd.f32 %v3848_v38, %v8841_v41  ;;  %v3869_v17 = vmul.f32 %v8996_v46, %v3723_v53  ;;  %v10624_v10 = vld [vmem:[#allocation131_spill] sm:$0xff] }
 0x373   : > { %v9091_v11 = vadd.f32 %v3866_v4, %v8853_v45  ;;  %v9094_v16 = vadd.f32 %v3815_v55, %v8868_v25  ;;  %v9097_v57 = vadd.f32 %v3833_v58, %v10623_v28  ;;  %v3814_v22 = vmul.f32 %v8983_v26, %v3722_v24 }
 0x374   : > { %v9105_v41 = vadd.f32 %v3851_v50, %v10624_v10  ;;  %v3832_v35 = vmul.f32 %v8987_v61, %v3722_v24  ;;  %v3850_v45 = vmul.f32 %v8993_v7, %v3722_v24  ;;  %v3868_v25 = vmul.f32 %v8996_v46, %v3722_v24 }
 0x375   : > { %v9111_v5 = vadd.f32 %v3869_v17, %v8898_v30  ;;  %v9114_v48 = vadd.f32 %v3814_v22, %v8903_v47  ;;  %v3731_v3 = vsel %vm1350_vm2, %v8974_v12, 0.0  ;;  %v3730_v14 = vsel %vm1350_vm2, %v3661_v9, 0.0  ;;  %v3649_v50 = vpop.permute.xlu0 %3648 }
 0x376   : > { %v9120_v53 = vadd.f32 %v3832_v35, %v8910_v13  ;;  %v9123_v40 = vadd.f32 %v3850_v45, %v8912_v39  ;;  %v3817_v24 = vmul.f32 %v8983_v26, %v3731_v3  ;;  %v9127_v30 = vstv %s9054_s25 }
 0x377   : > { %v3835_v47 = vmul.f32 %v8987_v61, %v3731_v3  ;;  %v3853_v12 = vmul.f32 %v8993_v7, %v3731_v3  ;;  %v3871_v9 = vmul.f32 %v8996_v46, %v3731_v3  ;;  %v3816_v27 = vmul.f32 %v8983_v26, %v3730_v14 }
 0x378   : > { %v9134_v13 = vadd.f32 %v3868_v25, %v8946_v37  ;;  %v9137_v39 = vadd.f32 %v3817_v24, %v8960_v2  ;;  %v3834_v38 = vmul.f32 %v8987_v61, %v3730_v14  ;;  %v3852_v4 = vmul.f32 %v8993_v7, %v3730_v14 }
 0x379   : > { %v9142_v63 = vadd.f32 %v3835_v47, %v8962_v15  ;;  %v9145_v55 = vadd.f32 %v3853_v12, %v8964_v44  ;;  %v9148_v58 = vadd.f32 %v3871_v9, %v8976_v56  ;;  %v3870_v26 = vmul.f32 %v8996_v46, %v3730_v14 }
 0x37a   : > { %v9152_v37 = vadd.f32 %v3816_v27, %v9000_v34  ;;  %v9155_v2 = vadd.f32 %v3834_v38, %v9002_v29  ;;  %v9158_v61 = vadd.f32 %v3852_v4, %v9004_v1  ;;  %v9161_v7 = vstv %s9088_s1  ;;  %v3667_v34 = vpop.permute.xlu1 %3666 }
 0x37b   : > { %v9164_v15 = vstv %s9100_s19  ;;  %v9167_v44 = vstv %s9102_s16  ;;  %v3709_v56 = vsel %vm1350_vm2, %v9012_v51, 0.0  ;;  %v3708_v46 = vsel %vm1350_vm2, %v3617_v23, 0.0 }
 0x37c   : > { %v3883_v17 = vmul.f32 %v9127_v30, %v3709_v56  ;;  %v3901_v29 = vmul.f32 %v9161_v7, %v3709_v56  ;;  %v3919_v1 = vmul.f32 %v9164_v15, %v3709_v56  ;;  %v3937_v28 = vmul.f32 %v9167_v44, %v3709_v56 }
 0x37d   : > { %v3882_v22 = vmul.f32 %v9127_v30, %v3708_v46  ;;  %v3900_v10 = vmul.f32 %v9161_v7, %v3708_v46  ;;  %v3918_v35 = vmul.f32 %v9164_v15, %v3708_v46  ;;  %v3936_v51 = vmul.f32 %v9167_v44, %v3708_v46 }
 0x37e   : > { %v9181_v23 = vadd.f32 %v3870_v26, %v9014_v36  ;;  %v9184_v45 = vadd.f32 %v3883_v17, %v9020_v0  ;;  %v9187_v25 = vadd.f32 %v3901_v29, %v9023_v33  ;;  %v9190_v3 = vadd.f32 %v3919_v1, %v9026_v54 }
 0x37f   : > { %v9193_v14 = vadd.f32 %v3937_v28, %v9030_v19  ;;  %v9196_v24 = vadd.f32 %v3882_v22, %v9033_v60  ;;  %v9199_v47 = vadd.f32 %v3900_v10, %v9036_v42  ;;  %v9202_v36 = vadd.f32 %v3918_v35, %v9041_v52  ;;  %v3665_v52 = vpop.permute.xlu0 %3664 }
 0x380   : > { %v9205_v0 = vadd.f32 %v3936_v51, %v9047_v31  ;;  %v3717_v33 = vsel %vm1350_vm2, %v9064_v43, 0.0  ;;  %v3716_v54 = vsel %vm1350_vm2, %v3633_v6, 0.0  ;;  %v3725_v19 = vsel %vm1350_vm2, %v3651_v20, 0.0  ;;  %v3623_v31 = vpop.permute.xlu1 %3622 }
 0x381   : > { %v3885_v12 = vmul.f32 %v9127_v30, %v3717_v33  ;;  %v3903_v60 = vmul.f32 %v9161_v7, %v3717_v33  ;;  %v3921_v42 = vmul.f32 %v9164_v15, %v3717_v33  ;;  %v3939_v9 = vmul.f32 %v9167_v44, %v3717_v33 }
 0x382   : > { %v3884_v27 = vmul.f32 %v9127_v30, %v3716_v54  ;;  %v3902_v43 = vmul.f32 %v9161_v7, %v3716_v54  ;;  %v3920_v6 = vmul.f32 %v9164_v15, %v3716_v54  ;;  %v3724_v20 = vsel %vm1350_vm2, %v3649_v50, 0.0 }
 0x383   : > { %v9222_v38 = vadd.f32 %v3885_v12, %v9057_v21  ;;  %v9225_v4 = vadd.f32 %v3903_v60, %v9060_v8  ;;  %v9228_v26 = vadd.f32 %v3921_v42, %v9067_v59  ;;  %v3938_v56 = vmul.f32 %v9167_v44, %v3716_v54  ;;  %v3621_v51 = vpop.permute.xlu0 %3620 }
 0x384   : > { %v9234_v46 = vadd.f32 %v3939_v9, %v9073_v18  ;;  %v9237_v17 = vadd.f32 %v3884_v27, %v9079_v49  ;;  %v9240_v50 = vadd.f32 %v3902_v43, %v9082_v62  ;;  %v9243_v21 = vadd.f32 %v3920_v6, %v9085_v32  ;;  %v3639_v33 = vpop.permute.xlu1 %3638 }
 0x385   : > { %v3887_v8 = vmul.f32 %v9127_v30, %v3725_v19  ;;  %v3905_v59 = vmul.f32 %v9161_v7, %v3725_v19  ;;  %v3923_v29 = vmul.f32 %v9164_v15, %v3725_v19  ;;  %v3941_v1 = vmul.f32 %v9167_v44, %v3725_v19 }
 0x386   : > { %v3886_v18 = vmul.f32 %v9127_v30, %v3724_v20  ;;  %v3904_v28 = vmul.f32 %v9161_v7, %v3724_v20  ;;  %v3922_v49 = vmul.f32 %v9164_v15, %v3724_v20  ;;  %v3940_v62 = vmul.f32 %v9167_v44, %v3724_v20 }
 0x387   : > { %v9258_v32 = vadd.f32 %v3938_v56, %v9091_v11  ;;  %v9261_v22 = vadd.f32 %v3887_v8, %v9094_v16  ;;  %v9264_v10 = vadd.f32 %v3905_v59, %v9097_v57  ;;  %v9267_v35 = vadd.f32 %v3923_v29, %v9105_v41 }
 0x388   : > { %v9270_v54 = vadd.f32 %v3941_v1, %v9111_v5  ;;  %v9273_v19 = vadd.f32 %v3886_v18, %v9114_v48  ;;  %v9276_v11 = vadd.f32 %v3904_v28, %v9120_v53  ;;  %v9279_v16 = vadd.f32 %v3922_v49, %v9123_v40  ;;  %v3655_v20 = vpop.permute.xlu1 %3654 }
 0x389   : > { %v9282_v57 = vadd.f32 %v3940_v62, %v9134_v13  ;;  %v3733_v41 = vsel %vm1350_vm2, %v3667_v34, 0.0  ;;  %v3732_v12 = vsel %vm1350_vm2, %v3665_v52, 0.0  ;;  %v9287_v60 = vstv %s9215_s17 }
 0x38a   : > { %v3889_v5 = vmul.f32 %v9127_v30, %v3733_v41  ;;  %v3907_v48 = vmul.f32 %v9161_v7, %v3733_v41  ;;  %v3925_v42 = vmul.f32 %v9164_v15, %v3733_v41  ;;  %v3943_v53 = vmul.f32 %v9167_v44, %v3733_v41 }
 0x38b   : > { %v3888_v40 = vmul.f32 %v9127_v30, %v3732_v12  ;;  %v3906_v13 = vmul.f32 %v9161_v7, %v3732_v12  ;;  %v3924_v34 = vmul.f32 %v9164_v15, %v3732_v12  ;;  %v9297_v9 = vstv %s9231_s4 }
 0x38c   : > { %v9300_v52 = vadd.f32 %v3889_v5, %v9137_v39  ;;  %v9303_v27 = vadd.f32 %v3907_v48, %v9142_v63  ;;  %v9306_v43 = vadd.f32 %v3925_v42, %v9145_v55  ;;  %v9309_v6 = vmul.f32 %v9167_v44, %v3732_v12  ;;  %v3637_v63 = vpop.permute.xlu0 %3636  ;;  %v4539_v12 = vld [vmem:[%s4990_s30 + $0x8] sm:$0xff]  ;;  %v4540_v48 = vld [vmem:[%s4990_s30 + $0x18] sm:$0xff] }
 0x38d   : > { %v9312_v30 = vadd.f32 %v3943_v53, %v9148_v58  ;;  %v9315_v7 = vadd.f32 %v3888_v40, %v9152_v37  ;;  %v9318_v15 = vadd.f32 %v3906_v13, %v9155_v2  ;;  %v9321_v39 = vadd.f32 %v3924_v34, %v9158_v61  ;;  %v4541_v42 = vld [vmem:[%s4990_s30 + $0x28] sm:$0xff] }
 0x38e   : > { %v9324_v56 = vstv %s9253_s15  ;;  %v9327_v55 = vstv %s9255_s18  ;;  %v3711_v44 = vsel %vm1350_vm2, %v3623_v31, 0.0  ;;  %v3710_v8 = vsel %vm1350_vm2, %v3621_v51, 0.0 }
 0x38f   : > { %v3955_v58 = vmul.f32 %v9287_v60, %v3711_v44  ;;  %v3973_v37 = vmul.f32 %v9297_v9, %v3711_v44  ;;  %v3991_v2 = vmul.f32 %v9324_v56, %v3711_v44  ;;  %v4009_v61 = vmul.f32 %v9327_v55, %v3711_v44 }
 0x390   : > { %v3719_v59 = vsel %vm1350_vm2, %v3639_v33, 0.0  ;;  %v3718_v29 = vsel %vm1350_vm2, %v3637_v63, 0.0  ;;  %v9338_v31 = vsel %vm1350_vm2, %v3655_v20, 0.0  ;;  %v3954_v62 = vmul.f32 %v9287_v60, %v3710_v8 }
 0x391   : > { %v3963_v1 = vadd.f32 %v3955_v58, %v9184_v45  ;;  %v3981_v18 = vadd.f32 %v3973_v37, %v9187_v25  ;;  %v3999_v28 = vadd.f32 %v3991_v2, %v9190_v3  ;;  %v4017_v49 = vadd.f32 %v4009_v61, %v9193_v14  ;;  %v4542_v3 = vld [vmem:[%s4990_s30 + $0x38] sm:$0xff]  ;;  %v4543_v37 = vld [vmem:[%s4990_s30] sm:$0xff]  ;;  %v4544_v61 = vld [vmem:[%s4990_s30 + $0x10] sm:$0xff] }
 0x392   : > { %v3972_v51 = vmul.f32 %v9297_v9, %v3710_v8  ;;  %v3990_v33 = vmul.f32 %v9324_v56, %v3710_v8  ;;  %v4008_v41 = vmul.f32 %v9327_v55, %v3710_v8  ;;  %v3962_v53 = vadd.f32 %v3954_v62, %v9196_v24 }
 0x393   : > { %v4025_v5 = vmul.f32 %v4539_v12, %v3963_v1  ;;  %v4027_v45 = vmul.f32 %v4540_v48, %v3981_v18  ;;  %v4029_v25 = vmul.f32 %v4541_v42, %v3999_v28  ;;  %v4031_v14 = vmul.f32 %v4542_v3, %v4017_v49  ;;  %v4545_v1 = vld [vmem:[%s4990_s30 + $0x20] sm:$0xff]  ;;  %v4546_v28 = vld [vmem:[%s4990_s30 + $0x30] sm:$0xff] }
 0x394   : > { %v3980_v40 = vadd.f32 %v3972_v51, %v9199_v47  ;;  %v3998_v13 = vadd.f32 %v3990_v33, %v9202_v36  ;;  %v4016_v34 = vadd.f32 %v4008_v41, %v9205_v0  ;;  %v4024_v2 = vmul.f32 %v4543_v37, %v3962_v53  ;;  %v4549_v53 = vld [vmem:[%s4990_s30 + $0x68] sm:$0xff] }
 0x395   : > { %v4057_v63 = vadd.f32 %v4539_v12, %v4025_v5  ;;  %v4059_v20 = vadd.f32 %v4540_v48, %v4027_v45  ;;  %v4061_v44 = vadd.f32 %v4541_v42, %v4029_v25  ;;  %v4063_v58 = vadd.f32 %v4542_v3, %v4031_v14  ;;  %v3653_v42 = vpop.permute.xlu0 %3652  ;;  %v4547_v25 = vld [vmem:[%s4990_s30 + $0x48] sm:$0xff]  ;;  %v4548_v3 = vld [vmem:[%s4990_s30 + $0x58] sm:$0xff] }
 0x396   : > { %v4026_v8 = vmul.f32 %v4544_v61, %v3980_v40  ;;  %v4028_v18 = vmul.f32 %v4545_v1, %v3998_v13  ;;  %v4030_v49 = vmul.f32 %v4546_v28, %v4016_v34  ;;  %v3957_v24 = vmul.f32 %v9287_v60, %v3719_v59  ;;  %v4550_v13 = vld [vmem:[%s4990_s30 + $0x78] sm:$0xff] }
 0x397   : > { %4090 = vst.msk [vmem:[%s9362_s27 + $0x8] sm:$0xff] %vm4088_vm4, %v4057_v63  ;;  %4092 = vst.msk [vmem:[%s9362_s27 + $0x18] sm:$0xff] %vm4088_vm4, %v4059_v20  ;;  %v3975_v47 = vmul.f32 %v9297_v9, %v3719_v59  ;;  %v3993_v36 = vmul.f32 %v9324_v56, %v3719_v59  ;;  %v4011_v0 = vmul.f32 %v9327_v55, %v3719_v59 }
 0x398   : > { %4094 = vst.msk [vmem:[%s9362_s27 + $0x28] sm:$0xff] %vm4088_vm4, %v4061_v44  ;;  %4096 = vst.msk [vmem:[%s9362_s27 + $0x38] sm:$0xff] %vm4088_vm4, %v4063_v58  ;;  %v4056_v62 = vadd.f32 %v4543_v37, %v4024_v2  ;;  %v4058_v51 = vadd.f32 %v4544_v61, %v4026_v8  ;;  %v4060_v33 = vadd.f32 %v4545_v1, %v4028_v18  ;;  %v4551_v8 = vld [vmem:[%s4990_s30 + $0x40] sm:$0xff]  ;;  %v4552_v18 = vld [vmem:[%s4990_s30 + $0x50] sm:$0xff] }
 0x399   : > { %v4062_v41 = vadd.f32 %v4546_v28, %v4030_v49  ;;  %v3965_v12 = vadd.f32 %v3957_v24, %v9222_v38  ;;  %v3983_v5 = vadd.f32 %v3975_v47, %v9225_v4  ;;  %v4001_v48 = vadd.f32 %v3993_v36, %v9228_v26  ;;  %v4553_v49 = vld [vmem:[%s4990_s30 + $0x60] sm:$0xff]  ;;  %v4554_v24 = vld [vmem:[%s4990_s30 + $0x70] sm:$0xff] }
 0x39a   : > { %v4019_v45 = vadd.f32 %v4011_v0, %v9234_v46  ;;  %4089 = vst.msk [vmem:[%s9362_s27] sm:$0xff] %vm4088_vm4, %v4056_v62  ;;  %4091 = vst.msk [vmem:[%s9362_s27 + $0x10] sm:$0xff] %vm4088_vm4, %v4058_v51  ;;  %v3956_v59 = vmul.f32 %v9287_v60, %v3718_v29  ;;  %v3974_v38 = vmul.f32 %v9297_v9, %v3718_v29  ;;  %v3671_v0 = vpop.permute.xlu1 %3670  ;;  %v3669_v62 = vpop.permute.xlu0 %3668 }
 0x39b   : > { %4093 = vst.msk [vmem:[%s9362_s27 + $0x20] sm:$0xff] %vm4088_vm4, %v4060_v33  ;;  %4095 = vst.msk [vmem:[%s9362_s27 + $0x30] sm:$0xff] %vm4088_vm4, %v4062_v41  ;;  %v3992_v4 = vmul.f32 %v9324_v56, %v3718_v29  ;;  %v4010_v26 = vmul.f32 %v9327_v55, %v3718_v29  ;;  %v4033_v46 = vmul.f32 %v4547_v25, %v3965_v12 }
 0x39c   : > { %v4035_v14 = vmul.f32 %v4548_v3, %v3983_v5  ;;  %v4037_v40 = vmul.f32 %v4549_v53, %v4001_v48  ;;  %v4039_v34 = vmul.f32 %v4550_v13, %v4019_v45  ;;  %v3964_v63 = vadd.f32 %v3956_v59, %v9237_v17 }
 0x39d   : > { %v3982_v20 = vadd.f32 %v3974_v38, %v9240_v50  ;;  %v4000_v29 = vadd.f32 %v3992_v4, %v9243_v21  ;;  %v4018_v44 = vadd.f32 %v4010_v26, %v9258_v32  ;;  %v4065_v58 = vadd.f32 %v4547_v25, %v4033_v46  ;;  %v4555_v38 = vld [vmem:[%s4990_s30 + $0x88] sm:$0xff]  ;;  %v4556_v4 = vld [vmem:[%s4990_s30 + $0x98] sm:$0xff] }
 0x39e   : > { %v4067_v37 = vadd.f32 %v4548_v3, %v4035_v14  ;;  %v4069_v2 = vadd.f32 %v4549_v53, %v4037_v40  ;;  %v4071_v61 = vadd.f32 %v4550_v13, %v4039_v34  ;;  %v4032_v1 = vmul.f32 %v4551_v8, %v3964_v63  ;;  %v4558_v25 = vld [vmem:[%s4990_s30 + $0xb8] sm:$0xff] }
 0x39f   : > { %v4034_v28 = vmul.f32 %v4552_v18, %v3982_v20  ;;  %v4036_v17 = vmul.f32 %v4553_v49, %v4000_v29  ;;  %v4038_v47 = vmul.f32 %v4554_v24, %v4018_v44  ;;  %4098 = vst.msk [vmem:[%s9362_s27 + $0x48] sm:$0xff] %vm4088_vm4, %v4065_v58  ;;  %v3959_v50 = vmul.f32 %v9287_v60, %v9338_v31 }
 0x3a0   : > { %4100 = vst.msk [vmem:[%s9362_s27 + $0x58] sm:$0xff] %vm4088_vm4, %v4067_v37  ;;  %4102 = vst.msk [vmem:[%s9362_s27 + $0x68] sm:$0xff] %vm4088_vm4, %v4069_v2  ;;  %v3977_v21 = vmul.f32 %v9297_v9, %v9338_v31  ;;  %v3995_v32 = vmul.f32 %v9324_v56, %v9338_v31  ;;  %v4013_v36 = vmul.f32 %v9327_v55, %v9338_v31 }
 0x3a1   : > { %4104 = vst.msk [vmem:[%s9362_s27 + $0x78] sm:$0xff] %vm4088_vm4, %v4071_v61  ;;  %v4064_v51 = vadd.f32 %v4551_v8, %v4032_v1  ;;  %v4066_v33 = vadd.f32 %v4552_v18, %v4034_v28  ;;  %v4068_v41 = vadd.f32 %v4553_v49, %v4036_v17  ;;  %v4070_v12 = vadd.f32 %v4554_v24, %v4038_v47  ;;  %v4561_v1 = vld [vmem:[%s4990_s30 + $0xa0] sm:$0xff]  ;;  %v4562_v28 = vld [vmem:[%s4990_s30 + $0xb0] sm:$0xff] }
 0x3a2   : > { %v3967_v5 = vadd.f32 %v3959_v50, %v9261_v22  ;;  %v3985_v48 = vadd.f32 %v3977_v21, %v9264_v10  ;;  %v4003_v45 = vadd.f32 %v3995_v32, %v9267_v35  ;;  %v4021_v59 = vadd.f32 %v4013_v36, %v9270_v54 }
 0x3a3   : > { %v9426_v31 = vadd.f32 %v9309_v6, %v9181_v23  ;;  %4097 = vst.msk [vmem:[%s9362_s27 + $0x40] sm:$0xff] %vm4088_vm4, %v4064_v51  ;;  %4099 = vst.msk [vmem:[%s9362_s27 + $0x50] sm:$0xff] %vm4088_vm4, %v4066_v33  ;;  %v3726_v22 = vsel %vm1350_vm2, %v3653_v42, 0.0  ;;  %v3735_v10 = vsel %vm1350_vm2, %v3671_v0, 0.0  ;;  %v3734_v35 = vsel %vm1350_vm2, %v3669_v62, 0.0  ;;  %v4557_v23 = vld [vmem:[%s4990_s30 + $0xa8] sm:$0xff] }
 0x3a4   : > { %4101 = vst.msk [vmem:[%s9362_s27 + $0x60] sm:$0xff] %vm4088_vm4, %v4068_v41  ;;  %4103 = vst.msk [vmem:[%s9362_s27 + $0x70] sm:$0xff] %vm4088_vm4, %v4070_v12  ;;  %v4041_v54 = vmul.f32 %v4555_v38, %v3967_v5  ;;  %v4043_v26 = vmul.f32 %v4556_v4, %v3985_v48  ;;  %v4045_v6 = vmul.f32 %v4557_v23, %v4003_v45  ;;  %v4563_v62 = vld [vmem:[%s4990_s30 + $0xc8] sm:$0xff]  ;;  %v4564_v33 = vld [vmem:[%s4990_s30 + $0xd8] sm:$0xff] }
 0x3a5   : > { %v4047_v46 = vmul.f32 %v4558_v25, %v4021_v59  ;;  %v3958_v3 = vmul.f32 %v9287_v60, %v3726_v22  ;;  %v3976_v42 = vmul.f32 %v9297_v9, %v3726_v22  ;;  %v3994_v14 = vmul.f32 %v9324_v56, %v3726_v22  ;;  %v4565_v12 = vld [vmem:[%s4990_s30 + $0xe8] sm:$0xff]  ;;  %v4566_v5 = vld [vmem:[%s4990_s30 + $0xf8] sm:$0xff] }
 0x3a6   : > { %v4012_v53 = vmul.f32 %v9327_v55, %v3726_v22  ;;  %v4073_v40 = vadd.f32 %v4555_v38, %v4041_v54  ;;  %v4075_v13 = vadd.f32 %v4556_v4, %v4043_v26  ;;  %v4077_v34 = vadd.f32 %v4557_v23, %v4045_v6 }
 0x3a7   : > { %v4079_v63 = vadd.f32 %v4558_v25, %v4047_v46  ;;  %v3966_v20 = vadd.f32 %v3958_v3, %v9273_v19  ;;  %v3984_v29 = vadd.f32 %v3976_v42, %v9276_v11  ;;  %v4002_v44 = vadd.f32 %v3994_v14, %v9279_v16  ;;  %v4559_v16 = vld [vmem:[%s4990_s30 + $0x80] sm:$0xff] }
 0x3a8   : > { %v4020_v58 = vadd.f32 %v4012_v53, %v9282_v57  ;;  %4106 = vst.msk [vmem:[%s9362_s27 + $0x88] sm:$0xff] %vm4088_vm4, %v4073_v40  ;;  %4108 = vst.msk [vmem:[%s9362_s27 + $0x98] sm:$0xff] %vm4088_vm4, %v4075_v13  ;;  %v3961_v37 = vmul.f32 %v9287_v60, %v3735_v10  ;;  %v3979_v19 = vmul.f32 %v9297_v9, %v3735_v10  ;;  %v4560_v57 = vld [vmem:[%s4990_s30 + $0x90] sm:$0xff] }
 0x3a9   : > { %4110 = vst.msk [vmem:[%s9362_s27 + $0xa8] sm:$0xff] %vm4088_vm4, %v4077_v34  ;;  %4112 = vst.msk [vmem:[%s9362_s27 + $0xb8] sm:$0xff] %vm4088_vm4, %v4079_v63  ;;  %v3997_v2 = vmul.f32 %v9324_v56, %v3735_v10  ;;  %v4015_v11 = vmul.f32 %v9327_v55, %v3735_v10  ;;  %v4040_v61 = vmul.f32 %v4559_v16, %v3966_v20 }
 0x3aa   : > { %v4042_v8 = vmul.f32 %v4560_v57, %v3984_v29  ;;  %v4044_v18 = vmul.f32 %v4561_v1, %v4002_v44  ;;  %v4046_v49 = vmul.f32 %v4562_v28, %v4020_v58  ;;  %v3969_v17 = vadd.f32 %v3961_v37, %v9300_v52 }
 0x3ab   : > { %v3987_v24 = vadd.f32 %v3979_v19, %v9303_v27  ;;  %v4005_v47 = vadd.f32 %v3997_v2, %v9306_v43  ;;  %v4023_v50 = vadd.f32 %v4015_v11, %v9312_v30  ;;  %v4072_v21 = vadd.f32 %v4559_v16, %v4040_v61 }
 0x3ac   : > { %v4074_v32 = vadd.f32 %v4560_v57, %v4042_v8  ;;  %v4076_v36 = vadd.f32 %v4561_v1, %v4044_v18  ;;  %v4078_v0 = vadd.f32 %v4562_v28, %v4046_v49  ;;  %v4049_v51 = vmul.f32 %v4563_v62, %v3969_v17 }
 0x3ad   : > { %v4051_v41 = vmul.f32 %v4564_v33, %v3987_v24  ;;  %v4053_v52 = vmul.f32 %v4565_v12, %v4005_v47  ;;  %v4055_v48 = vmul.f32 %v4566_v5, %v4023_v50  ;;  %4105 = vst.msk [vmem:[%s9362_s27 + $0x80] sm:$0xff] %vm4088_vm4, %v4072_v21  ;;  %v3960_v27 = vmul.f32 %v9287_v60, %v3734_v35 }
 0x3ae   : > { %4107 = vst.msk [vmem:[%s9362_s27 + $0x90] sm:$0xff] %vm4088_vm4, %v4074_v32  ;;  %4109 = vst.msk [vmem:[%s9362_s27 + $0xa0] sm:$0xff] %vm4088_vm4, %v4076_v36  ;;  %v3978_v43 = vmul.f32 %v9297_v9, %v3734_v35  ;;  %v3996_v30 = vmul.f32 %v9324_v56, %v3734_v35  ;;  %v4014_v45 = vmul.f32 %v9327_v55, %v3734_v35  ;;  %v4569_v55 = vld [vmem:[%s4990_s30 + $0xe0] sm:$0xff]  ;;  %v4570_v35 = vld [vmem:[%s4990_s30 + $0xf0] sm:$0xff] }
 0x3af   : > { %4111 = vst.msk [vmem:[%s9362_s27 + $0xb0] sm:$0xff] %vm4088_vm4, %v4078_v0  ;;  %v4081_v59 = vadd.f32 %v4563_v62, %v4049_v51  ;;  %v4083_v22 = vadd.f32 %v4564_v33, %v4051_v41  ;;  %v4085_v10 = vadd.f32 %v4565_v12, %v4053_v52  ;;  %v4087_v38 = vadd.f32 %v4566_v5, %v4055_v48 }
 0x3b0   : > { %v3968_v54 = vadd.f32 %v3960_v27, %v9315_v7  ;;  %v3986_v60 = vadd.f32 %v3978_v43, %v9318_v15  ;;  %v4004_v4 = vadd.f32 %v3996_v30, %v9321_v39  ;;  %v4022_v9 = vadd.f32 %v4014_v45, %v9426_v31  ;;  %v4567_v7 = vld [vmem:[%s4990_s30 + $0xc0] sm:$0xff]  ;;  %v4568_v15 = vld [vmem:[%s4990_s30 + $0xd0] sm:$0xff]  ;;  %s4122_s30 = scalar_lea.sflag [#allocation4], %s4984_s3 }
 0x3b1   : > { %4114 = vst.msk [vmem:[%s9362_s27 + $0xc8] sm:$0xff] %vm4088_vm4, %v4081_v59  ;;  %4116 = vst.msk [vmem:[%s9362_s27 + $0xd8] sm:$0xff] %vm4088_vm4, %v4083_v22 }
 0x3b2   : > { %4118 = vst.msk [vmem:[%s9362_s27 + $0xe8] sm:$0xff] %vm4088_vm4, %v4085_v10  ;;  %4120 = vst.msk [vmem:[%s9362_s27 + $0xf8] sm:$0xff] %vm4088_vm4, %v4087_v38  ;;  %v4048_v56 = vmul.f32 %v4567_v7, %v3968_v54  ;;  %v4050_v39 = vmul.f32 %v4568_v15, %v3986_v60  ;;  %v4052_v31 = vmul.f32 %v4569_v55, %v4004_v4 }
 0x3b3   : > { %v4054_v26 = vmul.f32 %v4570_v35, %v4022_v9 }
 0x3b4   : > { %v4080_v23 = vadd.f32 %v4567_v7, %v4048_v56  ;;  %v4082_v6 = vadd.f32 %v4568_v15, %v4050_v39  ;;  %v4084_v25 = vadd.f32 %v4569_v55, %v4052_v31 }
 0x3b5   : > { %v4086_v46 = vadd.f32 %v4570_v35, %v4054_v26 }
 0x3b6   : > { %4113 = vst.msk [vmem:[%s9362_s27 + $0xc0] sm:$0xff] %vm4088_vm4, %v4080_v23  ;;  %4115 = vst.msk [vmem:[%s9362_s27 + $0xd0] sm:$0xff] %vm4088_vm4, %v4082_v6 }
 0x3b7   : > { %4117 = vst.msk [vmem:[%s9362_s27 + $0xe0] sm:$0xff] %vm4088_vm4, %v4084_v25  ;;  %4119 = vst.msk [vmem:[%s9362_s27 + $0xf0] sm:$0xff] %vm4088_vm4, %v4086_v46 }
 0x3b8   : > { %4674 = shalt.err (!%p4671_p2)
}
 0x3b9   : > { %s4675_s9 = scalar_lea.hbm %s9508_s7, 4096  ;;  %s4679_s8 = scalar_lea.hbm %s10628_s29, 8192 }
 0x3ba   : > { %p4676_p5 = scmp.ne.s32.totalorder %s9508_s7, %s4675_s9  ;;  %p4680_p12 = scmp.lt.u32.totalorder %s9508_s7, %s10628_s29 }
 0x3bb   : > { %p4681_p0 = scmp.lt.u32.totalorder %s4679_s8, %s4675_s9  ;;  %p4683_p11 = scmp.lt.u32.totalorder %s4675_s9, %s9508_s7 }
 0x3bc   : > { %p4677_p1 = pnand %p4676_p5, %p10629_p3 }
 0x3bd   : > { %p4682_p9 = por %p4681_p0, %p4680_p12 }
 0x3be   : > { %p4678_p6 = pneg %p4677_p1 }
 0x3bf   : > { %p4684_p7 = por %p4683_p11, %p4682_p9 }
 0x3c1   : > { %p4685_p8 = pnand %p4684_p7, %p4678_p6 }
 0x3c3   : > { %4688 = shalt.err (!%p4685_p8)
}
 0x3c4   : > { %s4766_s6 = smov 128   ;;  %s4767_s25 = smov 8  }
 0x3c5   : > { %4457 = dma.vmem_to_hbm [thread:$0]  (%p10629_p3), %s9510_s13, 4096, %s9508_s7, %s4122_s30, %s4766_s6, %s4766_s6, %s4767_s25  }
 0x3c6 PF: > { %s10630_s1 = sld [smem:[#allocation17_spill]]  ;;  %s10631_s19 = sld [smem:[#allocation24_spill]] }
 0x3c7   : > { %s10632_s16 = sld [smem:[#allocation22_spill]] }
 0x3cc   : > { %s4153_s17 = sand.u32 1, %s10630_s1   ;;  %p10633_p13 = scmp.ne.s32.totalorder %s10631_s19, 0 }
 0x3cd   : > { %p10634_p4 = scmp.ge.s32.totalorder %s10632_s16, 2  ;;  %s4154_s4 = scalar_lea.sflag [#allocation4], %s4153_s17 }
 0x3cf   : > { %p4474_p10 = pnand %p10634_p4, %p10633_p13 }
 0x3d1   : > { %4730 = dma.done.wait (!%p4474_p10), %s4154_s4, 4096  }
 0x3d2   : > { %4732 = vsyncadd (!%p4474_p10), %s4154_s4, 4294963200  ;;  %s25_s20 = sadd.s32 1, %s10632_s16   ;;  %s10635_s15 = sld [smem:[#allocation18_spill]] }
 0x3d3   : > { %p22_p2 = scmp.ge.s32.totalorder %s25_s20, 4   ;;  %s10636_s16 = sld [smem:[#allocation19_spill]] }
 0x3d4   : > { %s10637_s17 = sld [smem:[#allocation26_spill]]  ;;  %s10638_s18 = sld [smem:[#allocation21_spill]] }
 0x3d5   : > { %s10639_s19 = sld [smem:[#allocation25_spill]]  ;;  %24 = sbr.rel (!%p22_p2) target bundleno = 16 (0x10), region = 103 }
 0x3dc   :  { %4159 = vsyncpa [#allocation3], 1 }
 0x3dd   :  { %4161 = vsyncpa [#allocation3 + $0x1], 1 }
 0x3de   :  { %4162 = vsyncpa [#allocation7], 1 }
 0x3df   :  { %4164 = vsyncpa [#allocation7 + $0x1], 1 }
 0x3e0   :  { %4165 = vsyncpa [#allocation4], 1 }
 0x3e1   :  { %4167 = vsyncpa [#allocation4 + $0x1], 1 }
 0x3e2   :  { %4168 = vsyncpa [#allocation5], 1 }
 0x3e3   :  { %4170 = vsyncpa [#allocation5 + $0x1], 1 }
 0x3e4   :  { %4171 = vsyncpa [#allocation10], 1 }

</bundles_post_ra>
